<compile_context>
chip_gen: v6e
topology: v6e:2x2x1
jax: 0.10.0
libtpu: 0.0.40
codegen_flags: <defaults>
</compile_context>

<pallas_src>
import numpy as np
import jax
import jax.numpy as jnp
from jax import lax
from jax.experimental import pallas as pl
from jax.experimental.pallas import tpu as pltpu

GROUPS = 32
EPS = 1e-5
LANE = 128


def _round_up(x, m):
    return (x + m - 1) // m * m


# --------------------------------- kernel ----------------------------------
def _make_kernel(img_w, n_img, pad_rows, c_in_p, c_out_p, c_max, inv1, inv2,
                 has_res_conv):
    def _group_norm(h, p_ref, gamma_ref, beta_ref, inv_count):
        # h: (N, C) f32.  p_ref: (C, C) exact 0/1 same-group matrix.
        # One-pass stats (pad channels / pad rows contribute exactly zero to both sums).
        col_sum = jnp.sum(h, axis=0, keepdims=True)                      # (1, C)
        sq_sum = jnp.sum(h * h, axis=0, keepdims=True)                   # (1, C)
        mean_c = jnp.dot(col_sum, p_ref[...],
                         preferred_element_type=jnp.float32) * inv_count
        ex2_c = jnp.dot(sq_sum, p_ref[...],
                        preferred_element_type=jnp.float32) * inv_count
        var_c = ex2_c - mean_c * mean_c
        scale = lax.rsqrt(var_c + EPS) * gamma_ref[...]                  # per channel
        shift = beta_ref[...] - mean_c * scale
        return h * scale + shift                                         # single FMA pass

    def _silu(v):
        return v / (1.0 + jnp.exp(-v))                                   # exact sigmoid

    def _store_tap_sources(h, s_l, s_m, s_r, col_l, col_r, c):
        # Three pre-masked bf16 copies of the activation in halo-padded scratch:
        # only 2 mask multiplies per conv; vertical edges come free from the zero halo.
        rows = pl.ds(pad_rows, n_img)
        cols = pl.ds(0, c)
        s_m[rows, cols] = h.astype(jnp.bfloat16)
        s_l[rows, cols] = (h * col_l).astype(jnp.bfloat16)               # for kw=0 taps
        s_r[rows, cols] = (h * col_r).astype(jnp.bfloat16)               # for kw=2 taps

    def _conv3x3(s_l, s_m, s_r, w_ref, bias_ref, c_in):
        # 9 accumulated matmuls; each LHS is a sublane-offset slice of the scratch.
        srcs = (s_l, s_m, s_r)
        acc = None
        for t in range(9):
            kh, kw = divmod(t, 3)
            off = (kh - 1) * img_w + (kw - 1)
            lhs = srcs[kw][pl.ds(pad_rows + off, n_img), pl.ds(0, c_in)]
            d = jnp.dot(lhs, w_ref[t], preferred_element_type=jnp.float32)
            acc = d if acc is None else acc + d
        return acc + bias_ref[...]

    def kernel(x_ref, col_l_ref, col_r_ref,
               g1_ref, b1_ref, p1_ref, w1_ref, c1b_ref,
               g2_ref, b2_ref, p2_ref, w2_ref, c2b_ref,
               *rest):
        if has_res_conv:
            wr_ref, br_ref, o_ref, s_l, s_m, s_r = rest
        else:
            o_ref, s_l, s_m, s_r = rest

        # Zero the halo rows of the tap-source scratch (tiny; done every step so it is
        # correct no matter how the 'parallel' batch axis is split across cores).
        halo = jnp.zeros((pad_rows, c_max), jnp.bfloat16)
        for s in (s_l, s_m, s_r):
            s[pl.ds(0, pad_rows), :] = halo
            s[pl.ds(pad_rows + n_img, pad_rows), :] = halo

        x = x_ref[0]                                   # (N, Cin_pad) f32
        col_l = col_l_ref[...]                         # (N, 1) f32
        col_r = col_r_ref[...]

        h = _group_norm(x, p1_ref, g1_ref, b1_ref, inv1)
        h = _silu(h)
        _store_tap_sources(h, s_l, s_m, s_r, col_l, col_r, c_in_p)
        h = _conv3x3(s_l, s_m, s_r, w1_ref, c1b_ref, c_in_p)

        h = _group_norm(h, p2_ref, g2_ref, b2_ref, inv2)
        h = _silu(h)
        _store_tap_sources(h, s_l, s_m, s_r, col_l, col_r, c_out_p)
        h = _conv3x3(s_l, s_m, s_r, w2_ref, c2b_ref, c_out_p)

        if has_res_conv:
            res = jnp.dot(x.astype(jnp.bfloat16), wr_ref[...],
                          preferred_element_type=jnp.float32) + br_ref[...]
        else:
            res = x                                    # identity residual: no matmul
        o_ref[0] = (res + h).astype(o_ref.dtype)

    return kernel


# --------------------------- wrapper / glue code ----------------------------
def _group01(c_real, c_pad):
    # Exact 0/1 same-group matrix (padded channels are all-zero rows/cols).
    cg = c_real // GROUPS
    gid = np.arange(c_pad) // cg
    valid = np.arange(c_pad) < c_real
    p = (gid[:, None] == gid[None, :]) & valid[:, None] & valid[None, :]
    return jnp.asarray(p.astype(np.float32))


def _col_masks(h, w):
    col = np.arange(h * w) % w
    col_l = (col != w - 1).astype(np.float32).reshape(-1, 1)   # source rows for kw=0 taps
    col_r = (col != 0).astype(np.float32).reshape(-1, 1)       # source rows for kw=2 taps
    return jnp.asarray(col_l), jnp.asarray(col_r)


def _pad_last(a, target):
    pad = target - a.shape[-1]
    if pad == 0:
        return a
    return jnp.pad(a, [(0, 0)] * (a.ndim - 1) + [(0, pad)])


def _row(v, c_pad):
    return _pad_last(v.reshape(1, -1).astype(jnp.float32), c_pad)


def _conv3x3_weight(w_oihw, c_in_pad, c_out_pad):
    # OIHW -> (3,3,Cin,Cout) -> (9, Cin_pad, Cout_pad) bf16 (tap-major leading axis).
    c_out, c_in = w_oihw.shape[0], w_oihw.shape[1]
    w = jnp.transpose(w_oihw, (2, 3, 1, 0)).reshape(9, c_in, c_out)
    w = jnp.pad(w, ((0, 0), (0, c_in_pad - c_in), (0, c_out_pad - c_out)))
    return w.astype(jnp.bfloat16)


def _vmem_limit_bytes():
    # Generation-aware scoped-VMEM budget: ~45 MiB on v7x (64 MiB physical per core),
    # 64 MiB on v5e/v6e (128 MiB physical); conservative fallback if query unavailable.
    try:
        cap = int(pltpu.get_tpu_info().vmem_capacity_bytes)
        return int(min(64 * 1024 * 1024, 0.70 * cap))
    except Exception:
        return 48 * 1024 * 1024


def vae_residual_block(x_nchw, params):
    b, c_in, img_h, img_w = x_nchw.shape
    c_out = params["w1"].shape[0]
    n = img_h * img_w
    c_in_p = _round_up(c_in, LANE)
    c_out_p = _round_up(c_out, LANE)
    c_max = max(c_in_p, c_out_p)
    has_res_conv = c_in != c_out
    pad_rows = _round_up(img_w + 1, 8)       # zero halo rows above/below the image
    n_ext = n + 2 * pad_rows

    # NCHW -> (B, H*W, Cin_pad) f32, channels lane-dense.
    # TODO(synk): in a full decoder keep activations channels-last end-to-end so this
    # transpose/pad round-trip (two extra HBM passes) is not paid per block.
    x_flat = jnp.transpose(x_nchw, (0, 2, 3, 1)).reshape(b, n, c_in).astype(jnp.float32)
    x_flat = _pad_last(x_flat, c_in_p)

    col_l, col_r = _col_masks(img_h, img_w)
    p1 = _group01(c_in, c_in_p)
    p2 = _group01(c_out, c_out_p)
    inv1 = 1.0 / (n * (c_in // GROUPS))
    inv2 = 1.0 / (n * (c_out // GROUPS))

    w1 = _conv3x3_weight(params["w1"], c_in_p, c_out_p)
    w2 = _conv3x3_weight(params["w2"], c_out_p, c_out_p)

    args = [x_flat, col_l, col_r,
            _row(params["g1"], c_in_p), _row(params["b1"], c_in_p), p1,
            w1, _row(params["c1b"], c_out_p),
            _row(params["g2"], c_out_p), _row(params["b2"], c_out_p), p2,
            w2, _row(params["c2b"], c_out_p)]
    if has_res_conv:
        wr = jnp.transpose(params["wr"][:, :, 0, 0], (1, 0))           # (Cin, Cout)
        wr = jnp.pad(wr, ((0, c_in_p - c_in), (0, c_out_p - c_out))).astype(jnp.bfloat16)
        args += [wr, _row(params["br"], c_out_p)]

    # grid-invariant params: whole-array, single-buffered VMEM operands
    vmem_spec = pl.BlockSpec(memory_space=pltpu.MemorySpace.VMEM)
    in_specs = [pl.BlockSpec((1, n, c_in_p), lambda bi: (bi, 0, 0))]
    in_specs += [vmem_spec] * (len(args) - 1)

    kernel = _make_kernel(img_w, n, pad_rows, c_in_p, c_out_p, c_max, inv1, inv2,
                          has_res_conv)

    out = pl.pallas_call(
        kernel,
        out_shape=jax.ShapeDtypeStruct((b, n, c_out_p), jnp.float32),
        grid_spec=pltpu.PrefetchScalarGridSpec(
            num_scalar_prefetch=0,
            grid=(b,),
            in_specs=in_specs,
            out_specs=pl.BlockSpec((1, n, c_out_p), lambda bi: (bi, 0, 0)),
            scratch_shapes=[pltpu.VMEM((n_ext, c_max), jnp.bfloat16)] * 3,
        ),
        compiler_params=pltpu.CompilerParams(
            dimension_semantics=("parallel",),
            vmem_limit_bytes=_vmem_limit_bytes(),
        ),
    )(*args)

    out = out[:, :, :c_out]
    return jnp.transpose(out.reshape(b, img_h, img_w, c_out), (0, 3, 1, 2))   # back to NCHW


# ----------------------- deterministic parameter init -----------------------
def make_params(key, c_in, c_out):
    ks = jax.random.split(key, 10)
    p = {
        "g1": 1.0 + 0.1 * jax.random.normal(ks[0], (c_in,), jnp.float32),
        "b1": 0.1 * jax.random.normal(ks[1], (c_in,), jnp.float32),
        "w1": 0.1 * jax.random.normal(ks[2], (c_out, c_in, 3, 3), jnp.float32),
        "c1b": 0.1 * jax.random.normal(ks[3], (c_out,), jnp.float32),
        "g2": 1.0 + 0.1 * jax.random.normal(ks[4], (c_out,), jnp.float32),
        "b2": 0.1 * jax.random.normal(ks[5], (c_out,), jnp.float32),
        "w2": 0.1 * jax.random.normal(ks[6], (c_out, c_out, 3, 3), jnp.float32),
        "c2b": 0.1 * jax.random.normal(ks[7], (c_out,), jnp.float32),
    }
    if c_in != c_out:   # 1x1 conv residual (nn.Identity otherwise -> no params needed)
        p["wr"] = 0.1 * jax.random.normal(ks[8], (c_out, c_in, 1, 1), jnp.float32)
        p["br"] = 0.1 * jax.random.normal(ks[9], (c_out,), jnp.float32)
    return p


# ------------------------- plain-JAX reference check ------------------------
def reference_forward(x, p):
    def gn(x, gamma, beta):
        b, c, hh, ww = x.shape
        xr = x.reshape(b, GROUPS, -1)
        mean = xr.mean(axis=2, keepdims=True)
        var = xr.var(axis=2, keepdims=True)
        xr = (xr - mean) / jnp.sqrt(var + EPS)
        xr = xr.reshape(b, c, hh, ww)
        return xr * gamma[None, :, None, None] + beta[None, :, None, None]

    def conv(x, wgt, bias, pad):
        y = lax.conv_general_dilated(x, wgt, (1, 1), [(pad, pad), (pad, pad)],
                                     dimension_numbers=("NCHW", "OIHW", "NCHW"))
        return y + bias[None, :, None, None]

    h = gn(x, p["g1"], p["b1"])
    h = jax.nn.silu(h)
    h = conv(h, p["w1"], p["c1b"], 1)
    h = gn(h, p["g2"], p["b2"])
    h = jax.nn.silu(h)
    h = conv(h, p["w2"], p["c2b"], 1)
    r = conv(x, p["wr"], p["br"], 0) if "wr" in p else x
    return r + h


if __name__ == "__main__":
    key = jax.random.PRNGKey(0)

    configs = [
        (2, 32, 32, 16, 16),   # identity residual (in == out)
        (2, 64, 32, 16, 16),   # 1x1-conv residual (in != out)
    ]
    for i, (B, C_IN, C_OUT, H, W) in enumerate(configs):
        kx, kp = jax.random.split(jax.random.fold_in(key, i))
        x = jax.random.normal(kx, (B, C_IN, H, W), jnp.float32)
        params = make_params(kp, C_IN, C_OUT)

        out = jax.block_until_ready(vae_residual_block(x, params))
        ref = reference_forward(x, params)

        err = float(jnp.max(jnp.abs(out - ref)))
        mean_err = float(jnp.mean(jnp.abs(out - ref)))
        # tolerance reflects bf16 MXU inputs with f32 accumulation
        assert err < 1e-1 and mean_err < 3e-2, f"config {i}: max {err}, mean {mean_err}"

    print("KERNEL_OK")
</pallas_src>

<mosaic_0001>
module attributes {stable_mosaic.version = 11 : i64} {
  func.func @kernel(%arg0: i32, %arg1: memref<1x256x128xf32, #tpu.memory_space<vmem>>, %arg2: memref<256x1xf32, #tpu.memory_space<vmem>>, %arg3: memref<256x1xf32, #tpu.memory_space<vmem>>, %arg4: memref<1x128xf32, #tpu.memory_space<vmem>>, %arg5: memref<1x128xf32, #tpu.memory_space<vmem>>, %arg6: memref<128x128xf32, #tpu.memory_space<vmem>>, %arg7: memref<9x128x128xbf16, #tpu.memory_space<vmem>>, %arg8: memref<1x128xf32, #tpu.memory_space<vmem>>, %arg9: memref<1x128xf32, #tpu.memory_space<vmem>>, %arg10: memref<1x128xf32, #tpu.memory_space<vmem>>, %arg11: memref<128x128xf32, #tpu.memory_space<vmem>>, %arg12: memref<9x128x128xbf16, #tpu.memory_space<vmem>>, %arg13: memref<1x128xf32, #tpu.memory_space<vmem>>, %arg14: memref<1x256x128xf32, #tpu.memory_space<vmem>>, %arg15: memref<304x128xbf16, #tpu.memory_space<vmem>>, %arg16: memref<304x128xbf16, #tpu.memory_space<vmem>>, %arg17: memref<304x128xbf16, #tpu.memory_space<vmem>>) attributes {dimension_semantics = [#tpu.dimension_semantics<parallel>], iteration_bounds = array<i64: 2>, scalar_prefetch = 0 : i64, scratch_operands = 3 : i64, tpu.core_type = #tpu.core_type<tc>, window_params = [{transform_indices = @transform_0, window_bounds = array<i64: 1, 256, 128>}, {pipeline_mode = #tpu.pipeline_mode<synchronous>, transform_indices = @transform_1, window_bounds = array<i64: 256, 1>}, {pipeline_mode = #tpu.pipeline_mode<synchronous>, transform_indices = @transform_2, window_bounds = array<i64: 256, 1>}, {pipeline_mode = #tpu.pipeline_mode<synchronous>, transform_indices = @transform_3, window_bounds = array<i64: 1, 128>}, {pipeline_mode = #tpu.pipeline_mode<synchronous>, transform_indices = @transform_4, window_bounds = array<i64: 1, 128>}, {pipeline_mode = #tpu.pipeline_mode<synchronous>, transform_indices = @transform_5, window_bounds = array<i64: 128, 128>}, {pipeline_mode = #tpu.pipeline_mode<synchronous>, transform_indices = @transform_6, window_bounds = array<i64: 9, 128, 128>}, {pipeline_mode = #tpu.pipeline_mode<synchronous>, transform_indices = @transform_7, window_bounds = array<i64: 1, 128>}, {pipeline_mode = #tpu.pipeline_mode<synchronous>, transform_indices = @transform_8, window_bounds = array<i64: 1, 128>}, {pipeline_mode = #tpu.pipeline_mode<synchronous>, transform_indices = @transform_9, window_bounds = array<i64: 1, 128>}, {pipeline_mode = #tpu.pipeline_mode<synchronous>, transform_indices = @transform_10, window_bounds = array<i64: 128, 128>}, {pipeline_mode = #tpu.pipeline_mode<synchronous>, transform_indices = @transform_11, window_bounds = array<i64: 9, 128, 128>}, {pipeline_mode = #tpu.pipeline_mode<synchronous>, transform_indices = @transform_12, window_bounds = array<i64: 1, 128>}, {transform_indices = @transform_13, window_bounds = array<i64: 1, 256, 128>}]} {
    %cst = arith.constant 0.000000e+00 : bf16
    %0 = vector.broadcast %cst : bf16 to vector<24x128xbf16>
    %c0 = arith.constant 0 : index
    %c0_0 = arith.constant 0 : index
    %1 = vector.load %arg15[%c0, %c0_0] : memref<304x128xbf16, #tpu.memory_space<vmem>>, vector<24x128xbf16>
    tpu.vector_store %arg15[%c0, %c0_0], %0 {strides = array<i32>} : memref<304x128xbf16, #tpu.memory_space<vmem>>, vector<24x128xbf16>,
    %c280 = arith.constant 280 : index
    %c0_1 = arith.constant 0 : index
    %2 = vector.load %arg15[%c280, %c0_1] : memref<304x128xbf16, #tpu.memory_space<vmem>>, vector<24x128xbf16>
    tpu.vector_store %arg15[%c280, %c0_1], %0 {strides = array<i32>} : memref<304x128xbf16, #tpu.memory_space<vmem>>, vector<24x128xbf16>,
    %c0_2 = arith.constant 0 : index
    %c0_3 = arith.constant 0 : index
    %3 = vector.load %arg16[%c0_2, %c0_3] : memref<304x128xbf16, #tpu.memory_space<vmem>>, vector<24x128xbf16>
    tpu.vector_store %arg16[%c0_2, %c0_3], %0 {strides = array<i32>} : memref<304x128xbf16, #tpu.memory_space<vmem>>, vector<24x128xbf16>,
    %c280_4 = arith.constant 280 : index
    %c0_5 = arith.constant 0 : index
    %4 = vector.load %arg16[%c280_4, %c0_5] : memref<304x128xbf16, #tpu.memory_space<vmem>>, vector<24x128xbf16>
    tpu.vector_store %arg16[%c280_4, %c0_5], %0 {strides = array<i32>} : memref<304x128xbf16, #tpu.memory_space<vmem>>, vector<24x128xbf16>,
    %c0_6 = arith.constant 0 : index
    %c0_7 = arith.constant 0 : index
    %5 = vector.load %arg17[%c0_6, %c0_7] : memref<304x128xbf16, #tpu.memory_space<vmem>>, vector<24x128xbf16>
    tpu.vector_store %arg17[%c0_6, %c0_7], %0 {strides = array<i32>} : memref<304x128xbf16, #tpu.memory_space<vmem>>, vector<24x128xbf16>,
    %c280_8 = arith.constant 280 : index
    %c0_9 = arith.constant 0 : index
    %6 = vector.load %arg17[%c280_8, %c0_9] : memref<304x128xbf16, #tpu.memory_space<vmem>>, vector<24x128xbf16>
    tpu.vector_store %arg17[%c280_8, %c0_9], %0 {strides = array<i32>} : memref<304x128xbf16, #tpu.memory_space<vmem>>, vector<24x128xbf16>,
    %c0_10 = arith.constant 0 : index
    %c0_11 = arith.constant 0 : index
    %c0_12 = arith.constant 0 : index
    %7 = vector.load %arg1[%c0_10, %c0_11, %c0_12] : memref<1x256x128xf32, #tpu.memory_space<vmem>>, vector<1x256x128xf32>
    %8 = vector.shape_cast %7 : vector<1x256x128xf32> to vector<256x128xf32>
    %c0_13 = arith.constant 0 : index
    %c0_14 = arith.constant 0 : index
    %9 = vector.load %arg2[%c0_13, %c0_14] : memref<256x1xf32, #tpu.memory_space<vmem>>, vector<256x1xf32>
    %c0_15 = arith.constant 0 : index
    %c0_16 = arith.constant 0 : index
    %10 = vector.load %arg3[%c0_15, %c0_16] : memref<256x1xf32, #tpu.memory_space<vmem>>, vector<256x1xf32>
    %cst_17 = arith.constant dense<0.000000e+00> : vector<128xf32>
    %11 = vector.multi_reduction <add>, %8, %cst_17 [0] : vector<256x128xf32> to vector<128xf32>
    %12 = vector.shape_cast %11 : vector<128xf32> to vector<1x128xf32>
    %13 = arith.mulf %8, %8 : vector<256x128xf32>
    %cst_18 = arith.constant dense<0.000000e+00> : vector<128xf32>
    %14 = vector.multi_reduction <add>, %13, %cst_18 [0] : vector<256x128xf32> to vector<128xf32>
    %15 = vector.shape_cast %14 : vector<128xf32> to vector<1x128xf32>
    %c0_19 = arith.constant 0 : index
    %c0_20 = arith.constant 0 : index
    %16 = vector.load %arg6[%c0_19, %c0_20] : memref<128x128xf32, #tpu.memory_space<vmem>>, vector<128x128xf32>
    %cst_21 = arith.constant dense<0.000000e+00> : vector<1x128xf32>
    %17 = tpu.matmul %12, %16, %cst_21 {dimension_numbers = #tpu.dot_dimension_numbers<[1], [0], [0], [1], [0, 0, 1, 1], [], []>} : vector<1x128xf32>, vector<128x128xf32>, vector<1x128xf32> -> vector<1x128xf32>
    %cst_22 = arith.constant 3.906250e-03 : f32
    %18 = vector.broadcast %cst_22 : f32 to vector<1x128xf32>
    %19 = arith.mulf %17, %18 : vector<1x128xf32>
    %c0_23 = arith.constant 0 : index
    %c0_24 = arith.constant 0 : index
    %20 = vector.load %arg6[%c0_23, %c0_24] : memref<128x128xf32, #tpu.memory_space<vmem>>, vector<128x128xf32>
    %cst_25 = arith.constant dense<0.000000e+00> : vector<1x128xf32>
    %21 = tpu.matmul %15, %20, %cst_25 {dimension_numbers = #tpu.dot_dimension_numbers<[1], [0], [0], [1], [0, 0, 1, 1], [], []>} : vector<1x128xf32>, vector<128x128xf32>, vector<1x128xf32> -> vector<1x128xf32>
    %cst_26 = arith.constant 3.906250e-03 : f32
    %22 = vector.broadcast %cst_26 : f32 to vector<1x128xf32>
    %23 = arith.mulf %21, %22 : vector<1x128xf32>
    %24 = arith.mulf %19, %19 : vector<1x128xf32>
    %25 = arith.subf %23, %24 : vector<1x128xf32>
    %cst_27 = arith.constant 9.99999974E-6 : f32
    %26 = vector.broadcast %cst_27 : f32 to vector<1x128xf32>
    %27 = arith.addf %25, %26 : vector<1x128xf32>
    %28 = math.rsqrt %27 : vector<1x128xf32>
    %c0_28 = arith.constant 0 : index
    %c0_29 = arith.constant 0 : index
    %29 = vector.load %arg4[%c0_28, %c0_29] : memref<1x128xf32, #tpu.memory_space<vmem>>, vector<1x128xf32>
    %30 = arith.mulf %28, %29 : vector<1x128xf32>
    %c0_30 = arith.constant 0 : index
    %c0_31 = arith.constant 0 : index
    %31 = vector.load %arg5[%c0_30, %c0_31] : memref<1x128xf32, #tpu.memory_space<vmem>>, vector<1x128xf32>
    %32 = arith.mulf %19, %30 : vector<1x128xf32>
    %33 = arith.subf %31, %32 : vector<1x128xf32>
    %34 = vector.broadcast %30 : vector<1x128xf32> to vector<256x128xf32>
    %35 = arith.mulf %8, %34 : vector<256x128xf32>
    %36 = vector.broadcast %33 : vector<1x128xf32> to vector<256x128xf32>
    %37 = arith.addf %35, %36 : vector<256x128xf32>
    %cst_32 = arith.constant 0.000000e+00 : f32
    %38 = vector.broadcast %cst_32 : f32 to vector<256x128xf32>
    %39 = arith.subf %38, %37 : vector<256x128xf32>
    %40 = math.exp %39 : vector<256x128xf32>
    %cst_33 = arith.constant 1.000000e+00 : f32
    %41 = vector.broadcast %cst_33 : f32 to vector<256x128xf32>
    %42 = arith.addf %41, %40 : vector<256x128xf32>
    %43 = arith.divf %37, %42 : vector<256x128xf32>
    %44 = arith.truncf %43 : vector<256x128xf32> to vector<256x128xbf16>
    %c24 = arith.constant 24 : index
    %c0_34 = arith.constant 0 : index
    %45 = vector.load %arg16[%c24, %c0_34] : memref<304x128xbf16, #tpu.memory_space<vmem>>, vector<256x128xbf16>
    tpu.vector_store %arg16[%c24, %c0_34], %44 {strides = array<i32>} : memref<304x128xbf16, #tpu.memory_space<vmem>>, vector<256x128xbf16>,
    %46 = vector.broadcast %9 : vector<256x1xf32> to vector<256x128xf32>
    %47 = arith.mulf %43, %46 : vector<256x128xf32>
    %48 = arith.truncf %47 : vector<256x128xf32> to vector<256x128xbf16>
    %c24_35 = arith.constant 24 : index
    %c0_36 = arith.constant 0 : index
    %49 = vector.load %arg15[%c24_35, %c0_36] : memref<304x128xbf16, #tpu.memory_space<vmem>>, vector<256x128xbf16>
    tpu.vector_store %arg15[%c24_35, %c0_36], %48 {strides = array<i32>} : memref<304x128xbf16, #tpu.memory_space<vmem>>, vector<256x128xbf16>,
    %50 = vector.broadcast %10 : vector<256x1xf32> to vector<256x128xf32>
    %51 = arith.mulf %43, %50 : vector<256x128xf32>
    %52 = arith.truncf %51 : vector<256x128xf32> to vector<256x128xbf16>
    %c24_37 = arith.constant 24 : index
    %c0_38 = arith.constant 0 : index
    %53 = vector.load %arg17[%c24_37, %c0_38] : memref<304x128xbf16, #tpu.memory_space<vmem>>, vector<256x128xbf16>
    tpu.vector_store %arg17[%c24_37, %c0_38], %52 {strides = array<i32>} : memref<304x128xbf16, #tpu.memory_space<vmem>>, vector<256x128xbf16>,
    %c7 = arith.constant 7 : index
    %c0_39 = arith.constant 0 : index
    %54 = vector.load %arg15[%c7, %c0_39] : memref<304x128xbf16, #tpu.memory_space<vmem>>, vector<256x128xbf16>
    %c0_40 = arith.constant 0 : index
    %c0_41 = arith.constant 0 : index
    %c0_42 = arith.constant 0 : index
    %55 = vector.load %arg7[%c0_40, %c0_41, %c0_42] : memref<9x128x128xbf16, #tpu.memory_space<vmem>>, vector<1x128x128xbf16>
    %56 = vector.shape_cast %55 : vector<1x128x128xbf16> to vector<128x128xbf16>
    %cst_43 = arith.constant dense<0.000000e+00> : vector<256x128xf32>
    %57 = tpu.matmul %54, %56, %cst_43 {dimension_numbers = #tpu.dot_dimension_numbers<[1], [0], [0], [1], [0, 0, 1, 1], [], []>} : vector<256x128xbf16>, vector<128x128xbf16>, vector<256x128xf32> -> vector<256x128xf32>
    %c8 = arith.constant 8 : index
    %c0_44 = arith.constant 0 : index
    %58 = vector.load %arg16[%c8, %c0_44] : memref<304x128xbf16, #tpu.memory_space<vmem>>, vector<256x128xbf16>
    %c1 = arith.constant 1 : index
    %c0_45 = arith.constant 0 : index
    %c0_46 = arith.constant 0 : index
    %59 = vector.load %arg7[%c1, %c0_45, %c0_46] : memref<9x128x128xbf16, #tpu.memory_space<vmem>>, vector<1x128x128xbf16>
    %60 = vector.shape_cast %59 : vector<1x128x128xbf16> to vector<128x128xbf16>
    %cst_47 = arith.constant dense<0.000000e+00> : vector<256x128xf32>
    %61 = tpu.matmul %58, %60, %cst_47 {dimension_numbers = #tpu.dot_dimension_numbers<[1], [0], [0], [1], [0, 0, 1, 1], [], []>} : vector<256x128xbf16>, vector<128x128xbf16>, vector<256x128xf32> -> vector<256x128xf32>
    %62 = arith.addf %57, %61 : vector<256x128xf32>
    %c9 = arith.constant 9 : index
    %c0_48 = arith.constant 0 : index
    %63 = vector.load %arg17[%c9, %c0_48] : memref<304x128xbf16, #tpu.memory_space<vmem>>, vector<256x128xbf16>
    %c2 = arith.constant 2 : index
    %c0_49 = arith.constant 0 : index
    %c0_50 = arith.constant 0 : index
    %64 = vector.load %arg7[%c2, %c0_49, %c0_50] : memref<9x128x128xbf16, #tpu.memory_space<vmem>>, vector<1x128x128xbf16>
    %65 = vector.shape_cast %64 : vector<1x128x128xbf16> to vector<128x128xbf16>
    %cst_51 = arith.constant dense<0.000000e+00> : vector<256x128xf32>
    %66 = tpu.matmul %63, %65, %cst_51 {dimension_numbers = #tpu.dot_dimension_numbers<[1], [0], [0], [1], [0, 0, 1, 1], [], []>} : vector<256x128xbf16>, vector<128x128xbf16>, vector<256x128xf32> -> vector<256x128xf32>
    %67 = arith.addf %62, %66 : vector<256x128xf32>
    %c23 = arith.constant 23 : index
    %c0_52 = arith.constant 0 : index
    %68 = vector.load %arg15[%c23, %c0_52] : memref<304x128xbf16, #tpu.memory_space<vmem>>, vector<256x128xbf16>
    %c3 = arith.constant 3 : index
    %c0_53 = arith.constant 0 : index
    %c0_54 = arith.constant 0 : index
    %69 = vector.load %arg7[%c3, %c0_53, %c0_54] : memref<9x128x128xbf16, #tpu.memory_space<vmem>>, vector<1x128x128xbf16>
    %70 = vector.shape_cast %69 : vector<1x128x128xbf16> to vector<128x128xbf16>
    %cst_55 = arith.constant dense<0.000000e+00> : vector<256x128xf32>
    %71 = tpu.matmul %68, %70, %cst_55 {dimension_numbers = #tpu.dot_dimension_numbers<[1], [0], [0], [1], [0, 0, 1, 1], [], []>} : vector<256x128xbf16>, vector<128x128xbf16>, vector<256x128xf32> -> vector<256x128xf32>
    %72 = arith.addf %67, %71 : vector<256x128xf32>
    %c24_56 = arith.constant 24 : index
    %c0_57 = arith.constant 0 : index
    %73 = vector.load %arg16[%c24_56, %c0_57] : memref<304x128xbf16, #tpu.memory_space<vmem>>, vector<256x128xbf16>
    %c4 = arith.constant 4 : index
    %c0_58 = arith.constant 0 : index
    %c0_59 = arith.constant 0 : index
    %74 = vector.load %arg7[%c4, %c0_58, %c0_59] : memref<9x128x128xbf16, #tpu.memory_space<vmem>>, vector<1x128x128xbf16>
    %75 = vector.shape_cast %74 : vector<1x128x128xbf16> to vector<128x128xbf16>
    %cst_60 = arith.constant dense<0.000000e+00> : vector<256x128xf32>
    %76 = tpu.matmul %73, %75, %cst_60 {dimension_numbers = #tpu.dot_dimension_numbers<[1], [0], [0], [1], [0, 0, 1, 1], [], []>} : vector<256x128xbf16>, vector<128x128xbf16>, vector<256x128xf32> -> vector<256x128xf32>
    %77 = arith.addf %72, %76 : vector<256x128xf32>
    %c25 = arith.constant 25 : index
    %c0_61 = arith.constant 0 : index
    %78 = vector.load %arg17[%c25, %c0_61] : memref<304x128xbf16, #tpu.memory_space<vmem>>, vector<256x128xbf16>
    %c5 = arith.constant 5 : index
    %c0_62 = arith.constant 0 : index
    %c0_63 = arith.constant 0 : index
    %79 = vector.load %arg7[%c5, %c0_62, %c0_63] : memref<9x128x128xbf16, #tpu.memory_space<vmem>>, vector<1x128x128xbf16>
    %80 = vector.shape_cast %79 : vector<1x128x128xbf16> to vector<128x128xbf16>
    %cst_64 = arith.constant dense<0.000000e+00> : vector<256x128xf32>
    %81 = tpu.matmul %78, %80, %cst_64 {dimension_numbers = #tpu.dot_dimension_numbers<[1], [0], [0], [1], [0, 0, 1, 1], [], []>} : vector<256x128xbf16>, vector<128x128xbf16>, vector<256x128xf32> -> vector<256x128xf32>
    %82 = arith.addf %77, %81 : vector<256x128xf32>
    %c39 = arith.constant 39 : index
    %c0_65 = arith.constant 0 : index
    %83 = vector.load %arg15[%c39, %c0_65] : memref<304x128xbf16, #tpu.memory_space<vmem>>, vector<256x128xbf16>
    %c6 = arith.constant 6 : index
    %c0_66 = arith.constant 0 : index
    %c0_67 = arith.constant 0 : index
    %84 = vector.load %arg7[%c6, %c0_66, %c0_67] : memref<9x128x128xbf16, #tpu.memory_space<vmem>>, vector<1x128x128xbf16>
    %85 = vector.shape_cast %84 : vector<1x128x128xbf16> to vector<128x128xbf16>
    %cst_68 = arith.constant dense<0.000000e+00> : vector<256x128xf32>
    %86 = tpu.matmul %83, %85, %cst_68 {dimension_numbers = #tpu.dot_dimension_numbers<[1], [0], [0], [1], [0, 0, 1, 1], [], []>} : vector<256x128xbf16>, vector<128x128xbf16>, vector<256x128xf32> -> vector<256x128xf32>
    %87 = arith.addf %82, %86 : vector<256x128xf32>
    %c40 = arith.constant 40 : index
    %c0_69 = arith.constant 0 : index
    %88 = vector.load %arg16[%c40, %c0_69] : memref<304x128xbf16, #tpu.memory_space<vmem>>, vector<256x128xbf16>
    %c7_70 = arith.constant 7 : index
    %c0_71 = arith.constant 0 : index
    %c0_72 = arith.constant 0 : index
    %89 = vector.load %arg7[%c7_70, %c0_71, %c0_72] : memref<9x128x128xbf16, #tpu.memory_space<vmem>>, vector<1x128x128xbf16>
    %90 = vector.shape_cast %89 : vector<1x128x128xbf16> to vector<128x128xbf16>
    %cst_73 = arith.constant dense<0.000000e+00> : vector<256x128xf32>
    %91 = tpu.matmul %88, %90, %cst_73 {dimension_numbers = #tpu.dot_dimension_numbers<[1], [0], [0], [1], [0, 0, 1, 1], [], []>} : vector<256x128xbf16>, vector<128x128xbf16>, vector<256x128xf32> -> vector<256x128xf32>
    %92 = arith.addf %87, %91 : vector<256x128xf32>
    %c41 = arith.constant 41 : index
    %c0_74 = arith.constant 0 : index
    %93 = vector.load %arg17[%c41, %c0_74] : memref<304x128xbf16, #tpu.memory_space<vmem>>, vector<256x128xbf16>
    %c8_75 = arith.constant 8 : index
    %c0_76 = arith.constant 0 : index
    %c0_77 = arith.constant 0 : index
    %94 = vector.load %arg7[%c8_75, %c0_76, %c0_77] : memref<9x128x128xbf16, #tpu.memory_space<vmem>>, vector<1x128x128xbf16>
    %95 = vector.shape_cast %94 : vector<1x128x128xbf16> to vector<128x128xbf16>
    %cst_78 = arith.constant dense<0.000000e+00> : vector<256x128xf32>
    %96 = tpu.matmul %93, %95, %cst_78 {dimension_numbers = #tpu.dot_dimension_numbers<[1], [0], [0], [1], [0, 0, 1, 1], [], []>} : vector<256x128xbf16>, vector<128x128xbf16>, vector<256x128xf32> -> vector<256x128xf32>
    %97 = arith.addf %92, %96 : vector<256x128xf32>
    %c0_79 = arith.constant 0 : index
    %c0_80 = arith.constant 0 : index
    %98 = vector.load %arg8[%c0_79, %c0_80] : memref<1x128xf32, #tpu.memory_space<vmem>>, vector<1x128xf32>
    %99 = vector.broadcast %98 : vector<1x128xf32> to vector<256x128xf32>
    %100 = arith.addf %97, %99 : vector<256x128xf32>
    %cst_81 = arith.constant dense<0.000000e+00> : vector<128xf32>
    %101 = vector.multi_reduction <add>, %100, %cst_81 [0] : vector<256x128xf32> to vector<128xf32>
    %102 = vector.shape_cast %101 : vector<128xf32> to vector<1x128xf32>
    %103 = arith.mulf %100, %100 : vector<256x128xf32>
    %cst_82 = arith.constant dense<0.000000e+00> : vector<128xf32>
    %104 = vector.multi_reduction <add>, %103, %cst_82 [0] : vector<256x128xf32> to vector<128xf32>
    %105 = vector.shape_cast %104 : vector<128xf32> to vector<1x128xf32>
    %c0_83 = arith.constant 0 : index
    %c0_84 = arith.constant 0 : index
    %106 = vector.load %arg11[%c0_83, %c0_84] : memref<128x128xf32, #tpu.memory_space<vmem>>, vector<128x128xf32>
    %cst_85 = arith.constant dense<0.000000e+00> : vector<1x128xf32>
    %107 = tpu.matmul %102, %106, %cst_85 {dimension_numbers = #tpu.dot_dimension_numbers<[1], [0], [0], [1], [0, 0, 1, 1], [], []>} : vector<1x128xf32>, vector<128x128xf32>, vector<1x128xf32> -> vector<1x128xf32>
    %cst_86 = arith.constant 3.906250e-03 : f32
    %108 = vector.broadcast %cst_86 : f32 to vector<1x128xf32>
    %109 = arith.mulf %107, %108 : vector<1x128xf32>
    %c0_87 = arith.constant 0 : index
    %c0_88 = arith.constant 0 : index
    %110 = vector.load %arg11[%c0_87, %c0_88] : memref<128x128xf32, #tpu.memory_space<vmem>>, vector<128x128xf32>
    %cst_89 = arith.constant dense<0.000000e+00> : vector<1x128xf32>
    %111 = tpu.matmul %105, %110, %cst_89 {dimension_numbers = #tpu.dot_dimension_numbers<[1], [0], [0], [1], [0, 0, 1, 1], [], []>} : vector<1x128xf32>, vector<128x128xf32>, vector<1x128xf32> -> vector<1x128xf32>
    %cst_90 = arith.constant 3.906250e-03 : f32
    %112 = vector.broadcast %cst_90 : f32 to vector<1x128xf32>
    %113 = arith.mulf %111, %112 : vector<1x128xf32>
    %114 = arith.mulf %109, %109 : vector<1x128xf32>
    %115 = arith.subf %113, %114 : vector<1x128xf32>
    %cst_91 = arith.constant 9.99999974E-6 : f32
    %116 = vector.broadcast %cst_91 : f32 to vector<1x128xf32>
    %117 = arith.addf %115, %116 : vector<1x128xf32>
    %118 = math.rsqrt %117 : vector<1x128xf32>
    %c0_92 = arith.constant 0 : index
    %c0_93 = arith.constant 0 : index
    %119 = vector.load %arg9[%c0_92, %c0_93] : memref<1x128xf32, #tpu.memory_space<vmem>>, vector<1x128xf32>
    %120 = arith.mulf %118, %119 : vector<1x128xf32>
    %c0_94 = arith.constant 0 : index
    %c0_95 = arith.constant 0 : index
    %121 = vector.load %arg10[%c0_94, %c0_95] : memref<1x128xf32, #tpu.memory_space<vmem>>, vector<1x128xf32>
    %122 = arith.mulf %109, %120 : vector<1x128xf32>
    %123 = arith.subf %121, %122 : vector<1x128xf32>
    %124 = vector.broadcast %120 : vector<1x128xf32> to vector<256x128xf32>
    %125 = arith.mulf %100, %124 : vector<256x128xf32>
    %126 = vector.broadcast %123 : vector<1x128xf32> to vector<256x128xf32>
    %127 = arith.addf %125, %126 : vector<256x128xf32>
    %cst_96 = arith.constant 0.000000e+00 : f32
    %128 = vector.broadcast %cst_96 : f32 to vector<256x128xf32>
    %129 = arith.subf %128, %127 : vector<256x128xf32>
    %130 = math.exp %129 : vector<256x128xf32>
    %cst_97 = arith.constant 1.000000e+00 : f32
    %131 = vector.broadcast %cst_97 : f32 to vector<256x128xf32>
    %132 = arith.addf %131, %130 : vector<256x128xf32>
    %133 = arith.divf %127, %132 : vector<256x128xf32>
    %134 = arith.truncf %133 : vector<256x128xf32> to vector<256x128xbf16>
    %c24_98 = arith.constant 24 : index
    %c0_99 = arith.constant 0 : index
    %135 = vector.load %arg16[%c24_98, %c0_99] : memref<304x128xbf16, #tpu.memory_space<vmem>>, vector<256x128xbf16>
    tpu.vector_store %arg16[%c24_98, %c0_99], %134 {strides = array<i32>} : memref<304x128xbf16, #tpu.memory_space<vmem>>, vector<256x128xbf16>,
    %136 = vector.broadcast %9 : vector<256x1xf32> to vector<256x128xf32>
    %137 = arith.mulf %133, %136 : vector<256x128xf32>
    %138 = arith.truncf %137 : vector<256x128xf32> to vector<256x128xbf16>
    %c24_100 = arith.constant 24 : index
    %c0_101 = arith.constant 0 : index
    %139 = vector.load %arg15[%c24_100, %c0_101] : memref<304x128xbf16, #tpu.memory_space<vmem>>, vector<256x128xbf16>
    tpu.vector_store %arg15[%c24_100, %c0_101], %138 {strides = array<i32>} : memref<304x128xbf16, #tpu.memory_space<vmem>>, vector<256x128xbf16>,
    %140 = vector.broadcast %10 : vector<256x1xf32> to vector<256x128xf32>
    %141 = arith.mulf %133, %140 : vector<256x128xf32>
    %142 = arith.truncf %141 : vector<256x128xf32> to vector<256x128xbf16>
    %c24_102 = arith.constant 24 : index
    %c0_103 = arith.constant 0 : index
    %143 = vector.load %arg17[%c24_102, %c0_103] : memref<304x128xbf16, #tpu.memory_space<vmem>>, vector<256x128xbf16>
    tpu.vector_store %arg17[%c24_102, %c0_103], %142 {strides = array<i32>} : memref<304x128xbf16, #tpu.memory_space<vmem>>, vector<256x128xbf16>,
    %c7_104 = arith.constant 7 : index
    %c0_105 = arith.constant 0 : index
    %144 = vector.load %arg15[%c7_104, %c0_105] : memref<304x128xbf16, #tpu.memory_space<vmem>>, vector<256x128xbf16>
    %c0_106 = arith.constant 0 : index
    %c0_107 = arith.constant 0 : index
    %c0_108 = arith.constant 0 : index
    %145 = vector.load %arg12[%c0_106, %c0_107, %c0_108] : memref<9x128x128xbf16, #tpu.memory_space<vmem>>, vector<1x128x128xbf16>
    %146 = vector.shape_cast %145 : vector<1x128x128xbf16> to vector<128x128xbf16>
    %cst_109 = arith.constant dense<0.000000e+00> : vector<256x128xf32>
    %147 = tpu.matmul %144, %146, %cst_109 {dimension_numbers = #tpu.dot_dimension_numbers<[1], [0], [0], [1], [0, 0, 1, 1], [], []>} : vector<256x128xbf16>, vector<128x128xbf16>, vector<256x128xf32> -> vector<256x128xf32>
    %c8_110 = arith.constant 8 : index
    %c0_111 = arith.constant 0 : index
    %148 = vector.load %arg16[%c8_110, %c0_111] : memref<304x128xbf16, #tpu.memory_space<vmem>>, vector<256x128xbf16>
    %c1_112 = arith.constant 1 : index
    %c0_113 = arith.constant 0 : index
    %c0_114 = arith.constant 0 : index
    %149 = vector.load %arg12[%c1_112, %c0_113, %c0_114] : memref<9x128x128xbf16, #tpu.memory_space<vmem>>, vector<1x128x128xbf16>
    %150 = vector.shape_cast %149 : vector<1x128x128xbf16> to vector<128x128xbf16>
    %cst_115 = arith.constant dense<0.000000e+00> : vector<256x128xf32>
    %151 = tpu.matmul %148, %150, %cst_115 {dimension_numbers = #tpu.dot_dimension_numbers<[1], [0], [0], [1], [0, 0, 1, 1], [], []>} : vector<256x128xbf16>, vector<128x128xbf16>, vector<256x128xf32> -> vector<256x128xf32>
    %152 = arith.addf %147, %151 : vector<256x128xf32>
    %c9_116 = arith.constant 9 : index
    %c0_117 = arith.constant 0 : index
    %153 = vector.load %arg17[%c9_116, %c0_117] : memref<304x128xbf16, #tpu.memory_space<vmem>>, vector<256x128xbf16>
    %c2_118 = arith.constant 2 : index
    %c0_119 = arith.constant 0 : index
    %c0_120 = arith.constant 0 : index
    %154 = vector.load %arg12[%c2_118, %c0_119, %c0_120] : memref<9x128x128xbf16, #tpu.memory_space<vmem>>, vector<1x128x128xbf16>
    %155 = vector.shape_cast %154 : vector<1x128x128xbf16> to vector<128x128xbf16>
    %cst_121 = arith.constant dense<0.000000e+00> : vector<256x128xf32>
    %156 = tpu.matmul %153, %155, %cst_121 {dimension_numbers = #tpu.dot_dimension_numbers<[1], [0], [0], [1], [0, 0, 1, 1], [], []>} : vector<256x128xbf16>, vector<128x128xbf16>, vector<256x128xf32> -> vector<256x128xf32>
    %157 = arith.addf %152, %156 : vector<256x128xf32>
    %c23_122 = arith.constant 23 : index
    %c0_123 = arith.constant 0 : index
    %158 = vector.load %arg15[%c23_122, %c0_123] : memref<304x128xbf16, #tpu.memory_space<vmem>>, vector<256x128xbf16>
    %c3_124 = arith.constant 3 : index
    %c0_125 = arith.constant 0 : index
    %c0_126 = arith.constant 0 : index
    %159 = vector.load %arg12[%c3_124, %c0_125, %c0_126] : memref<9x128x128xbf16, #tpu.memory_space<vmem>>, vector<1x128x128xbf16>
    %160 = vector.shape_cast %159 : vector<1x128x128xbf16> to vector<128x128xbf16>
    %cst_127 = arith.constant dense<0.000000e+00> : vector<256x128xf32>
    %161 = tpu.matmul %158, %160, %cst_127 {dimension_numbers = #tpu.dot_dimension_numbers<[1], [0], [0], [1], [0, 0, 1, 1], [], []>} : vector<256x128xbf16>, vector<128x128xbf16>, vector<256x128xf32> -> vector<256x128xf32>
    %162 = arith.addf %157, %161 : vector<256x128xf32>
    %c24_128 = arith.constant 24 : index
    %c0_129 = arith.constant 0 : index
    %163 = vector.load %arg16[%c24_128, %c0_129] : memref<304x128xbf16, #tpu.memory_space<vmem>>, vector<256x128xbf16>
    %c4_130 = arith.constant 4 : index
    %c0_131 = arith.constant 0 : index
    %c0_132 = arith.constant 0 : index
    %164 = vector.load %arg12[%c4_130, %c0_131, %c0_132] : memref<9x128x128xbf16, #tpu.memory_space<vmem>>, vector<1x128x128xbf16>
    %165 = vector.shape_cast %164 : vector<1x128x128xbf16> to vector<128x128xbf16>
    %cst_133 = arith.constant dense<0.000000e+00> : vector<256x128xf32>
    %166 = tpu.matmul %163, %165, %cst_133 {dimension_numbers = #tpu.dot_dimension_numbers<[1], [0], [0], [1], [0, 0, 1, 1], [], []>} : vector<256x128xbf16>, vector<128x128xbf16>, vector<256x128xf32> -> vector<256x128xf32>
    %167 = arith.addf %162, %166 : vector<256x128xf32>
    %c25_134 = arith.constant 25 : index
    %c0_135 = arith.constant 0 : index
    %168 = vector.load %arg17[%c25_134, %c0_135] : memref<304x128xbf16, #tpu.memory_space<vmem>>, vector<256x128xbf16>
    %c5_136 = arith.constant 5 : index
    %c0_137 = arith.constant 0 : index
    %c0_138 = arith.constant 0 : index
    %169 = vector.load %arg12[%c5_136, %c0_137, %c0_138] : memref<9x128x128xbf16, #tpu.memory_space<vmem>>, vector<1x128x128xbf16>
    %170 = vector.shape_cast %169 : vector<1x128x128xbf16> to vector<128x128xbf16>
    %cst_139 = arith.constant dense<0.000000e+00> : vector<256x128xf32>
    %171 = tpu.matmul %168, %170, %cst_139 {dimension_numbers = #tpu.dot_dimension_numbers<[1], [0], [0], [1], [0, 0, 1, 1], [], []>} : vector<256x128xbf16>, vector<128x128xbf16>, vector<256x128xf32> -> vector<256x128xf32>
    %172 = arith.addf %167, %171 : vector<256x128xf32>
    %c39_140 = arith.constant 39 : index
    %c0_141 = arith.constant 0 : index
    %173 = vector.load %arg15[%c39_140, %c0_141] : memref<304x128xbf16, #tpu.memory_space<vmem>>, vector<256x128xbf16>
    %c6_142 = arith.constant 6 : index
    %c0_143 = arith.constant 0 : index
    %c0_144 = arith.constant 0 : index
    %174 = vector.load %arg12[%c6_142, %c0_143, %c0_144] : memref<9x128x128xbf16, #tpu.memory_space<vmem>>, vector<1x128x128xbf16>
    %175 = vector.shape_cast %174 : vector<1x128x128xbf16> to vector<128x128xbf16>
    %cst_145 = arith.constant dense<0.000000e+00> : vector<256x128xf32>
    %176 = tpu.matmul %173, %175, %cst_145 {dimension_numbers = #tpu.dot_dimension_numbers<[1], [0], [0], [1], [0, 0, 1, 1], [], []>} : vector<256x128xbf16>, vector<128x128xbf16>, vector<256x128xf32> -> vector<256x128xf32>
    %177 = arith.addf %172, %176 : vector<256x128xf32>
    %c40_146 = arith.constant 40 : index
    %c0_147 = arith.constant 0 : index
    %178 = vector.load %arg16[%c40_146, %c0_147] : memref<304x128xbf16, #tpu.memory_space<vmem>>, vector<256x128xbf16>
    %c7_148 = arith.constant 7 : index
    %c0_149 = arith.constant 0 : index
    %c0_150 = arith.constant 0 : index
    %179 = vector.load %arg12[%c7_148, %c0_149, %c0_150] : memref<9x128x128xbf16, #tpu.memory_space<vmem>>, vector<1x128x128xbf16>
    %180 = vector.shape_cast %179 : vector<1x128x128xbf16> to vector<128x128xbf16>
    %cst_151 = arith.constant dense<0.000000e+00> : vector<256x128xf32>
    %181 = tpu.matmul %178, %180, %cst_151 {dimension_numbers = #tpu.dot_dimension_numbers<[1], [0], [0], [1], [0, 0, 1, 1], [], []>} : vector<256x128xbf16>, vector<128x128xbf16>, vector<256x128xf32> -> vector<256x128xf32>
    %182 = arith.addf %177, %181 : vector<256x128xf32>
    %c41_152 = arith.constant 41 : index
    %c0_153 = arith.constant 0 : index
    %183 = vector.load %arg17[%c41_152, %c0_153] : memref<304x128xbf16, #tpu.memory_space<vmem>>, vector<256x128xbf16>
    %c8_154 = arith.constant 8 : index
    %c0_155 = arith.constant 0 : index
    %c0_156 = arith.constant 0 : index
    %184 = vector.load %arg12[%c8_154, %c0_155, %c0_156] : memref<9x128x128xbf16, #tpu.memory_space<vmem>>, vector<1x128x128xbf16>
    %185 = vector.shape_cast %184 : vector<1x128x128xbf16> to vector<128x128xbf16>
    %cst_157 = arith.constant dense<0.000000e+00> : vector<256x128xf32>
    %186 = tpu.matmul %183, %185, %cst_157 {dimension_numbers = #tpu.dot_dimension_numbers<[1], [0], [0], [1], [0, 0, 1, 1], [], []>} : vector<256x128xbf16>, vector<128x128xbf16>, vector<256x128xf32> -> vector<256x128xf32>
    %187 = arith.addf %182, %186 : vector<256x128xf32>
    %c0_158 = arith.constant 0 : index
    %c0_159 = arith.constant 0 : index
    %188 = vector.load %arg13[%c0_158, %c0_159] : memref<1x128xf32, #tpu.memory_space<vmem>>, vector<1x128xf32>
    %189 = vector.broadcast %188 : vector<1x128xf32> to vector<256x128xf32>
    %190 = arith.addf %187, %189 : vector<256x128xf32>
    %191 = arith.addf %8, %190 : vector<256x128xf32>
    %c0_160 = arith.constant 0 : index
    %c0_161 = arith.constant 0 : index
    %c0_162 = arith.constant 0 : index
    %192 = vector.load %arg14[%c0_160, %c0_161, %c0_162] : memref<1x256x128xf32, #tpu.memory_space<vmem>>, vector<1x256x128xf32>
    %193 = vector.shape_cast %192 : vector<1x256x128xf32> to vector<256x128xf32>
    %194 = vector.shape_cast %191 : vector<256x128xf32> to vector<1x256x128xf32>
    tpu.vector_store %arg14[%c0_160, %c0_161, %c0_162], %194 {strides = array<i32>} : memref<1x256x128xf32, #tpu.memory_space<vmem>>, vector<1x256x128xf32>,
    return
  }
  func.func @transform_0(%arg0: i32) -> (i32, i32, i32) {
    %c0_i32 = arith.constant 0 : i32
    %c0_i32_0 = arith.constant 0 : i32
    %c0_i32_1 = arith.constant 0 : i32
    return %arg0, %c0_i32, %c0_i32_0 : i32, i32, i32
  }
  func.func @transform_1(%arg0: i32) -> (i32, i32) {
    %c0_i32 = arith.constant 0 : i32
    %c0_i32_0 = arith.constant 0 : i32
    %c0_i32_1 = arith.constant 0 : i32
    return %c0_i32, %c0_i32_0 : i32, i32
  }
  func.func @transform_2(%arg0: i32) -> (i32, i32) {
    %c0_i32 = arith.constant 0 : i32
    %c0_i32_0 = arith.constant 0 : i32
    %c0_i32_1 = arith.constant 0 : i32
    return %c0_i32, %c0_i32_0 : i32, i32
  }
  func.func @transform_3(%arg0: i32) -> (i32, i32) {
    %c0_i32 = arith.constant 0 : i32
    %c0_i32_0 = arith.constant 0 : i32
    %c0_i32_1 = arith.constant 0 : i32
    return %c0_i32, %c0_i32_0 : i32, i32
  }
  func.func @transform_4(%arg0: i32) -> (i32, i32) {
    %c0_i32 = arith.constant 0 : i32
    %c0_i32_0 = arith.constant 0 : i32
    %c0_i32_1 = arith.constant 0 : i32
    return %c0_i32, %c0_i32_0 : i32, i32
  }
  func.func @transform_5(%arg0: i32) -> (i32, i32) {
    %c0_i32 = arith.constant 0 : i32
    %c0_i32_0 = arith.constant 0 : i32
    %c0_i32_1 = arith.constant 0 : i32
    return %c0_i32, %c0_i32_0 : i32, i32
  }
  func.func @transform_6(%arg0: i32) -> (i32, i32, i32) {
    %c0_i32 = arith.constant 0 : i32
    %c0_i32_0 = arith.constant 0 : i32
    %c0_i32_1 = arith.constant 0 : i32
    %c0_i32_2 = arith.constant 0 : i32
    return %c0_i32, %c0_i32_0, %c0_i32_1 : i32, i32, i32
  }
  func.func @transform_7(%arg0: i32) -> (i32, i32) {
    %c0_i32 = arith.constant 0 : i32
    %c0_i32_0 = arith.constant 0 : i32
    %c0_i32_1 = arith.constant 0 : i32
    return %c0_i32, %c0_i32_0 : i32, i32
  }
  func.func @transform_8(%arg0: i32) -> (i32, i32) {
    %c0_i32 = arith.constant 0 : i32
    %c0_i32_0 = arith.constant 0 : i32
    %c0_i32_1 = arith.constant 0 : i32
    return %c0_i32, %c0_i32_0 : i32, i32
  }
  func.func @transform_9(%arg0: i32) -> (i32, i32) {
    %c0_i32 = arith.constant 0 : i32
    %c0_i32_0 = arith.constant 0 : i32
    %c0_i32_1 = arith.constant 0 : i32
    return %c0_i32, %c0_i32_0 : i32, i32
  }
  func.func @transform_10(%arg0: i32) -> (i32, i32) {
    %c0_i32 = arith.constant 0 : i32
    %c0_i32_0 = arith.constant 0 : i32
    %c0_i32_1 = arith.constant 0 : i32
    return %c0_i32, %c0_i32_0 : i32, i32
  }
  func.func @transform_11(%arg0: i32) -> (i32, i32, i32) {
    %c0_i32 = arith.constant 0 : i32
    %c0_i32_0 = arith.constant 0 : i32
    %c0_i32_1 = arith.constant 0 : i32
    %c0_i32_2 = arith.constant 0 : i32
    return %c0_i32, %c0_i32_0, %c0_i32_1 : i32, i32, i32
  }
  func.func @transform_12(%arg0: i32) -> (i32, i32) {
    %c0_i32 = arith.constant 0 : i32
    %c0_i32_0 = arith.constant 0 : i32
    %c0_i32_1 = arith.constant 0 : i32
    return %c0_i32, %c0_i32_0 : i32, i32
  }
  func.func @transform_13(%arg0: i32) -> (i32, i32, i32) {
    %c0_i32 = arith.constant 0 : i32
    %c0_i32_0 = arith.constant 0 : i32
    %c0_i32_1 = arith.constant 0 : i32
    return %arg0, %c0_i32, %c0_i32_0 : i32, i32, i32
  }
}

</mosaic_0001>

<bundles_post_ra>
// kernel: tpu_custom_call.1
= control target key start
LH: loop header
LB: loop body
LE: loop exit
PB: predicated region body
PF: predicated region fallthrough
CT: control target
= control target key end

     0   :  { %18 = vsyncpa [#allocation6], 0  ;;  %s19551_s0 = inlined_call_operand.vmem [shape: f32[2,256,128], index: 0, kind: input, shape index: {}]   ;;  %s19552_s1 = inlined_call_operand.vmem [shape: f32[256,1], index: 1, kind: input, shape index: {}]   ;;  %s19553_s2 = inlined_call_operand.vmem [shape: f32[256,1], index: 2, kind: input, shape index: {}]   ;;  %s19554_s3 = inlined_call_operand.vmem [shape: f32[1,128], index: 3, kind: input, shape index: {}]   ;;  %s19555_s4 = inlined_call_operand.vmem [shape: f32[1,128], index: 4, kind: input, shape index: {}]   ;;  %s19556_s5 = inlined_call_operand.hbm [shape: f32[128,128], index: 5, kind: input, shape index: {}]   ;;  %s19557_s6 = inlined_call_operand.hbm [shape: bf16[9,128,128], index: 6, kind: input, shape index: {}]   ;;  %s19558_s7 = inlined_call_operand.vmem [shape: f32[1,128], index: 7, kind: input, shape index: {}]   ;;  %s19559_s8 = inlined_call_operand.vmem [shape: f32[1,128], index: 8, kind: input, shape index: {}]   ;;  %s19560_s9 = inlined_call_operand.vmem [shape: f32[1,128], index: 9, kind: input, shape index: {}]   ;;  %s19561_s10 = inlined_call_operand.hbm [shape: f32[128,128], index: 10, kind: input, shape index: {}]   ;;  %s19562_s11 = inlined_call_operand.hbm [shape: bf16[9,128,128], index: 11, kind: input, shape index: {}]   ;;  %s19563_s12 = inlined_call_operand.vmem [shape: f32[1,128], index: 12, kind: input, shape index: {}]   ;;  %s19564_s13 = inlined_call_operand.hbm [shape: f32[2,256,128], index: 13, kind: output, shape index: {}]  }
   0x1   :  { %19 = vsyncpa [#allocation9], 0 }
   0x2   :  { %20 = vsyncpa [#allocation12], 0 }
   0x3   :  { %21 = vsyncpa [#allocation7], 0 }
   0x4   :  { %23 = vsyncpa [#allocation7 + $0x1], 0  ;;  %s15948_s25 = smov 0   ;;  %s15950_s26 = smov 0  }
   0x5   :  { %s15952_s27 = smov 0   ;;  %s15954_s28 = smov 0  }
   0x6 LB: > { %19686 = sst [smem:[#allocation18_spill]] %s15850_s25  ;;  %s15969_s29 = sadd.s32 4294967295, %s15862_s28   ;;  %s15862_s28 = sphi %s15954_s28, %s20151_s28   ;;  %s15858_s27 = sphi %s15952_s27, %s20153_s27   ;;  %s15854_s26 = sphi %s15950_s26, %s20155_s26   ;;  %s15850_s25 = sphi %s15948_s25, %s20154_s25  }
   0x7   : > { %19687 = sst [smem:[#allocation19_spill]] %s15858_s27  ;;  %s11930_s30 = sadd.s32 4294967294, %s15862_s28  }
   0x8   : > { %s15973_s14 = sadd.s32 1, %s15862_s28   ;;  %s314_s15 = sadd.s32 1, %s15858_s27 }
   0x9   : > { %19688 = sst [smem:[#allocation20_spill]] %s15973_s14  ;;  %s311_s16 = ssub.s32 %s15862_s28, %s15973_s14 }
   0xa   : > { %p324_p0 = scmp.ne.s32.totalorder %s15858_s27, %s15854_s26  ;;  %p312_p1 = scmp.eq.s32.totalorder %s311_s16, 0 }
   0xb   : > { %p325_p2 = scmp.eq.s32.totalorder %s15969_s29, 1  ;;  %p330_p3 = scmp.ne.s32.totalorder %s15854_s26, %s15850_s25 }
   0xc   : > { %p331_p4 = scmp.eq.s32.totalorder %s11930_s30, 1  ;;  %p11931_p7 = scmp.ge.s32.totalorder %s15862_s28, 1 }
   0xd   : > { %s15984_s17 = scalar_select %p312_p1, %s15858_s27, %s314_s15  }
   0xe   : > { %p15986_p5 = por %p325_p2, %p324_p0  ;;  %p15990_p6 = por %p331_p4, %p330_p3 }
   0xf   : > { %19689 = sst [smem:[#allocation21_spill]] %s15984_s17  ;;  %p338_p8 = scmp.lt.s32.totalorder %s15862_s28, 3 }
  0x10   : > { %s19690_s18 = scalar_select %p15986_p5, 1, 0 }
  0x11   : > { %s19691_s19 = scalar_select %p15990_p6, 1, 0 }
  0x12   : > { %p19572_p9 = scmp.eq.s32.totalorder %s15969_s29, 0  ;;  %p15997_p10 = pnand %p11931_p7, %p338_p8 }
  0x13   : > { %19692 = sst [smem:[#allocation22_spill]] %s19691_s19  ;;  %s15864_s21 = smov [#allocation8]  }
  0x14   : > { %s19693_s20 = scalar_select %p15997_p10, 1, 0 }
  0x15   : > { %s375_s22 = sshll.u32 %s15864_s21, 4  ;;  %p14844_p11 = pneg %p15997_p10  ;;  %s376_s22 = int_to_ptr.vmem [resolvable:$true] %s375_s22 }
  0x16   : > { %s15865_s24 = smov [#allocation5]   ;;  %s15697_s15 = scalar_lea.vmem %s376_s22, 9216 }
  0x17   : > { %p16005_p12 = pnand %p19572_p9, %p14844_p11  ;;  %s362_s30 = sshll.u32 %s15865_s24, 4  ;;  %s363_s30 = int_to_ptr.vmem [resolvable:$true] %s362_s30 }
  0x18   : > { %p15698_p0 = scmp.ne.s32.totalorder %s376_s22, %s15697_s15  ;;  %p15705_p3 = scmp.lt.s32.totalorder %s376_s22, %s376_s22 }
  0x19   : > { %p15688_p13 = pneg %p16005_p12  ;;  %p15706_p4 = scmp.lt.s32.totalorder %s15697_s15, %s15697_s15 }
  0x1b   : > { %p15700_p1 = pnand %p15698_p0, %p15688_p13  ;;  %p15707_p7 = por %p15706_p4, %p15705_p3 }
  0x1d   : > { %p15701_p2 = pneg %p15700_p1 }
  0x1f   : > { %p15708_p8 = pnand %p15707_p7, %p15701_p2 }
  0x21   : > { %15711 = shalt.err (!%p15708_p8)
}
  0x22   : > { %s19570_s16 = smov 64   ;;  %s19571_s21 = smov 4  }
  0x23   : > { %14850 = dma.hbm_to_vmem [thread:$0]  (!%p16005_p12), %s19557_s6, 9216, %s376_s22, [#allocation9], %s19570_s16, %s19570_s16, %s19571_s21  }
  0x24   : > { %s15723_s27 = scalar_lea.vmem %s363_s30, 2048  ;;  %p15731_p2 = scmp.lt.s32.totalorder %s363_s30, %s363_s30 }
  0x25   : > { %p15724_p11 = scmp.ne.s32.totalorder %s363_s30, %s15723_s27  ;;  %p15732_p3 = scmp.lt.s32.totalorder %s15723_s27, %s15723_s27 }
  0x27   : > { %p15726_p0 = pnand %p15724_p11, %p15688_p13  ;;  %p15733_p4 = por %p15732_p3, %p15731_p2 }
  0x29   : > { %p15727_p1 = pneg %p15726_p0 }
  0x2b   : > { %p15734_p7 = pnand %p15733_p4, %p15727_p1 }
  0x2d   : > { %15737 = shalt.err (!%p15734_p7)
}
  0x2e   : > { %s15868_s15 = smov 128   ;;  %s15869_s14 = smov 8  }
  0x2f   : > { %14847 = dma.hbm_to_vmem [thread:$0]  (!%p16005_p12), %s19556_s5, 2048, %s363_s30, [#allocation6], %s15868_s15, %s15868_s15, %s15869_s14  }
  0x30   : > { %s15870_s17 = smov [#allocation10]   ;;  %s15871_s24 = smov [#allocation11]  }
  0x31   : > { %s397_s22 = sshll.u32 %s15870_s17, 4  ;;  %s410_s16 = sshll.u32 %s15871_s24, 4  ;;  %s398_s22 = int_to_ptr.vmem [resolvable:$true] %s397_s22  ;;  %s411_s16 = int_to_ptr.vmem [resolvable:$true] %s410_s16 }
  0x32   : > { %s15749_s21 = scalar_lea.vmem %s398_s22, 2048  ;;  %p15757_p1 = scmp.lt.s32.totalorder %s398_s22, %s398_s22 }
  0x33   : > { %p15750_p8 = scmp.ne.s32.totalorder %s398_s22, %s15749_s21  ;;  %p15758_p2 = scmp.lt.s32.totalorder %s15749_s21, %s15749_s21 }
  0x35   : > { %p15752_p11 = pnand %p15750_p8, %p15688_p13  ;;  %p15759_p3 = por %p15758_p2, %p15757_p1 }
  0x37   : > { %p15753_p0 = pneg %p15752_p11 }
  0x39   : > { %p15760_p4 = pnand %p15759_p3, %p15753_p0 }
  0x3b   : > { %15763 = shalt.err (!%p15760_p4)
}
  0x3c   : > { %14853 = dma.hbm_to_vmem [thread:$0]  (!%p16005_p12), %s19561_s10, 2048, %s398_s22, [#allocation9], %s15868_s15, %s15868_s15, %s15869_s14  }
  0x3d   : > { %s15775_s19 = scalar_lea.vmem %s411_s16, 9216  ;;  %p15783_p8 = scmp.lt.s32.totalorder %s411_s16, %s411_s16 }
  0x3e   : > { %p15776_p7 = scmp.ne.s32.totalorder %s411_s16, %s15775_s19  ;;  %p15784_p11 = scmp.lt.s32.totalorder %s15775_s19, %s15775_s19 }
  0x40   : > { %p15778_p9 = pnand %p15776_p7, %p15688_p13  ;;  %p15785_p5 = por %p15784_p11, %p15783_p8 }
  0x42   : > { %p15779_p6 = pneg %p15778_p9 }
  0x44   : > { %p15786_p10 = pnand %p15785_p5, %p15779_p6 }
  0x46   : > { %15789 = shalt.err (!%p15786_p10)
}
  0x47   : > { %s19695_s30 = smov 4   ;;  %s19696_s21 = smov 64  }
  0x48   : > { %14856 = dma.hbm_to_vmem [thread:$0]  (!%p16005_p12), %s19562_s11, 9216, %s411_s16, [#allocation12], %s19696_s21, %s19696_s21, %s19695_s30  }
  0x49   : > { %p19697_p0 = scmp.ne.s32.totalorder %s19693_s20, 0 }
  0x4b   : > { %437 = sbr.rel (%p19697_p0) target bundleno = 1889 (0x761), region = 72 }
  0x50   : > { %p19698_p13 = scmp.eq.s32.totalorder %s15969_s29, 0 }
  0x52   : > { %15833 = dma.done.wait (%p19698_p13), [#allocation6], 2048   ;;  %p19699_p9 = pmov %p19698_p13 }
  0x54   : > { %15835 = vsyncadd (%p19699_p9), [#allocation6], 4294965248  ;;  %p19700_p5 = pmov %p19699_p9 }
  0x56   : > { %15837 = dma.done.wait (%p19700_p5), [#allocation9], 11264   ;;  %p19701_p6 = pmov %p19700_p5 }
  0x57   : > { %p19702_p10 = pmov %p19700_p5 }
  0x58   : > { %15839 = vsyncadd (%p19701_p6), [#allocation9], 4294956032 }
  0x59   : > { %15841 = dma.done.wait (%p19702_p10), [#allocation12], 9216   ;;  %p19703_p12 = pmov %p19700_p5 }
  0x5a   : > { %p493_p1 = scmp.lt.s32.totalorder %s15969_s29, 1  ;;  %v19575_v0 = vmov 0.0   ;;  %vm15873_vm0 = vmmov 0   ;;  %v15874_v1 = vmov 0   ;;  %v16070_v2 = vld [vmem:[#allocation5 + $0x78] sm:$0xff]  ;;  %v16072_v3 = vld [vmem:[#allocation5 + $0x70] sm:$0xff] }
  0x5b   : > { %15843 = vsyncadd (%p19703_p12), [#allocation12], 4294958080  ;;  %13822 = vmatprep.subr.mxu1 %v19575_v0  ;;  %13854 = vmatprep.mubr.msk.f32.mxu1 %vm15873_vm0, %v19575_v0  ;;  %499 = vst [vmem:[#allocation2] sm:$0xf] %v15874_v1  ;;  %v16076_v4 = vld [vmem:[#allocation5 + $0x68] sm:$0xff]  ;;  %v16085_v5 = vld [vmem:[#allocation5 + $0x60] sm:$0xff] }
  0x5c   : > { %500 = vst [vmem:[#allocation2 + $0x4] sm:$0xf] %v15874_v1  ;;  %501 = vst [vmem:[#allocation2 + $0x8] sm:$0xf] %v15874_v1  ;;  %s494_s14 = scalar_select %p493_p1, %s15969_s29, 1  ;;  %14916 = vset.pattern.permute.xlu1 %v15874_v1  ;;  %14915 = vset.pattern.permute.xlu0 %v15874_v1  ;;  %v16091_v8 = vld [vmem:[#allocation5 + $0x58] sm:$0xff] }
  0x5d   : > { %502 = vst [vmem:[#allocation2 + $0x8c] sm:$0xf] %v15874_v1  ;;  %503 = vst [vmem:[#allocation2 + $0x90] sm:$0xf] %v15874_v1  ;;  %13823 = vmatpush3.msra.mxu1 %v16070_v2  ;;  %v16097_v15 = vld [vmem:[#allocation5 + $0x50] sm:$0xff]  ;;  %v16102_v20 = vld [vmem:[#allocation5 + $0x48] sm:$0xff] }
  0x5e   : > { %506 = vst [vmem:[#allocation3 + $0x4] sm:$0xf] %v15874_v1  ;;  %507 = vst [vmem:[#allocation3 + $0x8] sm:$0xf] %v15874_v1  ;;  %s12588_s20 = sshll.u32 %s494_s14, 8  ;;  %13824 = vmatprep.subr.mxu1 %v19575_v0  ;;  %v16107_v25 = vld [vmem:[#allocation5 + $0x40] sm:$0xff] }
  0x5f   : > { %508 = vst [vmem:[#allocation3 + $0x8c] sm:$0xf] %v15874_v1  ;;  %509 = vst [vmem:[#allocation3 + $0x90] sm:$0xf] %v15874_v1  ;;  %s16081_s15 = scalar_lea.vmem %s19551_s0, %s12588_s20  ;;  %13825 = vmatpush3.msra.mxu1 %v16072_v3  ;;  %v16112_v30 = vld [vmem:[#allocation5 + $0x38] sm:$0xff]  ;;  %v16117_v35 = vld [vmem:[#allocation5 + $0x30] sm:$0xff] }
  0x60   : > { %512 = vst [vmem:[#allocation4 + $0x4] sm:$0xf] %v15874_v1  ;;  %513 = vst [vmem:[#allocation4 + $0x8] sm:$0xf] %v15874_v1  ;;  %13826 = vmatprep.subr.mxu1 %v19575_v0  ;;  %v517_v6 = vld [vmem:[%s16081_s15] sm:$0xff]  ;;  %v518_v7 = vld [vmem:[%s16081_s15 + $0x8] sm:$0xff] }
  0x61   : > { %514 = vst [vmem:[#allocation4 + $0x8c] sm:$0xf] %v15874_v1  ;;  %515 = vst [vmem:[#allocation4 + $0x90] sm:$0xf] %v15874_v1  ;;  %13827 = vmatpush3.msra.mxu1 %v16076_v4  ;;  %v519_v9 = vld [vmem:[%s16081_s15 + $0x10] sm:$0xff]  ;;  %v613_v10 = vadd.f32 %v518_v7, %v517_v6  ;;  %v650_v11 = vmul.f32 %v517_v6, %v517_v6  ;;  %v651_v12 = vmul.f32 %v518_v7, %v518_v7  ;;  %v520_v13 = vld [vmem:[%s16081_s15 + $0x18] sm:$0xff] }
  0x62   : > { %516 = vst [vmem:[#allocation4 + $0x94] sm:$0xf] %v15874_v1  ;;  %13828 = vmatprep.subr.mxu1 %v19575_v0  ;;  %v652_v14 = vmul.f32 %v519_v9, %v519_v9  ;;  %v521_v17 = vld [vmem:[%s16081_s15 + $0x20] sm:$0xff]  ;;  %v653_v18 = vmul.f32 %v520_v13, %v520_v13  ;;  %v522_v22 = vld [vmem:[%s16081_s15 + $0x28] sm:$0xff]  ;;  %v523_v27 = vld [vmem:[%s16081_s15 + $0x30] sm:$0xff]  ;;  %s490_s17 = sand.u32 1, %s15854_s26  }
  0x63   : > { %13829 = vmatpush3.msra.mxu1 %v16085_v5  ;;  %v614_v16 = vadd.f32 %v613_v10, %v519_v9  ;;  %v682_v19 = vadd.f32 %v651_v12, %v650_v11  ;;  %v654_v23 = vmul.f32 %v521_v17, %v521_v17  ;;  %v655_v28 = vmul.f32 %v522_v22, %v522_v22  ;;  %v524_v32 = vld [vmem:[%s16081_s15 + $0x38] sm:$0xff]  ;;  %v551_v37 = vld [vmem:[%s19552_s1 + $0x10] sm:$0xff]  ;;  %v549_v38 = vld [vmem:[%s19552_s1] sm:$0xff]  ;;  %s11942_s20 = sshll.u32 %s490_s17, 8  ;;  %s12781_s16 = sshll.u32 %s15969_s29, 12 }
  0x64   : > { %13830 = vmatprep.subr.mxu1 %v19575_v0  ;;  %v656_v33 = vmul.f32 %v523_v27, %v523_v27  ;;  %v525_v39 = vld [vmem:[%s16081_s15 + $0x40] sm:$0xff]  ;;  %v657_v40 = vmul.f32 %v524_v32, %v524_v32  ;;  %1324 = vperm.xlu1 %14916, %v551_v37   ;;  %v16128_v42 = vld [vmem:[#allocation5 + $0x28] sm:$0xff]  ;;  %v526_v45 = vld [vmem:[%s16081_s15 + $0x48] sm:$0xff]  ;;  %vm2502_vm1 = vsmask.f32 4352  ;;  %s19294_s23 = scalar_lea.vmem [#allocation13], %s11942_s20  ;;  %s19502_s19 = scalar_lea.hbm %s19564_s13, %s12781_s16 }
  0x65   : > { %13831 = vmatpush3.msra.mxu1 %v16091_v8  ;;  %v615_v21 = vadd.f32 %v614_v16, %v520_v13  ;;  %v683_v24 = vadd.f32 %v682_v19, %v652_v14  ;;  %1314 = vperm.xlu0 %14915, %v549_v38   ;;  %v581_v44 = vld [vmem:[%s19553_s2] sm:$0xff]  ;;  %v658_v46 = vmul.f32 %v525_v39, %v525_v39  ;;  %v550_v48 = vld [vmem:[%s19552_s1 + $0x8] sm:$0xff]  ;;  %v527_v51 = vld [vmem:[%s16081_s15 + $0x50] sm:$0xff]  ;;  %vm3013_vm2 = vsmask.f32 7424  ;;  %s11827_s22 = sshll.u32 %s19294_s23, 4  ;;  %s19504_s22 = int_to_ptr.vmem [resolvable:$true] %s11827_s22 }
  0x66   : > { %13832 = vmatprep.subr.mxu1 %v19575_v0  ;;  %v16139_v49 = vld [vmem:[#allocation5 + $0x20] sm:$0xff]  ;;  %v659_v52 = vmul.f32 %v526_v45, %v526_v45  ;;  %v16144_v54 = vld [vmem:[#allocation5 + $0x18] sm:$0xff]  ;;  %v583_v56 = vld [vmem:[%s19553_s2 + $0x10] sm:$0xff]  ;;  %v660_v58 = vmul.f32 %v527_v51, %v527_v51  ;;  %s19511_s29 = scalar_lea.sflag [#allocation7], %s490_s17  ;;  %s15790_s30 = scalar_lea.vmem %s19504_s22, 4096 }
  0x67   : > { %13833 = vmatpush3.msra.mxu1 %v16097_v15  ;;  %v616_v26 = vadd.f32 %v615_v21, %v521_v17  ;;  %v684_v29 = vadd.f32 %v683_v24, %v653_v18  ;;  %v528_v57 = vld [vmem:[%s16081_s15 + $0x58] sm:$0xff]  ;;  %v582_v60 = vld [vmem:[%s19553_s2 + $0x8] sm:$0xff]  ;;  %v529_v63 = vld [vmem:[%s16081_s15 + $0x60] sm:$0xff]  ;;  %p15791_p2 = scmp.ne.s32.totalorder %s19504_s22, %s15790_s30  ;;  %p20147_p3 = scmp.ne.s32.totalorder %s19690_s18, 0 }
  0x68   : > { %13834 = vmatprep.subr.mxu1 %v19575_v0  ;;  %1666 = vperm.xlu1 %14916, %v581_v44   ;;  %v16155_v61 = vld [vmem:[#allocation5 + $0x10] sm:$0xff]  ;;  %v661_v1 = vmul.f32 %v528_v57, %v528_v57  ;;  %v16160_v7 = vld [vmem:[#allocation5 + $0x8] sm:$0xff]  ;;  %v585_v10 = vld [vmem:[%s19553_s2 + $0x20] sm:$0xff]  ;;  %v662_v12 = vmul.f32 %v529_v63, %v529_v63  ;;  %s15875_s21 = smov [#allocation13]  }
  0x69   : > { %13835 = vmatpush3.msra.mxu1 %v16102_v20  ;;  %v617_v31 = vadd.f32 %v616_v26, %v522_v22  ;;  %v685_v34 = vadd.f32 %v684_v29, %v654_v23  ;;  %1319 = vperm.xlu0 %14915, %v550_v48   ;;  %v530_v11 = vld [vmem:[%s16081_s15 + $0x68] sm:$0xff]  ;;  %v584_v14 = vld [vmem:[%s19553_s2 + $0x18] sm:$0xff]  ;;  %v531_v18 = vld [vmem:[%s16081_s15 + $0x70] sm:$0xff]  ;;  %p15792_p4 = pnand %p15791_p2, %p20147_p3  ;;  %s15794_s24 = sshll.u32 %s15875_s21, 4  ;;  %s15795_s24 = int_to_ptr.vmem [resolvable:$false] %s15794_s24 }
  0x6a   : > { %13836 = vmatprep.subr.mxu1 %v19575_v0  ;;  %v16171_v16 = vld [vmem:[#allocation5] sm:$0xff]  ;;  %v663_v19 = vmul.f32 %v530_v11, %v530_v11  ;;  %v553_v23 = vld [vmem:[%s19552_s1 + $0x20] sm:$0xff]  ;;  %v532_v24 = vld [vmem:[%s16081_s15 + $0x78] sm:$0xff]  ;;  %v664_v26 = vmul.f32 %v531_v18, %v531_v18  ;;  %s15796_s14 = scalar_lea.vmem %s15795_s24, 8192  ;;  %p15797_p8 = scmp.lt.s32.totalorder %s19504_s22, %s15795_s24 }
  0x6b   : > { %13837 = vmatpush3.msra.mxu1 %v16107_v25  ;;  %v618_v36 = vadd.f32 %v617_v31, %v523_v27  ;;  %v686_v41 = vadd.f32 %v685_v34, %v655_v28  ;;  %v552_v28 = vld [vmem:[%s19552_s1 + $0x18] sm:$0xff]  ;;  %v533_v31 = vld [vmem:[%s16081_s15 + $0x80] sm:$0xff]  ;;  %v534_v37 = vld [vmem:[%s16081_s15 + $0x88] sm:$0xff]  ;;  %p15793_p7 = pneg %p15792_p4  ;;  %p15798_p11 = scmp.lt.s32.totalorder %s15796_s14, %s15790_s30 }
  0x6c   : > { %13838 = vmatprep.subr.mxu1 %v19575_v0  ;;  %1676 = vperm.xlu1 %14916, %v583_v56   ;;  %v666_v38 = vmul.f32 %v533_v31, %v533_v31  ;;  %v587_v44 = vld [vmem:[%s19553_s2 + $0x30] sm:$0xff]  ;;  %v586_v48 = vld [vmem:[%s19553_s2 + $0x28] sm:$0xff]  ;;  %v589_v56 = vld [vmem:[%s19553_s2 + $0x40] sm:$0xff] }
  0x6d   : > { %13839 = vmatpush3.msra.mxu1 %v16112_v30  ;;  %v619_v43 = vadd.f32 %v618_v36, %v524_v32  ;;  %v687_v47 = vadd.f32 %v686_v41, %v656_v33  ;;  %1671 = vperm.xlu0 %14915, %v582_v60   ;;  %v665_v32 = vmul.f32 %v532_v24, %v532_v24  ;;  %v555_v36 = vld [vmem:[%s19552_s1 + $0x30] sm:$0xff]  ;;  %v588_v60 = vld [vmem:[%s19553_s2 + $0x38] sm:$0xff]  ;;  %p15799_p0 = por %p15798_p11, %p15797_p8 }
  0x6e   : > { %13840 = vmatprep.subr.mxu1 %v19575_v0  ;;  %v535_v41 = vld [vmem:[%s16081_s15 + $0x90] sm:$0xff] }
  0x6f   : > { %13841 = vmatpush3.msra.mxu1 %v16117_v35  ;;  %v620_v50 = vadd.f32 %v619_v43, %v525_v39  ;;  %v688_v53 = vadd.f32 %v687_v47, %v657_v40  ;;  %v554_v40 = vld [vmem:[%s19552_s1 + $0x28] sm:$0xff]  ;;  %p15800_p13 = pnand %p15799_p0, %p15793_p7 }
  0x70   : > { %13842 = vmatprep.subr.mxu1 %v19575_v0  ;;  %1686 = vperm.xlu1 %14916, %v585_v10   ;;  %v557_v10 = vld [vmem:[%s19552_s1 + $0x40] sm:$0xff] }
  0x71   : > { %13843 = vmatpush3.msra.mxu1 %v16128_v42  ;;  %v621_v55 = vadd.f32 %v620_v50, %v526_v45  ;;  %v689_v59 = vadd.f32 %v688_v53, %v658_v46  ;;  %1681 = vperm.xlu0 %14915, %v584_v14   ;;  %v536_v45 = vld [vmem:[%s16081_s15 + $0x98] sm:$0xff]  ;;  %v667_v46 = vmul.f32 %v534_v37, %v534_v37 }
  0x72   : > { %13844 = vmatprep.subr.mxu1 %v19575_v0  ;;  %v556_v14 = vld [vmem:[%s19552_s1 + $0x38] sm:$0xff] }
  0x73   : > { %13845 = vmatpush3.msra.mxu1 %v16139_v49  ;;  %v622_v62 = vadd.f32 %v621_v55, %v527_v51  ;;  %v690_v6 = vadd.f32 %v689_v59, %v659_v52  ;;  %v537_v51 = vld [vmem:[%s16081_s15 + $0xa0] sm:$0xff]  ;;  %v668_v52 = vmul.f32 %v535_v41, %v535_v41 }
  0x74   : > { %13846 = vmatprep.subr.mxu1 %v19575_v0  ;;  %1334 = vperm.xlu1 %14916, %v553_v23   ;;  %v559_v23 = vld [vmem:[%s19552_s1 + $0x50] sm:$0xff] }
  0x75   : > { %13847 = vmatpush3.msra.mxu1 %v16144_v54  ;;  %v623_v9 = vadd.f32 %v622_v62, %v528_v57  ;;  %v691_v13 = vadd.f32 %v690_v6, %v660_v58  ;;  %1329 = vperm.xlu0 %14915, %v552_v28   ;;  %v538_v57 = vld [vmem:[%s16081_s15 + $0xa8] sm:$0xff]  ;;  %v669_v58 = vmul.f32 %v536_v45, %v536_v45 }
  0x76   : > { %13848 = vmatprep.subr.mxu1 %v19575_v0  ;;  %v558_v28 = vld [vmem:[%s19552_s1 + $0x48] sm:$0xff] }
  0x77   : > { %13849 = vmatpush3.msra.mxu1 %v16155_v61  ;;  %v624_v17 = vadd.f32 %v623_v9, %v529_v63  ;;  %v692_v21 = vadd.f32 %v691_v13, %v661_v1  ;;  %v539_v63 = vld [vmem:[%s16081_s15 + $0xb0] sm:$0xff]  ;;  %v670_v1 = vmul.f32 %v537_v51, %v537_v51 }
  0x78   : > { %13850 = vmatprep.subr.mxu1 %v19575_v0  ;;  %1344 = vperm.xlu1 %14916, %v555_v36   ;;  %v591_v36 = vld [vmem:[%s19553_s2 + $0x50] sm:$0xff] }
  0x79   : > { %13851 = vmatpush3.msra.mxu1 %v16160_v7  ;;  %v625_v22 = vadd.f32 %v624_v17, %v530_v11  ;;  %v693_v27 = vadd.f32 %v692_v21, %v662_v12  ;;  %1339 = vperm.xlu0 %14915, %v554_v40   ;;  %v540_v11 = vld [vmem:[%s16081_s15 + $0xb8] sm:$0xff]  ;;  %v671_v12 = vmul.f32 %v538_v57, %v538_v57  ;;  %v590_v40 = vld [vmem:[%s19553_s2 + $0x48] sm:$0xff] }
  0x7a   : > { %13852 = vmatprep.subr.mxu1 %v19575_v0 }
  0x7b   : > { %13853 = vmatpush3.msra.mxu1 %v16171_v16  ;;  %v626_v29 = vadd.f32 %v625_v22, %v531_v18  ;;  %v694_v33 = vadd.f32 %v693_v27, %v663_v19  ;;  %v541_v18 = vld [vmem:[%s16081_s15 + $0xc0] sm:$0xff]  ;;  %v672_v19 = vmul.f32 %v539_v63, %v539_v63 }
  0x7c   : > { %13857 = vmatprep.subr.mxu1 %v19575_v0  ;;  %1696 = vperm.xlu1 %14916, %v587_v44  }
  0x7d   : > { %v627_v34 = vadd.f32 %v626_v29, %v532_v24  ;;  %v695_v39 = vadd.f32 %v694_v33, %v664_v26  ;;  %1691 = vperm.xlu0 %14915, %v586_v48   ;;  %v542_v24 = vld [vmem:[%s16081_s15 + $0xc8] sm:$0xff]  ;;  %v673_v26 = vmul.f32 %v540_v11, %v540_v11 }
  0x7e   : > { %v546_v48 = vld [vmem:[%s16081_s15 + $0xe8] sm:$0xff] }
  0x7f   : > { %v628_v43 = vadd.f32 %v627_v34, %v533_v31  ;;  %v696_v47 = vadd.f32 %v695_v39, %v665_v32  ;;  %v543_v31 = vld [vmem:[%s16081_s15 + $0xd0] sm:$0xff]  ;;  %v674_v32 = vmul.f32 %v541_v18, %v541_v18 }
  0x80   : > { %1706 = vperm.xlu1 %14916, %v589_v56   ;;  %v676_v44 = vmul.f32 %v543_v31, %v543_v31 }
  0x81   : > { %v629_v50 = vadd.f32 %v628_v43, %v534_v37  ;;  %v697_v53 = vadd.f32 %v696_v47, %v666_v38  ;;  %1701 = vperm.xlu0 %14915, %v588_v60   ;;  %v544_v37 = vld [vmem:[%s16081_s15 + $0xd8] sm:$0xff]  ;;  %v675_v38 = vmul.f32 %v542_v24, %v542_v24  ;;  %v545_v43 = vld [vmem:[%s16081_s15 + $0xe0] sm:$0xff] }
  0x82   : > { %v593_v47 = vld [vmem:[%s19553_s2 + $0x60] sm:$0xff]  ;;  %v678_v56 = vmul.f32 %v545_v43, %v545_v43  ;;  %v548_v60 = vld [vmem:[%s16081_s15 + $0xf8] sm:$0xff] }
  0x83   : > { %v630_v55 = vadd.f32 %v629_v50, %v535_v41  ;;  %v698_v59 = vadd.f32 %v697_v53, %v667_v46  ;;  %v677_v50 = vmul.f32 %v544_v37, %v544_v37 }
  0x84   : > { %1354 = vperm.xlu1 %14916, %v557_v10  }
  0x85   : > { %v631_v62 = vadd.f32 %v630_v55, %v536_v45  ;;  %v699_v6 = vadd.f32 %v698_v59, %v668_v52  ;;  %1349 = vperm.xlu0 %14915, %v556_v14   ;;  %v592_v52 = vld [vmem:[%s19553_s2 + $0x58] sm:$0xff]  ;;  %v547_v55 = vld [vmem:[%s16081_s15 + $0xf0] sm:$0xff]  ;;  %v561_v59 = vld [vmem:[%s19552_s1 + $0x60] sm:$0xff] }
  0x87   : > { %v632_v9 = vadd.f32 %v631_v62, %v537_v51  ;;  %v700_v13 = vadd.f32 %v699_v6, %v669_v58  ;;  %v679_v62 = vmul.f32 %v546_v48, %v546_v48 }
  0x88   : > { %1364 = vperm.xlu1 %14916, %v559_v23  }
  0x89   : > { %v633_v17 = vadd.f32 %v632_v9, %v538_v57  ;;  %v701_v21 = vadd.f32 %v700_v13, %v670_v1  ;;  %1359 = vperm.xlu0 %14915, %v558_v28   ;;  %v560_v1 = vld [vmem:[%s19552_s1 + $0x58] sm:$0xff]  ;;  %v680_v9 = vmul.f32 %v547_v55, %v547_v55  ;;  %v681_v13 = vmul.f32 %v548_v60, %v548_v60 }
  0x8b   : > { %v634_v22 = vadd.f32 %v633_v17, %v539_v63  ;;  %v702_v27 = vadd.f32 %v701_v21, %v671_v12  ;;  %v563_v12 = vld [vmem:[%s19552_s1 + $0x70] sm:$0xff]  ;;  %v562_v17 = vld [vmem:[%s19552_s1 + $0x68] sm:$0xff] }
  0x8c   : > { %1716 = vperm.xlu1 %14916, %v591_v36  }
  0x8d   : > { %v635_v29 = vadd.f32 %v634_v22, %v540_v11  ;;  %v703_v33 = vadd.f32 %v702_v27, %v672_v19  ;;  %1711 = vperm.xlu0 %14915, %v590_v40   ;;  %v595_v22 = vld [vmem:[%s19553_s2 + $0x70] sm:$0xff]  ;;  %v594_v27 = vld [vmem:[%s19553_s2 + $0x68] sm:$0xff] }
  0x8f   : > { %v636_v34 = vadd.f32 %v635_v29, %v541_v18  ;;  %v704_v39 = vadd.f32 %v703_v33, %v673_v26  ;;  %v597_v29 = vld [vmem:[%s19553_s2 + $0x80] sm:$0xff] }
  0x90   : > { %1726 = vperm.xlu1 %14916, %v593_v47   ;;  %v607_v47 = vld [vmem:[%s19553_s2 + $0xd0] sm:$0xff] }
  0x91   : > { %v637_v41 = vadd.f32 %v636_v34, %v542_v24  ;;  %v705_v45 = vadd.f32 %v704_v39, %v674_v32  ;;  %1721 = vperm.xlu0 %14915, %v592_v52   ;;  %v596_v34 = vld [vmem:[%s19553_s2 + $0x78] sm:$0xff] }
  0x92   : > { %v576_v52 = vld [vmem:[%s19552_s1 + $0xd8] sm:$0xff] }
  0x93   : > { %v638_v46 = vadd.f32 %v637_v41, %v543_v31  ;;  %v706_v51 = vadd.f32 %v705_v45, %v675_v38  ;;  %v565_v38 = vld [vmem:[%s19552_s1 + $0x80] sm:$0xff]  ;;  %v564_v41 = vld [vmem:[%s19552_s1 + $0x78] sm:$0xff]  ;;  %v598_v45 = vld [vmem:[%s19553_s2 + $0x88] sm:$0xff] }
  0x94   : > { %1374 = vperm.xlu1 %14916, %v561_v59   ;;  %v580_v59 = vld [vmem:[%s19552_s1 + $0xf8] sm:$0xff] }
  0x95   : > { %v639_v53 = vadd.f32 %v638_v46, %v544_v37  ;;  %v707_v57 = vadd.f32 %v706_v51, %v676_v44  ;;  %1369 = vperm.xlu0 %14915, %v560_v1   ;;  %v566_v44 = vld [vmem:[%s19552_s1 + $0x88] sm:$0xff]  ;;  %v572_v46 = vld [vmem:[%s19552_s1 + $0xb8] sm:$0xff]  ;;  %v577_v51 = vld [vmem:[%s19552_s1 + $0xe0] sm:$0xff] }
  0x97   : > { %v640_v58 = vadd.f32 %v639_v53, %v545_v43  ;;  %v708_v63 = vadd.f32 %v707_v57, %v677_v50  ;;  %v567_v43 = vld [vmem:[%s19552_s1 + $0x90] sm:$0xff]  ;;  %v608_v50 = vld [vmem:[%s19553_s2 + $0xd8] sm:$0xff]  ;;  %v610_v57 = vld [vmem:[%s19553_s2 + $0xe8] sm:$0xff] }
  0x98   : > { %1384 = vperm.xlu1 %14916, %v563_v12   ;;  %v579_v53 = vld [vmem:[%s19552_s1 + $0xf0] sm:$0xff] }
  0x99   : > { %v641_v6 = vadd.f32 %v640_v58, %v546_v48  ;;  %v709_v10 = vadd.f32 %v708_v63, %v678_v56  ;;  %1379 = vperm.xlu0 %14915, %v562_v17   ;;  %v609_v48 = vld [vmem:[%s19553_s2 + $0xe0] sm:$0xff]  ;;  %v611_v56 = vld [vmem:[%s19553_s2 + $0xf0] sm:$0xff]  ;;  %v612_v58 = vld [vmem:[%s19553_s2 + $0xf8] sm:$0xff] }
  0x9b   : > { %v642_v11 = vadd.f32 %v641_v6, %v547_v55  ;;  %v710_v14 = vadd.f32 %v709_v10, %v679_v62  ;;  %v578_v55 = vld [vmem:[%s19552_s1 + $0xe8] sm:$0xff] }
  0x9c   : > { %1736 = vperm.xlu1 %14916, %v595_v22  }
  0x9d   : > { %v643_v18 = vadd.f32 %v642_v11, %v548_v60  ;;  %v711_v19 = vadd.f32 %v710_v14, %v680_v9  ;;  %1731 = vperm.xlu0 %14915, %v594_v27  }
  0x9f   : > { %v644_v21 = vrot.slane %v643_v18, 4  ;;  %v712_v23 = vadd.f32 %v711_v19, %v681_v13 }
  0xa0   : > { %1746 = vperm.xlu1 %14916, %v597_v29  }
  0xa1   : > { %v645_v24 = vadd.f32 %v644_v21, %v643_v18  ;;  %v713_v26 = vrot.slane %v712_v23, 4  ;;  %1741 = vperm.xlu0 %14915, %v596_v34   ;;  %v14917_v21 = vld [vmem:[#allocation8 + $0x78] sm:$0xff]  }
  0xa2   : > { %13892 = vmatprep.subr.bf16.mxu0 %v14917_v21 }
  0xa3   : > { %v646_v28 = vrot.slane %v645_v24, 2  ;;  %v714_v31 = vadd.f32 %v713_v26, %v712_v23  ;;  %13893 = vmatpush3.bf16.msra.mxu0 %v14917_v21  ;;  %v15621_v21 = vld [vmem:[%s16081_s15] sm:$0xff] }
  0xa4   : > { %1394 = vperm.xlu1 %14916, %v565_v38  }
  0xa5   : > { %v647_v32 = vadd.f32 %v646_v28, %v645_v24  ;;  %v715_v33 = vrot.slane %v714_v31, 2  ;;  %1389 = vperm.xlu0 %14915, %v564_v41   ;;  %v14918_v24 = vld [vmem:[#allocation8 + $0x70] sm:$0xff]   ;;  %v14921_v41 = vld [vmem:[#allocation8 + $0x60] sm:$0xff]  }
  0xa6   : > { %13894 = vmatprep.subr.bf16.mxu0 %v14918_v24 }
  0xa7   : > { %v648_v36 = vrot.slane %v647_v32, 1  ;;  %v16267_v37 = vadd.f32 %v715_v33, %v714_v31  ;;  %13895 = vmatpush3.bf16.msra.mxu0 %v14918_v24  ;;  %v14919_v31 = vld [vmem:[#allocation8 + $0x68] sm:$0xff]  }
  0xa8   : > { %1404 = vperm.xlu1 %14916, %v567_v43   ;;  %13896 = vmatprep.subr.bf16.mxu0 %v14919_v31  ;;  %v14922_v43 = vld [vmem:[#allocation8 + $0x30] sm:$0xff]  }
  0xa9   : > { %v649_v39 = vadd.f32 %v648_v36, %v647_v32  ;;  %v717_v40 = vrot.slane %v16267_v37, 1  ;;  %1399 = vperm.xlu0 %14915, %v566_v44   ;;  %v14923_v44 = vld [vmem:[#allocation8 + $0x58] sm:$0xff]  }
  0xab   : > { %13855 = vmatmul.mubr.f32.vlgmr.msra.gmra.mxu1 %v649_v39  ;;  %13897 = vmatpush3.bf16.msra.mxu0 %v14919_v31 }
  0xac   : > { %13858 = vmatpush3.msra.mxu1 %v16070_v2  ;;  %13889 = vmatprep.mubr.msk.f32.mxu1 %vm15873_vm0, %v19575_v0  ;;  %v599_v2 = vld [vmem:[%s19553_s2 + $0x90] sm:$0xff] }
  0xad   : > { %13859 = vmatprep.subr.mxu1 %v19575_v0  ;;  %1756 = vperm.xlu1 %14916, %v599_v2  }
  0xae   : > { %13860 = vmatpush3.msra.mxu1 %v16072_v3  ;;  %v601_v3 = vld [vmem:[%s19553_s2 + $0xa0] sm:$0xff]  ;;  %1751 = vperm.xlu0 %14915, %v598_v45  }
  0xaf   : > { %13861 = vmatprep.subr.mxu1 %v19575_v0  ;;  %13898 = vmatprep.subr.bf16.mxu0 %v14921_v41 }
  0xb0   : > { %13862 = vmatpush3.msra.mxu1 %v16076_v4  ;;  %v600_v4 = vld [vmem:[%s19553_s2 + $0x98] sm:$0xff]  ;;  %13899 = vmatpush3.bf16.msra.mxu0 %v14921_v41  ;;  %v15626_v41 = vld [vmem:[%s16081_s15 + $0x20] sm:$0xff] }
  0xb1   : > { %13863 = vmatprep.subr.mxu1 %v19575_v0  ;;  %1766 = vperm.xlu1 %14916, %v601_v3   ;;  %v14924_v3 = vld [vmem:[#allocation8 + $0x28] sm:$0xff]  }
  0xb2   : > { %13864 = vmatpush3.msra.mxu1 %v16085_v5  ;;  %v569_v5 = vld [vmem:[%s19552_s1 + $0xa0] sm:$0xff]  ;;  %1761 = vperm.xlu0 %14915, %v600_v4   ;;  %v886_v4 = vlaneseq }
  0xb3   : > { %13865 = vmatprep.subr.mxu1 %v19575_v0  ;;  %13900 = vmatprep.subr.bf16.mxu0 %v14923_v44 }
  0xb4   : > { %13866 = vmatpush3.msra.mxu1 %v16091_v8  ;;  %v568_v8 = vld [vmem:[%s19552_s1 + $0x98] sm:$0xff]  ;;  %13901 = vmatpush3.bf16.msra.mxu0 %v14923_v44  ;;  %v15627_v44 = vld [vmem:[%s16081_s15 + $0x28] sm:$0xff] }
  0xb5   : > { %13867 = vmatprep.subr.mxu1 %v19575_v0  ;;  %1414 = vperm.xlu1 %14916, %v569_v5   ;;  %v14925_v5 = vld [vmem:[#allocation8 + $0x50] sm:$0xff]  }
  0xb6   : > { %13868 = vmatpush3.msra.mxu1 %v16097_v15  ;;  %v571_v15 = vld [vmem:[%s19552_s1 + $0xb0] sm:$0xff]  ;;  %1409 = vperm.xlu0 %14915, %v568_v8   ;;  %v14926_v8 = vld [vmem:[#allocation8 + $0x20] sm:$0xff]  }
  0xb7   : > { %13869 = vmatprep.subr.mxu1 %v19575_v0  ;;  %13902 = vmatprep.subr.bf16.mxu0 %v14925_v5 }
  0xb8   : > { %13870 = vmatpush3.msra.mxu1 %v16102_v20  ;;  %v570_v20 = vld [vmem:[%s19552_s1 + $0xa8] sm:$0xff]  ;;  %13903 = vmatpush3.bf16.msra.mxu0 %v14925_v5 }
  0xb9   : > { %13871 = vmatprep.subr.mxu1 %v19575_v0  ;;  %1424 = vperm.xlu1 %14916, %v571_v15  }
  0xba   : > { %13872 = vmatpush3.msra.mxu1 %v16107_v25  ;;  %v603_v25 = vld [vmem:[%s19553_s2 + $0xb0] sm:$0xff]  ;;  %1419 = vperm.xlu0 %14915, %v570_v20  }
  0xbb   : > { %13873 = vmatprep.subr.mxu1 %v19575_v0 }
  0xbc   : > { %13874 = vmatpush3.msra.mxu1 %v16112_v30  ;;  %v602_v30 = vld [vmem:[%s19553_s2 + $0xa8] sm:$0xff] }
  0xbd   : > { %13875 = vmatprep.subr.mxu1 %v19575_v0  ;;  %1776 = vperm.xlu1 %14916, %v603_v25   ;;  %v887_v25 = vshrl.u32 %v886_v4, 7  ;;  %v15628_v4 = vld [vmem:[%s16081_s15 + $0x30] sm:$0xff] }
  0xbe   : > { %13876 = vmatpush3.msra.mxu1 %v16117_v35  ;;  %v605_v35 = vld [vmem:[%s19553_s2 + $0xc0] sm:$0xff]  ;;  %1771 = vperm.xlu0 %14915, %v602_v30   ;;  %v14927_v30 = vld [vmem:[#allocation8 + $0x48] sm:$0xff]  }
  0xbf   : > { %13877 = vmatprep.subr.mxu1 %v19575_v0  ;;  %13904 = vmatprep.subr.bf16.mxu0 %v14927_v30 }
  0xc0   : > { %13878 = vmatpush3.msra.mxu1 %v16128_v42  ;;  %v604_v42 = vld [vmem:[%s19553_s2 + $0xb8] sm:$0xff]  ;;  %13905 = vmatpush3.bf16.msra.mxu0 %v14927_v30 }
  0xc1   : > { %13879 = vmatprep.subr.mxu1 %v19575_v0  ;;  %1786 = vperm.xlu1 %14916, %v605_v35   ;;  %v881_v35 = vld [vmem:[%s19554_s3] sm:$0x1] }
  0xc2   : > { %13880 = vmatpush3.msra.mxu1 %v16139_v49  ;;  %v718_v49 = vadd.f32 %v717_v40, %v16267_v37  ;;  %1781 = vperm.xlu0 %14915, %v604_v42   ;;  %v14920_v37 = vld [vmem:[#allocation8 + $0x38] sm:$0xff]  }
  0xc3   : > { %13881 = vmatprep.subr.mxu1 %v19575_v0  ;;  %v14928_v42 = vld [vmem:[#allocation8 + $0x18] sm:$0xff]  }
  0xc4   : > { %13882 = vmatpush3.msra.mxu1 %v16144_v54  ;;  %v573_v54 = vld [vmem:[%s19552_s1 + $0xc0] sm:$0xff] }
  0xc5   : > { %13883 = vmatprep.subr.mxu1 %v19575_v0  ;;  %1434 = vperm.xlu1 %14916, %v573_v54   ;;  %v14929_v54 = vld [vmem:[#allocation8 + $0x40] sm:$0xff]  }
  0xc6   : > { %13884 = vmatpush3.msra.mxu1 %v16155_v61  ;;  %v575_v61 = vld [vmem:[%s19552_s1 + $0xd0] sm:$0xff]  ;;  %1429 = vperm.xlu0 %14915, %v572_v46   ;;  %v14930_v46 = vld [vmem:[#allocation8 + $0x10] sm:$0xff]  }
  0xc7   : > { %13885 = vmatprep.subr.mxu1 %v19575_v0  ;;  %13906 = vmatprep.subr.bf16.mxu0 %v14929_v54 }
  0xc8   : > { %13886 = vmatpush3.msra.mxu1 %v16160_v7  ;;  %v574_v7 = vld [vmem:[%s19552_s1 + $0xc8] sm:$0xff]  ;;  %13907 = vmatpush3.bf16.msra.mxu0 %v14929_v54 }
  0xc9   : > { %13887 = vmatprep.subr.mxu1 %v19575_v0  ;;  %1444 = vperm.xlu1 %14916, %v575_v61   ;;  %v14931_v61 = vld [vmem:[#allocation3 + $0x4] sm:$0xff]   ;;  %v15631_v54 = vld [vmem:[%s16081_s15 + $0x48] sm:$0xff] }
  0xca   : > { %13888 = vmatpush3.msra.mxu1 %v16171_v16  ;;  %v606_v16 = vld [vmem:[%s19553_s2 + $0xc8] sm:$0xff]  ;;  %1439 = vperm.xlu0 %14915, %v574_v7  }
  0xcb   : > { %13890 = vmatmul.mubr.f32.vlgmr.msra.gmra.mxu1 %v718_v49  ;;  %13940 = vmatprep.subr.bf16.mxu1 %v14920_v37 }
  0xcc   : > { %13941 = vmatpush3.bf16.msra.mxu1 %v14920_v37  ;;  %13908 = vmatprep.mubr.bf16.mxu0 %v14931_v61  ;;  %v15625_v37 = vld [vmem:[%s16081_s15 + $0x18] sm:$0xff]  ;;  %v15632_v61 = vld [vmem:[%s16081_s15 + $0x50] sm:$0xff] }
  0xcd   : > { %1796 = vperm.xlu1 %14916, %v607_v47   ;;  %13942 = vmatprep.subr.bf16.mxu1 %v14922_v43  ;;  %v16447_v47 = vsub.s32 0, %v887_v25 }
  0xce   : > { %1791 = vperm.xlu0 %14915, %v606_v16   ;;  %v16449_v16 = vld [vmem:[#allocation8 + $0xb8] sm:$0xff]  }
  0xcf   : > { %19726 = vst [vmem:[#allocation45_spill] sm:$0xff] %v16447_v47  ;;  %19727 = vst [vmem:[#allocation46_spill] sm:$0xff] %v16449_v16  ;;  %13988 = vmatprep.subr.bf16.mxu0 %v16449_v16 }
  0xd0   : > { %13943 = vmatpush3.bf16.msra.mxu1 %v14922_v43 }
  0xd1   : > { %1806 = vperm.xlu1 %14916, %v609_v48   ;;  %13944 = vmatprep.subr.bf16.mxu1 %v14924_v3  ;;  %v883_v48 = vld [vmem:[%s19555_s4] sm:$0x1] }
  0xd2   : > { %1801 = vperm.xlu0 %14915, %v608_v50  }
  0xd4   : > { %13945 = vmatpush3.bf16.msra.mxu1 %v14924_v3 }
  0xd5   : > { %1454 = vperm.xlu1 %14916, %v577_v51   ;;  %13946 = vmatprep.subr.bf16.mxu1 %v14926_v8 }
  0xd6   : > { %1449 = vperm.xlu0 %14915, %v576_v52  }
  0xd8   : > { %13947 = vmatpush3.bf16.msra.mxu1 %v14926_v8  ;;  %v15629_v8 = vld [vmem:[%s16081_s15 + $0x38] sm:$0xff] }
  0xd9   : > { %1464 = vperm.xlu1 %14916, %v579_v53   ;;  %13948 = vmatprep.subr.bf16.mxu1 %v14928_v42  ;;  %v14935_v53 = vld [vmem:[#allocation8 + $0x8] sm:$0xff]  }
  0xda   : > { %1459 = vperm.xlu0 %14915, %v578_v55  }
  0xdc   : > { %13949 = vmatpush3.bf16.msra.mxu1 %v14928_v42  ;;  %v15630_v42 = vld [vmem:[%s16081_s15 + $0x40] sm:$0xff] }
  0xdd   : > { %1816 = vperm.xlu1 %14916, %v611_v56   ;;  %13950 = vmatprep.subr.bf16.mxu1 %v14930_v46 }
  0xde   : > { %1811 = vperm.xlu0 %14915, %v610_v57   ;;  %v16462_v57 = vld [vmem:[#allocation2] sm:$0xf8]  }
  0xdf   : > { %v16400_v60 = vpop.permute.xlu1 %1324 }
  0xe0   : > { %19704 = vst [vmem:[#allocation23_spill] sm:$0xff] %v16400_v60  ;;  %v16402_v62 = vpop.permute.xlu0 %1314  ;;  %13951 = vmatpush3.bf16.msra.mxu1 %v14930_v46 }
  0xe1   : > { %1821 = vperm.xlu1 %14916, %v612_v58   ;;  %19705 = vst [vmem:[#allocation24_spill] sm:$0xff] %v16402_v62  ;;  %13952 = vmatprep.subr.bf16.mxu1 %v14935_v53 }
  0xe2   : > { %1469 = vperm.xlu0 %14915, %v580_v59   ;;  %v14936_v59 = vld [vmem:[#allocation8] sm:$0xff]  }
  0xe3   : > { %v16404_v63 = vpop.permute.xlu1 %1666 }
  0xe4   : > { %19706 = vst [vmem:[#allocation25_spill] sm:$0xff] %v16404_v63  ;;  %v16406_v1 = vpop.permute.xlu0 %1319  ;;  %13953 = vmatpush3.bf16.msra.mxu1 %v14935_v53 }
  0xe5   : > { %19707 = vst [vmem:[#allocation26_spill] sm:$0xff] %v16406_v1  ;;  %13954 = vmatprep.subr.bf16.mxu1 %v14936_v59 }
  0xe7   : > { %v16408_v9 = vpop.permute.xlu1 %1676 }
  0xe8   : > { %19708 = vst [vmem:[#allocation27_spill] sm:$0xff] %v16408_v9  ;;  %v16410_v10 = vpop.permute.xlu0 %1671  ;;  %13955 = vmatpush3.bf16.msra.mxu1 %v14936_v59 }
  0xe9   : > { %19709 = vst [vmem:[#allocation28_spill] sm:$0xff] %v16410_v10 }
  0xeb   : > { %v16412_v12 = vpop.permute.xlu1 %1686 }
  0xec   : > { %19710 = vst [vmem:[#allocation29_spill] sm:$0xff] %v16412_v12  ;;  %v16414_v13 = vpop.permute.xlu0 %1681 }
  0xed   : > { %19711 = vst [vmem:[#allocation30_spill] sm:$0xff] %v16414_v13 }
  0xef   : > { %v16416_v14 = vpop.permute.xlu1 %1334 }
  0xf0   : > { %19712 = vst [vmem:[#allocation31_spill] sm:$0xff] %v16416_v14  ;;  %v16418_v17 = vpop.permute.xlu0 %1329 }
  0xf1   : > { %19713 = vst [vmem:[#allocation32_spill] sm:$0xff] %v16418_v17 }
  0xf3   : > { %v16420_v18 = vpop.permute.xlu1 %1344 }
  0xf4   : > { %19714 = vst [vmem:[#allocation33_spill] sm:$0xff] %v16420_v18  ;;  %v16422_v19 = vpop.permute.xlu0 %1339 }
  0xf5   : > { %19715 = vst [vmem:[#allocation34_spill] sm:$0xff] %v16422_v19 }
  0xf7   : > { %v16424_v22 = vpop.permute.xlu1 %1696 }
  0xf8   : > { %19716 = vst [vmem:[#allocation35_spill] sm:$0xff] %v16424_v22  ;;  %v16426_v23 = vpop.permute.xlu0 %1691 }
  0xf9   : > { %19717 = vst [vmem:[#allocation36_spill] sm:$0xff] %v16426_v23 }
  0xfb   : > { %v16428_v27 = vpop.permute.xlu1 %1706 }
  0xfc   : > { %19718 = vst [vmem:[#allocation37_spill] sm:$0xff] %v16428_v27  ;;  %v16430_v28 = vpop.permute.xlu0 %1701 }
  0xfd   : > { %19719 = vst [vmem:[#allocation38_spill] sm:$0xff] %v16430_v28 }
  0xff   : > { %v16432_v38 = vpop.permute.xlu1 %1354 }
 0x100   : > { %19720 = vst [vmem:[#allocation39_spill] sm:$0xff] %v16432_v38  ;;  %v16434_v39 = vpop.permute.xlu0 %1349 }
 0x101   : > { %19721 = vst [vmem:[#allocation40_spill] sm:$0xff] %v16434_v39 }
 0x103   : > { %v16436_v2 = vpop.permute.xlu1 %1364 }
 0x104   : > { %19722 = vst [vmem:[#allocation41_spill] sm:$0xff] %v16436_v2  ;;  %v16438_v45 = vpop.permute.xlu0 %1359 }
 0x105   : > { %19723 = vst [vmem:[#allocation42_spill] sm:$0xff] %v16438_v45 }
 0x107   : > { %v16440_v15 = vpop.permute.xlu1 %1716 }
 0x108   : > { %19724 = vst [vmem:[#allocation43_spill] sm:$0xff] %v16440_v15  ;;  %v16442_v20 = vpop.permute.xlu0 %1711 }
 0x109   : > { %19725 = vst [vmem:[#allocation44_spill] sm:$0xff] %v16442_v20 }
 0x10b   : > { %v16454_v50 = vpop.permute.xlu1 %1726 }
 0x10c   : > { %19728 = vst [vmem:[#allocation47_spill] sm:$0xff] %v16454_v50  ;;  %v16456_v51 = vpop.permute.xlu0 %1721 }
 0x10d   : > { %19729 = vst [vmem:[#allocation48_spill] sm:$0xff] %v16456_v51 }
 0x16b   : > { %v801_v6 = vpop.f32.mrf.mxu1 }
 0x16c   : > { %v805_v26 = vmul.f32 0.00390625, %v801_v6  ;;  %v16467_v6 = vpop.permute.xlu1 %1374 }
 0x16d   : > { %v13856_v11 = vpop.f32.mrf.mxu1  ;;  %19730 = vst [vmem:[#allocation49_spill] sm:$0xff] %v16467_v6  ;;  %v15640_v6 = vld [vmem:[%s16081_s15 + $0xa0] sm:$0xff] }
 0x16e   : > { %v877_v32 = vmul.f32 %v805_v26, %v805_v26  ;;  %v16469_v11 = vpop.permute.xlu0 %1369 }
 0x16f   : > { %19731 = vst [vmem:[#allocation50_spill] sm:$0xff] %v16469_v11 }
 0x18b   : > { %v872_v29 = vpop.f32.mrf.mxu1 }
 0x18c   : > { %v876_v33 = vmul.f32 0.00390625, %v872_v29 }
 0x18d   : > { %v13891_v34 = vpop.f32.mrf.mxu1 }
 0x18e   : > { %v878_v36 = vsub.f32 %v876_v33, %v877_v32  ;;  %v15623_v32 = vld [vmem:[%s16081_s15 + $0x8] sm:$0xff]  ;;  %v15624_v34 = vld [vmem:[%s16081_s15 + $0x10] sm:$0xff] }
 0x190   : > { %v879_v40 = vadd.f32 1e-05, %v878_v36 }
 0x192   : > { %15361 = vrsqrt.f32 %v879_v40 }
 0x19f   : > { %v15362_v49 = vpop.eup %15361 }
 0x1a0   : > { %v882_v7 = vmul.f32 %v15362_v49, %v881_v35  ;;  %v16493_v35 = vld [vmem:[#allocation8 + $0xf8] sm:$0xff]  }
 0x1a1   : > { %19732 = vst [vmem:[#allocation51_spill] sm:$0xff] %v16493_v35  ;;  %14036 = vmatprep.subr.bf16.mxu1 %v16493_v35 }
 0x1a2   : > { %v884_v52 = vmul.f32 %v882_v7, %v805_v26  ;;  %v16459_v56 = vrot.slane %v882_v7, %v16447_v47  ;;  %v15622_v26 = vld [vmem:[%s16081_s15 + $0x90] sm:$0xff] }
 0x1a4   : > { %v885_v55 = vsub.f32 %v883_v48, %v884_v52  ;;  %v890_v24 = vmul.f32 %v15621_v21, %v16459_v56  ;;  %v908_v29 = vmul.f32 %v15622_v26, %v16459_v56  ;;  %v891_v33 = vmul.f32 %v15623_v32, %v16459_v56  ;;  %v15633_v52 = vld [vmem:[%s16081_s15 + $0x58] sm:$0xff] }
 0x1a5   : > { %v892_v36 = vmul.f32 %v15624_v34, %v16459_v56  ;;  %v893_v40 = vmul.f32 %v15625_v37, %v16459_v56  ;;  %v894_v43 = vmul.f32 %v15626_v41, %v16459_v56  ;;  %v895_v3 = vmul.f32 %v15627_v44, %v16459_v56  ;;  %v15635_v34 = vld [vmem:[%s16081_s15 + $0x68] sm:$0xff] }
 0x1a6   : > { %v16465_v58 = vrot.slane %v885_v55, %v16447_v47  ;;  %v896_v5 = vmul.f32 %v15628_v4, %v16459_v56  ;;  %v897_v25 = vmul.f32 %v15629_v8, %v16459_v56  ;;  %v898_v49 = vmul.f32 %v15630_v42, %v16459_v56  ;;  %v15636_v41 = vld [vmem:[%s16081_s15 + $0x88] sm:$0xff]  ;;  %v16522_v4 = vpop.permute.xlu1 %1384  ;;  %v15638_v42 = vld [vmem:[%s16081_s15 + $0x78] sm:$0xff] }
 0x1a7   : > { %v899_v46 = vmul.f32 %v15631_v54, %v16459_v56  ;;  %v900_v7 = vmul.f32 %v15632_v61, %v16459_v56  ;;  %v901_v53 = vmul.f32 %v15633_v52, %v16459_v56  ;;  %v907_v44 = vmul.f32 %v15636_v41, %v16459_v56  ;;  %19733 = vst [vmem:[#allocation52_spill] sm:$0xff] %v16522_v4 }
 0x1a8   : > { %v16491_v30 = vadd.f32 %v16465_v58, %v908_v29  ;;  %v16502_v48 = vadd.f32 %v16465_v58, %v890_v24  ;;  %v16508_v21 = vadd.f32 %v16465_v58, %v891_v33  ;;  %v16511_v26 = vadd.f32 %v16465_v58, %v892_v36  ;;  %v15634_v29 = vld [vmem:[%s16081_s15 + $0x60] sm:$0xff]  ;;  %v16524_v33 = vpop.permute.xlu0 %1379  ;;  %v15637_v36 = vld [vmem:[%s16081_s15 + $0x70] sm:$0xff] }
 0x1a9   : > { %v902_v32 = vmul.f32 %v15634_v29, %v16459_v56  ;;  %v903_v24 = vmul.f32 %v15635_v34, %v16459_v56  ;;  %v16518_v37 = vadd.f32 %v16465_v58, %v893_v40  ;;  %19734 = vst [vmem:[#allocation53_spill] sm:$0xff] %v16524_v33  ;;  %v904_v8 = vmul.f32 %v15637_v36, %v16459_v56  ;;  %v15639_v40 = vld [vmem:[%s16081_s15 + $0x80] sm:$0xff] }
 0x1aa   : > { %v978_v55 = vsub.f32 0.0, %v16491_v30  ;;  %v905_v54 = vmul.f32 %v15638_v42, %v16459_v56  ;;  %v16531_v52 = vadd.f32 %v16465_v58, %v894_v43  ;;  %v906_v29 = vmul.f32 %v15639_v40, %v16459_v56  ;;  %v16570_v4 = vpop.permute.xlu1 %1736 }
 0x1ab   : > { %v16537_v59 = vadd.f32 %v16465_v58, %v895_v3  ;;  %v16540_v34 = vadd.f32 %v16465_v58, %v907_v44  ;;  %v960_v41 = vsub.f32 0.0, %v16502_v48  ;;  %v16544_v36 = vadd.f32 %v16465_v58, %v896_v5  ;;  %19737 = vst [vmem:[#allocation56_spill] sm:$0xff] %v16570_v4 }
 0x1ac   : > { %v1028_v61 = vmul.f32 1.442695, %v978_v55  ;;  %v961_v43 = vsub.f32 0.0, %v16508_v21  ;;  %v962_v55 = vsub.f32 0.0, %v16511_v26  ;;  %v16549_v42 = vadd.f32 %v16465_v58, %v897_v25  ;;  %v16572_v50 = vpop.permute.xlu0 %1731 }
 0x1ad   : > { %v16552_v40 = vadd.f32 %v16465_v58, %v898_v49  ;;  %v977_v3 = vsub.f32 0.0, %v16540_v34  ;;  %v963_v44 = vsub.f32 0.0, %v16518_v37  ;;  %v16557_v0 = vadd.f32 %v16465_v58, %v899_v46  ;;  %19738 = vst [vmem:[#allocation57_spill] sm:$0xff] %v16572_v50 }
 0x1ae   : > { %15363 = vpow2.f32 %v1028_v61  ;;  %v16560_v5 = vadd.f32 %v16465_v58, %v900_v7  ;;  %v16563_v61 = vadd.f32 %v16465_v58, %v901_v53  ;;  %v964_v31 = vsub.f32 0.0, %v16531_v52 }
 0x1af   : > { %v16567_v25 = vadd.f32 %v16465_v58, %v902_v32  ;;  %v1026_v49 = vmul.f32 1.442695, %v977_v3  ;;  %v965_v47 = vsub.f32 0.0, %v16537_v59  ;;  %v992_v35 = vmul.f32 1.442695, %v960_v41 }
 0x1b0   : > { %19735 = vst [vmem:[#allocation54_spill] sm:$0xff] %v16563_v61  ;;  %v16575_v46 = vadd.f32 %v16465_v58, %v903_v24  ;;  %v966_v7 = vsub.f32 0.0, %v16544_v36  ;;  %v994_v53 = vmul.f32 1.442695, %v961_v43  ;;  %v996_v16 = vmul.f32 1.442695, %v962_v55 }
 0x1b1   : > { %19736 = vst [vmem:[#allocation55_spill] sm:$0xff] %v16567_v25  ;;  %v16579_v33 = vadd.f32 %v16465_v58, %v904_v8  ;;  %15365 = vpow2.f32 %v1026_v49  ;;  %v967_v32 = vsub.f32 0.0, %v16549_v42  ;;  %v998_v3 = vmul.f32 1.442695, %v963_v44 }
 0x1b2   : > { %19739 = vst [vmem:[#allocation58_spill] sm:$0xff] %v16575_v46  ;;  %v16583_v41 = vadd.f32 %v16465_v58, %v905_v54  ;;  %v968_v4 = vsub.f32 0.0, %v16552_v40  ;;  %v1000_v50 = vmul.f32 1.442695, %v964_v31  ;;  %15367 = vpow2.f32 %v992_v35  ;;  %v16594_v35 = vpop.permute.xlu1 %1746 }
 0x1b3   : > { %19740 = vst [vmem:[#allocation59_spill] sm:$0xff] %v16579_v33  ;;  %v16587_v24 = vadd.f32 %v16465_v58, %v906_v29  ;;  %v969_v43 = vsub.f32 0.0, %v16557_v0  ;;  %v1002_v55 = vmul.f32 1.442695, %v965_v47  ;;  %15369 = vpow2.f32 %v994_v53  ;;  %19743 = vst [vmem:[#allocation62_spill] sm:$0xff] %v16594_v35  ;;  %v16596_v29 = vpop.permute.xlu0 %1741 }
 0x1b4   : > { %19741 = vst [vmem:[#allocation60_spill] sm:$0xff] %v16583_v41  ;;  %v970_v8 = vsub.f32 0.0, %v16560_v5  ;;  %v971_v49 = vsub.f32 0.0, %v16563_v61  ;;  %v1004_v44 = vmul.f32 1.442695, %v966_v7  ;;  %15371 = vpow2.f32 %v996_v16  ;;  %19744 = vst [vmem:[#allocation63_spill] sm:$0xff] %v16596_v29 }
 0x1b5   : > { %19742 = vst [vmem:[#allocation61_spill] sm:$0xff] %v16587_v24  ;;  %v972_v54 = vsub.f32 0.0, %v16567_v25  ;;  %v973_v51 = vsub.f32 0.0, %v16575_v46  ;;  %v1006_v31 = vmul.f32 1.442695, %v967_v32  ;;  %15373 = vpow2.f32 %v998_v3  ;;  %v15641_v3 = vld [vmem:[%s16081_s15 + $0x98] sm:$0xff] }
 0x1b6   : > { %v974_v47 = vsub.f32 0.0, %v16579_v33  ;;  %v975_v53 = vsub.f32 0.0, %v16583_v41  ;;  %v1008_v15 = vmul.f32 1.442695, %v968_v4  ;;  %15375 = vpow2.f32 %v1000_v50 }
 0x1b7   : > { %v976_v7 = vsub.f32 0.0, %v16587_v24  ;;  %v1010_v16 = vmul.f32 1.442695, %v969_v43  ;;  %15377 = vpow2.f32 %v1002_v55  ;;  %v910_v20 = vmul.f32 %v15640_v6, %v16459_v56  ;;  %v15649_v24 = vld [vmem:[%s16081_s15 + $0xd8] sm:$0xff] }
 0x1b8   : > { %v1012_v32 = vmul.f32 1.442695, %v970_v8  ;;  %v1014_v11 = vmul.f32 1.442695, %v971_v49  ;;  %15379 = vpow2.f32 %v1004_v44  ;;  %v909_v35 = vmul.f32 %v15641_v3, %v16459_v56  ;;  %v15642_v49 = vld [vmem:[%s16081_s15 + $0xd0] sm:$0xff] }
 0x1b9   : > { %v1016_v33 = vmul.f32 1.442695, %v972_v54  ;;  %v1018_v41 = vmul.f32 1.442695, %v973_v51  ;;  %15381 = vpow2.f32 %v1006_v31  ;;  %v16606_v50 = vadd.f32 %v16465_v58, %v910_v20  ;;  %v16613_v51 = vpop.permute.xlu1 %1394  ;;  %v16615_v54 = vpop.permute.xlu0 %1389  ;;  %v15643_v20 = vld [vmem:[%s16081_s15 + $0xb0] sm:$0xff] }
 0x1ba   : > { %v1020_v43 = vmul.f32 1.442695, %v974_v47  ;;  %15383 = vpow2.f32 %v1008_v15  ;;  %v16609_v6 = vadd.f32 %v16465_v58, %v909_v35  ;;  %v1022_v55 = vmul.f32 1.442695, %v975_v53  ;;  %19747 = vst [vmem:[#allocation66_spill] sm:$0xff] %v16613_v51  ;;  %19748 = vst [vmem:[#allocation67_spill] sm:$0xff] %v16615_v54 }
 0x1bb   : > { %v15364_v29 = vpop.eup %15363  ;;  %19745 = vst [vmem:[#allocation64_spill] sm:$0xff] %v16606_v50  ;;  %v1024_v8 = vmul.f32 1.442695, %v976_v7  ;;  %15385 = vpow2.f32 %v1010_v16  ;;  %v916_v44 = vmul.f32 %v15642_v49, %v16459_v56  ;;  %v912_v31 = vmul.f32 %v15643_v20, %v16459_v56  ;;  %v15644_v15 = vld [vmem:[%s16081_s15 + $0xa8] sm:$0xff]  ;;  %v15646_v7 = vld [vmem:[%s16081_s15 + $0xc0] sm:$0xff]  ;;  %v15648_v54 = vld [vmem:[%s16081_s15 + $0xb8] sm:$0xff] }
 0x1bc   : > { %v1074_v4 = vadd.f32 1.0, %v15364_v29  ;;  %19746 = vst [vmem:[#allocation65_spill] sm:$0xff] %v16609_v6  ;;  %v911_v35 = vmul.f32 %v15644_v15, %v16459_v56  ;;  %v15645_v29 = vld [vmem:[%s16081_s15 + $0xc8] sm:$0xff]  ;;  %v980_v53 = vsub.f32 0.0, %v16606_v50  ;;  %v914_v16 = vmul.f32 %v15646_v7, %v16459_v56  ;;  %v15647_v15 = vld [vmem:[%s16081_s15 + $0xe0] sm:$0xff] }
 0x1bd   : > { %v915_v47 = vmul.f32 %v15645_v29, %v16459_v56  ;;  %v16627_v3 = vadd.f32 %v16465_v58, %v916_v44  ;;  %v979_v49 = vsub.f32 0.0, %v16609_v6  ;;  %v918_v29 = vmul.f32 %v15647_v15, %v16459_v56 }
 0x1be   : > { %15387 = vrcp.f32 %v1074_v4  ;;  %v15366_v4 = vpop.eup %15365  ;;  %v913_v7 = vmul.f32 %v15648_v54, %v16459_v56  ;;  %v917_v44 = vmul.f32 %v15649_v24, %v16459_v56  ;;  %v15650_v54 = vld [vmem:[%s16081_s15 + $0xf0] sm:$0xff] }
 0x1bf   : > { %15389 = vpow2.f32 %v1012_v32  ;;  %19749 = vst [vmem:[#allocation68_spill] sm:$0xff] %v16627_v3  ;;  %v16631_v20 = vadd.f32 %v16465_v58, %v915_v47  ;;  %v15368_v32 = vpop.eup %15367  ;;  %v1073_v51 = vadd.f32 1.0, %v15366_v4  ;;  %v16643_v47 = vadd.f32 %v16465_v58, %v911_v35 }
 0x1c0   : > { %15391 = vpow2.f32 %v1014_v11  ;;  %v15370_v50 = vpop.eup %15369  ;;  %v16640_v11 = vadd.f32 %v16465_v58, %v912_v31  ;;  %v16646_v15 = vadd.f32 %v16465_v58, %v918_v29  ;;  %v16649_v4 = vadd.f32 %v16465_v58, %v917_v44  ;;  %v16655_v31 = vpop.permute.xlu0 %1399 }
 0x1c1   : > { %19750 = vst [vmem:[#allocation69_spill] sm:$0xff] %v16631_v20  ;;  %15393 = vpow2.f32 %v1016_v33  ;;  %19752 = vst [vmem:[#allocation71_spill] sm:$0xff] %v16643_v47  ;;  %v15372_v6 = vpop.eup %15371  ;;  %v1032_v33 = vmul.f32 1.442695, %v980_v53  ;;  %v920_v24 = vmul.f32 %v15650_v54, %v16459_v56  ;;  %v1056_v35 = vadd.f32 1.0, %v15368_v32  ;;  %v15651_v32 = vld [vmem:[%s16081_s15 + $0xe8] sm:$0xff] }
 0x1c2   : > { %15395 = vpow2.f32 %v1018_v41  ;;  %19751 = vst [vmem:[#allocation70_spill] sm:$0xff] %v16640_v11  ;;  %19753 = vst [vmem:[#allocation72_spill] sm:$0xff] %v16646_v15  ;;  %v15374_v46 = vpop.eup %15373  ;;  %v16653_v41 = vpop.permute.xlu1 %1404  ;;  %v16658_v29 = vadd.f32 %v16465_v58, %v914_v16  ;;  %v1057_v44 = vadd.f32 1.0, %v15370_v50  ;;  %v16662_v25 = vadd.f32 %v16465_v58, %v913_v7 }
 0x1c3   : > { %15397 = vrcp.f32 %v1073_v51  ;;  %19754 = vst [vmem:[#allocation73_spill] sm:$0xff] %v16649_v4  ;;  %19755 = vst [vmem:[#allocation74_spill] sm:$0xff] %v16653_v41  ;;  %v15376_v53 = vpop.eup %15375  ;;  %v16665_v54 = vadd.f32 %v16465_v58, %v920_v24  ;;  %v1058_v2 = vadd.f32 1.0, %v15372_v6  ;;  %v919_v16 = vmul.f32 %v15651_v32, %v16459_v56 }
 0x1c4   : > { %19756 = vst [vmem:[#allocation75_spill] sm:$0xff] %v16655_v31  ;;  %15399 = vpow2.f32 %v1020_v43  ;;  %19757 = vst [vmem:[#allocation76_spill] sm:$0xff] %v16658_v29  ;;  %v15378_v27 = vpop.eup %15377  ;;  %v16667_v43 = vmul.f32 1.442695, %v979_v49  ;;  %v1059_v51 = vadd.f32 1.0, %v15374_v46  ;;  %v982_v50 = vsub.f32 0.0, %v16640_v11 }
 0x1c5   : > { %15401 = vpow2.f32 %v1022_v55  ;;  %19758 = vst [vmem:[#allocation77_spill] sm:$0xff] %v16662_v25  ;;  %19759 = vst [vmem:[#allocation78_spill] sm:$0xff] %v16665_v54  ;;  %v15380_v61 = vpop.eup %15379  ;;  %v981_v55 = vsub.f32 0.0, %v16643_v47  ;;  %v1060_v28 = vadd.f32 1.0, %v15376_v53  ;;  %v16674_v24 = vadd.f32 %v16465_v58, %v919_v16  ;;  %v16682_v47 = vpop.permute.xlu0 %1751 }
 0x1c6   : > { %15403 = vpow2.f32 %v1024_v8  ;;  %v15382_v7 = vpop.eup %15381  ;;  %v15652_v8 = vld [vmem:[%s16081_s15 + $0xf8] sm:$0xff]  ;;  %v1061_v45 = vadd.f32 1.0, %v15378_v27  ;;  %v984_v32 = vsub.f32 0.0, %v16658_v29  ;;  %v983_v46 = vsub.f32 0.0, %v16662_v25  ;;  %v16680_v11 = vpop.permute.xlu1 %1756  ;;  %19762 = vst [vmem:[#allocation81_spill] sm:$0xff] %v16682_v47 }
 0x1c7   : > { %15405 = vpow2.f32 %v1032_v33  ;;  %19760 = vst [vmem:[#allocation79_spill] sm:$0xff] %v16674_v24  ;;  %v921_v6 = vmul.f32 %v15652_v8, %v16459_v56  ;;  %v15384_v49 = vpop.eup %15383  ;;  %19761 = vst [vmem:[#allocation80_spill] sm:$0xff] %v16680_v11  ;;  %v1062_v53 = vadd.f32 1.0, %v15380_v61  ;;  %v1063_v8 = vadd.f32 1.0, %v15382_v7 }
 0x1c8   : > { %15407 = vrcp.f32 %v1056_v35  ;;  %v15386_v33 = vpop.eup %15385  ;;  %v986_v35 = vsub.f32 0.0, %v16627_v3  ;;  %v985_v27 = vsub.f32 0.0, %v16631_v20  ;;  %v1064_v22 = vadd.f32 1.0, %v15384_v49 }
 0x1c9   : > { %15409 = vrcp.f32 %v1057_v44  ;;  %v16686_v16 = vadd.f32 %v16465_v58, %v921_v6  ;;  %v988_v44 = vsub.f32 0.0, %v16646_v15  ;;  %v16691_v38 = vmul.f32 1.442695, %v982_v50 }
 0x1ca   : > { %15411 = vrcp.f32 %v1058_v2  ;;  %v1065_v61 = vadd.f32 1.0, %v15386_v33  ;;  %v16693_v3 = vmul.f32 1.442695, %v981_v55  ;;  %v16695_v58 = vmul.f32 1.442695, %v984_v32  ;;  %v16707_v32 = vpop.permute.xlu1 %1766 }
 0x1cb   : > { %v15388_v56 = vpop.eup %15387  ;;  %15413 = vrcp.f32 %v1059_v51  ;;  %v16697_v6 = vmul.f32 1.442695, %v983_v46  ;;  %v16699_v15 = vmul.f32 1.442695, %v986_v35  ;;  %v987_v50 = vsub.f32 0.0, %v16649_v4  ;;  %19763 = vst [vmem:[#allocation82_spill] sm:$0xff] %v16707_v32 }
 0x1cc   : > { %v15390_v25 = vpop.eup %15389  ;;  %v1125_v29 = vmul.f32 %v15388_v56, %v16491_v30  ;;  %15415 = vrcp.f32 %v1060_v28  ;;  %v16701_v30 = vmul.f32 1.442695, %v985_v27  ;;  %v16703_v28 = vmul.f32 1.442695, %v988_v44 }
 0x1cd   : > { %v15392_v2 = vpop.eup %15391  ;;  %15417 = vrcp.f32 %v1061_v45  ;;  %v1066_v51 = vadd.f32 1.0, %v15390_v25  ;;  %v16709_v25 = vpop.permute.xlu0 %1761  ;;  %v990_v46 = vsub.f32 0.0, %v16665_v54  ;;  %v989_v44 = vsub.f32 0.0, %v16674_v24 }
 0x1ce   : > { %v15394_v7 = vpop.eup %15393  ;;  %15419 = vrcp.f32 %v1062_v53  ;;  %v1490_v55 = vmul.f32 %v16653_v41, %v1125_v29  ;;  %v1067_v49 = vadd.f32 1.0, %v15392_v2  ;;  %19764 = vst [vmem:[#allocation83_spill] sm:$0xff] %v16709_v25  ;;  %v1842_v35 = vmul.f32 %v16680_v11, %v1125_v29 }
 0x1cf   : > { %v15396_v20 = vpop.eup %15395  ;;  %15421 = vrcp.f32 %v1063_v8  ;;  %v1068_v56 = vadd.f32 1.0, %v15394_v7  ;;  %v19765_v2 = vshrl.u32 %v16462_v57, 16 }
 0x1d0   : > { %v15398_v45 = vpop.eup %15397  ;;  %15423 = vrcp.f32 %v1064_v22  ;;  %v1069_v27 = vadd.f32 1.0, %v15396_v20 }
 0x1d1   : > { %v15400_v33 = vpop.eup %15399  ;;  %v1123_v53 = vmul.f32 %v15398_v45, %v16540_v34  ;;  %15425 = vrcp.f32 %v1065_v61  ;;  %v16717_v41 = vrot.slane %v19765_v2, 3  ;;  %v19766_v34 = vshll.u32 %v16462_v57, 16  ;;  %v16727_v57 = vpop.permute.xlu1 %1414 }
 0x1d2   : > { %v15402_v8 = vpop.eup %15401  ;;  %15427 = vrcp.f32 %v1066_v51  ;;  %v1070_v7 = vadd.f32 1.0, %v15400_v33  ;;  %v991_v51 = vsub.f32 0.0, %v16686_v16  ;;  %19767 = vst [vmem:[#allocation84_spill] sm:$0xff] %v16727_v57  ;;  %v16731_v33 = vmul.f32 1.442695, %v987_v50 }
 0x1d3   : > { %v15404_v22 = vpop.eup %15403  ;;  %v12825_v4 = vpack.c.bf16 %v1125_v29, %v1123_v53  ;;  %v1489_v54 = vmul.f32 %v16655_v31, %v1123_v53  ;;  %v1841_v25 = vmul.f32 %v16682_v47, %v1123_v53  ;;  %v16723_v45 = vrot.slane %v19766_v34, 4  ;;  %v16729_v34 = vpop.permute.xlu0 %1409 }
 0x1d4   : > { %v15406_v61 = vpop.eup %15405  ;;  %v1071_v20 = vadd.f32 1.0, %v15402_v8  ;;  %15429 = vrcp.f32 %v1067_v49  ;;  %v1072_v31 = vadd.f32 1.0, %v15404_v22  ;;  %19768 = vst [vmem:[#allocation85_spill] sm:$0xff] %v16729_v34 }
 0x1d5   : > { %v15408_v11 = vpop.eup %15407  ;;  %13240 = vst [vmem:[#allocation3 + $0x50] sm:$0xff] %v12825_v4   ;;  %v12900_v2 = vpack.c.bf16 %v1490_v55, %v1489_v54  ;;  %v12975_v24 = vpack.c.bf16 %v1842_v35, %v1841_v25  ;;  %v1076_v32 = vadd.f32 1.0, %v15406_v61  ;;  %15431 = vrcp.f32 %v1068_v56  ;;  %v19772_v35 = vld [vmem:[#allocation35_spill] sm:$0xff] }
 0x1d6   : > { %v15410_v29 = vpop.eup %15409  ;;  %15433 = vrcp.f32 %v1069_v27  ;;  %v1089_v53 = vmul.f32 %v15408_v11, %v16502_v48  ;;  %v16734_v54 = vmul.f32 1.442695, %v990_v46  ;;  %v16736_v55 = vmul.f32 1.442695, %v989_v44 }
 0x1d7   : > { %v15412_v49 = vpop.eup %15411  ;;  %13255 = vst [vmem:[#allocation2 + $0x50] sm:$0xff] %v12900_v2   ;;  %13270 = vst [vmem:[#allocation4 + $0x50] sm:$0xff] %v12975_v24   ;;  %15435 = vrcp.f32 %v1076_v32  ;;  %v1091_v4 = vmul.f32 %v15410_v29, %v16508_v21  ;;  %v16743_v32 = vmul.f32 1.442695, %v991_v51  ;;  %v16758_v51 = vpop.permute.xlu1 %1424 }
 0x1d8   : > { %v15414_v25 = vpop.eup %15413  ;;  %15437 = vrcp.f32 %v1070_v7  ;;  %v1093_v48 = vmul.f32 %v15412_v49, %v16511_v26  ;;  %v12589_v11 = vpack.c.bf16 %v1089_v53, %v1089_v53  ;;  %v1472_v24 = vmul.f32 %v16402_v62, %v1089_v53  ;;  %19769 = vst [vmem:[#allocation86_spill] sm:$0xff] %v16758_v51 }
 0x1d9   : > { %v15416_v50 = vpop.eup %15415  ;;  %15439 = vrcp.f32 %v1071_v20  ;;  %v1095_v56 = vmul.f32 %v15414_v25, %v16518_v37  ;;  %v1473_v27 = vmul.f32 %v16406_v1, %v1091_v4  ;;  %v16751_v37 = vmul.f32 %v16404_v63, %v1089_v53 }
 0x1da   : > { %v15418_v21 = vpop.eup %15417  ;;  %15441 = vrcp.f32 %v1072_v31  ;;  %v1097_v46 = vmul.f32 %v15416_v50, %v16531_v52  ;;  %v12785_v8 = vpack.c.bf16 %v1093_v48, %v1091_v4  ;;  %1280 = vst [vmem:[#allocation3 + $0xc] sm:$0xf] %v12589_v11  ;;  %v1474_v22 = vmul.f32 %v16400_v60, %v1093_v48 }
 0x1db   : > { %v15420_v26 = vpop.eup %15419  ;;  %15443 = vpow2.f32 %v16667_v43  ;;  %v1099_v44 = vmul.f32 %v15418_v21, %v16537_v59  ;;  %v1475_v52 = vmul.f32 %v16418_v17, %v1095_v56  ;;  %v16756_v20 = vmul.f32 %v16410_v10, %v1091_v4  ;;  %v16760_v43 = vpop.permute.xlu0 %1419  ;;  %v14937_v17 = vld [vmem:[#allocation8 + $0xb0] sm:$0xff]  }
 0x1dc   : > { %v15422_v61 = vpop.eup %15421  ;;  %v1101_v7 = vmul.f32 %v15420_v26, %v16544_v36  ;;  %v12790_v31 = vpack.c.bf16 %v1097_v46, %v1095_v56  ;;  %13232 = vst [vmem:[#allocation3 + $0x10] sm:$0xff] %v12785_v8   ;;  %19770 = vst [vmem:[#allocation87_spill] sm:$0xff] %v16760_v43  ;;  %v1476_v29 = vmul.f32 %v16416_v14, %v1097_v46 }
 0x1dd   : > { %v15424_v59 = vpop.eup %15423  ;;  %v1103_v2 = vmul.f32 %v15422_v61, %v16549_v42  ;;  %v1477_v53 = vmul.f32 %v16422_v19, %v1099_v44  ;;  %v16766_v36 = vmul.f32 %v16408_v9, %v1093_v48  ;;  %v16770_v11 = vmul.f32 %v16414_v13, %v1095_v56  ;;  %v19782_v19 = vld [vmem:[#allocation50_spill] sm:$0xff] }
 0x1de   : > { %v15426_v49 = vpop.eup %15425  ;;  %v1105_v25 = vmul.f32 %v15424_v59, %v16552_v40  ;;  %v12795_v4 = vpack.c.bf16 %v1101_v7, %v1099_v44  ;;  %v16773_v50 = vmul.f32 %v16412_v12, %v1097_v46  ;;  %13233 = vst [vmem:[#allocation3 + $0x18] sm:$0xff] %v12790_v31   ;;  %v1478_v8 = vmul.f32 %v16420_v18, %v1101_v7  ;;  %v19771_v59 = vld [vmem:[#allocation39_spill] sm:$0xff]  ;;  %v19773_v31 = vld [vmem:[#allocation42_spill] sm:$0xff]  ;;  %v19777_v18 = vld [vmem:[#allocation37_spill] sm:$0xff] }
 0x1df   : > { %v15428_v21 = vpop.eup %15427  ;;  %v1107_v42 = vmul.f32 %v15426_v49, %v16557_v0  ;;  %v1479_v26 = vmul.f32 %v16434_v39, %v1103_v2  ;;  %v16779_v48 = vmul.f32 %v16426_v23, %v1099_v44  ;;  %v16784_v47 = vmul.f32 %v19772_v35, %v1101_v7  ;;  %v19774_v0 = vld [vmem:[#allocation38_spill] sm:$0xff]  ;;  %v16795_v7 = vpop.permute.xlu1 %1776 }
 0x1e0   : > { %v1109_v40 = vmul.f32 %v15428_v21, %v16560_v5  ;;  %v12800_v61 = vpack.c.bf16 %v1105_v25, %v1103_v2  ;;  %v1480_v56 = vmul.f32 %v19771_v59, %v1105_v25  ;;  %13234 = vst [vmem:[#allocation3 + $0x20] sm:$0xff] %v12795_v4   ;;  %v16788_v49 = vmul.f32 %v19774_v0, %v1103_v2  ;;  %v19775_v44 = vld [vmem:[#allocation54_spill] sm:$0xff]  ;;  %v19776_v5 = vld [vmem:[#allocation41_spill] sm:$0xff]  ;;  %v16797_v4 = vpop.permute.xlu0 %1771 }
 0x1e1   : > { %v15430_v46 = vpop.eup %15429  ;;  %v1481_v12 = vmul.f32 %v19773_v31, %v1107_v42  ;;  %v12621_v13 = vpack.c.bf16 %v1472_v24, %v1472_v24  ;;  %v12860_v9 = vpack.c.bf16 %v1474_v22, %v1473_v27  ;;  %v16793_v59 = vmul.f32 %v19777_v18, %v1105_v25  ;;  %19778 = vst [vmem:[#allocation54_spill] sm:$0xff] %v16795_v7  ;;  %v19780_v31 = vld [vmem:[#allocation55_spill] sm:$0xff]  ;;  %v19783_v18 = vld [vmem:[#allocation44_spill] sm:$0xff] }
 0x1e2   : > { %v15432_v10 = vpop.eup %15431  ;;  %v1111_v23 = vmul.f32 %v15430_v46, %v19775_v44  ;;  %v12805_v39 = vpack.c.bf16 %v1109_v40, %v1107_v42  ;;  %v1482_v21 = vmul.f32 %v19776_v5, %v1109_v40  ;;  %13235 = vst [vmem:[#allocation3 + $0x28] sm:$0xff] %v12800_v61   ;;  %19779 = vst [vmem:[#allocation88_spill] sm:$0xff] %v16797_v4  ;;  %v19781_v44 = vld [vmem:[#allocation58_spill] sm:$0xff] }
 0x1e3   : > { %v15434_v35 = vpop.eup %15433  ;;  %v1113_v2 = vmul.f32 %v15432_v10, %v19780_v31  ;;  %v12865_v0 = vpack.c.bf16 %v1476_v29, %v1475_v52  ;;  %v12870_v24 = vpack.c.bf16 %v1478_v8, %v1477_v53  ;;  %v12875_v27 = vpack.c.bf16 %v1480_v56, %v1479_v26  ;;  %1632 = vst [vmem:[#allocation2 + $0xc] sm:$0xf] %v12621_v13  ;;  %v14933_v22 = vld [vmem:[#allocation3 + $0xc] sm:$0xff]   ;;  %v19784_v10 = vld [vmem:[#allocation49_spill] sm:$0xff]  ;;  %v19787_v8 = vld [vmem:[#allocation64_spill] sm:$0xff] }
 0x1e4   : > { %13247 = vst [vmem:[#allocation2 + $0x10] sm:$0xff] %v12860_v9   ;;  %v15436_v46 = vpop.eup %15435  ;;  %v1115_v5 = vmul.f32 %v15434_v35, %v19781_v44  ;;  %v1483_v25 = vmul.f32 %v19782_v19, %v1111_v23  ;;  %v16803_v61 = vmul.f32 %v19783_v18, %v1107_v42  ;;  %13236 = vst [vmem:[#allocation3 + $0x30] sm:$0xff] %v12805_v39   ;;  %v19785_v29 = vld [vmem:[#allocation43_spill] sm:$0xff]  ;;  %v19786_v9 = vld [vmem:[#allocation48_spill] sm:$0xff]  ;;  %13909 = vmatmul.mubr.bf16.vlgmr.msra.gmra.mxu0 %v14933_v22 }
 0x1e5   : > { %v12880_v14 = vpack.c.bf16 %v1482_v21, %v1481_v12  ;;  %v15438_v60 = vpop.eup %15437  ;;  %v12810_v63 = vpack.c.bf16 %v1113_v2, %v1111_v23  ;;  %v1484_v52 = vmul.f32 %v19784_v10, %v1113_v2  ;;  %v16807_v53 = vmul.f32 %v19785_v29, %v1109_v40  ;;  %13248 = vst [vmem:[#allocation2 + $0x18] sm:$0xff] %v12865_v0   ;;  %v14934_v35 = vld [vmem:[#allocation3 + $0x14] sm:$0xff]   ;;  %v19789_v56 = vld [vmem:[#allocation53_spill] sm:$0xff]  ;;  %v19790_v21 = vld [vmem:[#allocation46_spill] sm:$0xff] }
 0x1e6   : > { %v16810_v13 = vmul.f32 %v19786_v9, %v1111_v23  ;;  %13249 = vst [vmem:[#allocation2 + $0x20] sm:$0xff] %v12870_v24   ;;  %13250 = vst [vmem:[#allocation2 + $0x28] sm:$0xff] %v12875_v27   ;;  %v15440_v42 = vpop.eup %15439  ;;  %v16813_v39 = vmul.f32 %v15436_v46, %v19787_v8  ;;  %v19788_v12 = vld [vmem:[#allocation59_spill] sm:$0xff]  ;;  %v1485_v31 = vmul.f32 %v19789_v56, %v1115_v5  ;;  %13989 = vmatpush3.bf16.msra.mxu0 %v19790_v21  ;;  %v19791_v0 = vld [vmem:[#allocation60_spill] sm:$0xff]  ;;  %v16826_v21 = vpop.permute.xlu1 %1786 }
 0x1e7   : > { %v1117_v26 = vmul.f32 %v15438_v60, %v19788_v12  ;;  %v12653_v40 = vpack.c.bf16 %v16751_v37, %v16751_v37  ;;  %13251 = vst [vmem:[#allocation2 + $0x30] sm:$0xff] %v12880_v14   ;;  %v15442_v23 = vpop.eup %15441  ;;  %v1119_v24 = vmul.f32 %v15440_v42, %v19791_v0  ;;  %v19792_v27 = vld [vmem:[#allocation47_spill] sm:$0xff]  ;;  %v19793_v44 = vld [vmem:[#allocation57_spill] sm:$0xff]  ;;  %13237 = vst [vmem:[#allocation3 + $0x38] sm:$0xff] %v12810_v63   ;;  %13912 = vmatprep.mubr.bf16.mxu0 %v14934_v35  ;;  %v16828_v42 = vpop.permute.xlu0 %1781 }
 0x1e8   : > { %v1836_v22 = vmul.f32 %v19792_v27, %v1113_v2  ;;  %v1837_v9 = vmul.f32 %v19793_v44, %v1115_v5  ;;  %v12885_v46 = vpack.c.bf16 %v1484_v52, %v1483_v25  ;;  %v14944_v8 = vld [vmem:[#allocation8 + $0xa8] sm:$0xff]   ;;  %v15444_v60 = vpop.eup %15443  ;;  %v19794_v12 = vld [vmem:[#allocation61_spill] sm:$0xff]  ;;  %19797 = vst [vmem:[#allocation55_spill] sm:$0xff] %v16826_v21  ;;  %19798 = vst [vmem:[#allocation58_spill] sm:$0xff] %v16828_v42  ;;  %13990 = vmatprep.subr.bf16.mxu0 %v14937_v17 }
 0x1e9   : > { %v1121_v29 = vmul.f32 %v15442_v23, %v19794_v12  ;;  %v12815_v18 = vpack.c.bf16 %v1117_v26, %v1115_v5  ;;  %v19795_v56 = vld [vmem:[#allocation52_spill] sm:$0xff]  ;;  %1984 = vst [vmem:[#allocation4 + $0xc] sm:$0xf] %v12653_v40  ;;  %v1075_v2 = vadd.f32 1.0, %v15444_v60  ;;  %v19799_v63 = vld [vmem:[#allocation67_spill] sm:$0xff]  ;;  %v12935_v23 = vpack.c.bf16 %v16766_v36, %v16756_v20  ;;  %v19801_v40 = vld [vmem:[#allocation66_spill] sm:$0xff] }
 0x1ea   : > { %v1486_v37 = vmul.f32 %v19795_v56, %v1117_v26  ;;  %v19796_v14 = vld [vmem:[#allocation56_spill] sm:$0xff]  ;;  %v1487_v25 = vmul.f32 %v19799_v63, %v1119_v24  ;;  %v19800_v52 = vld [vmem:[#allocation63_spill] sm:$0xff]  ;;  %13252 = vst [vmem:[#allocation2 + $0x38] sm:$0xff] %v12885_v46   ;;  %13991 = vmatpush3.bf16.msra.mxu0 %v14937_v17  ;;  %v14939_v60 = vld [vmem:[#allocation3 + $0x24] sm:$0xff]   ;;  %v12945_v20 = vpack.c.bf16 %v16784_v47, %v16779_v48 }
 0x1eb   : > { %v1838_v10 = vmul.f32 %v19796_v14, %v1117_v26  ;;  %v1839_v35 = vmul.f32 %v19800_v52, %v1119_v24  ;;  %v14938_v5 = vld [vmem:[#allocation3 + $0x1c] sm:$0xff]   ;;  %v16834_v0 = vld [vmem:[#allocation8 + $0xa0] sm:$0xff]   ;;  %v12820_v26 = vpack.c.bf16 %v1121_v29, %v1119_v24  ;;  %v1488_v12 = vmul.f32 %v19801_v40, %v1121_v29  ;;  %v19802_v14 = vld [vmem:[#allocation62_spill] sm:$0xff]  ;;  %13238 = vst [vmem:[#allocation3 + $0x40] sm:$0xff] %v12815_v18  }
 0x1ec   : > { %v1840_v44 = vmul.f32 %v19802_v14, %v1121_v29  ;;  %v12890_v27 = vpack.c.bf16 %v1486_v37, %v1485_v31  ;;  %v14941_v56 = vld [vmem:[#allocation2 + $0x8] sm:$0xff]   ;;  %15445 = vrcp.f32 %v1075_v2  ;;  %v12940_v52 = vpack.c.bf16 %v16773_v50, %v16770_v11  ;;  %13262 = vst [vmem:[#allocation4 + $0x10] sm:$0xff] %v12935_v23   ;;  %v14942_v24 = vld [vmem:[#allocation2 + $0x10] sm:$0xff]   ;;  %13992 = vmatprep.subr.bf16.mxu0 %v14944_v8  ;;  %v14943_v46 = vld [vmem:[#allocation2 + $0x18] sm:$0xff]  }
 0x1ed   : > { %v12950_v36 = vpack.c.bf16 %v16793_v59, %v16788_v49  ;;  %13239 = vst [vmem:[#allocation3 + $0x48] sm:$0xff] %v12820_v26   ;;  %v12895_v29 = vpack.c.bf16 %v1488_v12, %v1487_v25  ;;  %v12955_v17 = vpack.c.bf16 %v16807_v53, %v16803_v61  ;;  %v12960_v18 = vpack.c.bf16 %v1836_v22, %v16810_v13  ;;  %v14947_v48 = vld [vmem:[#allocation2 + $0x20] sm:$0xff]   ;;  %v16849_v59 = vpop.permute.xlu1 %1434  ;;  %v16851_v49 = vpop.permute.xlu0 %1429  ;;  %v14959_v23 = vld [vmem:[#allocation8 + $0x90] sm:$0xff]  }
 0x1ee   : > { %v12965_v31 = vpack.c.bf16 %v1838_v10, %v1837_v9  ;;  %13253 = vst [vmem:[#allocation2 + $0x40] sm:$0xff] %v12890_v27   ;;  %v12970_v11 = vpack.c.bf16 %v1840_v44, %v1839_v35  ;;  %15447 = vpow2.f32 %v16691_v38  ;;  %13263 = vst [vmem:[#allocation4 + $0x18] sm:$0xff] %v12940_v52   ;;  %13913 = vmatmul.mubr.bf16.gmra.mxu0 %v14938_v5  ;;  %v2512_v47 = vshrl.u32 %v14941_v56, 16  ;;  %v14954_v53 = vld [vmem:[#allocation8 + $0x98] sm:$0xff]   ;;  %v14948_v27 = vld [vmem:[#allocation2 + $0x28] sm:$0xff]  }
 0x1ef   : > { %13264 = vst [vmem:[#allocation4 + $0x20] sm:$0xff] %v12945_v20   ;;  %13265 = vst [vmem:[#allocation4 + $0x28] sm:$0xff] %v12950_v36   ;;  %v2515_v50 = vshll.u32 %v14941_v56, 16  ;;  %15449 = vpow2.f32 %v16693_v3  ;;  %13916 = vmatprep.mubr.bf16.mxu0 %v14939_v60  ;;  %v2521_v61 = vshrl.u32 %v14942_v24, 16  ;;  %v2524_v38 = vshll.u32 %v14942_v24, 16  ;;  %13993 = vmatpush3.bf16.msra.mxu0 %v14944_v8  ;;  %v14952_v37 = vld [vmem:[#allocation2 + $0x30] sm:$0xff]  }
 0x1f0   : > { %13254 = vst [vmem:[#allocation2 + $0x48] sm:$0xff] %v12895_v29   ;;  %13266 = vst [vmem:[#allocation4 + $0x30] sm:$0xff] %v12955_v17   ;;  %v2530_v10 = vshrl.u32 %v14943_v46, 16  ;;  %15451 = vpow2.f32 %v16695_v58  ;;  %v2514_v9 = vrot.slane %v2512_v47, 3  ;;  %v2533_v56 = vshll.u32 %v14943_v46, 16  ;;  %13994 = vmatprep.subr.bf16.mxu0 %v16834_v0  ;;  %v14965_v5 = vld [vmem:[#allocation8 + $0xf0] sm:$0xff]  }
 0x1f1   : > { %13267 = vst [vmem:[#allocation4 + $0x38] sm:$0xff] %v12960_v18   ;;  %13268 = vst [vmem:[#allocation4 + $0x40] sm:$0xff] %v12965_v31   ;;  %v2517_v13 = vrot.slane %v2515_v50, 4  ;;  %15453 = vpow2.f32 %v16697_v6  ;;  %v2523_v3 = vrot.slane %v2521_v61, 3  ;;  %v2526_v22 = vrot.slane %v2524_v38, 4  ;;  %v14945_v12 = vld [vmem:[#allocation3 + $0x2c] sm:$0xff]   ;;  %v16868_v20 = vpop.permute.xlu0 %1439 }
 0x1f2   : > { %19803 = vst [vmem:[#allocation64_spill] sm:$0xff] %v16849_v59  ;;  %19804 = vst [vmem:[#allocation59_spill] sm:$0xff] %v16851_v49  ;;  %v2532_v44 = vrot.slane %v2530_v10, 3  ;;  %15455 = vpow2.f32 %v16699_v15  ;;  %v2535_v8 = vrot.slane %v2533_v56, 4  ;;  %v2539_v25 = vshrl.u32 %v14947_v48, 16  ;;  %v19809_v50 = vld [vmem:[#allocation82_spill] sm:$0xff] }
 0x1f3   : > { %13269 = vst [vmem:[#allocation4 + $0x48] sm:$0xff] %v12970_v11   ;;  %v2518_v2 = vor.u32 %v2517_v13, %v2514_v9  ;;  %15457 = vpow2.f32 %v16701_v30  ;;  %v2527_v58 = vor.u32 %v2526_v22, %v2523_v3  ;;  %v2542_v52 = vshll.u32 %v14947_v48, 16  ;;  %13995 = vmatpush3.bf16.msra.mxu0 %v16834_v0  ;;  %v16866_v30 = vpop.permute.xlu1 %1444  ;;  %19807 = vst [vmem:[#allocation60_spill] sm:$0xff] %v16868_v20  ;;  %v19808_v11 = vld [vmem:[#allocation51_spill] sm:$0xff]  ;;  %v14970_v10 = vld [vmem:[#allocation8 + $0xe8] sm:$0xff]  }
 0x1f4   : > { %v2548_v35 = vshrl.u32 %v14948_v27, 16  ;;  %15459 = vpow2.f32 %v16703_v28  ;;  %v19805_v6 = vor.u32 %v16723_v45, %v16717_v41  ;;  %v16864_v15 = vor.u32 %v2535_v8, %v2532_v44  ;;  %13996 = vmatprep.subr.bf16.mxu0 %v14954_v53  ;;  %19806 = vst [vmem:[#allocation46_spill] sm:$0xff] %v16866_v30  ;;  %v14946_v28 = vld [vmem:[#allocation3 + $0x34] sm:$0xff]   ;;  %v14953_v41 = vld [vmem:[#allocation2 + $0x38] sm:$0xff]  }
 0x1f5   : > { %v2541_v60 = vrot.slane %v2539_v25, 3  ;;  %15461 = vpow2.f32 %v16731_v33  ;;  %v2528_v0 = vsel %vm2502_vm1, %v2518_v2, %v2527_v58  ;;  %v2544_v36 = vrot.slane %v2542_v52, 4  ;;  %v16882_v38 = vld [vmem:[#allocation2 + $0x40] sm:$0xff]   ;;  %v16887_v3 = vld [vmem:[#allocation2 + $0x50] sm:$0xff]   ;;  %v16896_v52 = vld [vmem:[#allocation8 + $0xe0] sm:$0xff]  }
 0x1f6   : > { %v2519_v26 = vsel %vm2502_vm1, %v19805_v6, %v2518_v2  ;;  %v2550_v24 = vrot.slane %v2548_v35, 3  ;;  %15463 = vpow2.f32 %v16734_v54  ;;  %v2537_v45 = vsel %vm2502_vm1, %v2527_v58, %v16864_v15  ;;  %13917 = vmatmul.mubr.bf16.gmra.mxu0 %v14945_v12  ;;  %v14966_v54 = vld [vmem:[#allocation8 + $0x88] sm:$0xff]   ;;  %v16898_v35 = vld [vmem:[#allocation8 + $0x80] sm:$0xff]  }
 0x1f7   : > { %13956 = vmatprep.mubr.bf16.mxu1 %v2519_v26  ;;  %v2551_v29 = vshll.u32 %v14948_v27, 16  ;;  %v2557_v17 = vshrl.u32 %v14952_v37, 16  ;;  %15465 = vpow2.f32 %v16736_v55  ;;  %13920 = vmatprep.mubr.bf16.mxu0 %v14946_v28  ;;  %v2560_v33 = vshll.u32 %v14952_v37, 16  ;;  %v16889_v44 = vpop.permute.xlu1 %1796  ;;  %v16891_v37 = vpop.permute.xlu0 %1791  ;;  %v16894_v58 = vld [vmem:[#allocation2 + $0x48] sm:$0xff]  }
 0x1f8   : > { %13957 = vmatmul.mubr.bf16.vlgmr.msra.gmra.mxu1 %v2528_v0  ;;  %v2566_v18 = vshrl.u32 %v14953_v41, 16  ;;  %15467 = vpow2.f32 %v16743_v32  ;;  %v2569_v46 = vshll.u32 %v14953_v41, 16  ;;  %13997 = vmatpush3.bf16.msra.mxu0 %v14954_v53  ;;  %v1844_v48 = vmul.f32 %v19809_v50, %v16813_v39  ;;  %v19810_v32 = vld [vmem:[#allocation65_spill] sm:$0xff]  ;;  %19811 = vst [vmem:[#allocation61_spill] sm:$0xff] %v16889_v44  ;;  %19812 = vst [vmem:[#allocation51_spill] sm:$0xff] %v16891_v37  ;;  %v19813_v12 = vld [vmem:[#allocation83_spill] sm:$0xff] }
 0x1f9   : > { %13960 = vmatprep.mubr.bf16.mxu1 %v2537_v45  ;;  %v2553_v31 = vrot.slane %v2551_v29, 4  ;;  %14037 = vmatpush3.bf16.msra.mxu1 %v19808_v11  ;;  %v15446_v47 = vpop.eup %15445  ;;  %v1492_v61 = vmul.f32 %v16727_v57, %v16813_v39  ;;  %v2545_v55 = vor.u32 %v2544_v36, %v2541_v60  ;;  %v14950_v53 = vld [vmem:[#allocation3 + $0x3c] sm:$0xff]   ;;  %v2559_v56 = vrot.slane %v2557_v17, 3  ;;  %v14951_v36 = vld [vmem:[#allocation3 + $0x44] sm:$0xff]  }
 0x1fa   : > { %13998 = vmatprep.subr.bf16.mxu0 %v14959_v23  ;;  %14038 = vmatprep.subr.bf16.mxu1 %v14965_v5  ;;  %v1127_v9 = vmul.f32 %v15446_v47, %v19810_v32  ;;  %v2562_v27 = vrot.slane %v2560_v33, 4  ;;  %v2568_v2 = vrot.slane %v2566_v18, 3  ;;  %v2571_v8 = vrot.slane %v2569_v46, 4 }
 0x1fb   : > { %v16885_v13 = vor.u32 %v2553_v31, %v2550_v24  ;;  %v15448_v22 = vpop.eup %15447  ;;  %v2575_v25 = vshrl.u32 %v16882_v38, 16  ;;  %v2546_v45 = vsel %vm2502_vm1, %v16864_v15, %v2545_v55  ;;  %v2578_v17 = vshll.u32 %v16882_v38, 16  ;;  %v16910_v32 = vpop.permute.xlu1 %1806 }
 0x1fc   : > { %v15450_v6 = vpop.eup %15449  ;;  %v12830_v26 = vpack.c.bf16 %v16813_v39, %v1127_v9  ;;  %v1843_v60 = vmul.f32 %v19813_v12, %v1127_v9  ;;  %v1491_v0 = vmul.f32 %v16729_v34, %v1127_v9  ;;  %v1078_v28 = vadd.f32 1.0, %v15448_v22  ;;  %13999 = vmatpush3.bf16.msra.mxu0 %v14959_v23  ;;  %19814 = vst [vmem:[#allocation65_spill] sm:$0xff] %v16910_v32  ;;  %v16912_v9 = vpop.permute.xlu0 %1801 }
 0x1fd   : > { %14039 = vmatpush3.bf16.msra.mxu1 %v14965_v5  ;;  %v15452_v24 = vpop.eup %15451  ;;  %v1077_v41 = vadd.f32 1.0, %v15450_v6  ;;  %v2555_v29 = vsel %vm2502_vm1, %v2545_v55, %v16885_v13  ;;  %14000 = vmatprep.subr.bf16.mxu0 %v14966_v54  ;;  %v2584_v15 = vshrl.u32 %v16894_v58, 16  ;;  %v2563_v47 = vor.u32 %v2562_v27, %v2559_v56  ;;  %19815 = vst [vmem:[#allocation89_spill] sm:$0xff] %v16912_v9  ;;  %v16917_v56 = vld [vmem:[#allocation8 + $0x138] sm:$0xff]  }
 0x1fe   : > { %14040 = vmatprep.subr.bf16.mxu1 %v14970_v10  ;;  %v15454_v39 = vpop.eup %15453  ;;  %13241 = vst [vmem:[#allocation3 + $0x58] sm:$0xff] %v12830_v26   ;;  %v12980_v33 = vpack.c.bf16 %v1844_v48, %v1843_v60  ;;  %v12905_v18 = vpack.c.bf16 %v1492_v61, %v1491_v0  ;;  %15469 = vrcp.f32 %v1078_v28  ;;  %v1080_v31 = vadd.f32 1.0, %v15452_v24  ;;  %13921 = vmatmul.mubr.bf16.gmra.mxu0 %v14950_v53  ;;  %v14978_v61 = vld [vmem:[#allocation8 + $0xd8] sm:$0xff]  }
 0x1ff   : > { %v15456_v23 = vpop.eup %15455  ;;  %15471 = vrcp.f32 %v1077_v41  ;;  %v1079_v5 = vadd.f32 1.0, %v15454_v39  ;;  %13924 = vmatprep.mubr.bf16.mxu0 %v14951_v36  ;;  %v2593_v48 = vshrl.u32 %v16887_v3, 16  ;;  %v2577_v53 = vrot.slane %v2575_v25, 3  ;;  %v14955_v0 = vld [vmem:[#allocation3 + $0x4c] sm:$0xff]   ;;  %v14980_v36 = vld [vmem:[#allocation8 + $0xd0] sm:$0xff]   ;;  %v16926_v39 = vpop.permute.xlu1 %1454 }
 0x200   : > { %13961 = vmatmul.mubr.bf16.gmra.mxu1 %v2546_v45  ;;  %v15458_v46 = vpop.eup %15457  ;;  %13271 = vst [vmem:[#allocation4 + $0x58] sm:$0xff] %v12980_v33   ;;  %13256 = vst [vmem:[#allocation2 + $0x58] sm:$0xff] %v12905_v18   ;;  %15473 = vrcp.f32 %v1080_v31  ;;  %v1082_v11 = vadd.f32 1.0, %v15456_v23  ;;  %14001 = vmatpush3.bf16.msra.mxu0 %v14966_v54  ;;  %v2587_v22 = vshll.u32 %v16894_v58, 16  ;;  %v2580_v6 = vrot.slane %v2578_v17, 4 }
 0x201   : > { %13964 = vmatprep.mubr.bf16.mxu1 %v2555_v29  ;;  %14041 = vmatpush3.bf16.msra.mxu1 %v14970_v10  ;;  %v15460_v55 = vpop.eup %15459  ;;  %15475 = vrcp.f32 %v1079_v5  ;;  %v1081_v38 = vadd.f32 1.0, %v15458_v46  ;;  %v2572_v10 = vor.u32 %v2571_v8, %v2568_v2  ;;  %v2586_v28 = vrot.slane %v2584_v15, 3  ;;  %19816 = vst [vmem:[#allocation90_spill] sm:$0xff] %v16926_v39  ;;  %v14985_v15 = vld [vmem:[#allocation8 + $0xc8] sm:$0xff]  }
 0x202   : > { %14042 = vmatprep.subr.bf16.mxu1 %v16896_v52  ;;  %14002 = vmatprep.subr.bf16.mxu0 %v16898_v35  ;;  %v15462_v27 = vpop.eup %15461  ;;  %15477 = vrcp.f32 %v1082_v11  ;;  %v1084_v54 = vadd.f32 1.0, %v15460_v55  ;;  %v2596_v25 = vshll.u32 %v16887_v3, 16  ;;  %v2589_v41 = vrot.slane %v2587_v22, 4 }
 0x203   : > { %v15464_v26 = vpop.eup %15463  ;;  %15479 = vrcp.f32 %v1081_v38  ;;  %v1083_v60 = vadd.f32 1.0, %v15462_v27  ;;  %v2564_v8 = vsel %vm2502_vm1, %v16885_v13, %v2563_v47  ;;  %v2573_v17 = vsel %vm2502_vm1, %v2563_v47, %v2572_v10  ;;  %v19818_v38 = vld [vmem:[#allocation70_spill] sm:$0xff] }
 0x204   : > { %v15466_v58 = vpop.eup %15465  ;;  %15481 = vrcp.f32 %v1084_v54  ;;  %v1086_v24 = vadd.f32 1.0, %v15464_v26  ;;  %14003 = vmatpush3.bf16.msra.mxu0 %v16898_v35  ;;  %v2595_v13 = vrot.slane %v2593_v48, 3  ;;  %v2598_v33 = vrot.slane %v2596_v25, 4  ;;  %v19819_v26 = vld [vmem:[#allocation71_spill] sm:$0xff]  ;;  %v16932_v48 = vpop.permute.xlu1 %1464 }
 0x205   : > { %14043 = vmatpush3.bf16.msra.mxu1 %v16896_v52  ;;  %v15468_v45 = vpop.eup %15467  ;;  %15483 = vrcp.f32 %v1083_v60  ;;  %v1085_v2 = vadd.f32 1.0, %v15466_v58  ;;  %v14956_v29 = vld [vmem:[#allocation3 + $0x54] sm:$0xff]   ;;  %14084 = vmatprep.subr.bf16.mxu0 %v16917_v56  ;;  %v16928_v52 = vpop.permute.xlu0 %1449  ;;  %v2581_v18 = vor.u32 %v2580_v6, %v2577_v53  ;;  %v2590_v31 = vor.u32 %v2589_v41, %v2586_v28  ;;  %19820 = vst [vmem:[#allocation70_spill] sm:$0xff] %v16932_v48 }
 0x206   : > { %14044 = vmatprep.subr.bf16.mxu1 %v14978_v61  ;;  %15485 = vrcp.f32 %v1086_v24  ;;  %v1087_v3 = vadd.f32 1.0, %v15468_v45  ;;  %13925 = vmatmul.mubr.bf16.gmra.mxu0 %v14955_v0  ;;  %19817 = vst [vmem:[#allocation91_spill] sm:$0xff] %v16928_v52  ;;  %v2599_v27 = vor.u32 %v2598_v33, %v2595_v13  ;;  %v14988_v0 = vld [vmem:[#allocation8 + $0xc0] sm:$0xff]   ;;  %v19822_v24 = vld [vmem:[#allocation76_spill] sm:$0xff] }
 0x207   : > { %15487 = vrcp.f32 %v1085_v2  ;;  %13928 = vmatprep.mubr.bf16.mxu0 %v14956_v29  ;;  %v14964_v35 = vld [vmem:[#allocation2 + $0x58] sm:$0xff]   ;;  %v2582_v53 = vsel %vm2502_vm1, %v2572_v10, %v2581_v18  ;;  %v2591_v6 = vsel %vm2502_vm1, %v2581_v18, %v2590_v31  ;;  %v19824_v33 = vld [vmem:[#allocation68_spill] sm:$0xff] }
 0x208   : > { %13965 = vmatmul.mubr.bf16.gmra.mxu1 %v2564_v8  ;;  %15489 = vrcp.f32 %v1087_v3  ;;  %v2602_v23 = vshrl.u32 %v14964_v35, 16  ;;  %v2605_v5 = vshll.u32 %v14964_v35, 16  ;;  %v19823_v29 = vld [vmem:[#allocation77_spill] sm:$0xff] }
 0x209   : > { %13968 = vmatprep.mubr.bf16.mxu1 %v2573_v17  ;;  %14045 = vmatpush3.bf16.msra.mxu1 %v14978_v61  ;;  %v16934_v61 = vpop.permute.xlu0 %1459 }
 0x20a   : > { %14046 = vmatprep.subr.bf16.mxu1 %v14980_v36  ;;  %v2604_v11 = vrot.slane %v2602_v23, 3  ;;  %v2607_v47 = vrot.slane %v2605_v5, 4  ;;  %19821 = vst [vmem:[#allocation71_spill] sm:$0xff] %v16934_v61  ;;  %v2600_v23 = vsel %vm2502_vm1, %v2590_v31, %v2599_v27 }
 0x20b   : > { %v15470_v46 = vpop.eup %15469 }
 0x20c   : > { %v15472_v55 = vpop.eup %15471  ;;  %v1133_v22 = vmul.f32 %v15470_v46, %v19818_v38  ;;  %v16941_v41 = vor.u32 %v2607_v47, %v2604_v11  ;;  %v16951_v38 = vld [vmem:[#allocation8 + $0x178] sm:$0xff]  }
 0x20d   : > { %14047 = vmatpush3.bf16.msra.mxu1 %v14980_v36  ;;  %v15474_v54 = vpop.eup %15473  ;;  %v1131_v60 = vmul.f32 %v15472_v55, %v19819_v26 }
 0x20e   : > { %14048 = vmatprep.subr.bf16.mxu1 %v14985_v15  ;;  %v15476_v28 = vpop.eup %15475  ;;  %v1494_v25 = vmul.f32 %v16758_v51, %v1133_v22  ;;  %v1846_v58 = vmul.f32 %v16795_v7, %v1133_v22  ;;  %v1137_v36 = vmul.f32 %v15474_v54, %v19822_v24 }
 0x20f   : > { %v15478_v45 = vpop.eup %15477  ;;  %v12835_v2 = vpack.c.bf16 %v1133_v22, %v1131_v60  ;;  %v1493_v8 = vmul.f32 %v16760_v43, %v1131_v60  ;;  %v1845_v10 = vmul.f32 %v16797_v4, %v1131_v60  ;;  %v1135_v3 = vmul.f32 %v15476_v28, %v19823_v29  ;;  %v19825_v60 = vld [vmem:[#allocation69_spill] sm:$0xff]  ;;  %v19826_v28 = vld [vmem:[#allocation72_spill] sm:$0xff]  ;;  %v15125_v43 = vld [vmem:[#allocation3 + $0x8c] sm:$0xff]  }
 0x210   : > { %13969 = vmatmul.mubr.bf16.gmra.mxu1 %v2582_v53  ;;  %v15480_v17 = vpop.eup %15479  ;;  %v1848_v35 = vmul.f32 %v16826_v21, %v1137_v36  ;;  %v1496_v13 = vmul.f32 %v16849_v59, %v1137_v36  ;;  %v1141_v18 = vmul.f32 %v15478_v45, %v19824_v33  ;;  %v16961_v45 = vpop.permute.xlu0 %1811  ;;  %v16967_v33 = vld [vmem:[#allocation4 + $0x4] sm:$0xff]  }
 0x211   : > { %13972 = vmatprep.mubr.bf16.mxu1 %v2591_v6  ;;  %14049 = vmatpush3.bf16.msra.mxu1 %v14985_v15  ;;  %v15482_v5 = vpop.eup %15481  ;;  %13242 = vst [vmem:[#allocation3 + $0x60] sm:$0xff] %v12835_v2   ;;  %v12910_v46 = vpack.c.bf16 %v1494_v25, %v1493_v8  ;;  %v12985_v11 = vpack.c.bf16 %v1846_v58, %v1845_v10  ;;  %v19827_v58 = vld [vmem:[#allocation73_spill] sm:$0xff]  ;;  %19829 = vst [vmem:[#allocation77_spill] sm:$0xff] %v16961_v45 }
 0x212   : > { %v12840_v47 = vpack.c.bf16 %v1137_v36, %v1135_v3  ;;  %v1847_v55 = vmul.f32 %v16828_v42, %v1135_v3  ;;  %14050 = vmatprep.subr.bf16.mxu1 %v14988_v0  ;;  %v15484_v22 = vpop.eup %15483  ;;  %v1495_v54 = vmul.f32 %v16851_v49, %v1135_v3  ;;  %v1498_v26 = vmul.f32 %v16866_v30, %v1141_v18  ;;  %v16959_v36 = vpop.permute.xlu1 %1816 }
 0x213   : > { %v1139_v53 = vmul.f32 %v15480_v17, %v19825_v60  ;;  %v1850_v31 = vmul.f32 %v16889_v44, %v1141_v18  ;;  %v15486_v15 = vpop.eup %15485  ;;  %13257 = vst [vmem:[#allocation2 + $0x60] sm:$0xff] %v12910_v46   ;;  %13272 = vst [vmem:[#allocation4 + $0x60] sm:$0xff] %v12985_v11   ;;  %v1145_v25 = vmul.f32 %v15482_v5, %v19826_v28 }
 0x214   : > { %13243 = vst [vmem:[#allocation3 + $0x68] sm:$0xff] %v12840_v47   ;;  %v12990_v6 = vpack.c.bf16 %v1848_v35, %v1847_v55  ;;  %v1143_v24 = vmul.f32 %v15484_v22, %v19827_v58  ;;  %19828 = vst [vmem:[#allocation76_spill] sm:$0xff] %v16959_v36  ;;  %v2609_v2 = vsel %vm2502_vm1, %v2599_v27, %v16941_v41  ;;  %v15488_v8 = vpop.eup %15487  ;;  %v19830_v55 = vld [vmem:[#allocation78_spill] sm:$0xff] }
 0x215   : > { %v12915_v10 = vpack.c.bf16 %v1496_v13, %v1495_v54  ;;  %v12845_v29 = vpack.c.bf16 %v1141_v18, %v1139_v53  ;;  %v1497_v3 = vmul.f32 %v16868_v20, %v1139_v53  ;;  %v1849_v17 = vmul.f32 %v16891_v37, %v1139_v53  ;;  %14051 = vmatpush3.bf16.msra.mxu1 %v14988_v0  ;;  %v15490_v35 = vpop.eup %15489  ;;  %v19831_v54 = vld [vmem:[#allocation79_spill] sm:$0xff] }
 0x216   : > { %13273 = vst [vmem:[#allocation4 + $0x68] sm:$0xff] %v12990_v6   ;;  %v1852_v5 = vmul.f32 %v16910_v32, %v1145_v25  ;;  %v12850_v46 = vpack.c.bf16 %v1145_v25, %v1143_v24  ;;  %v1851_v11 = vmul.f32 %v16912_v9, %v1143_v24  ;;  %v1500_v47 = vmul.f32 %v16926_v39, %v1145_v25 }
 0x217   : > { %14132 = vmatprep.subr.bf16.mxu1 %v16951_v38  ;;  %13258 = vst [vmem:[#allocation2 + $0x68] sm:$0xff] %v12915_v10   ;;  %13244 = vst [vmem:[#allocation3 + $0x70] sm:$0xff] %v12845_v29   ;;  %v12920_v27 = vpack.c.bf16 %v1498_v26, %v1497_v3  ;;  %v12995_v13 = vpack.c.bf16 %v1850_v31, %v1849_v17  ;;  %v1499_v18 = vmul.f32 %v16928_v52, %v1143_v24  ;;  %v16982_v24 = vpop.permute.xlu1 %1821 }
 0x218   : > { %v1149_v22 = vmul.f32 %v15486_v15, %v19830_v55  ;;  %13973 = vmatmul.mubr.bf16.gmra.mxu1 %v2600_v23  ;;  %13245 = vst [vmem:[#allocation3 + $0x78] sm:$0xff] %v12850_v46   ;;  %v13000_v0 = vpack.c.bf16 %v1852_v5, %v1851_v11  ;;  %v1147_v60 = vmul.f32 %v15488_v8, %v19831_v54  ;;  %v14960_v31 = vld [vmem:[#allocation3 + $0x5c] sm:$0xff]   ;;  %v3017_v25 = vshll.u32 %v16967_v33, 16 }
 0x219   : > { %v1151_v53 = vmul.f32 %v15490_v35, %v16686_v16  ;;  %13976 = vmatprep.mubr.bf16.mxu1 %v2609_v2  ;;  %13259 = vst [vmem:[#allocation2 + $0x70] sm:$0xff] %v12920_v27   ;;  %13274 = vst [vmem:[#allocation4 + $0x70] sm:$0xff] %v12995_v13   ;;  %v12925_v6 = vpack.c.bf16 %v1500_v47, %v1499_v18  ;;  %v16984_v2 = vpop.permute.xlu0 %1469  ;;  %13929 = vmatmul.mubr.bf16.gmra.mxu0 %v14960_v31  ;;  %v3015_v11 = vshrl.u32 %v16967_v33, 16  ;;  %v14976_v13 = vld [vmem:[#allocation4 + $0xc] sm:$0xff]  }
 0x21a   : > { %v1502_v28 = vmul.f32 %v16932_v48, %v1149_v22  ;;  %v1854_v26 = vmul.f32 %v16959_v36, %v1149_v22  ;;  %13275 = vst [vmem:[#allocation4 + $0x78] sm:$0xff] %v13000_v0   ;;  %v12855_v15 = vpack.c.bf16 %v1149_v22, %v1147_v60  ;;  %v1501_v23 = vmul.f32 %v16934_v61, %v1147_v60  ;;  %v14969_v35 = vld [vmem:[#allocation2 + $0x60] sm:$0xff]  }
 0x21b   : > { %v1853_v58 = vmul.f32 %v16961_v45, %v1147_v60  ;;  %19832 = vst [vmem:[#allocation68_spill] sm:$0xff] %v16982_v24  ;;  %v12620_v16 = vpack.c.bf16 %v1151_v53, %v1151_v53  ;;  %19833 = vst [vmem:[#allocation69_spill] sm:$0xff] %v16984_v2  ;;  %v1855_v8 = vmul.f32 %v16982_v24, %v1151_v53  ;;  %v14961_v29 = vld [vmem:[#allocation3 + $0x64] sm:$0xff]   ;;  %v3019_v47 = vrot.slane %v3017_v25, 1 }
 0x21c   : > { %13260 = vst [vmem:[#allocation2 + $0x78] sm:$0xff] %v12925_v6   ;;  %v1503_v10 = vmul.f32 %v16984_v2, %v1151_v53  ;;  %13246 = vst [vmem:[#allocation3 + $0x80] sm:$0xff] %v12855_v15   ;;  %v12930_v3 = vpack.c.bf16 %v1502_v28, %v1501_v23  ;;  %13932 = vmatprep.mubr.bf16.mxu0 %v14961_v29  ;;  %v2611_v27 = vshrl.u32 %v14969_v35, 16  ;;  %v2614_v55 = vshll.u32 %v14969_v35, 16  ;;  %v14982_v6 = vld [vmem:[#allocation4 + $0x14] sm:$0xff]  }
 0x21d   : > { %v13005_v17 = vpack.c.bf16 %v1854_v26, %v1853_v58  ;;  %1311 = vst [vmem:[#allocation3 + $0x88] sm:$0xf] %v12620_v16  ;;  %v12684_v5 = vpack.c.bf16 %v1855_v8, %v1855_v8  ;;  %v3022_v31 = vshll.u32 %v14976_v13, 16  ;;  %v14986_v8 = vld [vmem:[#allocation2 + $0x8] sm:$0xf8]  }
 0x21e   : > { %v12652_v46 = vpack.c.bf16 %v1503_v10, %v1503_v10  ;;  %13261 = vst [vmem:[#allocation2 + $0x80] sm:$0xff] %v12930_v3   ;;  %v14967_v18 = vld [vmem:[#allocation3 + $0x6c] sm:$0xff]   ;;  %v2613_v0 = vrot.slane %v2611_v27, 3  ;;  %v2616_v60 = vrot.slane %v2614_v55, 4  ;;  %v14987_v27 = vld [vmem:[#allocation2 + $0x10] sm:$0xff]  }
 0x21f   : > { %13276 = vst [vmem:[#allocation4 + $0x80] sm:$0xff] %v13005_v17   ;;  %2015 = vst [vmem:[#allocation4 + $0x88] sm:$0xf] %v12684_v5  ;;  %v14968_v22 = vld [vmem:[#allocation3 + $0x74] sm:$0xff]   ;;  %v3024_v55 = vrot.slane %v3022_v31, 1  ;;  %v3548_v24 = vshll.u32 %v14987_v27, 16 }
 0x220   : > { %1663 = vst [vmem:[#allocation2 + $0x88] sm:$0xf] %v12652_v46  ;;  %v14971_v54 = vld [vmem:[#allocation2 + $0x68] sm:$0xff]   ;;  %v14977_v53 = vld [vmem:[#allocation2 + $0x70] sm:$0xff]   ;;  %v2617_v33 = vor.u32 %v2616_v60, %v2613_v0  ;;  %v3034_v31 = vshrl.u32 %v14982_v6, 16 }
 0x221   : > { %v2620_v28 = vshrl.u32 %v14971_v54, 16  ;;  %v2623_v26 = vshll.u32 %v14971_v54, 16  ;;  %13933 = vmatmul.mubr.bf16.gmra.mxu0 %v14967_v18  ;;  %v2629_v25 = vshrl.u32 %v14977_v53, 16  ;;  %v2632_v15 = vshll.u32 %v14977_v53, 16  ;;  %v16992_v53 = vld [vmem:[#allocation4 + $0x1c] sm:$0xff]  }
 0x222   : > { %13936 = vmatprep.mubr.bf16.mxu0 %v14968_v22  ;;  %v2618_v10 = vsel %vm2502_vm1, %v16941_v41, %v2617_v33  ;;  %v3020_v18 = vor.u32 %v3019_v47, %v3015_v11  ;;  %v3030_v54 = vshll.u32 %v14982_v6, 16 }
 0x223   : > { %v14979_v23 = vld [vmem:[#allocation2 + $0x78] sm:$0xff]   ;;  %v2622_v58 = vrot.slane %v2620_v28, 3  ;;  %v2625_v16 = vrot.slane %v2623_v26, 4  ;;  %v2631_v29 = vrot.slane %v2629_v25, 3  ;;  %v2634_v3 = vrot.slane %v2632_v15, 4  ;;  %13977 = vmatmul.mubr.bf16.gmra.mxu1 %v2618_v10 }
 0x224   : > { %v2638_v17 = vshrl.u32 %v14979_v23, 16  ;;  %v2641_v5 = vshll.u32 %v14979_v23, 16  ;;  %v3537_v28 = vshrl.u32 %v14986_v8, 16  ;;  %v14974_v41 = vld [vmem:[#allocation3 + $0x7c] sm:$0xff]   ;;  %v3026_v26 = vshrl.u32 %v14976_v13, 16 }
 0x225   : > { %v2626_v35 = vor.u32 %v2625_v16, %v2622_v58  ;;  %v14984_v46 = vld [vmem:[#allocation2 + $0x80] ss:$0 sps:$4 sm:$0xff]   ;;  %v2635_v25 = vor.u32 %v2634_v3, %v2631_v29  ;;  %v3540_v23 = vshll.u32 %v14986_v8, 16  ;;  %v3545_v16 = vshrl.u32 %v14987_v27, 16 }
 0x226   : > { %v2640_v0 = vrot.slane %v2638_v17, 3  ;;  %v2643_v60 = vrot.slane %v2641_v5, 4  ;;  %v2647_v15 = vshrl.u32 %v14984_v46, 16  ;;  %v2650_v10 = vshll.u32 %v14984_v46, 16  ;;  %v14992_v17 = vld [vmem:[#allocation2 + $0x18] sm:$0xff]  }
 0x227   : > { %v2627_v22 = vsel %vm2502_vm1, %v2617_v33, %v2626_v35  ;;  %v3025_v11 = vsel %vm3013_vm2, %v3020_v18, %v3024_v55  ;;  %v3032_v47 = vrot.slane %v3030_v54, 1  ;;  %v14990_v33 = vld [vmem:[#allocation4 + $0x24] sm:$0xff]   ;;  %v3028_v5 = vor.u32 %v3026_v26, %v3024_v55  ;;  %v14993_v18 = vld [vmem:[#allocation2 + $0x20] sm:$0xff]  }
 0x228   : > { %13980 = vmatprep.mubr.bf16.mxu1 %v2627_v22  ;;  %v2644_v58 = vor.u32 %v2643_v60, %v2640_v0  ;;  %v3038_v22 = vshll.u32 %v16992_v53, 16  ;;  %v3539_v36 = vrot.slane %v3537_v28, 3  ;;  %v2636_v13 = vsel %vm2502_vm1, %v2626_v35, %v2635_v25  ;;  %v14989_v60 = vld [vmem:[#allocation8 + $0x130] sm:$0xff]  }
 0x229   : > { %13937 = vmatmul.mubr.bf16.gmra.mxu0 %v14974_v41  ;;  %v2649_v29 = vrot.slane %v2647_v15, 3  ;;  %v2652_v3 = vrot.slane %v2650_v10, 4  ;;  %v3542_v46 = vrot.slane %v3540_v23, 4  ;;  %v3547_v27 = vrot.slane %v3545_v16, 3  ;;  %v16999_v28 = vld [vmem:[#allocation4 + $0x2c] sm:$0xff]   ;;  %v14995_v16 = vld [vmem:[#allocation4 + $0x34] sm:$0xff]  }
 0x22a   : > { %14004 = vmatprep.mubr.bf16.mxu0 %v3025_v11  ;;  %v2645_v8 = vsel %vm2502_vm1, %v2635_v25, %v2644_v58  ;;  %v3550_v0 = vrot.slane %v3548_v24, 4  ;;  %v3036_v6 = vor.u32 %v3034_v31, %v3032_v47  ;;  %v3046_v54 = vshll.u32 %v14990_v33, 16 }
 0x22b   : > { %13981 = vmatmul.mubr.bf16.gmra.mxu1 %v2636_v13  ;;  %v3033_v55 = vsel %vm3013_vm2, %v3028_v5, %v3032_v47  ;;  %v3040_v41 = vrot.slane %v3038_v22, 1  ;;  %v2653_v26 = vor.u32 %v2652_v3, %v2649_v29  ;;  %v3554_v35 = vshrl.u32 %v14992_v17, 16  ;;  %v14994_v5 = vld [vmem:[#allocation8 + $0x128] sm:$0xff]   ;;  %v14997_v22 = vld [vmem:[#allocation2 + $0x28] sm:$0xff]  }
 0x22c   : > { %13984 = vmatprep.mubr.bf16.mxu1 %v2645_v8  ;;  %v3557_v15 = vshll.u32 %v14992_v17, 16  ;;  %v3543_v10 = vor.u32 %v3542_v46, %v3539_v36  ;;  %v3551_v11 = vor.u32 %v3550_v0, %v3547_v27  ;;  %v3563_v13 = vshrl.u32 %v14993_v18, 16  ;;  %v14998_v8 = vld [vmem:[#allocation2 + $0x30] sm:$0xff]  }
 0x22d   : > { %v3566_v25 = vshll.u32 %v14993_v18, 16  ;;  %v3041_v24 = vsel %vm3013_vm2, %v3036_v6, %v3040_v41  ;;  %v3048_v23 = vrot.slane %v3046_v54, 1  ;;  %v3042_v47 = vshrl.u32 %v16992_v53, 16 }
 0x22e   : > { %v3050_v31 = vshrl.u32 %v14990_v33, 16  ;;  %v2654_v29 = vsel %vm2502_vm1, %v2644_v58, %v2653_v26  ;;  %v3054_v36 = vshll.u32 %v16999_v28, 16  ;;  %v3556_v17 = vrot.slane %v3554_v35, 3  ;;  %v17007_v33 = vld [vmem:[#allocation4 + $0x3c] sm:$0xff]  }
 0x22f   : > { %v3559_v3 = vrot.slane %v3557_v15, 4  ;;  %v3552_v46 = vsel %vm2502_vm1, %v3543_v10, %v3551_v11  ;;  %v3044_v27 = vor.u32 %v3042_v47, %v3040_v41  ;;  %v3565_v0 = vrot.slane %v3563_v13, 3  ;;  %v14999_v26 = vld [vmem:[#allocation8 + $0x120] sm:$0xff]   ;;  %v17010_v41 = vld [vmem:[#allocation4 + $0x44] sm:$0xff]  }
 0x230   : > { %v3052_v18 = vor.u32 %v3050_v31, %v3048_v23  ;;  %v3062_v53 = vshll.u32 %v14995_v16, 16  ;;  %v3056_v6 = vrot.slane %v3054_v36, 1  ;;  %v3572_v54 = vshrl.u32 %v14997_v22, 16  ;;  %v15015_v13 = vld [vmem:[#allocation8 + $0x170] sm:$0xff]   ;;  %v15004_v31 = vld [vmem:[#allocation8 + $0x118] sm:$0xff]  }
 0x231   : > { %14005 = vmatmul.mubr.bf16.vlgmr.msra.gmra.mxu0 %v3033_v55  ;;  %v3560_v58 = vor.u32 %v3559_v3, %v3556_v17  ;;  %v3575_v55 = vshll.u32 %v14997_v22, 16  ;;  %v3049_v35 = vsel %vm3013_vm2, %v3044_v27, %v3048_v23  ;;  %v3584_v10 = vshll.u32 %v14998_v8, 16  ;;  %v15002_v47 = vld [vmem:[#allocation2 + $0x38] sm:$0xff]   ;;  %v15003_v23 = vld [vmem:[#allocation2 + $0x40] sm:$0xff]  }
 0x232   : > { %14085 = vmatpush3.bf16.msra.mxu0 %v16917_v56  ;;  %14008 = vmatprep.mubr.bf16.mxu0 %v3041_v24  ;;  %v3568_v56 = vrot.slane %v3566_v25, 4  ;;  %v3581_v24 = vshrl.u32 %v14998_v8, 16  ;;  %v3057_v25 = vsel %vm3013_vm2, %v3052_v18, %v3056_v6  ;;  %v3066_v22 = vshrl.u32 %v14995_v16, 16  ;;  %v15020_v16 = vld [vmem:[#allocation8 + $0x168] sm:$0xff]  }
 0x233   : > { %14086 = vmatprep.subr.bf16.mxu0 %v14989_v60  ;;  %13985 = vmatmul.mubr.bf16.gmra.mxu1 %v2654_v29  ;;  %v3058_v29 = vshrl.u32 %v16999_v28, 16  ;;  %v3070_v36 = vshll.u32 %v17007_v33, 16  ;;  %v3561_v17 = vsel %vm2502_vm1, %v3551_v11, %v3560_v58  ;;  %v3574_v3 = vrot.slane %v3572_v54, 3  ;;  %v17019_v54 = vld [vmem:[#allocation4 + $0x4c] sm:$0xff]  }
 0x234   : > { %14052 = vmatprep.mubr.bf16.mxu1 %v3552_v46  ;;  %v3569_v15 = vor.u32 %v3568_v56, %v3565_v0  ;;  %v3577_v8 = vrot.slane %v3575_v55, 4  ;;  %v3583_v0 = vrot.slane %v3581_v24, 3  ;;  %v3586_v56 = vrot.slane %v3584_v10, 4 }
 0x235   : > { %v3060_v27 = vor.u32 %v3058_v29, %v3056_v6  ;;  %v3078_v28 = vshll.u32 %v17010_v41, 16  ;;  %v3072_v11 = vrot.slane %v3070_v36, 1  ;;  %v3590_v55 = vshrl.u32 %v15002_v47, 16  ;;  %v15022_v36 = vld [vmem:[#allocation8 + $0x160] sm:$0xff]  }
 0x236   : > { %14087 = vmatpush3.bf16.msra.mxu0 %v14989_v60  ;;  %v3064_v60 = vrot.slane %v3062_v53, 1  ;;  %v3570_v46 = vsel %vm2502_vm1, %v3560_v58, %v3569_v15  ;;  %v3578_v53 = vor.u32 %v3577_v8, %v3574_v3  ;;  %v3587_v58 = vor.u32 %v3586_v56, %v3583_v0  ;;  %v15007_v8 = vld [vmem:[#allocation2 + $0x48] sm:$0xff]   ;;  %v15008_v0 = vld [vmem:[#allocation2 + $0x50] sm:$0xff]   ;;  %v15027_v56 = vld [vmem:[#allocation8 + $0x158] sm:$0xff]  }
 0x237   : > { %14088 = vmatprep.subr.bf16.mxu0 %v14994_v5  ;;  %v3599_v24 = vshrl.u32 %v15003_v23, 16  ;;  %v3602_v10 = vshll.u32 %v15003_v23, 16  ;;  %v3080_v29 = vrot.slane %v3078_v28, 1  ;;  %v3592_v23 = vrot.slane %v3590_v55, 3  ;;  %v17031_v55 = vld [vmem:[#allocation4 + $0x5c] sm:$0xff]  }
 0x238   : > { %v3068_v18 = vor.u32 %v3066_v22, %v3064_v60  ;;  %v3065_v6 = vsel %vm3013_vm2, %v3060_v27, %v3064_v60  ;;  %v3082_v22 = vshrl.u32 %v17010_v41, 16  ;;  %v3579_v60 = vsel %vm2502_vm1, %v3569_v15, %v3578_v53  ;;  %v15023_v15 = vld [vmem:[#allocation8 + $0x100] sm:$0xff]  }
 0x239   : > { %14009 = vmatmul.mubr.bf16.gmra.mxu0 %v3049_v35  ;;  %v3593_v35 = vshll.u32 %v15002_v47, 16  ;;  %v15016_v47 = vld [vmem:[#allocation8 + $0x108] sm:$0xff]   ;;  %v3601_v27 = vrot.slane %v3599_v24, 3  ;;  %v3617_v24 = vshrl.u32 %v15008_v0, 16 }
 0x23a   : > { %14012 = vmatprep.mubr.bf16.mxu0 %v3057_v25  ;;  %14089 = vmatpush3.bf16.msra.mxu0 %v14994_v5  ;;  %v15009_v5 = vld [vmem:[#allocation8 + $0x110] sm:$0xff]   ;;  %v3073_v25 = vsel %vm3013_vm2, %v3068_v18, %v3072_v11  ;;  %v3084_v41 = vor.u32 %v3082_v22, %v3080_v29 }
 0x23b   : > { %14090 = vmatprep.subr.bf16.mxu0 %v14999_v26  ;;  %14053 = vmatmul.mubr.bf16.vlgmr.msra.gmra.mxu1 %v3561_v17  ;;  %v3086_v17 = vshll.u32 %v17019_v54, 16  ;;  %v3595_v3 = vrot.slane %v3593_v35, 4  ;;  %v3608_v35 = vshrl.u32 %v15007_v8, 16  ;;  %v15029_v22 = vld [vmem:[#allocation8 + $0x150] sm:$0xff]  }
 0x23c   : > { %14056 = vmatprep.mubr.bf16.mxu1 %v3570_v46  ;;  %14133 = vmatpush3.bf16.msra.mxu1 %v16951_v38  ;;  %v17023_v38 = vld [vmem:[#allocation4 + $0x54] sm:$0xff]  }
 0x23d   : > { %14134 = vmatprep.subr.bf16.mxu1 %v15015_v13  ;;  %v3088_v18 = vrot.slane %v3086_v17, 1  ;;  %v3596_v28 = vor.u32 %v3595_v3, %v3592_v23  ;;  %v3098_v17 = vshrl.u32 %v17023_v38, 16  ;;  %v3610_v3 = vrot.slane %v3608_v35, 3 }
 0x23e   : > { %14091 = vmatpush3.bf16.msra.mxu0 %v14999_v26  ;;  %v3074_v26 = vshrl.u32 %v17007_v33, 16  ;;  %v3604_v33 = vrot.slane %v3602_v10, 4  ;;  %v3620_v10 = vshll.u32 %v15008_v0, 16 }
 0x23f   : > { %14092 = vmatprep.subr.bf16.mxu0 %v15004_v31  ;;  %v3597_v23 = vsel %vm2502_vm1, %v3587_v58, %v3596_v28 }
 0x240   : > { %14135 = vmatpush3.bf16.msra.mxu1 %v15015_v13  ;;  %v3588_v13 = vsel %vm2502_vm1, %v3578_v53, %v3587_v58  ;;  %v3076_v46 = vor.u32 %v3074_v26, %v3072_v11  ;;  %v3605_v53 = vor.u32 %v3604_v33, %v3601_v27  ;;  %v15012_v26 = vld [vmem:[#allocation2 + $0x58] sm:$0xff]   ;;  %v3619_v27 = vrot.slane %v3617_v24, 3  ;;  %v15034_v58 = vld [vmem:[#allocation8 + $0x148] sm:$0xff]  }
 0x241   : > { %14013 = vmatmul.mubr.bf16.gmra.mxu0 %v3065_v6  ;;  %14136 = vmatprep.subr.bf16.mxu1 %v15020_v16  ;;  %v3611_v6 = vshll.u32 %v15007_v8, 16  ;;  %v3622_v33 = vrot.slane %v3620_v10, 4  ;;  %v3626_v35 = vshrl.u32 %v15012_v26, 16 }
 0x242   : > { %14016 = vmatprep.mubr.bf16.mxu0 %v3073_v25  ;;  %14093 = vmatpush3.bf16.msra.mxu0 %v15004_v31  ;;  %v3094_v31 = vshll.u32 %v17023_v38, 16  ;;  %v3081_v11 = vsel %vm3013_vm2, %v3076_v46, %v3080_v29  ;;  %v3089_v25 = vsel %vm3013_vm2, %v3084_v41, %v3088_v18  ;;  %v3102_v29 = vshll.u32 %v17031_v55, 16 }
 0x243   : > { %14094 = vmatprep.subr.bf16.mxu0 %v15009_v5  ;;  %14057 = vmatmul.mubr.bf16.gmra.mxu1 %v3579_v60  ;;  %v3090_v60 = vshrl.u32 %v17019_v54, 16  ;;  %v3613_v8 = vrot.slane %v3611_v6, 4  ;;  %v15014_v54 = vld [vmem:[#allocation2 + $0x60] sm:$0xff]   ;;  %v3629_v6 = vshll.u32 %v15012_v26, 16 }
 0x244   : > { %14060 = vmatprep.mubr.bf16.mxu1 %v3588_v13  ;;  %14137 = vmatpush3.bf16.msra.mxu1 %v15020_v16  ;;  %v3096_v16 = vrot.slane %v3094_v31, 1  ;;  %v17039_v13 = vld [vmem:[#allocation8 + $0x1b8] sm:$0xff]   ;;  %v3104_v0 = vrot.slane %v3102_v29, 1  ;;  %v3638_v24 = vshll.u32 %v15014_v54, 16  ;;  %v3628_v29 = vrot.slane %v3626_v35, 3 }
 0x245   : > { %14138 = vmatprep.subr.bf16.mxu1 %v15022_v36  ;;  %v3092_v46 = vor.u32 %v3090_v60, %v3088_v18  ;;  %v3614_v41 = vor.u32 %v3613_v8, %v3610_v3  ;;  %v15011_v31 = vld [vmem:[#allocation4 + $0x6c] sm:$0xff]   ;;  %v3623_v18 = vor.u32 %v3622_v33, %v3619_v27  ;;  %v3106_v60 = vshrl.u32 %v17031_v55, 16  ;;  %v15019_v3 = vld [vmem:[#allocation2 + $0x68] sm:$0xff]   ;;  %v15021_v33 = vld [vmem:[#allocation2 + $0x70] sm:$0xff]  }
 0x246   : > { %14095 = vmatpush3.bf16.msra.mxu0 %v15009_v5  ;;  %v15010_v5 = vld [vmem:[#allocation4 + $0x64] sm:$0xff]   ;;  %v3100_v38 = vor.u32 %v3098_v17, %v3096_v16  ;;  %v3640_v27 = vrot.slane %v3638_v24, 4  ;;  %v15018_v55 = vld [vmem:[#allocation4 + $0x7c] sm:$0xff]   ;;  %v3647_v35 = vshll.u32 %v15019_v3, 16 }
 0x247   : > { %14096 = vmatprep.subr.bf16.mxu0 %v15016_v47  ;;  %v3114_v17 = vshrl.u32 %v15010_v5, 16  ;;  %v3615_v26 = vsel %vm2502_vm1, %v3605_v53, %v3614_v41  ;;  %v3624_v8 = vsel %vm2502_vm1, %v3614_v41, %v3623_v18  ;;  %v3653_v41 = vshrl.u32 %v15021_v33, 16 }
 0x248   : > { %14139 = vmatpush3.bf16.msra.mxu1 %v15022_v36  ;;  %v3606_v36 = vsel %vm2502_vm1, %v3596_v28, %v3605_v53  ;;  %v3097_v28 = vsel %vm3013_vm2, %v3092_v46, %v3096_v16  ;;  %v3105_v10 = vsel %vm3013_vm2, %v3100_v38, %v3104_v0  ;;  %v3631_v16 = vrot.slane %v3629_v6, 4 }
 0x249   : > { %14017 = vmatmul.mubr.bf16.gmra.mxu0 %v3081_v11  ;;  %14140 = vmatprep.subr.bf16.mxu1 %v15027_v56  ;;  %v3635_v11 = vshrl.u32 %v15014_v54, 16 }
 0x24a   : > { %14020 = vmatprep.mubr.bf16.mxu0 %v3089_v25  ;;  %14097 = vmatpush3.bf16.msra.mxu0 %v15016_v47  ;;  %v3110_v47 = vshll.u32 %v15010_v5, 16  ;;  %v17048_v5 = vld [vmem:[#allocation8 + $0x1f8] sm:$0xff]   ;;  %v3632_v38 = vor.u32 %v3631_v16, %v3628_v29  ;;  %v3649_v29 = vrot.slane %v3647_v35, 4 }
 0x24b   : > { %14098 = vmatprep.subr.bf16.mxu0 %v15023_v15  ;;  %14061 = vmatmul.mubr.bf16.gmra.mxu1 %v3597_v23  ;;  %v3118_v23 = vshll.u32 %v15011_v31, 16  ;;  %v3637_v46 = vrot.slane %v3635_v11, 3 }
 0x24c   : > { %14064 = vmatprep.mubr.bf16.mxu1 %v3606_v36  ;;  %14141 = vmatpush3.bf16.msra.mxu1 %v15027_v56  ;;  %v3112_v25 = vrot.slane %v3110_v47, 1  ;;  %v15017_v56 = vld [vmem:[#allocation4 + $0x74] sm:$0xff]   ;;  %v3108_v36 = vor.u32 %v3106_v60, %v3104_v0  ;;  %v3644_v47 = vshrl.u32 %v15019_v3, 16  ;;  %v3656_v0 = vshll.u32 %v15021_v33, 16 }
 0x24d   : > { %14142 = vmatprep.subr.bf16.mxu1 %v15029_v22  ;;  %v3126_v54 = vshll.u32 %v15017_v56, 16  ;;  %v3120_v53 = vrot.slane %v3118_v23, 1  ;;  %v3134_v60 = vshll.u32 %v15018_v55, 16  ;;  %v3655_v3 = vrot.slane %v3653_v41, 3 }
 0x24e   : > { %14099 = vmatpush3.bf16.msra.mxu0 %v15023_v15  ;;  %v15037_v15 = vld [vmem:[#allocation8 + $0x140] sm:$0xff]   ;;  %v3113_v6 = vsel %vm3013_vm2, %v3108_v36, %v3112_v25  ;;  %v3646_v23 = vrot.slane %v3644_v47, 3  ;;  %v15028_v36 = vld [vmem:[#allocation2 + $0x80] sm:$0xff]  }
 0x24f   : > { %14180 = vmatprep.subr.bf16.mxu0 %v17039_v13  ;;  %v3128_v24 = vrot.slane %v3126_v54, 1  ;;  %v3674_v47 = vshll.u32 %v15028_v36, 16 }
 0x250   : > { %14143 = vmatpush3.bf16.msra.mxu1 %v15029_v22  ;;  %v3116_v22 = vor.u32 %v3114_v17, %v3112_v25  ;;  %v15026_v17 = vld [vmem:[#allocation2 + $0x78] sm:$0xff]  }
 0x251   : > { %14021 = vmatmul.mubr.bf16.gmra.mxu0 %v3097_v28  ;;  %14144 = vmatprep.subr.bf16.mxu1 %v15034_v58  ;;  %v3641_v28 = vor.u32 %v3640_v27, %v3637_v46  ;;  %v15024_v46 = vld [vmem:[#allocation4 + $0x84] ss:$0 sps:$4 sm:$0x11]   ;;  %v3662_v27 = vshrl.u32 %v15026_v17, 16  ;;  %v3665_v33 = vshll.u32 %v15026_v17, 16  ;;  %v15035_v17 = vld [vmem:[#allocation4 + $0xc] sm:$0xff]  }
 0x252   : > { %14024 = vmatprep.mubr.bf16.mxu0 %v3105_v10  ;;  %v3121_v11 = vsel %vm3013_vm2, %v3116_v22, %v3120_v53  ;;  %v3130_v10 = vshrl.u32 %v15017_v56, 16  ;;  %v3650_v56 = vor.u32 %v3649_v29, %v3646_v23 }
 0x253   : > { %14065 = vmatmul.mubr.bf16.gmra.mxu1 %v3615_v26  ;;  %v3633_v26 = vsel %vm2502_vm1, %v3623_v18, %v3632_v38  ;;  %v3642_v25 = vsel %vm2502_vm1, %v3632_v38, %v3641_v28  ;;  %v3671_v18 = vshrl.u32 %v15028_v36, 16  ;;  %v3142_v38 = vshll.u32 %v15024_v46, 16 }
 0x254   : > { %14068 = vmatprep.mubr.bf16.mxu1 %v3624_v8  ;;  %14145 = vmatpush3.bf16.msra.mxu1 %v15034_v58  ;;  %v3122_v58 = vshrl.u32 %v15011_v31, 16  ;;  %v3658_v8 = vrot.slane %v3656_v0, 4  ;;  %v3136_v31 = vrot.slane %v3134_v60, 1  ;;  %v3651_v41 = vsel %vm2502_vm1, %v3641_v28, %v3650_v56  ;;  %v15036_v28 = vld [vmem:[#allocation4 + $0x14] sm:$0xff]  }
 0x255   : > { %14146 = vmatprep.subr.bf16.mxu1 %v15037_v15  ;;  %v3664_v0 = vrot.slane %v3662_v27, 3  ;;  %v3673_v60 = vrot.slane %v3671_v18, 3  ;;  %v4472_v18 = vshll.u32 %v15036_v28, 16 }
 0x256   : > { %v3124_v16 = vor.u32 %v3122_v58, %v3120_v53  ;;  %v3659_v54 = vor.u32 %v3658_v8, %v3655_v3  ;;  %v3138_v53 = vshrl.u32 %v15018_v55, 16  ;;  %v4467_v8 = vshll.u32 %v15035_v17, 16 }
 0x258   : > { %14147 = vmatpush3.bf16.msra.mxu1 %v15037_v15  ;;  %v3132_v15 = vor.u32 %v3130_v10, %v3128_v24  ;;  %v3129_v22 = vsel %vm3013_vm2, %v3124_v16, %v3128_v24  ;;  %v3660_v58 = vsel %vm2502_vm1, %v3650_v56, %v3659_v54  ;;  %v3140_v10 = vor.u32 %v3138_v53, %v3136_v31  ;;  %v15025_v16 = vld [vmem:[#allocation3 + $0xc] sm:$0xff]  }
 0x259   : > { %14025 = vmatmul.mubr.bf16.gmra.mxu0 %v3113_v6  ;;  %14228 = vmatprep.subr.bf16.mxu1 %v17048_v5  ;;  %v15033_v6 = vld [vmem:[#allocation2 + $0x88] ss:$0 sps:$4 sm:$0xff]   ;;  %v3676_v24 = vrot.slane %v3674_v47, 4  ;;  %v4469_v27 = vrot.slane %v4467_v8, 1 }
 0x25a   : > { %14028 = vmatprep.mubr.bf16.mxu0 %v3121_v11  ;;  %v3137_v35 = vsel %vm3013_vm2, %v3132_v15, %v3136_v31  ;;  %v3667_v11 = vrot.slane %v3665_v33, 4  ;;  %v3680_v29 = vshrl.u32 %v15033_v6, 16  ;;  %v15041_v31 = vld [vmem:[#allocation4 + $0x1c] sm:$0xff]   ;;  %v15047_v8 = vld [vmem:[#allocation4 + $0x34] sm:$0xff]  }
 0x25b   : > { %14069 = vmatmul.mubr.bf16.gmra.mxu1 %v3633_v26  ;;  %v3144_v26 = vrot.slane %v3142_v38, 1  ;;  %v3677_v3 = vor.u32 %v3676_v24, %v3673_v60  ;;  %v15031_v33 = vld [vmem:[#allocation3 + $0x14] sm:$0xff]   ;;  %v4480_v53 = vshll.u32 %v15041_v31, 16  ;;  %v15032_v38 = vld [vmem:[#allocation3 + $0x1c] sm:$0xff]   ;;  %v4476_v24 = vshrl.u32 %v15036_v28, 16  ;;  %v15053_v28 = vld [vmem:[#allocation8 + $0x198] sm:$0xff]  }
 0x25c   : > { %14072 = vmatprep.mubr.bf16.mxu1 %v3642_v25  ;;  %v3668_v23 = vor.u32 %v3667_v11, %v3664_v0  ;;  %v3683_v25 = vshll.u32 %v15033_v6, 16  ;;  %v3682_v15 = vrot.slane %v3680_v29, 3  ;;  %v15039_v29 = vld [vmem:[#allocation3 + $0x24] sm:$0xff]  }
 0x25d   : > { %v3145_v55 = vsel %vm3013_vm2, %v3140_v10, %v3144_v26  ;;  %v4482_v11 = vrot.slane %v4480_v53, 1  ;;  %v15046_v10 = vld [vmem:[#allocation4 + $0x2c] sm:$0xff]   ;;  %v15069_v53 = vld [vmem:[#allocation8 + $0x1e8] sm:$0xff]  }
 0x25e   : > { %v3669_v36 = vsel %vm2502_vm1, %v3659_v54, %v3668_v23  ;;  %v3685_v46 = vrot.slane %v3683_v25, 4  ;;  %v3678_v56 = vsel %vm2502_vm1, %v3668_v23, %v3677_v3  ;;  %v4474_v54 = vrot.slane %v4472_v18, 1  ;;  %v15040_v25 = vld [vmem:[#allocation3 + $0x2c] sm:$0xff]  }
 0x25f   : > { %v4504_v18 = vshll.u32 %v15047_v8, 16 }
 0x260   : > { %v3686_v47 = vor.u32 %v3685_v46, %v3682_v15  ;;  %v4478_v23 = vor.u32 %v4476_v24, %v4474_v54  ;;  %v15056_v24 = vld [vmem:[#allocation4 + $0x4c] sm:$0xff]  }
 0x261   : > { %14029 = vmatmul.mubr.bf16.gmra.mxu0 %v3129_v22  ;;  %v4465_v22 = vshrl.u32 %v15035_v17, 16  ;;  %v4484_v17 = vshrl.u32 %v15041_v31, 16 }
 0x262   : > { %14032 = vmatprep.mubr.bf16.mxu0 %v3137_v35  ;;  %v15038_v35 = vld [vmem:[#allocation8 + $0x1b0] sm:$0xff]   ;;  %v3687_v0 = vsel %vm2502_vm1, %v3677_v3, %v3686_v47  ;;  %v4483_v15 = vsel %vm3013_vm2, %v4478_v23, %v4482_v11 }
 0x263   : > { %14073 = vmatmul.mubr.bf16.gmra.mxu1 %v3651_v41  ;;  %v4470_v6 = vor.u32 %v4469_v27, %v4465_v22  ;;  %v15042_v41 = vld [vmem:[#allocation4 + $0x24] sm:$0xff]   ;;  %v4500_v22 = vshrl.u32 %v15046_v10, 16 }
 0x264   : > { %14076 = vmatprep.mubr.bf16.mxu1 %v3660_v58  ;;  %v15043_v58 = vld [vmem:[#allocation8 + $0x1a8] sm:$0xff]   ;;  %v4488_v26 = vshll.u32 %v15042_v41, 16  ;;  %v4492_v27 = vshrl.u32 %v15042_v41, 16  ;;  %v15058_v47 = vld [vmem:[#allocation8 + $0x190] sm:$0xff]   ;;  %v15071_v41 = vld [vmem:[#allocation8 + $0x1e0] sm:$0xff]  }
 0x265   : > { %v4475_v60 = vsel %vm3013_vm2, %v4470_v6, %v4474_v54 }
 0x266   : > { %v4490_v3 = vrot.slane %v4488_v26, 1  ;;  %v4508_v26 = vshrl.u32 %v15047_v8, 16 }
 0x269   : > { %14033 = vmatmul.mubr.bf16.gmra.mxu0 %v3145_v55  ;;  %v4486_v55 = vor.u32 %v4484_v17, %v4482_v11  ;;  %v15052_v11 = vld [vmem:[#allocation4 + $0x44] sm:$0xff]   ;;  %v15049_v17 = vld [vmem:[#allocation3 + $0x44] sm:$0xff]  }
 0x26a   : > { %14100 = vmatprep.mubr.bf16.mxu0 %v15025_v16  ;;  %v4496_v16 = vshll.u32 %v15046_v10, 16 }
 0x26b   : > { %14077 = vmatmul.mubr.bf16.gmra.mxu1 %v3669_v36  ;;  %v15064_v36 = vld [vmem:[#allocation8 + $0x1f0] sm:$0xff]   ;;  %v4491_v46 = vsel %vm3013_vm2, %v4486_v55, %v4490_v3  ;;  %v15077_v55 = vld [vmem:[#allocation8 + $0x1d8] sm:$0xff]  }
 0x26c   : > { %14080 = vmatprep.mubr.bf16.mxu1 %v3678_v56  ;;  %v4498_v31 = vrot.slane %v4496_v16, 1  ;;  %v15051_v56 = vld [vmem:[#allocation4 + $0x3c] sm:$0xff]   ;;  %v15050_v16 = vld [vmem:[#allocation3 + $0x4c] sm:$0xff]  }
 0x26d   : > { %v4512_v54 = vshll.u32 %v15051_v56, 16  ;;  %v4516_v23 = vshrl.u32 %v15051_v56, 16 }
 0x26e   : > { %v4502_v6 = vor.u32 %v4500_v22, %v4498_v31  ;;  %v4524_v22 = vshrl.u32 %v15052_v11, 16 }
 0x271   : > { %14101 = vmatmul.mubr.bf16.vlgmr.msra.gmra.mxu0 %v15031_v33  ;;  %v15044_v33 = vld [vmem:[#allocation3 + $0x34] sm:$0xff]  }
 0x272   : > { %14181 = vmatpush3.bf16.msra.mxu0 %v17039_v13  ;;  %14104 = vmatprep.mubr.bf16.mxu0 %v15032_v38  ;;  %v15048_v13 = vld [vmem:[#allocation8 + $0x1a0] sm:$0xff]   ;;  %v15045_v38 = vld [vmem:[#allocation3 + $0x3c] sm:$0xff]  }
 0x273   : > { %14182 = vmatprep.subr.bf16.mxu0 %v15038_v35  ;;  %14081 = vmatmul.mubr.bf16.gmra.mxu1 %v3687_v0  ;;  %v4506_v0 = vrot.slane %v4504_v18, 1  ;;  %v4532_v18 = vshrl.u32 %v15056_v24, 16 }
 0x274   : > { %14148 = vmatprep.mubr.bf16.mxu1 %v4475_v60  ;;  %v4514_v60 = vrot.slane %v4512_v54, 1 }
 0x275   : > { %v4507_v10 = vsel %vm3013_vm2, %v4502_v6, %v4506_v0  ;;  %v15055_v6 = vld [vmem:[#allocation3 + $0x5c] sm:$0xff]  }
 0x276   : > { %14183 = vmatpush3.bf16.msra.mxu0 %v15038_v35  ;;  %v4494_v35 = vor.u32 %v4492_v27, %v4490_v3  ;;  %v4518_v3 = vor.u32 %v4516_v23, %v4514_v60 }
 0x277   : > { %14184 = vmatprep.subr.bf16.mxu0 %v15043_v58 }
 0x279   : > { %14105 = vmatmul.mubr.bf16.gmra.mxu0 %v15039_v29  ;;  %v4520_v29 = vshll.u32 %v15052_v11, 16  ;;  %v15086_v11 = vld [vmem:[#allocation8 + $0x1c0] sm:$0xff]  }
 0x27a   : > { %14108 = vmatprep.mubr.bf16.mxu0 %v15040_v25  ;;  %14185 = vmatpush3.bf16.msra.mxu0 %v15043_v58  ;;  %v15065_v58 = vld [vmem:[#allocation8 + $0x188] sm:$0xff]   ;;  %v4510_v25 = vor.u32 %v4508_v26, %v4506_v0 }
 0x27b   : > { %14186 = vmatprep.subr.bf16.mxu0 %v15048_v13  ;;  %14149 = vmatmul.mubr.bf16.vlgmr.msra.gmra.mxu1 %v4483_v15  ;;  %v15057_v15 = vld [vmem:[#allocation4 + $0x54] sm:$0xff]  }
 0x27c   : > { %14152 = vmatprep.mubr.bf16.mxu1 %v4491_v46  ;;  %14229 = vmatpush3.bf16.msra.mxu1 %v17048_v5  ;;  %v4499_v5 = vsel %vm3013_vm2, %v4494_v35, %v4498_v31  ;;  %v15079_v46 = vld [vmem:[#allocation8 + $0x1d0] sm:$0xff]   ;;  %v4515_v8 = vsel %vm3013_vm2, %v4510_v25, %v4514_v60  ;;  %v17071_v31 = vld [vmem:[#allocation8 + $0x238] sm:$0xff]   ;;  %v15084_v35 = vld [vmem:[#allocation8 + $0x1c8] sm:$0xff]  }
 0x27d   : > { %14230 = vmatprep.subr.bf16.mxu1 %v15064_v36  ;;  %v15060_v25 = vld [vmem:[#allocation3 + $0x6c] sm:$0xff]  }
 0x27e   : > { %14187 = vmatpush3.bf16.msra.mxu0 %v15048_v13  ;;  %v15072_v13 = vld [vmem:[#allocation8 + $0x180] sm:$0xff]  }
 0x27f   : > { %14188 = vmatprep.subr.bf16.mxu0 %v15053_v28 }
 0x280   : > { %14231 = vmatpush3.bf16.msra.mxu1 %v15064_v36  ;;  %v4528_v36 = vshll.u32 %v15056_v24, 16  ;;  %v15068_v24 = vld [vmem:[#allocation4 + $0x6c] sm:$0xff]  }
 0x281   : > { %14109 = vmatmul.mubr.bf16.gmra.mxu0 %v15044_v33  ;;  %14232 = vmatprep.subr.bf16.mxu1 %v15069_v53  ;;  %v15061_v33 = vld [vmem:[#allocation4 + $0x5c] sm:$0xff]  }
 0x282   : > { %14112 = vmatprep.mubr.bf16.mxu0 %v15045_v38  ;;  %14189 = vmatpush3.bf16.msra.mxu0 %v15053_v28  ;;  %v4522_v28 = vrot.slane %v4520_v29, 1  ;;  %v4530_v27 = vrot.slane %v4528_v36, 1  ;;  %v4544_v0 = vshll.u32 %v15061_v33, 16  ;;  %v4548_v26 = vshrl.u32 %v15061_v33, 16  ;;  %v15059_v29 = vld [vmem:[#allocation3 + $0x64] sm:$0xff]  }
 0x283   : > { %14190 = vmatprep.subr.bf16.mxu0 %v15058_v47  ;;  %14153 = vmatmul.mubr.bf16.gmra.mxu1 %v4499_v5  ;;  %v15063_v5 = vld [vmem:[#allocation4 + $0x64] sm:$0xff]  }
 0x284   : > { %14156 = vmatprep.mubr.bf16.mxu1 %v4507_v10  ;;  %14233 = vmatpush3.bf16.msra.mxu1 %v15069_v53  ;;  %v4523_v56 = vsel %vm3013_vm2, %v4518_v3, %v4522_v28  ;;  %v15054_v53 = vld [vmem:[#allocation3 + $0x54] sm:$0xff]   ;;  %v4526_v38 = vor.u32 %v4524_v22, %v4522_v28  ;;  %v4534_v54 = vor.u32 %v4532_v18, %v4530_v27  ;;  %v4546_v60 = vrot.slane %v4544_v0, 1  ;;  %v15075_v36 = vld [vmem:[#allocation2 + $0x18] sm:$0xff]  }
 0x285   : > { %14234 = vmatprep.subr.bf16.mxu1 %v15071_v41  ;;  %v4552_v23 = vshll.u32 %v15063_v5, 16  ;;  %v15074_v3 = vld [vmem:[#allocation2 + $0x10] sm:$0xf8]  }
 0x286   : > { %14191 = vmatpush3.bf16.msra.mxu0 %v15058_v47  ;;  %v4536_v47 = vshll.u32 %v15057_v15, 16  ;;  %v15076_v22 = vld [vmem:[#allocation4 + $0x7c] sm:$0xff]   ;;  %v4987_v18 = vshrl.u32 %v15074_v3, 16 }
 0x287   : > { %14192 = vmatprep.subr.bf16.mxu0 %v15065_v58  ;;  %v4554_v28 = vrot.slane %v4552_v23, 1  ;;  %v15082_v23 = vld [vmem:[#allocation2 + $0x28] sm:$0xff]  }
 0x288   : > { %14235 = vmatpush3.bf16.msra.mxu1 %v15071_v41  ;;  %v4538_v41 = vrot.slane %v4536_v47, 1  ;;  %v4990_v47 = vshll.u32 %v15074_v3, 16 }
 0x289   : > { %14113 = vmatmul.mubr.bf16.gmra.mxu0 %v15049_v17  ;;  %14236 = vmatprep.subr.bf16.mxu1 %v15077_v55  ;;  %v4540_v17 = vshrl.u32 %v15057_v15, 16 }
 0x28a   : > { %14116 = vmatprep.mubr.bf16.mxu0 %v15050_v16  ;;  %14193 = vmatpush3.bf16.msra.mxu0 %v15065_v58  ;;  %v4531_v58 = vsel %vm3013_vm2, %v4526_v38, %v4530_v27  ;;  %v4539_v10 = vsel %vm3013_vm2, %v4534_v54, %v4538_v41  ;;  %v4560_v16 = vshll.u32 %v15068_v24, 16  ;;  %v4556_v27 = vshrl.u32 %v15063_v5, 16  ;;  %v15066_v54 = vld [vmem:[#allocation3 + $0x74] sm:$0xff]  }
 0x28b   : > { %14194 = vmatprep.subr.bf16.mxu0 %v15072_v13  ;;  %14157 = vmatmul.mubr.bf16.gmra.mxu1 %v4515_v8  ;;  %v19834_v8 = vmov 0.0   ;;  %v4564_v38 = vshrl.u32 %v15068_v24, 16 }
 0x28c   : > { %14160 = vmatprep.mubr.bf16.mxu1 %v4523_v56  ;;  %14237 = vmatpush3.bf16.msra.mxu1 %v15077_v55  ;;  %v4550_v55 = vor.u32 %v4548_v26, %v4546_v60  ;;  %v4562_v33 = vrot.slane %v4560_v16, 1  ;;  %v4558_v0 = vor.u32 %v4556_v27, %v4554_v28  ;;  %v5013_v27 = vshrl.u32 %v15082_v23, 16 }
 0x28d   : > { %14238 = vmatprep.subr.bf16.mxu1 %v15079_v46 }
 0x28e   : > { %14195 = vmatpush3.bf16.msra.mxu0 %v15072_v13  ;;  %v4542_v13 = vor.u32 %v4540_v17, %v4538_v41  ;;  %v4555_v56 = vsel %vm3013_vm2, %v4550_v55, %v4554_v28  ;;  %v15067_v41 = vld [vmem:[#allocation3 + $0x7c] sm:$0xff]   ;;  %v4992_v17 = vrot.slane %v4990_v47, 4  ;;  %v4580_v47 = vshrl.u32 %v15076_v22, 16 }
 0x28f   : > { %14276 = vmatprep.subr.bf16.mxu0 %v17071_v31 }
 0x290   : > { %14239 = vmatpush3.bf16.msra.mxu1 %v15079_v46  ;;  %v15070_v46 = vld [vmem:[#allocation4 + $0x74] sm:$0xff]   ;;  %v4547_v15 = vsel %vm3013_vm2, %v4542_v13, %v4546_v60  ;;  %v4989_v60 = vrot.slane %v4987_v18, 3  ;;  %v15078_v13 = vld [vmem:[#allocation4 + $0x84] sm:$0xff]   ;;  %v5016_v18 = vshll.u32 %v15082_v23, 16 }
 0x291   : > { %14117 = vmatmul.mubr.bf16.gmra.mxu0 %v15054_v53  ;;  %14240 = vmatprep.subr.bf16.mxu1 %v15084_v35  ;;  %v4998_v53 = vshll.u32 %v15075_v36, 16  ;;  %v4572_v55 = vshrl.u32 %v15070_v46, 16 }
 0x292   : > { %14120 = vmatprep.mubr.bf16.mxu0 %v15055_v6  ;;  %v4568_v6 = vshll.u32 %v15070_v46, 16  ;;  %v4993_v28 = vor.u32 %v4992_v17, %v4989_v60  ;;  %v15083_v46 = vld [vmem:[#allocation4 + $0x8c] ss:$0 sps:$4 sm:$0x11]  }
 0x293   : > { %14161 = vmatmul.mubr.bf16.gmra.mxu1 %v4531_v58  ;;  %v4576_v58 = vshll.u32 %v15076_v22, 16  ;;  %v5000_v5 = vrot.slane %v4998_v53, 4  ;;  %v15073_v53 = vld [vmem:[#allocation3 + $0x84] sm:$0xff]  }
 0x294   : > { %14164 = vmatprep.mubr.bf16.mxu1 %v4539_v10  ;;  %14241 = vmatpush3.bf16.msra.mxu1 %v15084_v35  ;;  %v4995_v35 = vshrl.u32 %v15075_v36, 16  ;;  %v15081_v10 = vld [vmem:[#allocation2 + $0x20] sm:$0xff]   ;;  %v15089_v17 = vld [vmem:[#allocation2 + $0x38] sm:$0xff]  }
 0x295   : > { %14242 = vmatprep.subr.bf16.mxu1 %v15086_v11  ;;  %v4578_v16 = vrot.slane %v4576_v58, 1  ;;  %v5004_v3 = vshrl.u32 %v15081_v10, 16  ;;  %v5007_v36 = vshll.u32 %v15081_v10, 16  ;;  %v5015_v58 = vrot.slane %v5013_v27, 3 }
 0x296   : > { %v4997_v26 = vrot.slane %v4995_v35, 3  ;;  %v4584_v35 = vshll.u32 %v15078_v13, 16  ;;  %v5018_v10 = vrot.slane %v5016_v18, 4  ;;  %v5031_v27 = vshrl.u32 %v15089_v17, 16 }
 0x297   : > { %v5034_v18 = vshll.u32 %v15089_v17, 16  ;;  %v15085_v17 = vld [vmem:[#allocation3 + $0x14] sm:$0xff]  }
 0x298   : > { %14243 = vmatpush3.bf16.msra.mxu1 %v15086_v11  ;;  %v4566_v11 = vor.u32 %v4564_v38, %v4562_v33  ;;  %v4586_v22 = vrot.slane %v4584_v35, 1 }
 0x299   : > { %14121 = vmatmul.mubr.bf16.gmra.mxu0 %v15059_v29  ;;  %14324 = vmatprep.subr.mxu1 %v19834_v8  ;;  %v4570_v29 = vrot.slane %v4568_v6, 1 }
 0x29a   : > { %14124 = vmatprep.mubr.bf16.mxu0 %v15060_v25  ;;  %v4563_v25 = vsel %vm3013_vm2, %v4558_v0, %v4562_v33  ;;  %v4582_v33 = vor.u32 %v4580_v47, %v4578_v16  ;;  %v5009_v0 = vrot.slane %v5007_v36, 4  ;;  %v4588_v36 = vshrl.u32 %v15078_v13, 16 }
 0x29b   : > { %14165 = vmatmul.mubr.bf16.gmra.mxu1 %v4547_v15  ;;  %v4571_v24 = vsel %vm3013_vm2, %v4566_v11, %v4570_v29  ;;  %v5001_v15 = vor.u32 %v5000_v5, %v4997_v26  ;;  %v4574_v38 = vor.u32 %v4572_v55, %v4570_v29  ;;  %v4592_v5 = vshll.u32 %v15083_v46, 16 }
 0x29c   : > { %14168 = vmatprep.mubr.bf16.mxu1 %v4555_v56  ;;  %v4587_v29 = vsel %vm3013_vm2, %v4582_v33, %v4586_v22  ;;  %v4590_v47 = vor.u32 %v4588_v36, %v4586_v22  ;;  %v15093_v33 = vld [vmem:[#allocation2 + $0x40] sm:$0xff]  }
 0x29d   : > { %v5002_v11 = vsel %vm2502_vm1, %v4993_v28, %v5001_v15  ;;  %v4579_v26 = vsel %vm3013_vm2, %v4574_v38, %v4578_v16  ;;  %v4594_v35 = vrot.slane %v4592_v5, 1  ;;  %v5040_v5 = vshrl.u32 %v15093_v33, 16 }
 0x2a1   : > { %14125 = vmatmul.mubr.bf16.gmra.mxu0 %v15066_v54  ;;  %v5006_v54 = vrot.slane %v5004_v3, 3  ;;  %v5019_v3 = vor.u32 %v5018_v10, %v5015_v58  ;;  %v15094_v58 = vld [vmem:[#allocation2 + $0x48] sm:$0xff]   ;;  %v4595_v10 = vsel %vm3013_vm2, %v4590_v47, %v4594_v35 }
 0x2a2   : > { %14128 = vmatprep.mubr.bf16.mxu0 %v15067_v41  ;;  %v15088_v41 = vld [vmem:[#allocation2 + $0x30] sm:$0xff]   ;;  %v5049_v36 = vshrl.u32 %v15094_v58, 16  ;;  %v15097_v35 = vld [vmem:[#allocation8 + $0x220] sm:$0xff]  }
 0x2a3   : > { %14169 = vmatmul.mubr.bf16.gmra.mxu1 %v4563_v25  ;;  %v5010_v25 = vor.u32 %v5009_v0, %v5006_v54  ;;  %v5022_v55 = vshrl.u32 %v15088_v41, 16  ;;  %v5033_v0 = vrot.slane %v5031_v27, 3  ;;  %v5052_v27 = vshll.u32 %v15094_v58, 16 }
 0x2a4   : > { %14172 = vmatprep.mubr.bf16.mxu1 %v4571_v24  ;;  %v17082_v56 = vpop.f32.mrf.mxu0  ;;  %v5025_v24 = vshll.u32 %v15088_v41, 16  ;;  %v5036_v41 = vrot.slane %v5034_v18, 4 }
 0x2a5   : > { %v5011_v38 = vsel %vm2502_vm1, %v5001_v15, %v5010_v25  ;;  %v5024_v46 = vrot.slane %v5022_v55, 3  ;;  %v5020_v54 = vsel %vm2502_vm1, %v5010_v25, %v5019_v3  ;;  %v15092_v15 = vld [vmem:[#allocation8 + $0x228] sm:$0xff]  }
 0x2a6   : > { %v17084_v6 = vpop.f32.mrf.mxu0  ;;  %v5037_v25 = vor.u32 %v5036_v41, %v5033_v0  ;;  %v5051_v41 = vrot.slane %v5049_v36, 3 }
 0x2a8   : > { %v17087_v60 = vpop.f32.mrf.mxu0 }
 0x2a9   : > { %14129 = vmatmul.mubr.bf16.gmra.mxu0 %v15073_v53  ;;  %v15087_v53 = vld [vmem:[#allocation8 + $0x230] sm:$0xff]  }
 0x2aa   : > { %14196 = vmatprep.mubr.bf16.mxu0 %v5002_v11  ;;  %v17090_v23 = vpop.f32.mrf.mxu0  ;;  %v5027_v11 = vrot.slane %v5025_v24, 4 }
 0x2ab   : > { %14173 = vmatmul.mubr.bf16.gmra.mxu1 %v4579_v26 }
 0x2ac   : > { %14176 = vmatprep.mubr.bf16.mxu1 %v4587_v29  ;;  %v5028_v26 = vor.u32 %v5027_v11, %v5024_v46  ;;  %v5043_v29 = vshll.u32 %v15093_v33, 16  ;;  %v5042_v11 = vrot.slane %v5040_v5, 3 }
 0x2ae   : > { %v17093_v28 = vpop.f32.mrf.mxu0  ;;  %v5045_v33 = vrot.slane %v5043_v29, 4  ;;  %v5038_v0 = vsel %vm2502_vm1, %v5028_v26, %v5037_v25  ;;  %v15102_v29 = vld [vmem:[#allocation8 + $0x218] sm:$0xff]  }
 0x2b0   : > { %v17095_v16 = vpop.f32.mrf.mxu0  ;;  %v5046_v36 = vor.u32 %v5045_v33, %v5042_v11 }
 0x2b1   : > { %14197 = vmatmul.mubr.bf16.vlgmr.msra.gmra.mxu0 %v5011_v38  ;;  %v5029_v38 = vsel %vm2502_vm1, %v5019_v3, %v5028_v26 }
 0x2b2   : > { %v17099_v13 = vpop.f32.mrf.mxu0  ;;  %14277 = vmatpush3.bf16.msra.mxu0 %v17071_v31  ;;  %14200 = vmatprep.mubr.bf16.mxu0 %v5020_v54  ;;  %v15098_v54 = vld [vmem:[#allocation2 + $0x50] sm:$0xff]   ;;  %v5047_v11 = vsel %vm2502_vm1, %v5037_v25, %v5046_v36 }
 0x2b3   : > { %14278 = vmatprep.subr.bf16.mxu0 %v15087_v53  ;;  %14177 = vmatmul.mubr.bf16.gmra.mxu1 %v4595_v10  ;;  %v15099_v10 = vld [vmem:[#allocation2 + $0x58] sm:$0xff]   ;;  %v15112_v25 = vld [vmem:[#allocation8 + $0x208] sm:$0xff]  }
 0x2b4   : > { %v17103_v22 = vpop.f32.mrf.mxu0  ;;  %14244 = vmatprep.mubr.bf16.mxu1 %v15085_v17  ;;  %v15090_v17 = vld [vmem:[#allocation3 + $0x1c] sm:$0xff]  }
 0x2b6   : > { %v17105_v24 = vpop.f32.mrf.mxu0  ;;  %14279 = vmatpush3.bf16.msra.mxu0 %v15087_v53 }
 0x2b7   : > { %14280 = vmatprep.subr.bf16.mxu0 %v15092_v15 }
 0x2b8   : > { %v13958_v55 = vpop.f32.mrf.mxu1  ;;  %v17110_v47 = vpop.f32.mrf.mxu0 }
 0x2b9   : > { %v17108_v31 = vadd.f32 %v13958_v55, %v17082_v56  ;;  %14201 = vmatmul.mubr.bf16.gmra.mxu0 %v5029_v38  ;;  %v5054_v56 = vrot.slane %v5052_v27, 4  ;;  %v5058_v27 = vshrl.u32 %v15098_v54, 16 }
 0x2ba   : > { %v2753_v18 = vpop.f32.mrf.mxu1  ;;  %v17117_v58 = vpop.f32.mrf.mxu0  ;;  %14204 = vmatprep.mubr.bf16.mxu0 %v5038_v0  ;;  %14281 = vmatpush3.bf16.msra.mxu0 %v15092_v15  ;;  %v5070_v15 = vshll.u32 %v15099_v10, 16 }
 0x2bb   : > { %v17114_v46 = vadd.f32 %v2753_v18, %v17084_v6  ;;  %v15091_v6 = vld [vmem:[#allocation3 + $0x24] sm:$0xff]   ;;  %14282 = vmatprep.subr.bf16.mxu0 %v15097_v35  ;;  %14245 = vmatmul.mubr.bf16.vlgmr.msra.gmra.mxu1 %v15090_v17  ;;  %v5061_v18 = vshll.u32 %v15098_v54, 16  ;;  %v5055_v38 = vor.u32 %v5054_v56, %v5051_v41  ;;  %v5060_v54 = vrot.slane %v5058_v27, 3 }
 0x2bc   : > { %v13959_v53 = vpop.f32.mrf.mxu1  ;;  %v17122_v5 = vpop.f32.mrf.mxu0  ;;  %14248 = vmatprep.mubr.bf16.mxu1 %v15091_v6  ;;  %v15103_v56 = vld [vmem:[#allocation2 + $0x60] sm:$0xff]   ;;  %v5072_v6 = vrot.slane %v5070_v15, 4 }
 0x2bd   : > { %v17120_v55 = vadd.f32 %v13959_v53, %v17087_v60  ;;  %v5067_v60 = vshrl.u32 %v15099_v10, 16  ;;  %v5063_v41 = vrot.slane %v5061_v18, 4  ;;  %v5056_v10 = vsel %vm2502_vm1, %v5046_v36, %v5055_v38 }
 0x2be   : > { %v2756_v3 = vpop.f32.mrf.mxu1  ;;  %v17127_v45 = vpop.f32.mrf.mxu0  ;;  %14283 = vmatpush3.bf16.msra.mxu0 %v15097_v35  ;;  %v5076_v18 = vshrl.u32 %v15103_v56, 16 }
 0x2bf   : > { %v17125_v26 = vadd.f32 %v2756_v3, %v17090_v23  ;;  %14284 = vmatprep.subr.bf16.mxu0 %v15102_v29  ;;  %v15107_v23 = vld [vmem:[#allocation8 + $0x210] sm:$0xff]   ;;  %v15104_v3 = vld [vmem:[#allocation2 + $0x68] sm:$0xff]   ;;  %v5064_v36 = vor.u32 %v5063_v41, %v5060_v54 }
 0x2c0   : > { %v13962_v0 = vpop.f32.mrf.mxu1  ;;  %v17132_v9 = vpop.f32.mrf.mxu0  ;;  %v5085_v37 = vshrl.u32 %v15104_v3, 16  ;;  %v5088_v21 = vshll.u32 %v15104_v3, 16  ;;  %v5078_v54 = vrot.slane %v5076_v18, 3 }
 0x2c1   : > { %v17130_v53 = vadd.f32 %v13962_v0, %v17093_v28  ;;  %14205 = vmatmul.mubr.bf16.gmra.mxu0 %v5047_v11  ;;  %v5069_v28 = vrot.slane %v5067_v60, 3  ;;  %v15095_v0 = vld [vmem:[#allocation3 + $0x2c] sm:$0xff]   ;;  %v5079_v60 = vshll.u32 %v15103_v56, 16  ;;  %v15108_v56 = vld [vmem:[#allocation2 + $0x70] sm:$0xff]  }
 0x2c2   : > { %v2769_v32 = vpop.f32.mrf.mxu1  ;;  %v17139_v35 = vpop.f32.mrf.mxu0  ;;  %14208 = vmatprep.mubr.bf16.mxu0 %v5056_v10  ;;  %14285 = vmatpush3.bf16.msra.mxu0 %v15102_v29 }
 0x2c3   : > { %v17136_v33 = vadd.f32 %v2769_v32, %v17095_v16  ;;  %v15096_v32 = vld [vmem:[#allocation3 + $0x34] sm:$0xff]   ;;  %14286 = vmatprep.subr.bf16.mxu0 %v15107_v23  ;;  %14249 = vmatmul.mubr.bf16.gmra.mxu1 %v15095_v0  ;;  %v5073_v15 = vor.u32 %v5072_v6, %v5069_v28  ;;  %v5065_v0 = vsel %vm2502_vm1, %v5055_v38, %v5064_v36  ;;  %v5081_v41 = vrot.slane %v5079_v60, 4  ;;  %v15101_v38 = vld [vmem:[#allocation3 + $0x44] sm:$0xff]  }
 0x2c4   : > { %v13963_v17 = vpop.f32.mrf.mxu1  ;;  %14252 = vmatprep.mubr.bf16.mxu1 %v15096_v32  ;;  %v2343_v10 = vpop.f32.mrf.mxu0  ;;  %v5087_v32 = vrot.slane %v5085_v37, 3 }
 0x2c5   : > { %v17142_v44 = vadd.f32 %v13963_v17, %v17099_v13  ;;  %v15117_v17 = vld [vmem:[#allocation8 + $0x200] sm:$0xff]   ;;  %v5074_v28 = vsel %vm2502_vm1, %v5064_v36, %v5073_v15  ;;  %v5082_v60 = vor.u32 %v5081_v41, %v5078_v54  ;;  %v5094_v36 = vshrl.u32 %v15108_v56, 16 }
 0x2c6   : > { %v2772_v16 = vpop.f32.mrf.mxu1  ;;  %14287 = vmatpush3.bf16.msra.mxu0 %v15107_v23  ;;  %v13926_v3 = vpop.f32.mrf.mxu0  ;;  %v15100_v23 = vld [vmem:[#allocation3 + $0x3c] sm:$0xff]  }
 0x2c7   : > { %v17145_v27 = vadd.f32 %v2772_v16, %v17103_v22  ;;  %14288 = vmatprep.subr.bf16.mxu0 %v15112_v25  ;;  %v15109_v16 = vld [vmem:[#allocation2 + $0x78] sm:$0xff]   ;;  %v5096_v54 = vrot.slane %v5094_v36, 3 }
 0x2c8   : > { %v13966_v11 = vpop.f32.mrf.mxu1  ;;  %v5106_v42 = vshll.u32 %v15109_v16, 16 }
 0x2c9   : > { %v17148_v13 = vadd.f32 %v13966_v11, %v17105_v24  ;;  %14209 = vmatmul.mubr.bf16.gmra.mxu0 %v5065_v0  ;;  %v5090_v24 = vrot.slane %v5088_v21, 4  ;;  %v17161_v21 = vpop.f32.mrf.mxu0 }
 0x2ca   : > { %v2785_v29 = vpop.f32.mrf.mxu1  ;;  %14212 = vmatprep.mubr.bf16.mxu0 %v5074_v28  ;;  %14289 = vmatpush3.bf16.msra.mxu0 %v15112_v25  ;;  %v5103_v28 = vshrl.u32 %v15109_v16, 16  ;;  %v5108_v16 = vrot.slane %v5106_v42, 4 }
 0x2cb   : > { %v17152_v22 = vadd.f32 %v2785_v29, %v17110_v47  ;;  %14290 = vmatprep.subr.bf16.mxu0 %v15117_v17  ;;  %14253 = vmatmul.mubr.bf16.gmra.mxu1 %v15100_v23  ;;  %v5097_v29 = vshll.u32 %v15108_v56, 16  ;;  %v5091_v37 = vor.u32 %v5090_v24, %v5087_v32  ;;  %v15113_v56 = vld [vmem:[#allocation2 + $0x80] sm:$0xff]   ;;  %v13927_v24 = vpop.f32.mrf.mxu0 }
 0x2cc   : > { %v13967_v6 = vpop.f32.mrf.mxu1  ;;  %14256 = vmatprep.mubr.bf16.mxu1 %v15101_v38  ;;  %v5105_v38 = vrot.slane %v5103_v28, 3 }
 0x2cd   : > { %v17156_v11 = vadd.f32 %v13967_v6, %v17117_v58  ;;  %v5083_v6 = vsel %vm2502_vm1, %v5073_v15, %v5082_v60  ;;  %v5099_v41 = vrot.slane %v5097_v29, 4  ;;  %v5092_v32 = vsel %vm2502_vm1, %v5082_v60, %v5091_v37  ;;  %v15106_v15 = vld [vmem:[#allocation3 + $0x54] sm:$0xff]   ;;  %v17176_v60 = vpop.f32.mrf.mxu0 }
 0x2ce   : > { %v2788_v47 = vpop.f32.mrf.mxu1  ;;  %14291 = vmatpush3.bf16.msra.mxu0 %v15117_v17  ;;  %v5112_v29 = vshrl.u32 %v15113_v56, 16 }
 0x2cf   : > { %v17159_v18 = vadd.f32 %v2788_v47, %v17122_v5  ;;  %v15114_v47 = vld [vmem:[#allocation2 + $0x88] sm:$0xff]   ;;  %v5100_v36 = vor.u32 %v5099_v41, %v5096_v54 }
 0x2d0   : > { %v13970_v0 = vpop.f32.mrf.mxu1  ;;  %v5121_v42 = vshrl.u32 %v15114_v47, 16  ;;  %v5124_v7 = vshll.u32 %v15114_v47, 16 }
 0x2d1   : > { %v17164_v58 = vadd.f32 %v13970_v0, %v17127_v45  ;;  %14213 = vmatmul.mubr.bf16.gmra.mxu0 %v5083_v6  ;;  %v15105_v45 = vld [vmem:[#allocation3 + $0x4c] sm:$0xff]   ;;  %v5109_v6 = vor.u32 %v5108_v16, %v5105_v38  ;;  %v15110_v16 = vld [vmem:[#allocation3 + $0x5c] sm:$0xff]  }
 0x2d2   : > { %v2801_v25 = vpop.f32.mrf.mxu1  ;;  %14216 = vmatprep.mubr.bf16.mxu0 %v5092_v32  ;;  %v15119_v38 = vld [vmem:[#allocation4 + $0x14] sm:$0xff]  }
 0x2d3   : > { %v17168_v5 = vadd.f32 %v2801_v25, %v17132_v9  ;;  %14257 = vmatmul.mubr.bf16.gmra.mxu1 %v15105_v45  ;;  %v5115_v25 = vshll.u32 %v15113_v56, 16  ;;  %v5110_v54 = vsel %vm2502_vm1, %v5100_v36, %v5109_v6  ;;  %v5123_v56 = vrot.slane %v5121_v42, 3 }
 0x2d4   : > { %v13971_v23 = vpop.f32.mrf.mxu1  ;;  %14260 = vmatprep.mubr.bf16.mxu1 %v15106_v15  ;;  %v5126_v15 = vrot.slane %v5124_v7, 4 }
 0x2d5   : > { %v17172_v17 = vadd.f32 %v13971_v23, %v17139_v35  ;;  %v5101_v35 = vsel %vm2502_vm1, %v5091_v37, %v5100_v36  ;;  %v5114_v23 = vrot.slane %v5112_v29, 3  ;;  %v5117_v45 = vrot.slane %v5115_v25, 4  ;;  %v15120_v36 = vld [vmem:[#allocation4 + $0x1c] sm:$0xff]  }
 0x2d6   : > { %v2804_v0 = vpop.f32.mrf.mxu1  ;;  %v5127_v12 = vor.u32 %v5126_v15, %v5123_v56  ;;  %v15116_v56 = vld [vmem:[#allocation3 + $0x74] sm:$0xff]   ;;  %v5915_v15 = vshrl.u32 %v15119_v38, 16  ;;  %v5922_v2 = vshll.u32 %v15120_v36, 16 }
 0x2d7   : > { %v17174_v9 = vadd.f32 %v2804_v0, %v2343_v10  ;;  %v15118_v10 = vld [vmem:[#allocation2 + $0x90] ss:$0 sps:$4 sm:$0xff]   ;;  %v5118_v50 = vor.u32 %v5117_v45, %v5114_v23  ;;  %v15123_v45 = vld [vmem:[#allocation4 + $0x24] sm:$0xff]  }
 0x2d8   : > { %v13974_v28 = vpop.f32.mrf.mxu1  ;;  %v5130_v37 = vshrl.u32 %v15118_v10, 16  ;;  %v5133_v29 = vshll.u32 %v15118_v10, 16  ;;  %v15115_v10 = vld [vmem:[#allocation3 + $0x6c] sm:$0xff]  }
 0x2d9   : > { %v17178_v32 = vadd.f32 %v13974_v28, %v13926_v3  ;;  %v13930_v0 = vpop.f32.mrf.mxu0  ;;  %14217 = vmatmul.mubr.bf16.gmra.mxu0 %v5101_v35  ;;  %v15111_v28 = vld [vmem:[#allocation3 + $0x64] sm:$0xff]   ;;  %v5917_v35 = vshll.u32 %v15119_v38, 16  ;;  %v5119_v7 = vsel %vm2502_vm1, %v5109_v6, %v5118_v50 }
 0x2da   : > { %v17180_v4 = vpop.f32.mrf.mxu1  ;;  %14220 = vmatprep.mubr.bf16.mxu0 %v5110_v54  ;;  %v5132_v54 = vrot.slane %v5130_v37, 3 }
 0x2db   : > { %v2372_v3 = vpop.f32.mrf.mxu0  ;;  %14261 = vmatmul.mubr.bf16.gmra.mxu1 %v15110_v16  ;;  %v5128_v16 = vsel %vm2502_vm1, %v5118_v50, %v5127_v12  ;;  %v5919_v23 = vrot.slane %v5917_v35, 1  ;;  %v5924_v35 = vrot.slane %v5922_v2, 1  ;;  %v5934_v2 = vshrl.u32 %v15123_v45, 16 }
 0x2dc   : > { %v13975_v41 = vpop.f32.mrf.mxu1  ;;  %14264 = vmatprep.mubr.bf16.mxu1 %v15111_v28 }
 0x2dd   : > { %v17184_v47 = vadd.f32 %v13975_v41, %v13927_v24  ;;  %v13931_v25 = vpop.f32.mrf.mxu0  ;;  %v5135_v24 = vrot.slane %v5133_v29, 4  ;;  %v5920_v37 = vor.u32 %v5919_v23, %v5915_v15  ;;  %v5930_v29 = vshll.u32 %v15123_v45, 16  ;;  %v15122_v15 = vld [vmem:[#allocation3 + $0x84] sm:$0xff]  }
 0x2de   : > { %v17188_v42 = vpop.f32.mrf.mxu1  ;;  %v5926_v23 = vshrl.u32 %v15120_v36, 16 }
 0x2df   : > { %v17186_v14 = vpop.f32.mrf.mxu0  ;;  %v5136_v61 = vor.u32 %v5135_v24, %v5132_v54  ;;  %v15126_v54 = vld [vmem:[#allocation4 + $0x34] sm:$0xff]  }
 0x2e0   : > { %v5928_v59 = vor.u32 %v5926_v23, %v5924_v35 }
 0x2e1   : > { %v13934_v41 = vpop.f32.mrf.mxu0  ;;  %14221 = vmatmul.mubr.bf16.gmra.mxu0 %v5119_v7  ;;  %v5137_v38 = vsel %vm2502_vm1, %v5127_v12, %v5136_v61 }
 0x2e2   : > { %14224 = vmatprep.mubr.bf16.mxu0 %v5128_v16  ;;  %v15124_v16 = vld [vmem:[#allocation4 + $0x2c] sm:$0xff]  }
 0x2e3   : > { %v2388_v28 = vpop.f32.mrf.mxu0  ;;  %v13978_v48 = vpop.f32.mrf.mxu1  ;;  %14265 = vmatmul.mubr.bf16.gmra.mxu1 %v15115_v10 }
 0x2e4   : > { %v17192_v39 = vadd.f32 %v13978_v48, %v13930_v0  ;;  %14268 = vmatprep.mubr.bf16.mxu1 %v15116_v56  ;;  %v5925_v48 = vsel %vm3013_vm2, %v5920_v37, %v5924_v35  ;;  %v5932_v0 = vrot.slane %v5930_v29, 1 }
 0x2e5   : > { %v13935_v6 = vpop.f32.mrf.mxu0  ;;  %v2833_v7 = vpop.f32.mrf.mxu1 }
 0x2e6   : > { %v17194_v52 = vadd.f32 %v2833_v7, %v2372_v3  ;;  %v15121_v3 = vld [vmem:[#allocation3 + $0x7c] sm:$0xff]   ;;  %v5938_v7 = vshll.u32 %v15124_v16, 16  ;;  %v5936_v61 = vor.u32 %v5934_v2, %v5932_v0  ;;  %v5933_v45 = vsel %vm3013_vm2, %v5928_v59, %v5932_v0 }
 0x2e7   : > { %v17196_v50 = vpop.f32.mrf.mxu0  ;;  %v13979_v30 = vpop.f32.mrf.mxu1  ;;  %v5942_v2 = vshrl.u32 %v15124_v16, 16 }
 0x2e8   : > { %19835 = vst [vmem:[#allocation72_spill] sm:$0xff] %v17196_v50  ;;  %v17199_v20 = vadd.f32 %v13979_v30, %v13931_v25  ;;  %v5946_v25 = vshll.u32 %v15126_v54, 16  ;;  %v5940_v36 = vrot.slane %v5938_v7, 1 }
 0x2e9   : > { %v13938_v10 = vpop.f32.mrf.mxu0  ;;  %14225 = vmatmul.mubr.bf16.gmra.mxu0 %v5137_v38  ;;  %v17202_v24 = vpop.f32.mrf.mxu1 }
 0x2ea   : > { %19836 = vst [vmem:[#allocation73_spill] sm:$0xff] %v17202_v24  ;;  %14292 = vmatprep.mubr.bf16.mxu0 %v5925_v48  ;;  %v15127_v48 = vld [vmem:[#allocation4 + $0x3c] sm:$0xff]  }
 0x2eb   : > { %v2404_v56 = vpop.f32.mrf.mxu0  ;;  %v13982_v49 = vpop.f32.mrf.mxu1  ;;  %14269 = vmatmul.mubr.bf16.gmra.mxu1 %v15121_v3  ;;  %v15128_v3 = vld [vmem:[#allocation4 + $0x44] sm:$0xff]   ;;  %v5954_v57 = vshll.u32 %v15127_v48, 16 }
 0x2ec   : > { %v17204_v30 = vadd.f32 %v13982_v49, %v13934_v41  ;;  %14272 = vmatprep.mubr.bf16.mxu1 %v15122_v15  ;;  %v5941_v49 = vsel %vm3013_vm2, %v5936_v61, %v5940_v36  ;;  %v5948_v41 = vrot.slane %v5946_v25, 1  ;;  %v5962_v25 = vshll.u32 %v15128_v3, 16 }
 0x2ed   : > { %v13939_v12 = vpop.f32.mrf.mxu0  ;;  %v2849_v37 = vpop.f32.mrf.mxu1 }
 0x2ee   : > { %v17206_v29 = vadd.f32 %v2849_v37, %v2388_v28  ;;  %v5950_v37 = vshrl.u32 %v15126_v54, 16 }
 0x2ef   : > { %v17208_v38 = vpop.f32.mrf.mxu0  ;;  %v13983_v51 = vpop.f32.mrf.mxu1 }
 0x2f0   : > { %19837 = vst [vmem:[#allocation78_spill] sm:$0xff] %v17208_v38  ;;  %v17211_v35 = vadd.f32 %v13983_v51, %v13935_v6  ;;  %v5944_v51 = vor.u32 %v5942_v2, %v5940_v36  ;;  %v5952_v61 = vor.u32 %v5950_v37, %v5948_v41  ;;  %v5964_v2 = vrot.slane %v5962_v25, 1 }
 0x2f1   : > { %v14006_v23 = vpop.f32.mrf.mxu0  ;;  %14293 = vmatmul.mubr.bf16.vlgmr.msra.gmra.mxu0 %v5933_v45  ;;  %v17214_v15 = vpop.f32.mrf.mxu1 }
 0x2f2   : > { %19838 = vst [vmem:[#allocation79_spill] sm:$0xff] %v17214_v15  ;;  %v3373_v28 = vadd.f32 %v14006_v23, %v17108_v31  ;;  %14296 = vmatprep.mubr.bf16.mxu0 %v5941_v49  ;;  %v5956_v23 = vrot.slane %v5954_v57, 1  ;;  %v15129_v49 = vld [vmem:[#allocation4 + $0x4c] sm:$0xff]   ;;  %v5958_v57 = vshrl.u32 %v15127_v48, 16  ;;  %v15131_v48 = vld [vmem:[#allocation4 + $0x5c] sm:$0xff]  }
 0x2f3   : > { %v3244_v7 = vpop.f32.mrf.mxu0  ;;  %v13986_v34 = vpop.f32.mrf.mxu1  ;;  %14273 = vmatmul.mubr.bf16.gmra.mxu1 %v15125_v43 }
 0x2f4   : > { %v3371_v59 = vadd.f32 %v3244_v7, %v17114_v46  ;;  %v17218_v6 = vadd.f32 %v13986_v34, %v13938_v10  ;;  %14356 = vmatprep.mubr.msk.f32.mxu1 %vm15873_vm0, %v19834_v8  ;;  %v5949_v34 = vsel %vm3013_vm2, %v5944_v51, %v5948_v41  ;;  %v5957_v36 = vsel %vm3013_vm2, %v5952_v61, %v5956_v23  ;;  %v15130_v7 = vld [vmem:[#allocation4 + $0x54] sm:$0xff]  }
 0x2f5   : > { %v14007_v0 = vpop.f32.mrf.mxu0  ;;  %v2865_v45 = vpop.f32.mrf.mxu1  ;;  %v5978_v61 = vshll.u32 %v15130_v7, 16 }
 0x2f6   : > { %v3374_v31 = vadd.f32 %v14007_v0, %v17120_v55  ;;  %v17223_v16 = vadd.f32 %v2865_v45, %v2404_v56  ;;  %v5966_v0 = vshrl.u32 %v15128_v3, 16 }
 0x2f7   : > { %v3247_v54 = vpop.f32.mrf.mxu0  ;;  %v13987_v40 = vpop.f32.mrf.mxu1 }
 0x2f8   : > { %v17226_v43 = vadd.f32 %v3247_v54, %v17125_v26  ;;  %v17229_v46 = vadd.f32 %v13987_v40, %v13939_v12  ;;  %v5970_v26 = vshll.u32 %v15129_v49, 16  ;;  %v5960_v40 = vor.u32 %v5958_v57, %v5956_v23 }
 0x2f9   : > { %v14010_v10 = vpop.f32.mrf.mxu0  ;;  %14297 = vmatmul.mubr.bf16.gmra.mxu0 %v5949_v34  ;;  %v17232_v55 = vpop.f32.mrf.mxu1  ;;  %v5968_v54 = vor.u32 %v5966_v0, %v5964_v2 }
 0x2fa   : > { %19839 = vst [vmem:[#allocation92_spill] sm:$0xff] %v17232_v55  ;;  %v3377_v56 = vadd.f32 %v14010_v10, %v17130_v53  ;;  %14300 = vmatprep.mubr.bf16.mxu0 %v5957_v36  ;;  %v5972_v10 = vrot.slane %v5970_v26, 1  ;;  %v5974_v26 = vshrl.u32 %v15129_v49, 16  ;;  %v15133_v49 = vld [vmem:[#allocation4 + $0x6c] sm:$0xff]  }
 0x2fb   : > { %v3260_v37 = vpop.f32.mrf.mxu0  ;;  %v14054_v41 = vpop.f32.mrf.mxu1 }
 0x2fc   : > { %v3375_v45 = vadd.f32 %v3260_v37, %v17136_v33  ;;  %v17236_v12 = vadd.f32 %v14054_v41, %v3373_v28  ;;  %v5965_v33 = vsel %vm3013_vm2, %v5960_v40, %v5964_v2  ;;  %v5973_v57 = vsel %vm3013_vm2, %v5968_v54, %v5972_v10 }
 0x2fd   : > { %v14011_v51 = vpop.f32.mrf.mxu0  ;;  %v3786_v34 = vpop.f32.mrf.mxu1  ;;  %v5980_v37 = vrot.slane %v5978_v61, 1 }
 0x2fe   : > { %v3378_v25 = vadd.f32 %v14011_v51, %v17142_v44  ;;  %v17239_v63 = vadd.f32 %v3786_v34, %v3371_v59  ;;  %v15132_v44 = vld [vmem:[#allocation4 + $0x64] sm:$0xff]   ;;  %v5986_v51 = vshll.u32 %v15131_v48, 16 }
 0x2ff   : > { %v3263_v53 = vpop.f32.mrf.mxu0  ;;  %v14055_v36 = vpop.f32.mrf.mxu1  ;;  %v5994_v54 = vshll.u32 %v15132_v44, 16 }
 0x300   : > { %v17242_v3 = vadd.f32 %v3263_v53, %v17145_v27  ;;  %v17245_v23 = vadd.f32 %v14055_v36, %v3374_v31  ;;  %v5982_v27 = vshrl.u32 %v15130_v7, 16  ;;  %v5976_v31 = vor.u32 %v5974_v26, %v5972_v10 }
 0x301   : > { %v14014_v28 = vpop.f32.mrf.mxu0  ;;  %14301 = vmatmul.mubr.bf16.gmra.mxu0 %v5965_v33  ;;  %v17249_v0 = vpop.f32.mrf.mxu1 }
 0x302   : > { %v3381_v59 = vadd.f32 %v14014_v28, %v17148_v13  ;;  %14304 = vmatprep.mubr.bf16.mxu0 %v5973_v57  ;;  %v5984_v36 = vor.u32 %v5982_v27, %v5980_v37  ;;  %v5988_v57 = vrot.slane %v5986_v51, 1  ;;  %v5990_v51 = vshrl.u32 %v15131_v48, 16  ;;  %v15135_v48 = vld [vmem:[#allocation4 + $0x7c] sm:$0xff]  }
 0x303   : > { %v3276_v41 = vpop.f32.mrf.mxu0  ;;  %v14058_v2 = vpop.f32.mrf.mxu1 }
 0x304   : > { %v3379_v34 = vadd.f32 %v3276_v41, %v17152_v22  ;;  %v17252_v40 = vadd.f32 %v14058_v2, %v3377_v56  ;;  %v5981_v22 = vsel %vm3013_vm2, %v5976_v31, %v5980_v37  ;;  %v5989_v26 = vsel %vm3013_vm2, %v5984_v36, %v5988_v57 }
 0x305   : > { %v14015_v53 = vpop.f32.mrf.mxu0  ;;  %v3802_v33 = vpop.f32.mrf.mxu1  ;;  %v5996_v41 = vrot.slane %v5994_v54, 1 }
 0x306   : > { %v3382_v61 = vadd.f32 %v14015_v53, %v17156_v11  ;;  %v17255_v13 = vadd.f32 %v3802_v33, %v3375_v45  ;;  %v15134_v11 = vld [vmem:[#allocation4 + $0x74] sm:$0xff]   ;;  %v6002_v53 = vshll.u32 %v15133_v49, 16 }
 0x307   : > { %v3279_v28 = vpop.f32.mrf.mxu0  ;;  %v14059_v19 = vpop.f32.mrf.mxu1  ;;  %v6010_v36 = vshll.u32 %v15134_v11, 16 }
 0x308   : > { %v17258_v7 = vadd.f32 %v3279_v28, %v17159_v18  ;;  %v17261_v10 = vadd.f32 %v14059_v19, %v3378_v25  ;;  %v5998_v18 = vshrl.u32 %v15132_v44, 16  ;;  %v5992_v19 = vor.u32 %v5990_v51, %v5988_v57 }
 0x309   : > { %v14018_v56 = vpop.f32.mrf.mxu0  ;;  %14305 = vmatmul.mubr.bf16.gmra.mxu0 %v5981_v22  ;;  %v17265_v27 = vpop.f32.mrf.mxu1 }
 0x30a   : > { %v3385_v45 = vadd.f32 %v14018_v56, %v17164_v58  ;;  %14308 = vmatprep.mubr.bf16.mxu0 %v5989_v26  ;;  %v6000_v28 = vor.u32 %v5998_v18, %v5996_v41  ;;  %v6004_v26 = vrot.slane %v6002_v53, 1 }
 0x30b   : > { %v3292_v2 = vpop.f32.mrf.mxu0  ;;  %v14062_v37 = vpop.f32.mrf.mxu1 }
 0x30c   : > { %v3383_v33 = vadd.f32 %v3292_v2, %v17168_v5  ;;  %v17268_v25 = vadd.f32 %v14062_v37, %v3381_v59  ;;  %v5997_v5 = vsel %vm3013_vm2, %v5992_v19, %v5996_v41  ;;  %v6005_v51 = vsel %vm3013_vm2, %v6000_v28, %v6004_v26 }
 0x30d   : > { %v14019_v31 = vpop.f32.mrf.mxu0  ;;  %v3818_v22 = vpop.f32.mrf.mxu1  ;;  %v6012_v2 = vrot.slane %v6010_v36, 1  ;;  %v6018_v41 = vshll.u32 %v15135_v48, 16 }
 0x30e   : > { %v3386_v54 = vadd.f32 %v14019_v31, %v17172_v17  ;;  %v17271_v58 = vadd.f32 %v3818_v22, %v3379_v34  ;;  %v15136_v17 = vld [vmem:[#allocation4 + $0x84] sm:$0xff]   ;;  %v2818_v34 = vadd.f32 %v17180_v4, %v17161_v21  ;;  %v6014_v31 = vshrl.u32 %v15134_v11, 16 }
 0x30f   : > { %v3295_v56 = vpop.f32.mrf.mxu0  ;;  %v14063_v1 = vpop.f32.mrf.mxu1 }
 0x310   : > { %v17274_v44 = vadd.f32 %v3295_v56, %v17174_v9  ;;  %v17277_v57 = vadd.f32 %v14063_v1, %v3382_v61  ;;  %v6006_v9 = vshrl.u32 %v15133_v49, 16  ;;  %v6016_v36 = vor.u32 %v6014_v31, %v6012_v2 }
 0x311   : > { %v14022_v59 = vpop.f32.mrf.mxu0  ;;  %14309 = vmatmul.mubr.bf16.gmra.mxu0 %v5997_v5  ;;  %v17283_v53 = vpop.f32.mrf.mxu1  ;;  %v6026_v56 = vshll.u32 %v15136_v17, 16  ;;  %v15137_v5 = vld [vmem:[#allocation4 + $0x8c] sm:$0xff]   ;;  %v6020_v49 = vrot.slane %v6018_v41, 1  ;;  %v6030_v41 = vshrl.u32 %v15136_v17, 16 }
 0x312   : > { %v3389_v18 = vadd.f32 %v14022_v59, %v17178_v32  ;;  %14312 = vmatprep.mubr.bf16.mxu0 %v6005_v51  ;;  %v6008_v19 = vor.u32 %v6006_v9, %v6004_v26 }
 0x313   : > { %v3308_v37 = vpop.f32.mrf.mxu0  ;;  %v14066_v61 = vpop.f32.mrf.mxu1  ;;  %v6028_v9 = vrot.slane %v6026_v56, 1 }
 0x314   : > { %v3387_v1 = vadd.f32 %v3308_v37, %v2818_v34  ;;  %v17285_v22 = vadd.f32 %v14066_v61, %v3385_v45  ;;  %v6013_v11 = vsel %vm3013_vm2, %v6008_v19, %v6012_v2  ;;  %v6021_v45 = vsel %vm3013_vm2, %v6016_v36, %v6020_v49  ;;  %v15138_v61 = vld [vmem:[#allocation4 + $0x94] ss:$0 sps:$4 sm:$0x11]  }
 0x315   : > { %v14023_v28 = vpop.f32.mrf.mxu0  ;;  %v3834_v21 = vpop.f32.mrf.mxu1  ;;  %v6034_v37 = vshll.u32 %v15137_v5, 16 }
 0x316   : > { %v3390_v4 = vadd.f32 %v14023_v28, %v17184_v47  ;;  %v17288_v32 = vadd.f32 %v3834_v21, %v3383_v33  ;;  %v6022_v33 = vshrl.u32 %v15135_v48, 16 }
 0x317   : > { %v17290_v59 = vpop.f32.mrf.mxu0  ;;  %v14067_v51 = vpop.f32.mrf.mxu1  ;;  %v6036_v36 = vrot.slane %v6034_v37, 1 }
 0x318   : > { %19840 = vst [vmem:[#allocation93_spill] sm:$0xff] %v17290_v59  ;;  %v17293_v34 = vadd.f32 %v14067_v51, %v3386_v54  ;;  %v6024_v54 = vor.u32 %v6022_v33, %v6020_v49 }
 0x319   : > { %v14026_v26 = vpop.f32.mrf.mxu0  ;;  %14313 = vmatmul.mubr.bf16.gmra.mxu0 %v6013_v11  ;;  %v17297_v47 = vpop.f32.mrf.mxu1  ;;  %v6032_v11 = vor.u32 %v6030_v41, %v6028_v9 }
 0x31a   : > { %v3393_v31 = vadd.f32 %v14026_v26, %v17192_v39  ;;  %14316 = vmatprep.mubr.bf16.mxu0 %v6021_v45  ;;  %v6038_v39 = vshrl.u32 %v15137_v5, 16  ;;  %v6042_v26 = vshll.u32 %v15138_v61, 16  ;;  %v6029_v17 = vsel %vm3013_vm2, %v6024_v54, %v6028_v9 }
 0x31b   : > { %v3324_v28 = vpop.f32.mrf.mxu0  ;;  %v14070_v2 = vpop.f32.mrf.mxu1 }
 0x31c   : > { %v3391_v21 = vadd.f32 %v3324_v28, %v17194_v52  ;;  %v17300_v19 = vadd.f32 %v14070_v2, %v3389_v18  ;;  %v6037_v18 = vsel %vm3013_vm2, %v6032_v11, %v6036_v36  ;;  %v6044_v5 = vrot.slane %v6042_v26, 1 }
 0x31d   : > { %v14027_v51 = vpop.f32.mrf.mxu0  ;;  %v3850_v62 = vpop.f32.mrf.mxu1 }
 0x31e   : > { %v3394_v56 = vadd.f32 %v14027_v51, %v17199_v20  ;;  %v17303_v55 = vadd.f32 %v3850_v62, %v3387_v1  ;;  %v6040_v20 = vor.u32 %v6038_v39, %v6036_v36 }
 0x31f   : > { %v17305_v48 = vpop.f32.mrf.mxu0  ;;  %v14071_v45 = vpop.f32.mrf.mxu1 }
 0x320   : > { %19841 = vst [vmem:[#allocation94_spill] sm:$0xff] %v17305_v48  ;;  %v17308_v52 = vadd.f32 %v14071_v45, %v3390_v4  ;;  %v6045_v2 = vsel %vm3013_vm2, %v6040_v20, %v6044_v5  ;;  %v17552_v48 = vld [vmem:[#allocation10 + $0x10] sm:$0xff] }
 0x321   : > { %v14030_v49 = vpop.f32.mrf.mxu0  ;;  %14317 = vmatmul.mubr.bf16.gmra.mxu0 %v6029_v17  ;;  %v17312_v33 = vpop.f32.mrf.mxu1  ;;  %19879 = vst [vmem:[#allocation132_spill] sm:$0xff] %v17552_v48 }
 0x322   : > { %v3397_v37 = vadd.f32 %v14030_v49, %v17204_v30  ;;  %19842 = vst [vmem:[#allocation95_spill] sm:$0xff] %v17312_v33  ;;  %14320 = vmatprep.mubr.bf16.mxu0 %v6037_v18  ;;  %v17569_v33 = vld [vmem:[#allocation10] sm:$0xff] }
 0x323   : > { %v3340_v62 = vpop.f32.mrf.mxu0  ;;  %v14074_v61 = vpop.f32.mrf.mxu1  ;;  %19881 = vst [vmem:[#allocation134_spill] sm:$0xff] %v17569_v33 }
 0x324   : > { %v3395_v1 = vadd.f32 %v3340_v62, %v17206_v29  ;;  %v17315_v28 = vadd.f32 %v14074_v61, %v3393_v31 }
 0x325   : > { %v14031_v9 = vpop.f32.mrf.mxu0  ;;  %v3866_v41 = vpop.f32.mrf.mxu1 }
 0x326   : > { %v3398_v4 = vadd.f32 %v14031_v9, %v17211_v35  ;;  %v17319_v54 = vadd.f32 %v3866_v41, %v3391_v21 }
 0x327   : > { %v17321_v30 = vpop.f32.mrf.mxu0  ;;  %v14075_v51 = vpop.f32.mrf.mxu1 }
 0x328   : > { %19843 = vst [vmem:[#allocation96_spill] sm:$0xff] %v17321_v30  ;;  %v17323_v11 = vadd.f32 %v14075_v51, %v3394_v56 }
 0x329   : > { %v14034_v36 = vpop.f32.mrf.mxu0  ;;  %14321 = vmatmul.mubr.bf16.gmra.mxu0 %v6045_v2  ;;  %v17326_v39 = vpop.f32.mrf.mxu1 }
 0x32a   : > { %v3401_v29 = vadd.f32 %v14034_v36, %v17218_v6  ;;  %19844 = vst [vmem:[#allocation97_spill] sm:$0xff] %v17326_v39 }
 0x32b   : > { %v3356_v31 = vpop.f32.mrf.mxu0  ;;  %v14078_v35 = vpop.f32.mrf.mxu1 }
 0x32c   : > { %v3399_v26 = vadd.f32 %v3356_v31, %v17223_v16  ;;  %v17329_v45 = vadd.f32 %v14078_v35, %v3397_v37 }
 0x32d   : > { %v14035_v17 = vpop.f32.mrf.mxu0  ;;  %v3882_v49 = vpop.f32.mrf.mxu1 }
 0x32e   : > { %v3402_v21 = vadd.f32 %v14035_v17, %v17229_v46  ;;  %v17332_v18 = vadd.f32 %v3882_v49, %v3395_v1 }
 0x32f   : > { %v17334_v56 = vpop.f32.mrf.mxu0  ;;  %v14079_v20 = vpop.f32.mrf.mxu1 }
 0x330   : > { %19845 = vst [vmem:[#allocation98_spill] sm:$0xff] %v17334_v56  ;;  %v17336_v5 = vadd.f32 %v14079_v20, %v3398_v4  ;;  %v17410_v56 = vld [vmem:[#allocation10 + $0x68] sm:$0xff] }
 0x331   : > { %v14102_v6 = vpop.f32.mrf.mxu0  ;;  %v17338_v62 = vpop.f32.mrf.mxu1  ;;  %19852 = vst [vmem:[#allocation105_spill] sm:$0xff] %v17410_v56 }
 0x332   : > { %19846 = vst [vmem:[#allocation99_spill] sm:$0xff] %v17338_v62  ;;  %v4301_v61 = vadd.f32 %v14102_v6, %v17236_v12 }
 0x333   : > { %v4172_v16 = vpop.f32.mrf.mxu0  ;;  %v14082_v9 = vpop.f32.mrf.mxu1 }
 0x334   : > { %v4299_v37 = vadd.f32 %v4172_v16, %v17239_v63  ;;  %v17342_v41 = vadd.f32 %v14082_v9, %v3401_v29 }
 0x335   : > { %v14103_v46 = vpop.f32.mrf.mxu0  ;;  %v3898_v2 = vpop.f32.mrf.mxu1 }
 0x336   : > { %v4302_v1 = vadd.f32 %v14103_v46, %v17245_v23  ;;  %v17345_v51 = vadd.f32 %v3898_v2, %v3399_v26 }
 0x337   : > { %v17347_v36 = vpop.f32.mrf.mxu0  ;;  %v14083_v4 = vpop.f32.mrf.mxu1 }
 0x338   : > { %v17349_v31 = vadd.f32 %v14083_v4, %v3402_v21 }
 0x339   : > { %v14106_v35 = vpop.f32.mrf.mxu0  ;;  %v17351_v17 = vpop.f32.mrf.mxu1 }
 0x33a   : > { %19847 = vst [vmem:[#allocation100_spill] sm:$0xff] %v17351_v17  ;;  %v4305_v12 = vadd.f32 %v14106_v35, %v17252_v40  ;;  %v17398_v17 = vld [vmem:[#allocation10 + $0x70] sm:$0xff] }
 0x33b   : > { %v4188_v49 = vpop.f32.mrf.mxu0  ;;  %v14150_v29 = vpop.f32.mrf.mxu1  ;;  %19850 = vst [vmem:[#allocation103_spill] sm:$0xff] %v17398_v17 }
 0x33c   : > { %v17355_v63 = vadd.f32 %v4188_v49, %v17255_v13  ;;  %v17357_v20 = vadd.f32 %v14150_v29, %v4301_v61 }
 0x33d   : > { %v14107_v23 = vpop.f32.mrf.mxu0  ;;  %v4694_v6 = vpop.f32.mrf.mxu1 }
 0x33e   : > { %v4306_v26 = vadd.f32 %v14107_v23, %v17261_v10  ;;  %v17360_v16 = vadd.f32 %v4694_v6, %v4299_v37 }
 0x33f   : > { %v17362_v21 = vpop.f32.mrf.mxu0  ;;  %v14151_v9 = vpop.f32.mrf.mxu1 }
 0x340   : > { %v17364_v46 = vadd.f32 %v14151_v9, %v4302_v1 }
 0x341   : > { %v14110_v2 = vpop.f32.mrf.mxu0  ;;  %v17367_v4 = vpop.f32.mrf.mxu1 }
 0x342   : > { %v4309_v40 = vadd.f32 %v14110_v2, %v17268_v25 }
 0x343   : > { %v4204_v13 = vpop.f32.mrf.mxu0  ;;  %v14154_v35 = vpop.f32.mrf.mxu1 }
 0x344   : > { %v17370_v61 = vadd.f32 %v4204_v13, %v17271_v58  ;;  %v17372_v49 = vadd.f32 %v14154_v35, %v4305_v12  ;;  %v17387_v35 = vld [vmem:[#allocation10 + $0x78] sm:$0xff] }
 0x345   : > { %v14111_v10 = vpop.f32.mrf.mxu0  ;;  %v17375_v29 = vpop.f32.mrf.mxu1  ;;  %19848 = vst [vmem:[#allocation101_spill] sm:$0xff] %v17387_v35  ;;  %14325 = vmatpush3.msra.mxu1 %v17387_v35 }
 0x346   : > { %v4310_v37 = vadd.f32 %v14111_v10, %v17277_v57  ;;  %14326 = vmatprep.subr.mxu1 %v19834_v8 }
 0x347   : > { %v17377_v23 = vpop.f32.mrf.mxu0  ;;  %v14155_v1 = vpop.f32.mrf.mxu1  ;;  %14327 = vmatpush3.msra.mxu1 %v17398_v17 }
 0x348   : > { %v17379_v6 = vadd.f32 %v14155_v1, %v4306_v26  ;;  %14328 = vmatprep.subr.mxu1 %v19834_v8 }
 0x349   : > { %v14114_v25 = vpop.f32.mrf.mxu0  ;;  %v17382_v2 = vpop.f32.mrf.mxu1  ;;  %14329 = vmatpush3.msra.mxu1 %v17410_v56 }
 0x34a   : > { %v4313_v9 = vadd.f32 %v14114_v25, %v17285_v22  ;;  %14330 = vmatprep.subr.mxu1 %v19834_v8 }
 0x34b   : > { %v4220_v58 = vpop.f32.mrf.mxu0  ;;  %v14158_v12 = vpop.f32.mrf.mxu1 }
 0x34c   : > { %v17385_v13 = vadd.f32 %v4220_v58, %v17288_v32  ;;  %v17389_v57 = vadd.f32 %v14158_v12, %v4309_v40 }
 0x34d   : > { %v14115_v10 = vpop.f32.mrf.mxu0  ;;  %v17393_v1 = vpop.f32.mrf.mxu1 }
 0x34e   : > { %v4314_v26 = vadd.f32 %v14115_v10, %v17293_v34 }
 0x34f   : > { %v17396_v22 = vpop.f32.mrf.mxu0  ;;  %v14159_v25 = vpop.f32.mrf.mxu1 }
 0x350   : > { %19849 = vst [vmem:[#allocation102_spill] sm:$0xff] %v17396_v22  ;;  %v17400_v32 = vadd.f32 %v14159_v25, %v4310_v37 }
 0x351   : > { %v14118_v58 = vpop.f32.mrf.mxu0  ;;  %v17404_v12 = vpop.f32.mrf.mxu1 }
 0x352   : > { %v4317_v40 = vadd.f32 %v14118_v58, %v17300_v19 }
 0x353   : > { %v4236_v34 = vpop.f32.mrf.mxu0  ;;  %v14162_v35 = vpop.f32.mrf.mxu1 }
 0x354   : > { %v17408_v10 = vadd.f32 %v4236_v34, %v17303_v55  ;;  %v17412_v38 = vadd.f32 %v14162_v35, %v4313_v9  ;;  %v17423_v34 = vld [vmem:[#allocation10 + $0x60] sm:$0xff] }
 0x355   : > { %v14119_v37 = vpop.f32.mrf.mxu0  ;;  %v17416_v17 = vpop.f32.mrf.mxu1  ;;  %19854 = vst [vmem:[#allocation107_spill] sm:$0xff] %v17423_v34  ;;  %14331 = vmatpush3.msra.mxu1 %v17423_v34 }
 0x356   : > { %19851 = vst [vmem:[#allocation104_spill] sm:$0xff] %v17408_v10  ;;  %v4318_v25 = vadd.f32 %v14119_v37, %v17308_v52  ;;  %14332 = vmatprep.subr.mxu1 %v19834_v8 }
 0x357   : > { %v17419_v19 = vpop.f32.mrf.mxu0  ;;  %v14163_v58 = vpop.f32.mrf.mxu1 }
 0x358   : > { %19853 = vst [vmem:[#allocation106_spill] sm:$0xff] %v17419_v19  ;;  %v17421_v62 = vadd.f32 %v14163_v58, %v4314_v26  ;;  %v17435_v58 = vld [vmem:[#allocation10 + $0x58] sm:$0xff] }
 0x359   : > { %v14122_v55 = vpop.f32.mrf.mxu0  ;;  %v17426_v35 = vpop.f32.mrf.mxu1  ;;  %19857 = vst [vmem:[#allocation110_spill] sm:$0xff] %v17435_v58  ;;  %14333 = vmatpush3.msra.mxu1 %v17435_v58 }
 0x35a   : > { %v4321_v9 = vadd.f32 %v14122_v55, %v17315_v28  ;;  %19855 = vst [vmem:[#allocation108_spill] sm:$0xff] %v17426_v35  ;;  %14334 = vmatprep.subr.mxu1 %v19834_v8 }
 0x35b   : > { %v4252_v56 = vpop.f32.mrf.mxu0  ;;  %v14166_v37 = vpop.f32.mrf.mxu1 }
 0x35c   : > { %v17431_v52 = vadd.f32 %v4252_v56, %v17319_v54  ;;  %v17433_v30 = vadd.f32 %v14166_v37, %v4317_v40  ;;  %v17446_v56 = vld [vmem:[#allocation10 + $0x50] sm:$0xff] }
 0x35d   : > { %v14123_v26 = vpop.f32.mrf.mxu0  ;;  %v17438_v50 = vpop.f32.mrf.mxu1  ;;  %19860 = vst [vmem:[#allocation113_spill] sm:$0xff] %v17446_v56  ;;  %14335 = vmatpush3.msra.mxu1 %v17446_v56 }
 0x35e   : > { %19856 = vst [vmem:[#allocation109_spill] sm:$0xff] %v17431_v52  ;;  %v4322_v15 = vadd.f32 %v14123_v26, %v17323_v11  ;;  %19858 = vst [vmem:[#allocation111_spill] sm:$0xff] %v17438_v50  ;;  %14336 = vmatprep.subr.mxu1 %v19834_v8  ;;  %v17563_v50 = vld [vmem:[#allocation10 + $0x8] sm:$0xff] }
 0x35f   : > { %v17441_v28 = vpop.f32.mrf.mxu0  ;;  %v14167_v55 = vpop.f32.mrf.mxu1  ;;  %19880 = vst [vmem:[#allocation133_spill] sm:$0xff] %v17563_v50 }
 0x360   : > { %19859 = vst [vmem:[#allocation112_spill] sm:$0xff] %v17441_v28  ;;  %v17444_v34 = vadd.f32 %v14167_v55, %v4318_v25  ;;  %v17458_v55 = vld [vmem:[#allocation10 + $0x48] sm:$0xff] }
 0x361   : > { %v14126_v54 = vpop.f32.mrf.mxu0  ;;  %v17449_v37 = vpop.f32.mrf.mxu1  ;;  %19863 = vst [vmem:[#allocation116_spill] sm:$0xff] %v17458_v55  ;;  %14337 = vmatpush3.msra.mxu1 %v17458_v55 }
 0x362   : > { %v4325_v40 = vadd.f32 %v14126_v54, %v17329_v45  ;;  %19861 = vst [vmem:[#allocation114_spill] sm:$0xff] %v17449_v37  ;;  %14338 = vmatprep.subr.mxu1 %v19834_v8  ;;  %v17546_v37 = vld [vmem:[#allocation10 + $0x18] sm:$0xff] }
 0x363   : > { %v4268_v11 = vpop.f32.mrf.mxu0  ;;  %v14170_v58 = vpop.f32.mrf.mxu1  ;;  %19878 = vst [vmem:[#allocation131_spill] sm:$0xff] %v17546_v37 }
 0x364   : > { %v17454_v26 = vadd.f32 %v4268_v11, %v17332_v18  ;;  %v17456_v28 = vadd.f32 %v14170_v58, %v4321_v9  ;;  %v17469_v11 = vld [vmem:[#allocation10 + $0x40] sm:$0xff] }
 0x365   : > { %v14127_v25 = vpop.f32.mrf.mxu0  ;;  %v17461_v39 = vpop.f32.mrf.mxu1  ;;  %19866 = vst [vmem:[#allocation119_spill] sm:$0xff] %v17469_v11  ;;  %14339 = vmatpush3.msra.mxu1 %v17469_v11 }
 0x366   : > { %19862 = vst [vmem:[#allocation115_spill] sm:$0xff] %v17454_v26  ;;  %v4326_v52 = vadd.f32 %v14127_v25, %v17336_v5  ;;  %19864 = vst [vmem:[#allocation117_spill] sm:$0xff] %v17461_v39  ;;  %14340 = vmatprep.subr.mxu1 %v19834_v8 }
 0x367   : > { %v17464_v45 = vpop.f32.mrf.mxu0  ;;  %v14171_v54 = vpop.f32.mrf.mxu1 }
 0x368   : > { %19865 = vst [vmem:[#allocation118_spill] sm:$0xff] %v17464_v45  ;;  %v17467_v56 = vadd.f32 %v14171_v54, %v4322_v15  ;;  %v17481_v54 = vld [vmem:[#allocation10 + $0x38] sm:$0xff] }
 0x369   : > { %v14130_v18 = vpop.f32.mrf.mxu0  ;;  %v17472_v58 = vpop.f32.mrf.mxu1  ;;  %19869 = vst [vmem:[#allocation122_spill] sm:$0xff] %v17481_v54  ;;  %14341 = vmatpush3.msra.mxu1 %v17481_v54 }
 0x36a   : > { %v4329_v9 = vadd.f32 %v14130_v18, %v17342_v41  ;;  %19867 = vst [vmem:[#allocation120_spill] sm:$0xff] %v17472_v58  ;;  %14342 = vmatprep.subr.mxu1 %v19834_v8  ;;  %v17544_v58 = vld [vmem:[#allocation10 + $0x20] sm:$0xff] }
 0x36b   : > { %v4284_v5 = vpop.f32.mrf.mxu0  ;;  %v14174_v55 = vpop.f32.mrf.mxu1  ;;  %19877 = vst [vmem:[#allocation130_spill] sm:$0xff] %v17544_v58 }
 0x36c   : > { %v17477_v25 = vadd.f32 %v4284_v5, %v17345_v51  ;;  %v17479_v45 = vadd.f32 %v14174_v55, %v4325_v40  ;;  %v17492_v5 = vld [vmem:[#allocation10 + $0x30] sm:$0xff] }
 0x36d   : > { %v14131_v15 = vpop.f32.mrf.mxu0  ;;  %v17484_v39 = vpop.f32.mrf.mxu1  ;;  %19872 = vst [vmem:[#allocation125_spill] sm:$0xff] %v17492_v5  ;;  %14343 = vmatpush3.msra.mxu1 %v17492_v5 }
 0x36e   : > { %19868 = vst [vmem:[#allocation121_spill] sm:$0xff] %v17477_v25  ;;  %v4330_v26 = vadd.f32 %v14131_v15, %v17349_v31  ;;  %19870 = vst [vmem:[#allocation123_spill] sm:$0xff] %v17484_v39  ;;  %14344 = vmatprep.subr.mxu1 %v19834_v8 }
 0x36f   : > { %v17487_v41 = vpop.f32.mrf.mxu0  ;;  %v14175_v18 = vpop.f32.mrf.mxu1 }
 0x370   : > { %19871 = vst [vmem:[#allocation124_spill] sm:$0xff] %v17487_v41  ;;  %v17490_v11 = vadd.f32 %v14175_v18, %v4326_v52  ;;  %v17506_v18 = vld [vmem:[#allocation10 + $0x28] sm:$0xff] }
 0x371   : > { %v14198_v51 = vpop.f32.mrf.mxu0  ;;  %v17494_v40 = vpop.f32.mrf.mxu1  ;;  %19874 = vst [vmem:[#allocation127_spill] sm:$0xff] %v17506_v18  ;;  %14345 = vmatpush3.msra.mxu1 %v17506_v18 }
 0x372   : > { %19873 = vst [vmem:[#allocation126_spill] sm:$0xff] %v17494_v40  ;;  %v17497_v55 = vadd.f32 %v14198_v51, %v17357_v20  ;;  %14346 = vmatprep.subr.mxu1 %v19834_v8 }
 0x373   : > { %v5236_v31 = vpop.f32.mrf.mxu0  ;;  %v14178_v15 = vpop.f32.mrf.mxu1  ;;  %14347 = vmatpush3.msra.mxu1 %v17544_v58 }
 0x374   : > { %v17502_v54 = vadd.f32 %v5236_v31, %v17360_v16  ;;  %v17504_v41 = vadd.f32 %v14178_v15, %v4329_v9  ;;  %14348 = vmatprep.subr.mxu1 %v19834_v8 }
 0x375   : > { %v14199_v52 = vpop.f32.mrf.mxu0  ;;  %v17508_v25 = vpop.f32.mrf.mxu1  ;;  %14349 = vmatpush3.msra.mxu1 %v17546_v37 }
 0x376   : > { %19875 = vst [vmem:[#allocation128_spill] sm:$0xff] %v17508_v25  ;;  %v17511_v40 = vadd.f32 %v14199_v52, %v17364_v46  ;;  %14350 = vmatprep.subr.mxu1 %v19834_v8 }
 0x377   : > { %v17514_v20 = vpop.f32.mrf.mxu0  ;;  %v14179_v51 = vpop.f32.mrf.mxu1  ;;  %14351 = vmatpush3.msra.mxu1 %v17552_v48 }
 0x378   : > { %v17517_v5 = vadd.f32 %v14179_v51, %v4330_v26  ;;  %14352 = vmatprep.subr.mxu1 %v19834_v8 }
 0x379   : > { %v14202_v16 = vpop.f32.mrf.mxu0  ;;  %v17519_v9 = vpop.f32.mrf.mxu1  ;;  %14353 = vmatpush3.msra.mxu1 %v17563_v50 }
 0x37a   : > { %19876 = vst [vmem:[#allocation129_spill] sm:$0xff] %v17519_v9  ;;  %v17522_v31 = vadd.f32 %v14202_v16, %v17372_v49  ;;  %14354 = vmatprep.subr.mxu1 %v19834_v8 }
 0x37b   : > { %v17524_v15 = vpop.f32.mrf.mxu0  ;;  %v17526_v25 = vpop.f32.mrf.mxu1  ;;  %14355 = vmatpush3.msra.mxu1 %v17569_v33 }
 0x37c   : > { %14359 = vmatprep.subr.mxu1 %v19834_v8 }
 0x37d   : > { %v14203_v46 = vpop.f32.mrf.mxu0  ;;  %v17531_v18 = vpop.f32.mrf.mxu1 }
 0x37e   : > { %v17529_v52 = vadd.f32 %v14203_v46, %v17379_v6 }
 0x37f   : > { %v17533_v39 = vpop.f32.mrf.mxu0  ;;  %v17535_v26 = vpop.f32.mrf.mxu1 }
 0x381   : > { %v14206_v51 = vpop.f32.mrf.mxu0  ;;  %v17540_v49 = vpop.f32.mrf.mxu1 }
 0x382   : > { %v17538_v9 = vadd.f32 %v14206_v51, %v17389_v57 }
 0x383   : > { %v17542_v16 = vpop.f32.mrf.mxu0  ;;  %v17548_v6 = vpop.f32.mrf.mxu1 }
 0x385   : > { %v14207_v46 = vpop.f32.mrf.mxu0  ;;  %v17557_v51 = vpop.f32.mrf.mxu1 }
 0x386   : > { %v17555_v57 = vadd.f32 %v14207_v46, %v17400_v32 }
 0x387   : > { %v17560_v19 = vpop.f32.mrf.mxu0  ;;  %v17565_v10 = vpop.f32.mrf.mxu1 }
 0x389   : > { %v14210_v58 = vpop.f32.mrf.mxu0  ;;  %v17575_v46 = vpop.f32.mrf.mxu1 }
 0x38a   : > { %v17572_v32 = vadd.f32 %v14210_v58, %v17412_v38 }
 0x38b   : > { %v17577_v37 = vpop.f32.mrf.mxu0  ;;  %v17585_v59 = vpop.f32.mrf.mxu1 }
 0x38c   : > { %19882 = vst [vmem:[#allocation135_spill] sm:$0xff] %v17572_v32 }
 0x38d   : > { %v14211_v35 = vpop.f32.mrf.mxu0  ;;  %v17592_v32 = vpop.f32.mrf.mxu1 }
 0x38e   : > { %v17583_v48 = vadd.f32 %v14211_v35, %v17421_v62 }
 0x38f   : > { %v17587_v38 = vpop.f32.mrf.mxu0  ;;  %v17599_v8 = vpop.f32.mrf.mxu1 }
 0x390   : > { %19883 = vst [vmem:[#allocation136_spill] sm:$0xff] %v17583_v48  ;;  %19884 = vst [vmem:[#allocation137_spill] sm:$0xff] %v17587_v38 }
 0x391   : > { %v14214_v58 = vpop.f32.mrf.mxu0  ;;  %v17606_v38 = vpop.f32.mrf.mxu1 }
 0x392   : > { %v17590_v50 = vadd.f32 %v14214_v58, %v17433_v30 }
 0x393   : > { %v17594_v22 = vpop.f32.mrf.mxu0 }
 0x394   : > { %19885 = vst [vmem:[#allocation138_spill] sm:$0xff] %v17590_v50  ;;  %19886 = vst [vmem:[#allocation139_spill] sm:$0xff] %v17594_v22  ;;  %v17613_v22 = vpop.f32.mrf.mxu1 }
 0x395   : > { %v14215_v24 = vpop.f32.mrf.mxu0 }
 0x396   : > { %v17597_v33 = vadd.f32 %v14215_v24, %v17444_v34 }
 0x397   : > { %v17601_v62 = vpop.f32.mrf.mxu0 }
 0x398   : > { %19887 = vst [vmem:[#allocation140_spill] sm:$0xff] %v17597_v33  ;;  %19888 = vst [vmem:[#allocation141_spill] sm:$0xff] %v17601_v62  ;;  %v17620_v62 = vpop.f32.mrf.mxu1 }
 0x399   : > { %v14218_v35 = vpop.f32.mrf.mxu0 }
 0x39a   : > { %v17604_v48 = vadd.f32 %v14218_v35, %v17456_v28 }
 0x39b   : > { %v17608_v30 = vpop.f32.mrf.mxu0 }
 0x39c   : > { %19889 = vst [vmem:[#allocation142_spill] sm:$0xff] %v17604_v48  ;;  %19890 = vst [vmem:[#allocation143_spill] sm:$0xff] %v17608_v30  ;;  %v17627_v30 = vpop.f32.mrf.mxu1 }
 0x39d   : > { %v14219_v58 = vpop.f32.mrf.mxu0 }
 0x39e   : > { %v17611_v50 = vadd.f32 %v14219_v58, %v17467_v56 }
 0x39f   : > { %v17615_v24 = vpop.f32.mrf.mxu0 }
 0x3a0   : > { %19891 = vst [vmem:[#allocation144_spill] sm:$0xff] %v17611_v50  ;;  %19892 = vst [vmem:[#allocation145_spill] sm:$0xff] %v17615_v24  ;;  %v17634_v24 = vpop.f32.mrf.mxu1 }
 0x3a1   : > { %v14222_v34 = vpop.f32.mrf.mxu0 }
 0x3a2   : > { %v17618_v33 = vadd.f32 %v14222_v34, %v17479_v45 }
 0x3a3   : > { %v17622_v28 = vpop.f32.mrf.mxu0 }
 0x3a4   : > { %19893 = vst [vmem:[#allocation146_spill] sm:$0xff] %v17618_v33  ;;  %19894 = vst [vmem:[#allocation147_spill] sm:$0xff] %v17622_v28  ;;  %v3914_v33 = vadd.f32 %v17249_v0, %v17226_v43  ;;  %v5751_v0 = vadd.f32 %v17526_v25, %v17497_v55  ;;  %v17669_v25 = vld [vmem:[%s19558_s7] ss:$0 sm:$0xff] }
 0x3a5   : > { %v14223_v35 = vpop.f32.mrf.mxu0 }
 0x3a6   : > { %v17625_v48 = vadd.f32 %v14223_v35, %v17490_v11  ;;  %v17643_v11 = vpop.f32.mrf.mxu1 }
 0x3a7   : > { %v17629_v56 = vpop.f32.mrf.mxu0 }
 0x3a8   : > { %19895 = vst [vmem:[#allocation148_spill] sm:$0xff] %v17625_v48  ;;  %19896 = vst [vmem:[#allocation149_spill] sm:$0xff] %v17629_v56  ;;  %v4300_v48 = vadd.f32 %v17347_v36, %v3914_v33  ;;  %v5752_v33 = vadd.f32 %v17535_v26, %v17511_v40 }
 0x3a9   : > { %v14226_v58 = vpop.f32.mrf.mxu0 }
 0x3aa   : > { %v17632_v50 = vadd.f32 %v14226_v58, %v17504_v41  ;;  %v4822_v41 = vadd.f32 %v17367_v4, %v4300_v48  ;;  %v5749_v58 = vadd.f32 %v17531_v18, %v17502_v54  ;;  %v4825_v48 = vadd.f32 %v17375_v29, %v17355_v63 }
 0x3ab   : > { %v17636_v45 = vpop.f32.mrf.mxu0 }
 0x3ac   : > { %19897 = vst [vmem:[#allocation150_spill] sm:$0xff] %v17632_v50  ;;  %19898 = vst [vmem:[#allocation151_spill] sm:$0xff] %v17636_v45  ;;  %v17651_v50 = vpop.f32.mrf.mxu1  ;;  %v5364_v43 = vadd.f32 %v17514_v20, %v4822_v41  ;;  %v5367_v40 = vadd.f32 %v17524_v15, %v4825_v48  ;;  %v5755_v15 = vadd.f32 %v17548_v6, %v17522_v31 }
 0x3ad   : > { %v14227_v34 = vpop.f32.mrf.mxu0  ;;  %v5756_v31 = vadd.f32 %v17565_v10, %v17529_v52 }
 0x3ae   : > { %v17641_v28 = vadd.f32 %v14227_v34, %v17517_v5  ;;  %v3918_v34 = vadd.f32 %v17265_v27, %v17242_v3  ;;  %v5750_v4 = vadd.f32 %v17540_v49, %v5364_v43  ;;  %v17664_v20 = vpop.f32.mrf.mxu1 }
 0x3af   : > { %v17645_v35 = vpop.f32.mrf.mxu0 }
 0x3b0   : > { %v4304_v18 = vadd.f32 %v17362_v21, %v3918_v34  ;;  %v5753_v21 = vadd.f32 %v17557_v51, %v5367_v40  ;;  %v17686_v41 = vpop.f32.mrf.mxu1 }
 0x3b1   : > { %v14294_v56 = vpop.f32.mrf.mxu0 }
 0x3b2   : > { %v6273_v54 = vadd.f32 %v14294_v56, %v5751_v0  ;;  %v4826_v29 = vadd.f32 %v17382_v2, %v4304_v18 }
 0x3b3   : > { %v6144_v45 = vpop.f32.mrf.mxu0 }
 0x3b4   : > { %v6271_v5 = vadd.f32 %v6144_v45, %v5749_v58  ;;  %v17678_v49 = vadd.f32 %v17669_v25, %v6273_v54  ;;  %v5368_v45 = vadd.f32 %v17533_v39, %v4826_v29  ;;  %v3922_v39 = vadd.f32 %v17283_v53, %v17258_v7  ;;  %v17711_v53 = vpop.f32.mrf.mxu1 }
 0x3b5   : > { %v14295_v36 = vpop.f32.mrf.mxu0  ;;  %v4829_v7 = vadd.f32 %v17393_v1, %v17370_v61 }
 0x3b6   : > { %v6274_v3 = vadd.f32 %v14295_v36, %v5752_v33  ;;  %v17673_v55 = vadd.f32 %v17669_v25, %v6271_v5  ;;  %v5754_v6 = vadd.f32 %v17575_v46, %v5368_v45  ;;  %v6381_v36 = vmul.f32 %v17678_v49, %v17678_v49 }
 0x3b7   : > { %v6147_v27 = vpop.f32.mrf.mxu0  ;;  %v4308_v18 = vadd.f32 %v17377_v23, %v3922_v39  ;;  %v5371_v29 = vadd.f32 %v17542_v16, %v4829_v7  ;;  %v5759_v16 = vadd.f32 %v17585_v59, %v17538_v9 }
 0x3b8   : > { %v6272_v63 = vadd.f32 %v6147_v27, %v5750_v4  ;;  %v17689_v58 = vadd.f32 %v17669_v25, %v6274_v3  ;;  %v6379_v51 = vmul.f32 %v17673_v55, %v17673_v55 }
 0x3b9   : > { %v14298_v26 = vpop.f32.mrf.mxu0 }
 0x3ba   : > { %v17681_v56 = vadd.f32 %v17669_v25, %v6272_v63  ;;  %v6277_v34 = vadd.f32 %v14298_v26, %v5755_v15  ;;  %v6382_v10 = vmul.f32 %v17689_v58, %v17689_v58  ;;  %v4830_v63 = vadd.f32 %v17404_v12, %v4308_v18 }
 0x3bb   : > { %v6160_v2 = vpop.f32.mrf.mxu0  ;;  %v2821_v15 = vadd.f32 %v17188_v42, %v17176_v60  ;;  %v4833_v60 = vadd.f32 %v17416_v17, %v17385_v13  ;;  %v5760_v42 = vadd.f32 %v17599_v8, %v17555_v57 }
 0x3bc   : > { %v6342_v43 = vadd.f32 %v17681_v56, %v17673_v55  ;;  %v6380_v0 = vmul.f32 %v17681_v56, %v17681_v56  ;;  %v6275_v5 = vadd.f32 %v6160_v2, %v5753_v21  ;;  %v17719_v23 = vadd.f32 %v17669_v25, %v6277_v34 }
 0x3bd   : > { %v14299_v33 = vpop.f32.mrf.mxu0  ;;  %v5372_v12 = vadd.f32 %v17560_v19, %v4830_v63  ;;  %v5757_v2 = vadd.f32 %v17592_v32, %v5371_v29 }
 0x3be   : > { %v6343_v48 = vadd.f32 %v6342_v43, %v17678_v49  ;;  %v6411_v4 = vadd.f32 %v6380_v0, %v6379_v51  ;;  %v17706_v54 = vadd.f32 %v17669_v25, %v6275_v5  ;;  %v6278_v27 = vadd.f32 %v14299_v33, %v5756_v31  ;;  %v17733_v51 = vpop.f32.mrf.mxu1 }
 0x3bf   : > { %v6163_v52 = vpop.f32.mrf.mxu0  ;;  %v5758_v32 = vadd.f32 %v17606_v38, %v5372_v12 }
 0x3c0   : > { %v6412_v46 = vadd.f32 %v6411_v4, %v6381_v36  ;;  %v6344_v3 = vadd.f32 %v6343_v48, %v17689_v58  ;;  %v6276_v40 = vadd.f32 %v6163_v52, %v5754_v6  ;;  %v6383_v1 = vmul.f32 %v17706_v54, %v17706_v54  ;;  %v17752_v17 = vpop.f32.mrf.mxu1 }
 0x3c1   : > { %v14302_v26 = vpop.f32.mrf.mxu0  ;;  %v17736_v5 = vadd.f32 %v17669_v25, %v6278_v27  ;;  %v6385_v6 = vmul.f32 %v17719_v23, %v17719_v23  ;;  %v3926_v36 = vadd.f32 %v17297_v47, %v17274_v44  ;;  %v5375_v48 = vadd.f32 %v17577_v37, %v4833_v60  ;;  %v19900_v44 = vld [vmem:[#allocation102_spill] sm:$0xff]  ;;  %v19904_v60 = vld [vmem:[#allocation95_spill] sm:$0xff] }
 0x3c2   : > { %v6345_v61 = vadd.f32 %v6344_v3, %v17706_v54  ;;  %v6413_v21 = vadd.f32 %v6412_v46, %v6382_v10  ;;  %v17725_v45 = vadd.f32 %v17669_v25, %v6276_v40  ;;  %v6281_v59 = vadd.f32 %v14302_v26, %v5759_v16  ;;  %v19899_v10 = vld [vmem:[#allocation73_spill] sm:$0xff]  ;;  %v17777_v12 = vpop.f32.mrf.mxu1 }
 0x3c3   : > { %v6176_v43 = vpop.f32.mrf.mxu0  ;;  %v6386_v38 = vmul.f32 %v17736_v5, %v17736_v5  ;;  %v2837_v52 = vadd.f32 %v19899_v10, %v17186_v14  ;;  %v4312_v47 = vadd.f32 %v19900_v44, %v3926_v36  ;;  %v5761_v37 = vadd.f32 %v17620_v62, %v5375_v48  ;;  %v19901_v26 = vld [vmem:[#allocation93_spill] sm:$0xff]  ;;  %v19902_v14 = vld [vmem:[#allocation108_spill] sm:$0xff] }
 0x3c4   : > { %v6414_v0 = vadd.f32 %v6413_v21, %v6383_v1  ;;  %v6346_v39 = vadd.f32 %v6345_v61, %v17725_v45  ;;  %v6384_v31 = vmul.f32 %v17725_v45, %v17725_v45  ;;  %v6279_v19 = vadd.f32 %v6176_v43, %v5757_v2  ;;  %v19903_v21 = vld [vmem:[#allocation135_spill] sm:$0xff]  ;;  %v17800_v44 = vpop.f32.mrf.mxu1 }
 0x3c5   : > { %v14303_v9 = vpop.f32.mrf.mxu0  ;;  %v17765_v46 = vadd.f32 %v17669_v25, %v6281_v59  ;;  %v3388_v61 = vadd.f32 %v19901_v26, %v2821_v15  ;;  %v4834_v1 = vadd.f32 %v19902_v14, %v4312_v47  ;;  %v5763_v62 = vadd.f32 %v17613_v22, %v19903_v21  ;;  %v19906_v59 = vld [vmem:[#allocation111_spill] sm:$0xff]  ;;  %v19912_v26 = vld [vmem:[#allocation114_spill] sm:$0xff] }
 0x3c6   : > { %v6347_v34 = vadd.f32 %v6346_v39, %v17719_v23  ;;  %v6415_v33 = vadd.f32 %v6414_v0, %v6384_v31  ;;  %v17755_v8 = vadd.f32 %v17669_v25, %v6279_v19  ;;  %v6282_v13 = vadd.f32 %v14303_v9, %v5760_v42  ;;  %v19905_v42 = vld [vmem:[#allocation104_spill] sm:$0xff]  ;;  %v19907_v9 = vld [vmem:[#allocation137_spill] sm:$0xff] }
 0x3c7   : > { %v6179_v57 = vpop.f32.mrf.mxu0  ;;  %v3930_v15 = vadd.f32 %v19904_v60, %v3388_v61  ;;  %v4837_v19 = vadd.f32 %v19906_v59, %v19905_v42  ;;  %v5376_v22 = vadd.f32 %v19907_v9, %v4834_v1  ;;  %v19914_v60 = vld [vmem:[#allocation141_spill] sm:$0xff] }
 0x3c8   : > { %v6416_v4 = vadd.f32 %v6415_v33, %v6385_v6  ;;  %v6348_v18 = vadd.f32 %v6347_v34, %v17736_v5  ;;  %v6280_v7 = vadd.f32 %v6179_v57, %v5758_v32  ;;  %v6387_v40 = vmul.f32 %v17755_v8, %v17755_v8 }
 0x3c9   : > { %v14306_v3 = vpop.f32.mrf.mxu0  ;;  %v17780_v16 = vadd.f32 %v17669_v25, %v6282_v13  ;;  %v6389_v32 = vmul.f32 %v17765_v46, %v17765_v46  ;;  %v19908_v13 = vld [vmem:[#allocation106_spill] sm:$0xff]  ;;  %v5762_v10 = vadd.f32 %v17634_v24, %v5376_v22 }
 0x3ca   : > { %v6349_v27 = vadd.f32 %v6348_v18, %v17755_v8  ;;  %v6417_v63 = vadd.f32 %v6416_v4, %v6386_v38  ;;  %v17771_v29 = vadd.f32 %v17669_v25, %v6280_v7  ;;  %v6285_v36 = vadd.f32 %v14306_v3, %v5763_v62  ;;  %v19909_v38 = vld [vmem:[#allocation139_spill] sm:$0xff]  ;;  %v19910_v18 = vld [vmem:[#allocation136_spill] sm:$0xff] }
 0x3cb   : > { %v6192_v2 = vpop.f32.mrf.mxu0  ;;  %v4316_v57 = vadd.f32 %v19908_v13, %v3930_v15  ;;  %v5379_v4 = vadd.f32 %v19909_v38, %v4837_v19  ;;  %v5764_v7 = vadd.f32 %v17627_v30, %v19910_v18  ;;  %v6390_v3 = vmul.f32 %v17780_v16, %v17780_v16  ;;  %v19915_v19 = vld [vmem:[#allocation138_spill] sm:$0xff] }
 0x3cc   : > { %v6418_v43 = vadd.f32 %v6417_v63, %v6387_v40  ;;  %v6350_v0 = vadd.f32 %v6349_v27, %v17771_v29  ;;  %v6388_v39 = vmul.f32 %v17771_v29, %v17771_v29  ;;  %v6283_v31 = vadd.f32 %v6192_v2, %v5761_v37  ;;  %v19911_v37 = vld [vmem:[#allocation94_spill] sm:$0xff] }
 0x3cd   : > { %v14307_v6 = vpop.f32.mrf.mxu0  ;;  %v3392_v27 = vadd.f32 %v19911_v37, %v2837_v52  ;;  %v4838_v61 = vadd.f32 %v19912_v26, %v4316_v57  ;;  %v5765_v14 = vadd.f32 %v17651_v50, %v5379_v4  ;;  %v17809_v24 = vadd.f32 %v17669_v25, %v6285_v36  ;;  %v19917_v36 = vld [vmem:[#allocation117_spill] sm:$0xff]  ;;  %v19918_v57 = vld [vmem:[#allocation140_spill] sm:$0xff] }
 0x3ce   : > { %v6351_v34 = vadd.f32 %v6350_v0, %v17765_v46  ;;  %v6419_v33 = vadd.f32 %v6418_v43, %v6388_v39  ;;  %v17793_v48 = vadd.f32 %v17669_v25, %v6283_v31  ;;  %v6286_v1 = vadd.f32 %v14307_v6, %v5764_v7  ;;  %v17814_v43 = vpop.f32.mrf.mxu1  ;;  %v19913_v31 = vld [vmem:[#allocation97_spill] sm:$0xff]  ;;  %v19921_v26 = vld [vmem:[#allocation112_spill] sm:$0xff] }
 0x3cf   : > { %v6195_v47 = vpop.f32.mrf.mxu0  ;;  %v3934_v50 = vadd.f32 %v19913_v31, %v3392_v27  ;;  %v5380_v15 = vadd.f32 %v19914_v60, %v4838_v61  ;;  %v5767_v9 = vadd.f32 %v17643_v11, %v19915_v19  ;;  %v5768_v38 = vadd.f32 %v17664_v20, %v19918_v57  ;;  %v19922_v61 = vld [vmem:[#allocation143_spill] sm:$0xff]  ;;  %v19924_v31 = vld [vmem:[#allocation120_spill] sm:$0xff] }
 0x3d0   : > { %v6420_v40 = vadd.f32 %v6419_v33, %v6389_v32  ;;  %v6352_v63 = vadd.f32 %v6351_v34, %v17780_v16  ;;  %v6284_v21 = vadd.f32 %v6195_v47, %v5762_v10  ;;  %v6391_v52 = vmul.f32 %v17793_v48, %v17793_v48  ;;  %v19916_v33 = vld [vmem:[#allocation109_spill] sm:$0xff]  ;;  %v17836_v18 = vpop.f32.mrf.mxu1 }
 0x3d1   : > { %v14310_v30 = vpop.f32.mrf.mxu0  ;;  %v17824_v22 = vadd.f32 %v17669_v25, %v6286_v1  ;;  %v4841_v13 = vadd.f32 %v19917_v36, %v19916_v33  ;;  %v5766_v4 = vadd.f32 %v17686_v41, %v5380_v15  ;;  %v6393_v11 = vmul.f32 %v17809_v24, %v17809_v24  ;;  %v19926_v36 = vld [vmem:[#allocation142_spill] sm:$0xff] }
 0x3d2   : > { %v6353_v62 = vadd.f32 %v6352_v63, %v17793_v48  ;;  %v6421_v2 = vadd.f32 %v6420_v40, %v6390_v3  ;;  %v17817_v0 = vadd.f32 %v17669_v25, %v6284_v21  ;;  %v6289_v47 = vadd.f32 %v14310_v30, %v5767_v9  ;;  %v19919_v3 = vld [vmem:[#allocation72_spill] sm:$0xff]  ;;  %v19920_v40 = vld [vmem:[#allocation79_spill] sm:$0xff] }
 0x3d3   : > { %v6208_v39 = vpop.f32.mrf.mxu0  ;;  %v2853_v63 = vadd.f32 %v19920_v40, %v19919_v3  ;;  %v4320_v20 = vadd.f32 %v19921_v26, %v3934_v50  ;;  %v5383_v41 = vadd.f32 %v19922_v61, %v4841_v13  ;;  %v6394_v1 = vmul.f32 %v17824_v22, %v17824_v22  ;;  %v5721_v50 = vpop.f32.mrf.mxu1  ;;  %v19929_v3 = vld [vmem:[#allocation123_spill] sm:$0xff] }
 0x3d4   : > { %v6422_v42 = vadd.f32 %v6421_v2, %v6391_v52  ;;  %v6287_v59 = vadd.f32 %v6208_v39, %v5765_v14  ;;  %v6354_v32 = vadd.f32 %v6353_v62, %v17817_v0  ;;  %v6392_v6 = vmul.f32 %v17817_v0, %v17817_v0  ;;  %v19923_v2 = vld [vmem:[#allocation96_spill] sm:$0xff] }
 0x3d5   : > { %v14311_v34 = vpop.f32.mrf.mxu0  ;;  %v3396_v39 = vadd.f32 %v19923_v2, %v2853_v63  ;;  %v4842_v60 = vadd.f32 %v19924_v31, %v4320_v20  ;;  %v5769_v15 = vadd.f32 %v17733_v51, %v5383_v41  ;;  %v5771_v13 = vadd.f32 %v17711_v53, %v19926_v36  ;;  %v17874_v53 = vpop.f32.mrf.mxu1  ;;  %v19932_v2 = vld [vmem:[#allocation118_spill] sm:$0xff]  ;;  %v19933_v31 = vld [vmem:[#allocation147_spill] sm:$0xff] }
 0x3d6   : > { %v6355_v7 = vadd.f32 %v6354_v32, %v17809_v24  ;;  %v6423_v10 = vadd.f32 %v6422_v42, %v6392_v6  ;;  %v17840_v37 = vadd.f32 %v17669_v25, %v6287_v59  ;;  %v6290_v52 = vadd.f32 %v14311_v34, %v5768_v38  ;;  %v19925_v34 = vld [vmem:[#allocation145_spill] sm:$0xff] }
 0x3d7   : > { %v6211_v27 = vpop.f32.mrf.mxu0  ;;  %v17856_v59 = vadd.f32 %v17669_v25, %v6289_v47  ;;  %v5384_v33 = vadd.f32 %v19925_v34, %v4842_v60  ;;  %v19934_v60 = vld [vmem:[#allocation144_spill] sm:$0xff]  ;;  %v19935_v34 = vld [vmem:[#allocation126_spill] sm:$0xff] }
 0x3d8   : > { %v6288_v14 = vadd.f32 %v6211_v27, %v5766_v4  ;;  %v6424_v21 = vadd.f32 %v6423_v10, %v6393_v11  ;;  %v6356_v62 = vadd.f32 %v6355_v7, %v17824_v22  ;;  %v6395_v9 = vmul.f32 %v17840_v37, %v17840_v37  ;;  %v19927_v10 = vld [vmem:[#allocation99_spill] sm:$0xff] }
 0x3d9   : > { %v14314_v30 = vpop.f32.mrf.mxu0  ;;  %v17867_v4 = vadd.f32 %v17669_v25, %v6290_v52  ;;  %v3938_v47 = vadd.f32 %v19927_v10, %v3396_v39  ;;  %v19928_v27 = vld [vmem:[#allocation115_spill] sm:$0xff]  ;;  %v5770_v63 = vadd.f32 %v17777_v12, %v5384_v33  ;;  %v6397_v20 = vmul.f32 %v17856_v59, %v17856_v59 }
 0x3da   : > { %v17853_v42 = vadd.f32 %v17669_v25, %v6288_v14  ;;  %v6357_v19 = vadd.f32 %v6356_v62, %v17840_v37  ;;  %v6425_v32 = vadd.f32 %v6424_v21, %v6394_v1  ;;  %v4845_v40 = vadd.f32 %v19929_v3, %v19928_v27  ;;  %v19930_v21 = vld [vmem:[#allocation78_spill] sm:$0xff]  ;;  %v19931_v62 = vld [vmem:[#allocation92_spill] sm:$0xff] }
 0x3db   : > { %v6224_v6 = vpop.f32.mrf.mxu0  ;;  %v6293_v26 = vadd.f32 %v14314_v30, %v5771_v13  ;;  %v2869_v52 = vadd.f32 %v19931_v62, %v19930_v21  ;;  %v4324_v39 = vadd.f32 %v19932_v2, %v3938_v47  ;;  %v19936_v27 = vld [vmem:[#allocation98_spill] sm:$0xff]  ;;  %v19939_v62 = vld [vmem:[#allocation121_spill] sm:$0xff]  ;;  %v19940_v2 = vld [vmem:[#allocation128_spill] sm:$0xff] }
 0x3dc   : > { %v6396_v51 = vmul.f32 %v17853_v42, %v17853_v42  ;;  %v6291_v57 = vadd.f32 %v6224_v6, %v5769_v15  ;;  %v6426_v38 = vadd.f32 %v6425_v32, %v6395_v9  ;;  %v6358_v11 = vadd.f32 %v6357_v19, %v17853_v42 }
 0x3dd   : > { %v14315_v7 = vpop.f32.mrf.mxu0  ;;  %v5387_v12 = vadd.f32 %v19933_v31, %v4845_v40  ;;  %v5772_v15 = vadd.f32 %v17752_v17, %v19934_v60  ;;  %v6398_v19 = vmul.f32 %v17867_v4, %v17867_v4  ;;  %v4846_v33 = vadd.f32 %v19935_v34, %v4324_v39  ;;  %v19937_v40 = vld [vmem:[#allocation149_spill] sm:$0xff]  ;;  %v19941_v31 = vld [vmem:[#allocation146_spill] sm:$0xff] }
 0x3de   : > { %v6359_v61 = vadd.f32 %v6358_v11, %v17856_v59  ;;  %v6427_v41 = vadd.f32 %v6426_v38, %v6396_v51  ;;  %v17880_v14 = vadd.f32 %v17669_v25, %v6291_v57  ;;  %v17894_v13 = vadd.f32 %v17669_v25, %v6293_v26  ;;  %v5734_v57 = vpop.f32.mrf.mxu1 }
 0x3df   : > { %v6227_v1 = vpop.f32.mrf.mxu0  ;;  %v5773_v36 = vadd.f32 %v17814_v43, %v5387_v12  ;;  %v6294_v10 = vadd.f32 %v14315_v7, %v5772_v15  ;;  %v3400_v3 = vadd.f32 %v19936_v27, %v2869_v52  ;;  %v4849_v39 = vadd.f32 %v19940_v2, %v19939_v62 }
 0x3e0   : > { %v6292_v30 = vadd.f32 %v6227_v1, %v5770_v63  ;;  %v6428_v9 = vadd.f32 %v6427_v41, %v6397_v20  ;;  %v6360_v32 = vadd.f32 %v6359_v61, %v17867_v4  ;;  %v6399_v38 = vmul.f32 %v17880_v14, %v17880_v14  ;;  %v19938_v1 = vld [vmem:[#allocation100_spill] sm:$0xff]  ;;  %v14275_v52 = vpop.f32.mrf.mxu1 }
 0x3e1   : > { %v14318_v6 = vpop.f32.mrf.mxu0  ;;  %v5388_v63 = vadd.f32 %v19937_v40, %v4846_v33  ;;  %v3942_v21 = vadd.f32 %v19938_v1, %v3400_v3  ;;  %v5775_v7 = vadd.f32 %v17800_v44, %v19941_v31  ;;  %v17915_v60 = vadd.f32 %v17669_v25, %v6294_v10  ;;  %v19943_v33 = vld [vmem:[#allocation151_spill] sm:$0xff]  ;;  %v19945_v3 = vld [vmem:[#allocation129_spill] sm:$0xff] }
 0x3e2   : > { %v17897_v51 = vadd.f32 %v17669_v25, %v6292_v30  ;;  %v6361_v17 = vadd.f32 %v6360_v32, %v17880_v14  ;;  %v6429_v11 = vadd.f32 %v6428_v9, %v6398_v19  ;;  %v6401_v30 = vmul.f32 %v17894_v13, %v17894_v13  ;;  %v19942_v32 = vld [vmem:[#allocation124_spill] sm:$0xff] }
 0x3e3   : > { %v6240_v47 = vpop.f32.mrf.mxu0  ;;  %v5774_v12 = vadd.f32 %v5721_v50, %v5388_v63  ;;  %v4328_v34 = vadd.f32 %v19942_v32, %v3942_v21 }
 0x3e4   : > { %v6400_v43 = vmul.f32 %v17897_v51, %v17897_v51  ;;  %v6430_v26 = vadd.f32 %v6429_v11, %v6399_v38  ;;  %v6362_v20 = vadd.f32 %v6361_v17, %v17897_v51  ;;  %v6295_v61 = vadd.f32 %v6240_v47, %v5773_v36  ;;  %v19944_v17 = vld [vmem:[#allocation148_spill] sm:$0xff] }
 0x3e5   : > { %v14319_v41 = vpop.f32.mrf.mxu0  ;;  %v5391_v36 = vadd.f32 %v19943_v33, %v4849_v39  ;;  %v5776_v38 = vadd.f32 %v17836_v18, %v19944_v17  ;;  %v6297_v11 = vadd.f32 %v14318_v6, %v5775_v7  ;;  %v4850_v40 = vadd.f32 %v19945_v3, %v4328_v34  ;;  %v19946_v7 = vld [vmem:[#allocation150_spill] sm:$0xff] }
 0x3e6   : > { %v6363_v15 = vadd.f32 %v6362_v20, %v17894_v13  ;;  %v6431_v19 = vadd.f32 %v6430_v26, %v6400_v43  ;;  %v17923_v47 = vadd.f32 %v17669_v25, %v6295_v61  ;;  %v5737_v26 = vpop.f32.mrf.mxu1  ;;  %v6402_v20 = vmul.f32 %v17915_v60, %v17915_v60 }
 0x3e7   : > { %v6243_v9 = vpop.f32.mrf.mxu0  ;;  %v5777_v43 = vadd.f32 %v5734_v57, %v5391_v36  ;;  %v6298_v1 = vadd.f32 %v14319_v41, %v5776_v38  ;;  %v5392_v61 = vadd.f32 %v17645_v35, %v4850_v40  ;;  %v17935_v21 = vadd.f32 %v17669_v25, %v6297_v11 }
 0x3e8   : > { %v6296_v44 = vadd.f32 %v6243_v9, %v5774_v12  ;;  %v6432_v50 = vadd.f32 %v6431_v19, %v6401_v30  ;;  %v6364_v10 = vadd.f32 %v6363_v15, %v17915_v60  ;;  %v5779_v57 = vadd.f32 %v17874_v53, %v19946_v7 }
 0x3e9   : > { %v14322_v27 = vpop.f32.mrf.mxu0  ;;  %v5778_v12 = vadd.f32 %v5737_v26, %v5392_v61  ;;  %v6403_v30 = vmul.f32 %v17923_v47, %v17923_v47  ;;  %v17943_v41 = vadd.f32 %v17669_v25, %v6298_v1  ;;  %v5780_v19 = vadd.f32 %v14275_v52, %v17641_v28 }
 0x3ea   : > { %v17928_v63 = vadd.f32 %v17669_v25, %v6296_v44  ;;  %v6365_v18 = vadd.f32 %v6364_v10, %v17923_v47  ;;  %v6433_v62 = vadd.f32 %v6432_v50, %v6402_v20  ;;  %v6301_v9 = vadd.f32 %v14322_v27, %v5779_v57  ;;  %v19947_v57 = vld [vmem:[#allocation101_spill] sm:$0xff] }
 0x3eb   : > { %v6256_v6 = vpop.f32.mrf.mxu0  ;;  %v6405_v11 = vmul.f32 %v17935_v21, %v17935_v21 }
 0x3ec   : > { %v6366_v2 = vadd.f32 %v6365_v18, %v17928_v63  ;;  %v6299_v39 = vadd.f32 %v6256_v6, %v5777_v43  ;;  %v6434_v34 = vadd.f32 %v6433_v62, %v6403_v30  ;;  %v6404_v33 = vmul.f32 %v17928_v63, %v17928_v63 }
 0x3ed   : > { %v14323_v31 = vpop.f32.mrf.mxu0  ;;  %v17958_v28 = vadd.f32 %v17669_v25, %v6301_v9  ;;  %v6406_v43 = vmul.f32 %v17943_v41, %v17943_v41 }
 0x3ee   : > { %v6367_v35 = vadd.f32 %v6366_v2, %v17935_v21  ;;  %v17950_v53 = vadd.f32 %v17669_v25, %v6299_v39  ;;  %v6302_v44 = vadd.f32 %v14323_v31, %v5780_v19  ;;  %v6435_v50 = vadd.f32 %v6434_v34, %v6404_v33  ;;  %v19950_v19 = vld [vmem:[#allocation105_spill] sm:$0xff]  ;;  %v19952_v34 = vld [vmem:[#allocation110_spill] sm:$0xff] }
 0x3ef   : > { %v6259_v15 = vpop.f32.mrf.mxu0  ;;  %v6409_v7 = vmul.f32 %v17958_v28, %v17958_v28 }
 0x3f0   : > { %v6300_v32 = vadd.f32 %v6259_v15, %v5778_v12  ;;  %v6368_v36 = vadd.f32 %v6367_v35, %v17943_v41  ;;  %v17964_v10 = vadd.f32 %v17669_v25, %v6302_v44  ;;  %v6436_v3 = vadd.f32 %v6435_v50, %v6405_v11  ;;  %v19949_v35 = vld [vmem:[#allocation103_spill] sm:$0xff] }
 0x3f1   : > { %v6407_v1 = vmul.f32 %v17950_v53, %v17950_v53  ;;  %v19948_v12 = vmov 0.0   ;;  %v19955_v50 = vld [vmem:[#allocation119_spill] sm:$0xff] }
 0x3f2   : > { %v17954_v17 = vadd.f32 %v17669_v25, %v6300_v32  ;;  %v6369_v38 = vadd.f32 %v6368_v36, %v17950_v53  ;;  %v6437_v20 = vadd.f32 %v6436_v3, %v6406_v43  ;;  %v6410_v15 = vmul.f32 %v17964_v10, %v17964_v10  ;;  %v19951_v32 = vld [vmem:[#allocation107_spill] sm:$0xff]  ;;  %v19953_v36 = vld [vmem:[#allocation113_spill] sm:$0xff]  ;;  %v19959_v43 = vld [vmem:[#allocation130_spill] sm:$0xff] }
 0x3f3   : > { %v19958_v3 = vld [vmem:[#allocation127_spill] sm:$0xff] }
 0x3f4   : > { %v6370_v52 = vadd.f32 %v6369_v38, %v17954_v17  ;;  %v6438_v61 = vadd.f32 %v6437_v20, %v6407_v1  ;;  %v6408_v25 = vmul.f32 %v17954_v17, %v17954_v17  ;;  %v19954_v38 = vld [vmem:[#allocation116_spill] sm:$0xff]  ;;  %v19962_v1 = vld [vmem:[#allocation133_spill] sm:$0xff] }
 0x3f6   : > { %v6371_v27 = vadd.f32 %v6370_v52, %v17958_v28  ;;  %v6439_v39 = vadd.f32 %v6438_v61, %v6408_v25  ;;  %v19956_v52 = vld [vmem:[#allocation122_spill] sm:$0xff] }
 0x3f7   : > { %v19963_v61 = vld [vmem:[#allocation134_spill] sm:$0xff] }
 0x3f8   : > { %v6372_v40 = vadd.f32 %v6371_v27, %v17964_v10  ;;  %v6440_v30 = vadd.f32 %v6439_v39, %v6409_v7  ;;  %v19957_v27 = vld [vmem:[#allocation125_spill] sm:$0xff] }
 0x3fa   : > { %v6373_v26 = vrot.slane %v6372_v40, 4  ;;  %v6441_v9 = vadd.f32 %v6440_v30, %v6410_v15  ;;  %v15139_v15 = vld [vmem:[#allocation11 + $0x78] sm:$0xff]  }
 0x3fb   : > { %14394 = vmatprep.subr.bf16.mxu0 %v15139_v15 }
 0x3fc   : > { %v6374_v18 = vadd.f32 %v6373_v26, %v6372_v40  ;;  %v6442_v33 = vrot.slane %v6441_v9, 4  ;;  %v19960_v26 = vld [vmem:[#allocation131_spill] sm:$0xff]  ;;  %14395 = vmatpush3.bf16.msra.mxu0 %v15139_v15  ;;  %v18049_v15 = vld [vmem:[#allocation11 + $0xb8] sm:$0xff]  }
 0x3fe   : > { %v6375_v6 = vrot.slane %v6374_v18, 2  ;;  %v6443_v44 = vadd.f32 %v6442_v33, %v6441_v9  ;;  %v15145_v9 = vld [vmem:[#allocation11 + $0x38] sm:$0xff]   ;;  %v15148_v33 = vld [vmem:[#allocation11 + $0x28] sm:$0xff]  }
 0x400   : > { %v6376_v62 = vadd.f32 %v6375_v6, %v6374_v18  ;;  %v6444_v11 = vrot.slane %v6443_v44, 2  ;;  %v19961_v18 = vld [vmem:[#allocation132_spill] sm:$0xff] }
 0x402   : > { %v6377_v2 = vrot.slane %v6376_v62, 1  ;;  %v6445_v40 = vadd.f32 %v6444_v11, %v6443_v44  ;;  %v6610_v44 = vld [vmem:[%s19559_s8] sm:$0x1] }
 0x404   : > { %v6378_v31 = vadd.f32 %v6377_v2, %v6376_v62  ;;  %v6446_v20 = vrot.slane %v6445_v40, 1 }
 0x406   : > { %14357 = vmatmul.mubr.f32.vlgmr.msra.gmra.mxu1 %v6378_v31  ;;  %v6447_v6 = vadd.f32 %v6446_v20, %v6445_v40  ;;  %v19964_v20 = vld [vmem:[#allocation45_spill] sm:$0xff] }
 0x407   : > { %14360 = vmatpush3.msra.mxu1 %v19947_v57  ;;  %14391 = vmatprep.mubr.msk.f32.mxu1 %vm15873_vm0, %v19948_v12 }
 0x408   : > { %14361 = vmatprep.subr.mxu1 %v19948_v12 }
 0x409   : > { %14362 = vmatpush3.msra.mxu1 %v19949_v35 }
 0x40a   : > { %14363 = vmatprep.subr.mxu1 %v19948_v12 }
 0x40b   : > { %14364 = vmatpush3.msra.mxu1 %v19950_v19  ;;  %v15140_v19 = vld [vmem:[#allocation11 + $0x70] sm:$0xff]  }
 0x40c   : > { %14365 = vmatprep.subr.mxu1 %v19948_v12  ;;  %14396 = vmatprep.subr.bf16.mxu0 %v15140_v19 }
 0x40d   : > { %14366 = vmatpush3.msra.mxu1 %v19951_v32  ;;  %v15146_v32 = vld [vmem:[#allocation11 + $0x30] sm:$0xff]   ;;  %14397 = vmatpush3.bf16.msra.mxu0 %v15140_v19 }
 0x40e   : > { %14367 = vmatprep.subr.mxu1 %v19948_v12 }
 0x40f   : > { %14368 = vmatpush3.msra.mxu1 %v19952_v34  ;;  %v15153_v34 = vld [vmem:[#allocation3 + $0x4] sm:$0xff]  }
 0x410   : > { %14369 = vmatprep.subr.mxu1 %v19948_v12  ;;  %14410 = vmatprep.mubr.bf16.mxu0 %v15153_v34 }
 0x411   : > { %14370 = vmatpush3.msra.mxu1 %v19953_v36  ;;  %v15142_v36 = vld [vmem:[#allocation11 + $0x60] sm:$0xff]  }
 0x412   : > { %14371 = vmatprep.subr.mxu1 %v19948_v12 }
 0x413   : > { %14372 = vmatpush3.msra.mxu1 %v19954_v38 }
 0x414   : > { %14373 = vmatprep.subr.mxu1 %v19948_v12 }
 0x415   : > { %14374 = vmatpush3.msra.mxu1 %v19955_v50  ;;  %v15143_v50 = vld [vmem:[#allocation11 + $0x58] sm:$0xff]  }
 0x416   : > { %14375 = vmatprep.subr.mxu1 %v19948_v12 }
 0x417   : > { %14376 = vmatpush3.msra.mxu1 %v19956_v52  ;;  %v15149_v52 = vld [vmem:[#allocation11 + $0x20] sm:$0xff]  }
 0x418   : > { %14377 = vmatprep.subr.mxu1 %v19948_v12 }
 0x419   : > { %14378 = vmatpush3.msra.mxu1 %v19957_v27  ;;  %v15144_v27 = vld [vmem:[#allocation11 + $0x50] sm:$0xff]  }
 0x41a   : > { %14379 = vmatprep.subr.mxu1 %v19948_v12 }
 0x41b   : > { %14380 = vmatpush3.msra.mxu1 %v19958_v3  ;;  %v15151_v3 = vld [vmem:[#allocation11 + $0x18] sm:$0xff]  }
 0x41c   : > { %14381 = vmatprep.subr.mxu1 %v19948_v12 }
 0x41d   : > { %14382 = vmatpush3.msra.mxu1 %v19959_v43  ;;  %v6612_v43 = vld [vmem:[%s19560_s9] sm:$0x1] }
 0x41e   : > { %14383 = vmatprep.subr.mxu1 %v19948_v12 }
 0x41f   : > { %14384 = vmatpush3.msra.mxu1 %v19960_v26  ;;  %v15147_v26 = vld [vmem:[#allocation11 + $0x48] sm:$0xff]  }
 0x420   : > { %14385 = vmatprep.subr.mxu1 %v19948_v12 }
 0x421   : > { %14386 = vmatpush3.msra.mxu1 %v19961_v18 }
 0x422   : > { %14387 = vmatprep.subr.mxu1 %v19948_v12 }
 0x423   : > { %14388 = vmatpush3.msra.mxu1 %v19962_v1  ;;  %v15152_v1 = vld [vmem:[#allocation11 + $0x10] sm:$0xff]  }
 0x424   : > { %14389 = vmatprep.subr.mxu1 %v19948_v12  ;;  %v15141_v12 = vld [vmem:[#allocation11 + $0x68] sm:$0xff]  }
 0x425   : > { %14390 = vmatpush3.msra.mxu1 %v19963_v61  ;;  %14398 = vmatprep.subr.bf16.mxu0 %v15141_v12  ;;  %v15150_v61 = vld [vmem:[#allocation11 + $0x40] sm:$0xff]  }
 0x426   : > { %14392 = vmatmul.mubr.f32.vlgmr.msra.gmra.mxu1 %v6447_v6  ;;  %14442 = vmatprep.subr.bf16.mxu1 %v15145_v9 }
 0x427   : > { %14443 = vmatpush3.bf16.msra.mxu1 %v15145_v9  ;;  %14399 = vmatpush3.bf16.msra.mxu0 %v15141_v12 }
 0x428   : > { %14444 = vmatprep.subr.bf16.mxu1 %v15146_v32  ;;  %14400 = vmatprep.subr.bf16.mxu0 %v15142_v36 }
 0x42b   : > { %14445 = vmatpush3.bf16.msra.mxu1 %v15146_v32  ;;  %14401 = vmatpush3.bf16.msra.mxu0 %v15142_v36 }
 0x42c   : > { %14446 = vmatprep.subr.bf16.mxu1 %v15148_v33  ;;  %14402 = vmatprep.subr.bf16.mxu0 %v15143_v50 }
 0x42f   : > { %14447 = vmatpush3.bf16.msra.mxu1 %v15148_v33  ;;  %14403 = vmatpush3.bf16.msra.mxu0 %v15143_v50 }
 0x430   : > { %14448 = vmatprep.subr.bf16.mxu1 %v15149_v52  ;;  %14404 = vmatprep.subr.bf16.mxu0 %v15144_v27 }
 0x433   : > { %14449 = vmatpush3.bf16.msra.mxu1 %v15149_v52  ;;  %14405 = vmatpush3.bf16.msra.mxu0 %v15144_v27 }
 0x434   : > { %14450 = vmatprep.subr.bf16.mxu1 %v15151_v3  ;;  %14406 = vmatprep.subr.bf16.mxu0 %v15147_v26 }
 0x437   : > { %14451 = vmatpush3.bf16.msra.mxu1 %v15151_v3  ;;  %14407 = vmatpush3.bf16.msra.mxu0 %v15147_v26 }
 0x438   : > { %14452 = vmatprep.subr.bf16.mxu1 %v15152_v1  ;;  %14408 = vmatprep.subr.bf16.mxu0 %v15150_v61 }
 0x43b   : > { %14453 = vmatpush3.bf16.msra.mxu1 %v15152_v1  ;;  %14409 = vmatpush3.bf16.msra.mxu0 %v15150_v61 }
 0x43c   : > { %14490 = vmatprep.subr.bf16.mxu0 %v18049_v15 }
 0x4c6   : > { %v6530_v62 = vpop.f32.mrf.mxu1 }
 0x4c7   : > { %v6534_v2 = vmul.f32 0.00390625, %v6530_v62 }
 0x4c8   : > { %v14358_v25 = vpop.f32.mrf.mxu1 }
 0x4c9   : > { %v6606_v31 = vmul.f32 %v6534_v2, %v6534_v2 }
 0x4e6   : > { %v6601_v39 = vpop.f32.mrf.mxu1 }
 0x4e7   : > { %v6605_v7 = vmul.f32 0.00390625, %v6601_v39 }
 0x4e8   : > { %v14393_v57 = vpop.f32.mrf.mxu1 }
 0x4e9   : > { %v6607_v30 = vsub.f32 %v6605_v7, %v6606_v31 }
 0x4eb   : > { %v6608_v35 = vadd.f32 1e-05, %v6607_v30 }
 0x4ed   : > { %15491 = vrsqrt.f32 %v6608_v35 }
 0x4fa   : > { %v15492_v38 = vpop.eup %15491 }
 0x4fb   : > { %v6611_v11 = vmul.f32 %v15492_v38, %v6610_v44 }
 0x4fd   : > { %v6613_v40 = vmul.f32 %v6611_v11, %v6534_v2  ;;  %v18018_v18 = vrot.slane %v6611_v11, %v19964_v20  ;;  %v15157_v2 = vld [vmem:[#allocation11 + $0x8] sm:$0xff]  }
 0x4fe   : > { %14454 = vmatprep.subr.bf16.mxu1 %v15157_v2 }
 0x4ff   : > { %v6614_v6 = vsub.f32 %v6612_v43, %v6613_v40  ;;  %v6619_v62 = vmul.f32 %v18018_v18, %v17673_v55  ;;  %v6620_v25 = vmul.f32 %v18018_v18, %v17681_v56  ;;  %v6621_v31 = vmul.f32 %v18018_v18, %v17678_v49  ;;  %v15158_v49 = vld [vmem:[#allocation11] sm:$0xff]   ;;  %14455 = vmatpush3.bf16.msra.mxu1 %v15157_v2 }
 0x500   : > { %v6622_v7 = vmul.f32 %v18018_v18, %v17689_v58  ;;  %v6623_v57 = vmul.f32 %v18018_v18, %v17706_v54  ;;  %v6624_v55 = vmul.f32 %v18018_v18, %v17725_v45  ;;  %v6625_v56 = vmul.f32 %v18018_v18, %v17719_v23  ;;  %14456 = vmatprep.subr.bf16.mxu1 %v15158_v49 }
 0x501   : > { %v18025_v39 = vrot.slane %v6614_v6, %v19964_v20  ;;  %v6626_v30 = vmul.f32 %v18018_v18, %v17736_v5  ;;  %v6627_v35 = vmul.f32 %v18018_v18, %v17755_v8  ;;  %v6628_v58 = vmul.f32 %v18018_v18, %v17771_v29 }
 0x502   : > { %v6629_v54 = vmul.f32 %v18018_v18, %v17765_v46  ;;  %v6630_v45 = vmul.f32 %v18018_v18, %v17780_v16  ;;  %v6631_v23 = vmul.f32 %v18018_v18, %v17793_v48  ;;  %v6632_v5 = vmul.f32 %v18018_v18, %v17817_v0 }
 0x503   : > { %v6633_v8 = vmul.f32 %v18018_v18, %v17809_v24  ;;  %v6634_v29 = vmul.f32 %v18018_v18, %v17824_v22  ;;  %v6635_v46 = vmul.f32 %v18018_v18, %v17840_v37  ;;  %v18061_v16 = vmul.f32 %v18018_v18, %v17853_v42  ;;  %14457 = vmatpush3.bf16.msra.mxu1 %v15158_v49 }
 0x504   : > { %v18065_v48 = vmul.f32 %v18018_v18, %v17856_v59  ;;  %v18068_v0 = vadd.f32 %v18025_v39, %v6619_v62  ;;  %v18071_v24 = vadd.f32 %v18025_v39, %v6620_v25  ;;  %v18075_v22 = vmul.f32 %v18018_v18, %v17867_v4 }
 0x505   : > { %v18078_v37 = vadd.f32 %v18025_v39, %v6621_v31  ;;  %v18081_v42 = vadd.f32 %v18025_v39, %v6622_v7  ;;  %v18085_v59 = vmul.f32 %v18018_v18, %v17880_v14  ;;  %v18089_v19 = vmul.f32 %v18018_v18, %v17897_v51 }
 0x506   : > { %v18093_v4 = vmul.f32 %v18018_v18, %v17894_v13  ;;  %v18096_v9 = vadd.f32 %v18025_v39, %v6623_v57  ;;  %v18101_v12 = vmul.f32 %v18018_v18, %v17915_v60  ;;  %v18105_v14 = vmul.f32 %v18018_v18, %v17923_v47 }
 0x507   : > { %v18109_v51 = vmul.f32 %v18018_v18, %v17928_v63  ;;  %v18112_v13 = vadd.f32 %v18025_v39, %v6624_v55  ;;  %v18116_v32 = vmul.f32 %v18018_v18, %v17935_v21  ;;  %v18119_v34 = vadd.f32 %v18025_v39, %v6625_v56 }
 0x508   : > { %v6689_v60 = vsub.f32 0.0, %v18068_v0  ;;  %v6690_v33 = vsub.f32 0.0, %v18071_v24  ;;  %v18125_v47 = vmul.f32 %v18018_v18, %v17943_v41  ;;  %v18128_v63 = vadd.f32 %v18025_v39, %v6626_v30 }
 0x509   : > { %v6691_v36 = vsub.f32 0.0, %v18078_v37  ;;  %v6692_v21 = vsub.f32 0.0, %v18081_v42  ;;  %v18134_v38 = vmul.f32 %v18018_v18, %v17950_v53  ;;  %v18138_v44 = vmul.f32 %v18018_v18, %v17954_v17 }
 0x50a   : > { %v18141_v50 = vadd.f32 %v18025_v39, %v6627_v35  ;;  %v6693_v41 = vsub.f32 0.0, %v18096_v9  ;;  %v18146_v52 = vmul.f32 %v18018_v18, %v17958_v28  ;;  %v18150_v11 = vmul.f32 %v18018_v18, %v17964_v10 }
 0x50b   : > { %v18153_v53 = vadd.f32 %v18025_v39, %v6628_v58  ;;  %v6694_v27 = vsub.f32 0.0, %v18112_v13  ;;  %v18157_v17 = vadd.f32 %v18025_v39, %v6629_v54  ;;  %v6695_v3 = vsub.f32 0.0, %v18119_v34 }
 0x50c   : > { %v6721_v40 = vmul.f32 1.442695, %v6689_v60  ;;  %v6723_v43 = vmul.f32 1.442695, %v6690_v33  ;;  %v18161_v26 = vadd.f32 %v18025_v39, %v6630_v45  ;;  %v6696_v28 = vsub.f32 0.0, %v18128_v63 }
 0x50d   : > { %v6725_v20 = vmul.f32 1.442695, %v6691_v36  ;;  %v6727_v10 = vmul.f32 1.442695, %v6692_v21  ;;  %v18165_v18 = vadd.f32 %v18025_v39, %v6631_v23  ;;  %v6697_v1 = vsub.f32 0.0, %v18141_v50 }
 0x50e   : > { %15493 = vpow2.f32 %v6721_v40  ;;  %v6729_v6 = vmul.f32 1.442695, %v6693_v41  ;;  %v18169_v61 = vadd.f32 %v18025_v39, %v6632_v5  ;;  %v6698_v62 = vsub.f32 0.0, %v18153_v53  ;;  %v15185_v41 = vld [vmem:[#allocation11 + $0xf8] sm:$0xff]  }
 0x50f   : > { %15495 = vpow2.f32 %v6723_v43  ;;  %v6731_v25 = vmul.f32 1.442695, %v6694_v27  ;;  %v18173_v2 = vadd.f32 %v18025_v39, %v6633_v8  ;;  %v6699_v31 = vsub.f32 0.0, %v18157_v17  ;;  %14538 = vmatprep.subr.bf16.mxu1 %v15185_v41 }
 0x510   : > { %15497 = vpow2.f32 %v6725_v20  ;;  %v6733_v7 = vmul.f32 1.442695, %v6695_v3  ;;  %v18177_v57 = vadd.f32 %v18025_v39, %v6634_v29  ;;  %v6700_v55 = vsub.f32 0.0, %v18161_v26 }
 0x511   : > { %15499 = vpow2.f32 %v6727_v10  ;;  %v6735_v56 = vmul.f32 1.442695, %v6696_v28  ;;  %v18181_v30 = vadd.f32 %v18025_v39, %v6635_v46  ;;  %v6701_v35 = vsub.f32 0.0, %v18165_v18 }
 0x512   : > { %15501 = vpow2.f32 %v6729_v6  ;;  %v6737_v49 = vmul.f32 1.442695, %v6697_v1  ;;  %v18186_v58 = vadd.f32 %v18025_v39, %v18061_v16  ;;  %v6702_v54 = vsub.f32 0.0, %v18169_v61 }
 0x513   : > { %15503 = vpow2.f32 %v6731_v25  ;;  %v6739_v45 = vmul.f32 1.442695, %v6698_v62  ;;  %v18191_v23 = vadd.f32 %v18025_v39, %v18065_v48  ;;  %v6703_v5 = vsub.f32 0.0, %v18173_v2 }
 0x514   : > { %15505 = vpow2.f32 %v6733_v7  ;;  %v6741_v8 = vmul.f32 1.442695, %v6699_v31  ;;  %v18196_v29 = vadd.f32 %v18025_v39, %v18075_v22  ;;  %v6704_v46 = vsub.f32 0.0, %v18177_v57 }
 0x515   : > { %15507 = vpow2.f32 %v6735_v56  ;;  %v6743_v16 = vmul.f32 1.442695, %v6700_v55  ;;  %v18201_v60 = vadd.f32 %v18025_v39, %v18085_v59  ;;  %v6705_v33 = vsub.f32 0.0, %v18181_v30 }
 0x516   : > { %15509 = vpow2.f32 %v6737_v49  ;;  %v6745_v48 = vmul.f32 1.442695, %v6701_v35  ;;  %v18206_v36 = vadd.f32 %v18025_v39, %v18089_v19  ;;  %v6706_v21 = vsub.f32 0.0, %v18186_v58 }
 0x517   : > { %15511 = vpow2.f32 %v6739_v45  ;;  %v6747_v22 = vmul.f32 1.442695, %v6702_v54  ;;  %v18211_v27 = vadd.f32 %v18025_v39, %v18093_v4  ;;  %v6707_v59 = vsub.f32 0.0, %v18191_v23 }
 0x518   : > { %15513 = vpow2.f32 %v6741_v8  ;;  %v6749_v3 = vmul.f32 1.442695, %v6703_v5  ;;  %v18216_v40 = vadd.f32 %v18025_v39, %v18101_v12  ;;  %v6708_v19 = vsub.f32 0.0, %v18196_v29 }
 0x519   : > { %15515 = vpow2.f32 %v6743_v16  ;;  %v6751_v43 = vmul.f32 1.442695, %v6704_v46  ;;  %v18221_v28 = vadd.f32 %v18025_v39, %v18105_v14  ;;  %v6709_v4 = vsub.f32 0.0, %v18201_v60 }
 0x51a   : > { %15517 = vpow2.f32 %v6745_v48  ;;  %v6753_v20 = vmul.f32 1.442695, %v6705_v33  ;;  %v18228_v1 = vadd.f32 %v18025_v39, %v18109_v51  ;;  %v6710_v12 = vsub.f32 0.0, %v18206_v36 }
 0x51b   : > { %v18224_v10 = vpop.eup %15493  ;;  %15519 = vpow2.f32 %v6747_v22  ;;  %v6755_v6 = vmul.f32 1.442695, %v6706_v21  ;;  %v18233_v25 = vadd.f32 %v18025_v39, %v18116_v32  ;;  %v6711_v14 = vsub.f32 0.0, %v18211_v27 }
 0x51c   : > { %v15496_v62 = vpop.eup %15495  ;;  %15521 = vpow2.f32 %v6749_v3  ;;  %v6757_v31 = vmul.f32 1.442695, %v6707_v59  ;;  %v18238_v55 = vadd.f32 %v18025_v39, %v18125_v47  ;;  %v6712_v51 = vsub.f32 0.0, %v18216_v40 }
 0x51d   : > { %19965 = vst [vmem:[#allocation73_spill] sm:$0xff] %v18233_v25  ;;  %v15498_v7 = vpop.eup %15497  ;;  %15523 = vpow2.f32 %v6751_v43  ;;  %v6759_v56 = vmul.f32 1.442695, %v6708_v19  ;;  %v18243_v49 = vadd.f32 %v18025_v39, %v18134_v38  ;;  %v6713_v32 = vsub.f32 0.0, %v18221_v28 }
 0x51e   : > { %19966 = vst [vmem:[#allocation102_spill] sm:$0xff] %v18238_v55  ;;  %v15500_v35 = vpop.eup %15499  ;;  %15525 = vpow2.f32 %v6753_v20  ;;  %v6761_v54 = vmul.f32 1.442695, %v6709_v4  ;;  %v18248_v5 = vadd.f32 %v18025_v39, %v18138_v44  ;;  %v6714_v47 = vsub.f32 0.0, %v18228_v1 }
 0x51f   : > { %19967 = vst [vmem:[#allocation93_spill] sm:$0xff] %v18243_v49  ;;  %v15502_v45 = vpop.eup %15501  ;;  %15527 = vpow2.f32 %v6755_v6  ;;  %v6763_v8 = vmul.f32 1.442695, %v6710_v12  ;;  %v18253_v16 = vadd.f32 %v18025_v39, %v18146_v52  ;;  %v6715_v38 = vsub.f32 0.0, %v18233_v25 }
 0x520   : > { %19968 = vst [vmem:[#allocation108_spill] sm:$0xff] %v18248_v5  ;;  %v15504_v46 = vpop.eup %15503  ;;  %15529 = vpow2.f32 %v6757_v31  ;;  %v6765_v33 = vmul.f32 1.442695, %v6711_v14  ;;  %v18258_v21 = vadd.f32 %v18025_v39, %v18150_v11  ;;  %v6716_v44 = vsub.f32 0.0, %v18238_v55 }
 0x521   : > { %19969 = vst [vmem:[#allocation135_spill] sm:$0xff] %v18253_v16  ;;  %v15506_v48 = vpop.eup %15505  ;;  %15531 = vpow2.f32 %v6759_v56  ;;  %v6767_v22 = vmul.f32 1.442695, %v6712_v51  ;;  %v6717_v59 = vsub.f32 0.0, %v18243_v49  ;;  %v6769_v3 = vmul.f32 1.442695, %v6713_v32 }
 0x522   : > { %19970 = vst [vmem:[#allocation95_spill] sm:$0xff] %v18258_v21  ;;  %v15508_v41 = vpop.eup %15507  ;;  %15533 = vpow2.f32 %v6761_v54  ;;  %v6718_v19 = vsub.f32 0.0, %v18248_v5  ;;  %v6771_v43 = vmul.f32 1.442695, %v6714_v47  ;;  %v6719_v20 = vsub.f32 0.0, %v18253_v16 }
 0x523   : > { %v15510_v52 = vpop.eup %15509  ;;  %15535 = vpow2.f32 %v6763_v8  ;;  %v6773_v39 = vmul.f32 1.442695, %v6715_v38  ;;  %v6720_v12 = vsub.f32 0.0, %v18258_v21  ;;  %v6775_v6 = vmul.f32 1.442695, %v6716_v44 }
 0x524   : > { %v15512_v4 = vpop.eup %15511  ;;  %15537 = vpow2.f32 %v6765_v33  ;;  %v6777_v31 = vmul.f32 1.442695, %v6717_v59  ;;  %v6779_v56 = vmul.f32 1.442695, %v6718_v19  ;;  %v6781_v54 = vmul.f32 1.442695, %v6719_v20 }
 0x525   : > { %v15514_v11 = vpop.eup %15513  ;;  %15539 = vpow2.f32 %v6767_v22  ;;  %v6783_v8 = vmul.f32 1.442695, %v6720_v12  ;;  %v6785_v38 = vadd.f32 1.0, %v18224_v10  ;;  %v6786_v22 = vadd.f32 1.0, %v15496_v62  ;;  %v15162_v20 = vld [vmem:[#allocation2] sm:$0xf8]  }
 0x526   : > { %v15516_v14 = vpop.eup %15515  ;;  %15541 = vpow2.f32 %v6769_v3  ;;  %v6787_v3 = vadd.f32 1.0, %v15498_v7  ;;  %v6789_v21 = vadd.f32 1.0, %v15502_v45  ;;  %v6792_v5 = vadd.f32 1.0, %v15508_v41 }
 0x527   : > { %v15518_v51 = vpop.eup %15517  ;;  %15543 = vpow2.f32 %v6771_v43  ;;  %v6788_v43 = vadd.f32 1.0, %v15500_v35  ;;  %v7912_v7 = vshrl.u32 %v15162_v20, 16  ;;  %v6794_v35 = vadd.f32 1.0, %v15512_v4 }
 0x528   : > { %v15520_v32 = vpop.eup %15519  ;;  %15545 = vpow2.f32 %v6773_v39 }
 0x529   : > { %v15522_v47 = vpop.eup %15521  ;;  %15547 = vpow2.f32 %v6775_v6  ;;  %v6790_v6 = vadd.f32 1.0, %v15504_v46  ;;  %v6796_v46 = vadd.f32 1.0, %v15516_v14 }
 0x52a   : > { %v15524_v16 = vpop.eup %15523  ;;  %15549 = vpow2.f32 %v6777_v31  ;;  %v6791_v31 = vadd.f32 1.0, %v15506_v48  ;;  %v6797_v48 = vadd.f32 1.0, %v15518_v51 }
 0x52b   : > { %v15526_v33 = vpop.eup %15525  ;;  %15551 = vpow2.f32 %v6779_v56  ;;  %v6793_v56 = vadd.f32 1.0, %v15510_v52 }
 0x52c   : > { %v15528_v44 = vpop.eup %15527  ;;  %15553 = vpow2.f32 %v6781_v54  ;;  %v7915_v54 = vshll.u32 %v15162_v20, 16  ;;  %v6800_v20 = vadd.f32 1.0, %v15524_v16 }
 0x52d   : > { %v15530_v59 = vpop.eup %15529  ;;  %15555 = vpow2.f32 %v6783_v8  ;;  %v6802_v55 = vadd.f32 1.0, %v15528_v44 }
 0x52e   : > { %v15532_v19 = vpop.eup %15531  ;;  %15557 = vrcp.f32 %v6785_v38  ;;  %v6795_v38 = vadd.f32 1.0, %v15514_v11  ;;  %v18268_v41 = vrot.slane %v7915_v54, 4  ;;  %v6803_v11 = vadd.f32 1.0, %v15530_v59 }
 0x52f   : > { %v15534_v39 = vpop.eup %15533  ;;  %15559 = vrcp.f32 %v6786_v22  ;;  %v6804_v14 = vadd.f32 1.0, %v15532_v19 }
 0x530   : > { %v15536_v12 = vpop.eup %15535  ;;  %15561 = vrcp.f32 %v6787_v3  ;;  %v18266_v3 = vrot.slane %v7912_v7, 3 }
 0x531   : > { %v15538_v10 = vpop.eup %15537  ;;  %15563 = vrcp.f32 %v6788_v43  ;;  %v6799_v43 = vadd.f32 1.0, %v15522_v47  ;;  %v6806_v25 = vadd.f32 1.0, %v15536_v12 }
 0x532   : > { %v15540_v62 = vpop.eup %15539  ;;  %15565 = vrcp.f32 %v6789_v21  ;;  %v6798_v21 = vadd.f32 1.0, %v15520_v32 }
 0x533   : > { %v15542_v8 = vpop.eup %15541  ;;  %15567 = vrcp.f32 %v6790_v6  ;;  %v6801_v6 = vadd.f32 1.0, %v15526_v33  ;;  %v6808_v7 = vadd.f32 1.0, %v15540_v62 }
 0x534   : > { %v15544_v45 = vpop.eup %15543  ;;  %15569 = vrcp.f32 %v6791_v31  ;;  %v18270_v54 = vadd.f32 1.0, %v15542_v8 }
 0x535   : > { %v15546_v49 = vpop.eup %15545  ;;  %15571 = vrcp.f32 %v6792_v5  ;;  %v6805_v5 = vadd.f32 1.0, %v15534_v39  ;;  %v18272_v47 = vadd.f32 1.0, %v15544_v45 }
 0x536   : > { %v15548_v22 = vpop.eup %15547  ;;  %15573 = vrcp.f32 %v6793_v56  ;;  %v6807_v56 = vadd.f32 1.0, %v15538_v10  ;;  %v18274_v16 = vadd.f32 1.0, %v15546_v49 }
 0x537   : > { %v15550_v52 = vpop.eup %15549  ;;  %15575 = vrcp.f32 %v6794_v35  ;;  %v18276_v33 = vadd.f32 1.0, %v15548_v22 }
 0x538   : > { %v15552_v4 = vpop.eup %15551  ;;  %15577 = vrcp.f32 %v6795_v38  ;;  %v18278_v59 = vadd.f32 1.0, %v15550_v52  ;;  %v19971_v38 = vld [vmem:[#allocation24_spill] sm:$0xff] }
 0x539   : > { %v15554_v31 = vpop.eup %15553  ;;  %15579 = vrcp.f32 %v6796_v46  ;;  %v18280_v19 = vadd.f32 1.0, %v15552_v4  ;;  %v19974_v4 = vld [vmem:[#allocation23_spill] sm:$0xff] }
 0x53a   : > { %v15556_v51 = vpop.eup %15555  ;;  %15581 = vrcp.f32 %v6797_v48  ;;  %v18283_v10 = vadd.f32 1.0, %v15554_v31  ;;  %v19972_v48 = vld [vmem:[#allocation26_spill] sm:$0xff]  ;;  %v19975_v31 = vld [vmem:[#allocation32_spill] sm:$0xff] }
 0x53b   : > { %v15558_v32 = vpop.eup %15557  ;;  %15583 = vrcp.f32 %v6798_v21  ;;  %v18285_v62 = vadd.f32 1.0, %v15556_v51  ;;  %v19973_v21 = vld [vmem:[#allocation25_spill] sm:$0xff] }
 0x53c   : > { %v15560_v44 = vpop.eup %15559  ;;  %v6818_v39 = vmul.f32 %v15558_v32, %v18068_v0  ;;  %15585 = vrcp.f32 %v6799_v43 }
 0x53d   : > { %v15562_v12 = vpop.eup %15561  ;;  %v18288_v8 = vmul.f32 %v15560_v44, %v18071_v24  ;;  %15587 = vrcp.f32 %v6800_v20 }
 0x53e   : > { %v15564_v49 = vpop.eup %15563  ;;  %v18291_v35 = vmul.f32 %v15562_v12, %v18078_v37  ;;  %15589 = vrcp.f32 %v6801_v6  ;;  %v12685_v45 = vpack.c.bf16 %v6818_v39, %v6818_v39  ;;  %v7041_v46 = vmul.f32 %v6818_v39, %v19971_v38 }
 0x53f   : > { %v15566_v22 = vpop.eup %15565  ;;  %v18295_v0 = vmul.f32 %v15564_v49, %v18081_v42  ;;  %15591 = vrcp.f32 %v6802_v55  ;;  %v7042_v52 = vmul.f32 %v18288_v8, %v19972_v48  ;;  %v18300_v24 = vmul.f32 %v6818_v39, %v19973_v21  ;;  %v19976_v39 = vld [vmem:[#allocation31_spill] sm:$0xff]  ;;  %v19979_v21 = vld [vmem:[#allocation40_spill] sm:$0xff] }
 0x540   : > { %v15568_v43 = vpop.eup %15567  ;;  %v18303_v20 = vmul.f32 %v15566_v22, %v18096_v9  ;;  %15593 = vrcp.f32 %v6803_v11  ;;  %7009 = vst [vmem:[#allocation3 + $0xc] sm:$0xf] %v12685_v45  ;;  %v13010_v37 = vpack.c.bf16 %v18291_v35, %v18288_v8  ;;  %v7043_v42 = vmul.f32 %v18291_v35, %v19974_v4  ;;  %v19978_v22 = vld [vmem:[#allocation33_spill] sm:$0xff]  ;;  %v19980_v4 = vld [vmem:[#allocation39_spill] sm:$0xff] }
 0x541   : > { %v15570_v6 = vpop.eup %15569  ;;  %v18310_v55 = vmul.f32 %v15568_v43, %v18112_v13  ;;  %15595 = vrcp.f32 %v6804_v14  ;;  %v7044_v51 = vmul.f32 %v18295_v0, %v19975_v31  ;;  %v12717_v32 = vpack.c.bf16 %v7041_v46, %v7041_v46  ;;  %v19977_v14 = vld [vmem:[#allocation34_spill] sm:$0xff] }
 0x542   : > { %v15572_v44 = vpop.eup %15571  ;;  %v18315_v9 = vmul.f32 %v15570_v6, %v18119_v34  ;;  %15597 = vrcp.f32 %v6805_v5  ;;  %13277 = vst [vmem:[#allocation3 + $0x10] sm:$0xff] %v13010_v37   ;;  %v13015_v11 = vpack.c.bf16 %v18303_v20, %v18295_v0  ;;  %v7045_v12 = vmul.f32 %v18303_v20, %v19976_v39  ;;  %v19981_v6 = vld [vmem:[#allocation42_spill] sm:$0xff] }
 0x543   : > { %v15574_v49 = vpop.eup %15573  ;;  %v18322_v13 = vmul.f32 %v15572_v44, %v18128_v63  ;;  %15599 = vrcp.f32 %v6806_v25  ;;  %v7046_v45 = vmul.f32 %v18310_v55, %v19977_v14  ;;  %7201 = vst [vmem:[#allocation2 + $0xc] sm:$0xf] %v12717_v32  ;;  %v13085_v38 = vpack.c.bf16 %v7043_v42, %v7042_v52  ;;  %v19982_v44 = vld [vmem:[#allocation41_spill] sm:$0xff] }
 0x544   : > { %v15576_v34 = vpop.eup %15575  ;;  %v18327_v5 = vmul.f32 %v15574_v49, %v18141_v50  ;;  %15601 = vrcp.f32 %v6807_v56  ;;  %v13020_v46 = vpack.c.bf16 %v18315_v9, %v18310_v55  ;;  %v7047_v48 = vmul.f32 %v18315_v9, %v19978_v22  ;;  %13278 = vst [vmem:[#allocation3 + $0x18] sm:$0xff] %v13015_v11   ;;  %v15159_v11 = vld [vmem:[#allocation11 + $0xb0] sm:$0xff]  }
 0x545   : > { %v15578_v63 = vpop.eup %15577  ;;  %v18334_v25 = vmul.f32 %v15576_v34, %v18153_v53  ;;  %15603 = vrcp.f32 %v6808_v7  ;;  %v7048_v52 = vmul.f32 %v18322_v13, %v19979_v21  ;;  %v13090_v43 = vpack.c.bf16 %v7045_v12, %v7044_v51  ;;  %13292 = vst [vmem:[#allocation2 + $0x10] sm:$0xff] %v13085_v38   ;;  %v19983_v12 = vld [vmem:[#allocation50_spill] sm:$0xff]  ;;  %v19984_v34 = vld [vmem:[#allocation49_spill] sm:$0xff] }
 0x546   : > { %v15580_v50 = vpop.eup %15579  ;;  %v18339_v56 = vmul.f32 %v15578_v63, %v18157_v17  ;;  %15605 = vrcp.f32 %v18270_v54  ;;  %v13025_v37 = vpack.c.bf16 %v18327_v5, %v18322_v13  ;;  %v7049_v42 = vmul.f32 %v18327_v5, %v19980_v4  ;;  %13279 = vst [vmem:[#allocation3 + $0x20] sm:$0xff] %v13020_v46   ;;  %v19985_v22 = vld [vmem:[#allocation53_spill] sm:$0xff] }
 0x547   : > { %v15582_v53 = vpop.eup %15581  ;;  %v18347_v7 = vmul.f32 %v15580_v50, %v18161_v26  ;;  %15607 = vrcp.f32 %v18272_v47  ;;  %v7050_v31 = vmul.f32 %v18334_v25, %v19981_v6  ;;  %v13095_v17 = vpack.c.bf16 %v7047_v48, %v7046_v45  ;;  %13293 = vst [vmem:[#allocation2 + $0x18] sm:$0xff] %v13090_v43   ;;  %v19988_v6 = vld [vmem:[#allocation66_spill] sm:$0xff] }
 0x548   : > { %v15584_v51 = vpop.eup %15583  ;;  %v18353_v54 = vmul.f32 %v15582_v53, %v18165_v18  ;;  %15609 = vrcp.f32 %v18274_v16  ;;  %v13030_v32 = vpack.c.bf16 %v18339_v56, %v18334_v25  ;;  %v7051_v26 = vmul.f32 %v18339_v56, %v19982_v44  ;;  %13280 = vst [vmem:[#allocation3 + $0x28] sm:$0xff] %v13025_v37   ;;  %v19987_v37 = vld [vmem:[#allocation67_spill] sm:$0xff]  ;;  %v19990_v44 = vld [vmem:[#allocation28_spill] sm:$0xff] }
 0x549   : > { %v15586_v47 = vpop.eup %15585  ;;  %v18361_v39 = vmul.f32 %v15584_v51, %v18169_v61  ;;  %15611 = vrcp.f32 %v18276_v33  ;;  %v7052_v18 = vmul.f32 %v18347_v7, %v19983_v12  ;;  %v13100_v49 = vpack.c.bf16 %v7049_v42, %v7048_v52  ;;  %13294 = vst [vmem:[#allocation2 + $0x20] sm:$0xff] %v13095_v17   ;;  %v15155_v16 = vld [vmem:[#allocation3 + $0xc] sm:$0xff]  }
 0x54a   : > { %v15588_v14 = vpop.eup %15587  ;;  %v18367_v45 = vmul.f32 %v15586_v47, %v18173_v2  ;;  %15613 = vrcp.f32 %v18278_v59  ;;  %v13035_v38 = vpack.c.bf16 %v18353_v54, %v18347_v7  ;;  %v7053_v61 = vmul.f32 %v18353_v54, %v19984_v34  ;;  %13281 = vst [vmem:[#allocation3 + $0x30] sm:$0xff] %v13030_v32   ;;  %14411 = vmatmul.mubr.bf16.vlgmr.msra.gmra.mxu0 %v15155_v16  ;;  %v19989_v51 = vld [vmem:[#allocation75_spill] sm:$0xff]  ;;  %v19993_v34 = vld [vmem:[#allocation85_spill] sm:$0xff] }
 0x54b   : > { %v15590_v33 = vpop.eup %15589  ;;  %v18375_v46 = vmul.f32 %v15588_v14, %v18177_v57  ;;  %15615 = vrcp.f32 %v18280_v19  ;;  %v7054_v48 = vmul.f32 %v18361_v39, %v19985_v22  ;;  %v13105_v2 = vpack.c.bf16 %v7051_v26, %v7050_v31  ;;  %13295 = vst [vmem:[#allocation2 + $0x28] sm:$0xff] %v13100_v49   ;;  %v15156_v59 = vld [vmem:[#allocation3 + $0x14] sm:$0xff]   ;;  %14491 = vmatpush3.bf16.msra.mxu0 %v18049_v15  ;;  %v19992_v49 = vld [vmem:[#allocation74_spill] sm:$0xff]  ;;  %v19995_v22 = vld [vmem:[#allocation29_spill] sm:$0xff] }
 0x54c   : > { %v15592_v63 = vpop.eup %15591  ;;  %v18381_v21 = vmul.f32 %v15590_v33, %v18181_v30  ;;  %15617 = vrcp.f32 %v18283_v10  ;;  %v13040_v52 = vpack.c.bf16 %v18367_v45, %v18361_v39  ;;  %v19986_v57 = vld [vmem:[#allocation52_spill] sm:$0xff]  ;;  %13282 = vst [vmem:[#allocation3 + $0x38] sm:$0xff] %v13035_v38   ;;  %v13110_v4 = vpack.c.bf16 %v7053_v61, %v7052_v18  ;;  %14414 = vmatprep.mubr.bf16.mxu0 %v15156_v59  ;;  %v19994_v61 = vld [vmem:[#allocation30_spill] sm:$0xff] }
 0x54d   : > { %v7055_v43 = vmul.f32 %v18367_v45, %v19986_v57  ;;  %v15594_v19 = vpop.eup %15593  ;;  %v18390_v50 = vmul.f32 %v15592_v63, %v18186_v58  ;;  %15619 = vrcp.f32 %v18285_v62  ;;  %v7056_v30 = vmul.f32 %v18375_v46, %v19987_v37  ;;  %13296 = vst [vmem:[#allocation2 + $0x30] sm:$0xff] %v13105_v2   ;;  %14492 = vmatprep.subr.bf16.mxu0 %v15159_v11  ;;  %v15166_v10 = vld [vmem:[#allocation11 + $0xa8] sm:$0xff]  }
 0x54e   : > { %v15596_v42 = vpop.eup %15595  ;;  %v18396_v53 = vmul.f32 %v15594_v19, %v18191_v23  ;;  %v13045_v15 = vpack.c.bf16 %v18381_v21, %v18375_v46  ;;  %v7057_v58 = vmul.f32 %v18381_v21, %v19988_v6  ;;  %13283 = vst [vmem:[#allocation3 + $0x40] sm:$0xff] %v13040_v52   ;;  %v18409_v26 = vmul.f32 %v18288_v8, %v19990_v44  ;;  %v19991_v23 = vld [vmem:[#allocation27_spill] sm:$0xff]  ;;  %v15160_v2 = vld [vmem:[#allocation3 + $0x1c] sm:$0xff]   ;;  %v20002_v44 = vld [vmem:[#allocation38_spill] sm:$0xff] }
 0x54f   : > { %v13115_v31 = vpack.c.bf16 %v7055_v43, %v7054_v48  ;;  %v15598_v62 = vpop.eup %15597  ;;  %v18403_v17 = vmul.f32 %v15596_v42, %v18196_v29  ;;  %v7058_v32 = vmul.f32 %v18390_v50, %v19989_v51  ;;  %v18413_v47 = vmul.f32 %v18291_v35, %v19991_v23  ;;  %13297 = vst [vmem:[#allocation2 + $0x38] sm:$0xff] %v13110_v4   ;;  %v18422_v8 = vld [vmem:[#allocation11 + $0xa0] sm:$0xff]   ;;  %v19996_v63 = vld [vmem:[#allocation84_spill] sm:$0xff]  ;;  %v20003_v23 = vld [vmem:[#allocation37_spill] sm:$0xff] }
 0x550   : > { %v15600_v12 = vpop.eup %15599  ;;  %v18416_v18 = vmul.f32 %v15598_v62, %v18201_v60  ;;  %v13050_v29 = vpack.c.bf16 %v18396_v53, %v18390_v50  ;;  %v7059_v16 = vmul.f32 %v18396_v53, %v19992_v49  ;;  %v13120_v14 = vpack.c.bf16 %v7057_v58, %v7056_v30  ;;  %13284 = vst [vmem:[#allocation3 + $0x48] sm:$0xff] %v13045_v15   ;;  %v19997_v19 = vld [vmem:[#allocation87_spill] sm:$0xff]  ;;  %v19998_v30 = vld [vmem:[#allocation36_spill] sm:$0xff]  ;;  %v20000_v58 = vld [vmem:[#allocation86_spill] sm:$0xff] }
 0x551   : > { %13298 = vst [vmem:[#allocation2 + $0x40] sm:$0xff] %v13115_v31   ;;  %14493 = vmatpush3.bf16.msra.mxu0 %v15159_v11  ;;  %v15602_v38 = vpop.eup %15601  ;;  %v18425_v35 = vmul.f32 %v15600_v12, %v18206_v36  ;;  %v7060_v60 = vmul.f32 %v18403_v17, %v19993_v34  ;;  %v18431_v33 = vmul.f32 %v18295_v0, %v19994_v61  ;;  %v15161_v0 = vld [vmem:[#allocation3 + $0x24] sm:$0xff]   ;;  %v19999_v4 = vld [vmem:[#allocation35_spill] sm:$0xff] }
 0x552   : > { %v18435_v48 = vmul.f32 %v18303_v20, %v19995_v22  ;;  %14494 = vmatprep.subr.bf16.mxu0 %v15166_v10  ;;  %v15604_v11 = vpop.eup %15603  ;;  %v18438_v59 = vmul.f32 %v15602_v38, %v18211_v27  ;;  %v13055_v36 = vpack.c.bf16 %v18416_v18, %v18403_v17  ;;  %v7061_v52 = vmul.f32 %v18416_v18, %v19996_v63  ;;  %v20004_v49 = vld [vmem:[#allocation73_spill] sm:$0xff] }
 0x553   : > { %v13125_v57 = vpack.c.bf16 %v7059_v16, %v7058_v32  ;;  %13285 = vst [vmem:[#allocation3 + $0x50] sm:$0xff] %v13050_v29   ;;  %13299 = vst [vmem:[#allocation2 + $0x48] sm:$0xff] %v13120_v14   ;;  %v15606_v43 = vpop.eup %15605  ;;  %v18445_v20 = vmul.f32 %v15604_v11, %v18216_v40  ;;  %v7062_v37 = vmul.f32 %v18425_v35, %v19997_v19  ;;  %14415 = vmatmul.mubr.bf16.gmra.mxu0 %v15160_v2  ;;  %v20005_v14 = vld [vmem:[#allocation64_spill] sm:$0xff]  ;;  %v20011_v19 = vld [vmem:[#allocation46_spill] sm:$0xff] }
 0x554   : > { %v18451_v27 = vmul.f32 %v18310_v55, %v19998_v30  ;;  %v18455_v42 = vmul.f32 %v18315_v9, %v19999_v4  ;;  %v15608_v15 = vpop.eup %15607  ;;  %v18458_v6 = vmul.f32 %v15606_v43, %v18221_v28  ;;  %v13060_v40 = vpack.c.bf16 %v18438_v59, %v18425_v35  ;;  %13286 = vst [vmem:[#allocation3 + $0x58] sm:$0xff] %v13055_v36   ;;  %v20001_v9 = vld [vmem:[#allocation59_spill] sm:$0xff]  ;;  %v20008_v2 = vld [vmem:[#allocation44_spill] sm:$0xff]  ;;  %v15181_v4 = vld [vmem:[#allocation11 + $0x90] sm:$0xff]  }
 0x555   : > { %v7063_v31 = vmul.f32 %v18438_v59, %v20000_v58  ;;  %v13130_v62 = vpack.c.bf16 %v7061_v52, %v7060_v60  ;;  %13300 = vst [vmem:[#allocation2 + $0x50] sm:$0xff] %v13125_v57   ;;  %14418 = vmatprep.mubr.bf16.mxu0 %v15161_v0  ;;  %v15610_v55 = vpop.eup %15609  ;;  %v18465_v51 = vmul.f32 %v15608_v15, %v18228_v1  ;;  %v20009_v36 = vld [vmem:[#allocation43_spill] sm:$0xff]  ;;  %v20010_v57 = vld [vmem:[#allocation93_spill] sm:$0xff] }
 0x556   : > { %v7064_v32 = vmul.f32 %v18445_v20, %v20001_v9  ;;  %v18471_v28 = vmul.f32 %v18322_v13, %v20002_v44  ;;  %v18475_v12 = vmul.f32 %v18327_v5, %v20003_v23  ;;  %14495 = vmatpush3.bf16.msra.mxu0 %v15166_v10  ;;  %v15612_v29 = vpop.eup %15611  ;;  %v18478_v16 = vmul.f32 %v15610_v55, %v20004_v49  ;;  %v15176_v13 = vld [vmem:[#allocation11 + $0x98] sm:$0xff]   ;;  %v20007_v10 = vld [vmem:[#allocation60_spill] sm:$0xff]  ;;  %v20013_v58 = vld [vmem:[#allocation91_spill] sm:$0xff] }
 0x557   : > { %v13065_v1 = vpack.c.bf16 %v18458_v6, %v18445_v20  ;;  %v7065_v38 = vmul.f32 %v18458_v6, %v20005_v14  ;;  %v13135_v34 = vpack.c.bf16 %v7063_v31, %v7062_v37  ;;  %13287 = vst [vmem:[#allocation3 + $0x60] sm:$0xff] %v13060_v40   ;;  %13301 = vst [vmem:[#allocation2 + $0x58] sm:$0xff] %v13130_v62   ;;  %14496 = vmatprep.subr.bf16.mxu0 %v18422_v8  ;;  %v15614_v60 = vpop.eup %15613  ;;  %v20006_v5 = vld [vmem:[#allocation102_spill] sm:$0xff]  ;;  %v20015_v55 = vld [vmem:[#allocation47_spill] sm:$0xff] }
 0x558   : > { %v6872_v61 = vmul.f32 %v15612_v29, %v20006_v5  ;;  %v7066_v22 = vmul.f32 %v18465_v51, %v20007_v10  ;;  %v18490_v11 = vmul.f32 %v18334_v25, %v20008_v2  ;;  %v18494_v63 = vmul.f32 %v18339_v56, %v20009_v36  ;;  %v15616_v52 = vpop.eup %15615  ;;  %v20012_v25 = vld [vmem:[#allocation108_spill] sm:$0xff]  ;;  %v15167_v44 = vld [vmem:[#allocation3 + $0x2c] sm:$0xff]  }
 0x559   : > { %v6874_v0 = vmul.f32 %v15614_v60, %v20010_v57  ;;  %v13070_v43 = vpack.c.bf16 %v18478_v16, %v18465_v51  ;;  %v7067_v37 = vmul.f32 %v18478_v16, %v20011_v19  ;;  %v13140_v30 = vpack.c.bf16 %v7065_v38, %v7064_v32  ;;  %13288 = vst [vmem:[#allocation3 + $0x68] sm:$0xff] %v13065_v1   ;;  %v15618_v15 = vpop.eup %15617  ;;  %v20014_v56 = vld [vmem:[#allocation48_spill] sm:$0xff]  ;;  %v20016_v23 = vld [vmem:[#allocation135_spill] sm:$0xff]  ;;  %v20017_v1 = vld [vmem:[#allocation90_spill] sm:$0xff] }
 0x55a   : > { %13302 = vst [vmem:[#allocation2 + $0x60] sm:$0xff] %v13135_v34   ;;  %v6876_v40 = vmul.f32 %v15616_v52, %v20012_v25  ;;  %v7068_v31 = vmul.f32 %v6872_v61, %v20013_v58  ;;  %v18505_v62 = vmul.f32 %v18347_v7, %v20014_v56  ;;  %v18509_v9 = vmul.f32 %v18353_v54, %v20015_v55  ;;  %v15620_v32 = vpop.eup %15619  ;;  %v15168_v34 = vld [vmem:[#allocation3 + $0x34] sm:$0xff]   ;;  %v20020_v54 = vld [vmem:[#allocation57_spill] sm:$0xff]  ;;  %v20022_v57 = vld [vmem:[#allocation70_spill] sm:$0xff] }
 0x55b   : > { %14497 = vmatpush3.bf16.msra.mxu0 %v18422_v8  ;;  %v6878_v29 = vmul.f32 %v15618_v15, %v20016_v23  ;;  %v13075_v49 = vpack.c.bf16 %v6874_v0, %v6872_v61  ;;  %v7069_v14 = vmul.f32 %v6874_v0, %v20017_v1  ;;  %v13145_v38 = vpack.c.bf16 %v7067_v37, %v7066_v22  ;;  %v20018_v7 = vld [vmem:[#allocation95_spill] sm:$0xff]  ;;  %v20021_v8 = vld [vmem:[#allocation56_spill] sm:$0xff]  ;;  %v20024_v15 = vld [vmem:[#allocation69_spill] sm:$0xff] }
 0x55c   : > { %13289 = vst [vmem:[#allocation3 + $0x70] sm:$0xff] %v13070_v43   ;;  %13303 = vst [vmem:[#allocation2 + $0x68] sm:$0xff] %v13140_v30   ;;  %14498 = vmatprep.subr.bf16.mxu0 %v15176_v13  ;;  %v6880_v60 = vmul.f32 %v15620_v32, %v20018_v7  ;;  %v20019_v5 = vld [vmem:[#allocation71_spill] sm:$0xff]  ;;  %v18518_v2 = vmul.f32 %v18361_v39, %v20020_v54  ;;  %v18522_v36 = vmul.f32 %v18367_v45, %v20021_v8  ;;  %v20025_v25 = vld [vmem:[#allocation62_spill] sm:$0xff] }
 0x55d   : > { %v7070_v10 = vmul.f32 %v6876_v40, %v20019_v5  ;;  %14419 = vmatmul.mubr.bf16.gmra.mxu0 %v15167_v44  ;;  %v13080_v52 = vpack.c.bf16 %v6878_v29, %v6876_v40  ;;  %v7071_v22 = vmul.f32 %v6878_v29, %v20022_v57  ;;  %v13150_v43 = vpack.c.bf16 %v7069_v14, %v7068_v31  ;;  %v20023_v19 = vld [vmem:[#allocation63_spill] sm:$0xff]  ;;  %v20026_v45 = vld [vmem:[#allocation81_spill] sm:$0xff]  ;;  %v20027_v55 = vld [vmem:[#allocation80_spill] sm:$0xff] }
 0x55e   : > { %v18527_v37 = vmul.f32 %v18375_v46, %v20023_v19  ;;  %13290 = vst [vmem:[#allocation3 + $0x78] sm:$0xff] %v13075_v49   ;;  %13304 = vst [vmem:[#allocation2 + $0x70] sm:$0xff] %v13145_v38   ;;  %14422 = vmatprep.mubr.bf16.mxu0 %v15168_v34  ;;  %v12716_v30 = vpack.c.bf16 %v6880_v60, %v6880_v60  ;;  %v7072_v39 = vmul.f32 %v6880_v60, %v20024_v15  ;;  %v20028_v44 = vld [vmem:[#allocation83_spill] sm:$0xff]  ;;  %v20029_v23 = vld [vmem:[#allocation82_spill] sm:$0xff] }
 0x55f   : > { %v18532_v58 = vmul.f32 %v18381_v21, %v20025_v25  ;;  %v18536_v56 = vmul.f32 %v18390_v50, %v20026_v45  ;;  %14499 = vmatpush3.bf16.msra.mxu0 %v15176_v13  ;;  %v13155_v31 = vpack.c.bf16 %v7071_v22, %v7070_v10  ;;  %v7251_v46 = vmul.f32 %v18396_v53, %v20027_v55  ;;  %v15188_v21 = vld [vmem:[#allocation11 + $0x88] sm:$0xff]   ;;  %v20031_v13 = vld [vmem:[#allocation54_spill] sm:$0xff]  ;;  %v20033_v7 = vld [vmem:[#allocation55_spill] sm:$0xff] }
 0x560   : > { %v7252_v32 = vmul.f32 %v18403_v17, %v20028_v44  ;;  %v7253_v49 = vmul.f32 %v18416_v18, %v20029_v23  ;;  %13291 = vst [vmem:[#allocation3 + $0x80] sm:$0xff] %v13080_v52   ;;  %13305 = vst [vmem:[#allocation2 + $0x78] sm:$0xff] %v13150_v43   ;;  %14500 = vmatprep.subr.bf16.mxu0 %v15181_v4  ;;  %v12748_v1 = vpack.c.bf16 %v7072_v39, %v7072_v39  ;;  %v20030_v14 = vld [vmem:[#allocation88_spill] sm:$0xff]  ;;  %v20032_v34 = vld [vmem:[#allocation58_spill] sm:$0xff] }
 0x561   : > { %7040 = vst [vmem:[#allocation3 + $0x88] sm:$0xf] %v12716_v30  ;;  %v7254_v50 = vmul.f32 %v18425_v35, %v20030_v14  ;;  %v7255_v38 = vmul.f32 %v18438_v59, %v20031_v13  ;;  %v7256_v53 = vmul.f32 %v18445_v20, %v20032_v34  ;;  %v7257_v17 = vmul.f32 %v18458_v6, %v20033_v7  ;;  %v20034_v5 = vld [vmem:[#allocation51_spill] sm:$0xff]  ;;  %v20035_v10 = vld [vmem:[#allocation61_spill] sm:$0xff]  ;;  %v18557_v35 = vld [vmem:[#allocation2 + $0x10] sm:$0xff]  }
 0x562   : > { %v7258_v18 = vmul.f32 %v18465_v51, %v20034_v5  ;;  %v7259_v54 = vmul.f32 %v18478_v16, %v20035_v10  ;;  %v20036_v8 = vld [vmem:[#allocation89_spill] sm:$0xff]  ;;  %13306 = vst [vmem:[#allocation2 + $0x80] sm:$0xff] %v13155_v31   ;;  %v15163_v57 = vld [vmem:[#allocation2 + $0x8] sm:$0xff]   ;;  %7232 = vst [vmem:[#allocation2 + $0x88] sm:$0xf] %v12748_v1  ;;  %v12749_v16 = vpack.c.bf16 %v18300_v24, %v18300_v24 }
 0x563   : > { %v7260_v52 = vmul.f32 %v6872_v61, %v20036_v8  ;;  %v18559_v22 = vld [vmem:[#allocation11 + $0x80] sm:$0xff]   ;;  %v20037_v59 = vld [vmem:[#allocation65_spill] sm:$0xff]  ;;  %v20039_v6 = vld [vmem:[#allocation76_spill] sm:$0xff]  ;;  %14501 = vmatpush3.bf16.msra.mxu0 %v15181_v4  ;;  %v13160_v61 = vpack.c.bf16 %v18413_v47, %v18409_v26  ;;  %v13165_v25 = vpack.c.bf16 %v18435_v48, %v18431_v33  ;;  %v13180_v4 = vpack.c.bf16 %v18494_v63, %v18490_v11 }
 0x564   : > { %v7261_v20 = vmul.f32 %v6874_v0, %v20037_v59  ;;  %v20038_v43 = vld [vmem:[#allocation77_spill] sm:$0xff]  ;;  %v7263_v30 = vmul.f32 %v6878_v29, %v20039_v6  ;;  %v20040_v15 = vld [vmem:[#allocation68_spill] sm:$0xff]  ;;  %v13170_v0 = vpack.c.bf16 %v18455_v42, %v18451_v27  ;;  %14502 = vmatprep.subr.bf16.mxu0 %v15188_v21  ;;  %v13175_v29 = vpack.c.bf16 %v18475_v12, %v18471_v28  ;;  %v15169_v27 = vld [vmem:[#allocation2 + $0x20] sm:$0xff]  }
 0x565   : > { %v7262_v19 = vmul.f32 %v6876_v40, %v20038_v43  ;;  %v7264_v51 = vmul.f32 %v6880_v60, %v20040_v15  ;;  %v15172_v39 = vld [vmem:[#allocation3 + $0x3c] sm:$0xff]   ;;  %v15173_v45 = vld [vmem:[#allocation3 + $0x44] sm:$0xff]   ;;  %v13185_v24 = vpack.c.bf16 %v18509_v9, %v18505_v62  ;;  %7393 = vst [vmem:[#allocation4 + $0xc] sm:$0xf] %v12749_v16  ;;  %v13190_v26 = vpack.c.bf16 %v18522_v36, %v18518_v2 }
 0x566   : > { %v15165_v60 = vld [vmem:[#allocation2 + $0x18] sm:$0xff]   ;;  %14423 = vmatmul.mubr.bf16.gmra.mxu0 %v15172_v39  ;;  %v13195_v47 = vpack.c.bf16 %v18532_v58, %v18527_v37  ;;  %v13200_v33 = vpack.c.bf16 %v7251_v46, %v18536_v56  ;;  %v13205_v48 = vpack.c.bf16 %v7253_v49, %v7252_v32  ;;  %13307 = vst [vmem:[#allocation4 + $0x10] sm:$0xff] %v13160_v61   ;;  %13308 = vst [vmem:[#allocation4 + $0x18] sm:$0xff] %v13165_v25   ;;  %v18584_v63 = vld [vmem:[#allocation11 + $0x138] sm:$0xff]  }
 0x567   : > { %v12780_v40 = vpack.c.bf16 %v7264_v51, %v7264_v51  ;;  %13309 = vst [vmem:[#allocation4 + $0x20] sm:$0xff] %v13170_v0   ;;  %14426 = vmatprep.mubr.bf16.mxu0 %v15173_v45  ;;  %v13210_v42 = vpack.c.bf16 %v7255_v38, %v7254_v50  ;;  %v13215_v28 = vpack.c.bf16 %v7257_v17, %v7256_v53  ;;  %13310 = vst [vmem:[#allocation4 + $0x28] sm:$0xff] %v13175_v29   ;;  %v15170_v37 = vld [vmem:[#allocation2 + $0x28] sm:$0xff]   ;;  %v15174_v17 = vld [vmem:[#allocation2 + $0x30] sm:$0xff]  }
 0x568   : > { %v13220_v12 = vpack.c.bf16 %v7259_v54, %v7258_v18  ;;  %v13225_v11 = vpack.c.bf16 %v7261_v20, %v7260_v52  ;;  %13311 = vst [vmem:[#allocation4 + $0x30] sm:$0xff] %v13180_v4   ;;  %13312 = vst [vmem:[#allocation4 + $0x38] sm:$0xff] %v13185_v24   ;;  %14503 = vmatpush3.bf16.msra.mxu0 %v15188_v21  ;;  %v13230_v62 = vpack.c.bf16 %v7263_v30, %v7262_v19  ;;  %v15177_v49 = vld [vmem:[#allocation3 + $0x4c] sm:$0xff]   ;;  %v15187_v5 = vld [vmem:[#allocation11 + $0xf0] sm:$0xff]  }
 0x569   : > { %7424 = vst [vmem:[#allocation4 + $0x88] sm:$0xf] %v12780_v40  ;;  %13313 = vst [vmem:[#allocation4 + $0x40] sm:$0xff] %v13190_v26   ;;  %v7920_v9 = vshrl.u32 %v15163_v57, 16  ;;  %v7923_v2 = vshll.u32 %v15163_v57, 16  ;;  %v7929_v36 = vshrl.u32 %v18557_v35, 16  ;;  %14504 = vmatprep.subr.bf16.mxu0 %v18559_v22  ;;  %v7918_v58 = vor.u32 %v18268_v41, %v18266_v3 }
 0x56a   : > { %13314 = vst [vmem:[#allocation4 + $0x48] sm:$0xff] %v13195_v47   ;;  %13315 = vst [vmem:[#allocation4 + $0x50] sm:$0xff] %v13200_v33   ;;  %v7932_v56 = vshll.u32 %v18557_v35, 16  ;;  %v7938_v31 = vshrl.u32 %v15165_v60, 16  ;;  %v7941_v55 = vshll.u32 %v15165_v60, 16  ;;  %v7947_v23 = vshrl.u32 %v15169_v27, 16 }
 0x56b   : > { %13316 = vst [vmem:[#allocation4 + $0x58] sm:$0xff] %v13205_v48   ;;  %13317 = vst [vmem:[#allocation4 + $0x60] sm:$0xff] %v13210_v42   ;;  %v7922_v46 = vrot.slane %v7920_v9, 3  ;;  %v7925_v44 = vrot.slane %v7923_v2, 4  ;;  %v7931_v32 = vrot.slane %v7929_v36, 3  ;;  %v7950_v50 = vshll.u32 %v15169_v27, 16 }
 0x56c   : > { %13318 = vst [vmem:[#allocation4 + $0x68] sm:$0xff] %v13215_v28   ;;  %13319 = vst [vmem:[#allocation4 + $0x70] sm:$0xff] %v13220_v12   ;;  %v7934_v21 = vrot.slane %v7932_v56, 4  ;;  %v7940_v1 = vrot.slane %v7938_v31, 3  ;;  %v7943_v14 = vrot.slane %v7941_v55, 4  ;;  %14505 = vmatpush3.bf16.msra.mxu0 %v18559_v22  ;;  %v7956_v38 = vshrl.u32 %v15170_v37, 16 }
 0x56d   : > { %13320 = vst [vmem:[#allocation4 + $0x78] sm:$0xff] %v13225_v11   ;;  %13321 = vst [vmem:[#allocation4 + $0x80] sm:$0xff] %v13230_v62   ;;  %v7926_v13 = vor.u32 %v7925_v44, %v7922_v46  ;;  %v7959_v34 = vshll.u32 %v15170_v37, 16  ;;  %v15178_v3 = vld [vmem:[#allocation3 + $0x54] sm:$0xff]   ;;  %14586 = vmatprep.subr.bf16.mxu0 %v18584_v63  ;;  %v7949_v10 = vrot.slane %v7947_v23, 3  ;;  %v7952_v54 = vrot.slane %v7950_v50, 4 }
 0x56e   : > { %v7935_v41 = vor.u32 %v7934_v21, %v7931_v32  ;;  %v7944_v53 = vor.u32 %v7943_v14, %v7940_v1  ;;  %14427 = vmatmul.mubr.bf16.gmra.mxu0 %v15177_v49  ;;  %v7958_v52 = vrot.slane %v7956_v38, 3  ;;  %v15175_v35 = vld [vmem:[#allocation2 + $0x38] sm:$0xff]   ;;  %v15653_v22 = vld [vmem:[#allocation11 + $0xf8] sm:$0xff]   ;;  %v15192_v59 = vld [vmem:[#allocation11 + $0xe8] sm:$0xff]   ;;  %v7965_v19 = vshrl.u32 %v15174_v17, 16 }
 0x56f   : > { %v7927_v7 = vsel %vm2502_vm1, %v7918_v58, %v7926_v13  ;;  %14430 = vmatprep.mubr.bf16.mxu0 %v15178_v3  ;;  %v7961_v57 = vrot.slane %v7959_v34, 4  ;;  %v15197_v20 = vld [vmem:[#allocation4 + $0x4] sm:$0xff]   ;;  %v7953_v43 = vor.u32 %v7952_v54, %v7949_v10  ;;  %v7968_v6 = vshll.u32 %v15174_v17, 16  ;;  %v15183_v16 = vld [vmem:[#allocation3 + $0x64] sm:$0xff]   ;;  %v15194_v61 = vld [vmem:[#allocation11 + $0xe0] sm:$0xff]  }
 0x570   : > { %14458 = vmatprep.mubr.bf16.mxu1 %v7927_v7  ;;  %v7936_v18 = vsel %vm2502_vm1, %v7926_v13, %v7935_v41  ;;  %v7945_v8 = vsel %vm2502_vm1, %v7935_v41, %v7944_v53  ;;  %v15182_v30 = vld [vmem:[#allocation3 + $0x5c] sm:$0xff]   ;;  %v7974_v51 = vshrl.u32 %v15175_v35, 16  ;;  %v7977_v39 = vshll.u32 %v15175_v35, 16  ;;  %v15179_v29 = vld [vmem:[#allocation2 + $0x40] sm:$0xff]   ;;  %v15180_v4 = vld [vmem:[#allocation2 + $0x48] sm:$0xff]  }
 0x571   : > { %14459 = vmatmul.mubr.bf16.vlgmr.msra.gmra.mxu1 %v7936_v18  ;;  %v7962_v15 = vor.u32 %v7961_v57, %v7958_v52  ;;  %v8424_v25 = vshll.u32 %v15197_v20, 16  ;;  %v7954_v0 = vsel %vm2502_vm1, %v7944_v53, %v7953_v43  ;;  %v7967_v45 = vrot.slane %v7965_v19, 3  ;;  %v18598_v47 = vld [vmem:[#allocation4 + $0xc] sm:$0xff]   ;;  %v15189_v28 = vld [vmem:[#allocation3 + $0x6c] sm:$0xff]   ;;  %v15190_v2 = vld [vmem:[#allocation3 + $0x74] sm:$0xff]  }
 0x572   : > { %14462 = vmatprep.mubr.bf16.mxu1 %v7945_v8  ;;  %14539 = vmatpush3.bf16.msra.mxu1 %v15653_v22  ;;  %v7970_v40 = vrot.slane %v7968_v6, 4  ;;  %v7976_v60 = vrot.slane %v7974_v51, 3  ;;  %v7979_v26 = vrot.slane %v7977_v39, 4  ;;  %v15200_v33 = vld [vmem:[#allocation11 + $0xd8] sm:$0xff]   ;;  %v7983_v27 = vshrl.u32 %v15179_v29, 16  ;;  %v15184_v56 = vld [vmem:[#allocation2 + $0x50] sm:$0xff]  }
 0x573   : > { %14540 = vmatprep.subr.bf16.mxu1 %v15187_v5  ;;  %v7963_v24 = vsel %vm2502_vm1, %v7953_v43, %v7962_v15  ;;  %v7986_v42 = vshll.u32 %v15179_v29, 16  ;;  %v8422_v12 = vshrl.u32 %v15197_v20, 16  ;;  %v7992_v62 = vshrl.u32 %v15180_v4, 16  ;;  %v15204_v58 = vld [vmem:[#allocation4 + $0x14] sm:$0xff]   ;;  %v15202_v31 = vld [vmem:[#allocation11 + $0xd0] sm:$0xff]   ;;  %v15207_v38 = vld [vmem:[#allocation11 + $0xc8] sm:$0xff]  }
 0x574   : > { %v7971_v48 = vor.u32 %v7970_v40, %v7967_v45  ;;  %v7980_v11 = vor.u32 %v7979_v26, %v7976_v60  ;;  %v7995_v9 = vshll.u32 %v15180_v4, 16  ;;  %v8426_v36 = vrot.slane %v8424_v25, 1  ;;  %v15186_v21 = vld [vmem:[#allocation2 + $0x58] sm:$0xff]   ;;  %v18603_v53 = vld [vmem:[#allocation4 + $0x1c] sm:$0xff]   ;;  %v15191_v52 = vld [vmem:[#allocation2 + $0x60] sm:$0xff]  }
 0x575   : > { %v8429_v37 = vshll.u32 %v18598_v47, 16  ;;  %v7985_v46 = vrot.slane %v7983_v27, 3  ;;  %v7988_v44 = vrot.slane %v7986_v42, 4  ;;  %v7994_v23 = vrot.slane %v7992_v62, 3  ;;  %v15196_v41 = vld [vmem:[#allocation3 + $0x7c] sm:$0xff]   ;;  %v15210_v35 = vld [vmem:[#allocation11 + $0xc0] sm:$0xff]  }
 0x576   : > { %14431 = vmatmul.mubr.bf16.gmra.mxu0 %v15182_v30  ;;  %14541 = vmatpush3.bf16.msra.mxu1 %v15187_v5  ;;  %v7972_v55 = vsel %vm2502_vm1, %v7962_v15, %v7971_v48  ;;  %v7981_v32 = vsel %vm2502_vm1, %v7971_v48, %v7980_v11  ;;  %v7997_v49 = vrot.slane %v7995_v9, 4  ;;  %v8427_v1 = vor.u32 %v8426_v36, %v8422_v12  ;;  %v15212_v54 = vld [vmem:[#allocation4 + $0x24] sm:$0xff]   ;;  %v15193_v20 = vld [vmem:[#allocation2 + $0x68] sm:$0xff]   ;;  %v18610_v29 = vld [vmem:[#allocation4 + $0x2c] sm:$0xff]  }
 0x577   : > { %14434 = vmatprep.mubr.bf16.mxu0 %v15183_v16  ;;  %14542 = vmatprep.subr.bf16.mxu1 %v15192_v59  ;;  %v8431_v14 = vrot.slane %v8429_v37, 1  ;;  %v8437_v50 = vshll.u32 %v15204_v58, 16  ;;  %v8001_v13 = vshrl.u32 %v15184_v56, 16  ;;  %v7989_v34 = vor.u32 %v7988_v44, %v7985_v46  ;;  %v15211_v25 = vld [vmem:[#allocation11 + $0x130] sm:$0xff]   ;;  %v18612_v4 = vld [vmem:[#allocation11 + $0x178] sm:$0xff]   ;;  %v15216_v37 = vld [vmem:[#allocation11 + $0x128] sm:$0xff]  }
 0x578   : > { %v8004_v3 = vshll.u32 %v15184_v56, 16  ;;  %v7998_v7 = vor.u32 %v7997_v49, %v7994_v23  ;;  %v8010_v17 = vshrl.u32 %v15186_v21, 16  ;;  %v8013_v5 = vshll.u32 %v15186_v21, 16 }
 0x579   : > { %14463 = vmatmul.mubr.bf16.gmra.mxu1 %v7954_v0  ;;  %v8432_v18 = vsel %vm3013_vm2, %v8427_v1, %v8431_v14  ;;  %v8439_v10 = vrot.slane %v8437_v50, 1  ;;  %v8003_v8 = vrot.slane %v8001_v13, 3  ;;  %v8433_v57 = vshrl.u32 %v18598_v47, 16  ;;  %v15199_v47 = vld [vmem:[#allocation2 + $0x70] sm:$0xff]  }
 0x57a   : > { %14466 = vmatprep.mubr.bf16.mxu1 %v7963_v24  ;;  %14543 = vmatpush3.bf16.msra.mxu1 %v15192_v59  ;;  %v7990_v22 = vsel %vm2502_vm1, %v7980_v11, %v7989_v34  ;;  %v8006_v59 = vrot.slane %v8004_v3, 4  ;;  %v8441_v43 = vshrl.u32 %v15204_v58, 16  ;;  %v8445_v19 = vshll.u32 %v18603_v53, 16  ;;  %v18622_v1 = vld [vmem:[#allocation4 + $0x3c] sm:$0xff]  }
 0x57b   : > { %14544 = vmatprep.subr.bf16.mxu1 %v15194_v61  ;;  %v7999_v6 = vsel %vm2502_vm1, %v7989_v34, %v7998_v7  ;;  %v8012_v30 = vrot.slane %v8010_v17, 3  ;;  %v8015_v15 = vrot.slane %v8013_v5, 4  ;;  %v8435_v51 = vor.u32 %v8433_v57, %v8431_v14  ;;  %v15221_v14 = vld [vmem:[#allocation11 + $0x120] sm:$0xff]   ;;  %v15226_v17 = vld [vmem:[#allocation11 + $0x118] sm:$0xff]  }
 0x57c   : > { %v8443_v39 = vor.u32 %v8441_v43, %v8439_v10  ;;  %v8453_v16 = vshll.u32 %v15212_v54, 16  ;;  %v8007_v0 = vor.u32 %v8006_v59, %v8003_v8  ;;  %v8022_v45 = vshll.u32 %v15191_v52, 16  ;;  %v15208_v3 = vld [vmem:[#allocation2 + $0x8] sm:$0xf8]  }
 0x57d   : > { %v8447_v40 = vrot.slane %v8445_v19, 1  ;;  %v8016_v24 = vor.u32 %v8015_v15, %v8012_v30  ;;  %v8028_v60 = vshrl.u32 %v15193_v20, 16  ;;  %v8031_v26 = vshll.u32 %v15193_v20, 16  ;;  %v15209_v20 = vld [vmem:[#allocation2 + $0x10] sm:$0xff]  }
 0x57e   : > { %14435 = vmatmul.mubr.bf16.gmra.mxu0 %v15189_v28  ;;  %14545 = vmatpush3.bf16.msra.mxu1 %v15194_v61  ;;  %v8019_v61 = vshrl.u32 %v15191_v52, 16  ;;  %v8440_v48 = vsel %vm3013_vm2, %v8435_v51, %v8439_v10  ;;  %v8455_v42 = vrot.slane %v8453_v16, 1  ;;  %v15217_v28 = vld [vmem:[#allocation4 + $0x34] sm:$0xff]   ;;  %v8449_v11 = vshrl.u32 %v18603_v53, 16 }
 0x57f   : > { %14438 = vmatprep.mubr.bf16.mxu0 %v15190_v2  ;;  %14546 = vmatprep.subr.bf16.mxu1 %v15200_v33  ;;  %v8448_v27 = vsel %vm3013_vm2, %v8443_v39, %v8447_v40  ;;  %v8008_v62 = vsel %vm2502_vm1, %v7998_v7, %v8007_v0  ;;  %v8024_v9 = vrot.slane %v8022_v45, 4  ;;  %v8457_v2 = vshrl.u32 %v15212_v54, 16  ;;  %v15222_v7 = vld [vmem:[#allocation4 + $0x44] sm:$0xff]  }
 0x580   : > { %v8021_v12 = vrot.slane %v8019_v61, 3  ;;  %v8461_v36 = vshll.u32 %v18610_v29, 16  ;;  %v8017_v58 = vsel %vm2502_vm1, %v8007_v0, %v8016_v24  ;;  %v8030_v56 = vrot.slane %v8028_v60, 3  ;;  %v18630_v61 = vld [vmem:[#allocation4 + $0x4c] sm:$0xff]  }
 0x581   : > { %14467 = vmatmul.mubr.bf16.gmra.mxu1 %v7972_v55  ;;  %v8451_v55 = vor.u32 %v8449_v11, %v8447_v40  ;;  %v8469_v46 = vshll.u32 %v15217_v28, 16  ;;  %v8037_v44 = vshrl.u32 %v15199_v47, 16  ;;  %v8465_v54 = vshrl.u32 %v18610_v29, 16  ;;  %v15214_v29 = vld [vmem:[#allocation2 + $0x18] sm:$0xff]  }
 0x582   : > { %14470 = vmatprep.mubr.bf16.mxu1 %v7981_v32  ;;  %14547 = vmatpush3.bf16.msra.mxu1 %v15200_v33  ;;  %v15201_v33 = vld [vmem:[#allocation2 + $0x78] sm:$0xff]   ;;  %v8040_v32 = vshll.u32 %v15199_v47, 16  ;;  %v8025_v49 = vor.u32 %v8024_v9, %v8021_v12  ;;  %v8463_v21 = vrot.slane %v8461_v36, 1  ;;  %v8473_v52 = vshrl.u32 %v15217_v28, 16  ;;  %v15238_v9 = vld [vmem:[#allocation11 + $0x108] sm:$0xff]  }
 0x583   : > { %14548 = vmatprep.subr.bf16.mxu1 %v15202_v31  ;;  %v8046_v23 = vshrl.u32 %v15201_v33, 16  ;;  %v8049_v13 = vshll.u32 %v15201_v33, 16  ;;  %v8456_v34 = vsel %vm3013_vm2, %v8451_v55, %v8455_v42  ;;  %v8471_v53 = vrot.slane %v8469_v46, 1 }
 0x584   : > { %v8039_v5 = vrot.slane %v8037_v44, 3  ;;  %v8026_v8 = vsel %vm2502_vm1, %v8016_v24, %v8025_v49  ;;  %v8477_v57 = vshll.u32 %v18622_v1, 16  ;;  %v8467_v43 = vor.u32 %v8465_v54, %v8463_v21  ;;  %v18642_v54 = vld [vmem:[#allocation11 + $0x1b8] sm:$0xff]  }
 0x585   : > { %v8048_v10 = vrot.slane %v8046_v23, 3  ;;  %v8485_v30 = vshll.u32 %v15222_v7, 16  ;;  %v8944_v15 = vshrl.u32 %v15208_v3, 16  ;;  %v8947_v39 = vshll.u32 %v15208_v3, 16  ;;  %v15232_v3 = vld [vmem:[#allocation4 + $0x64] sm:$0xff]  }
 0x586   : > { %14439 = vmatmul.mubr.bf16.gmra.mxu0 %v15196_v41  ;;  %14549 = vmatpush3.bf16.msra.mxu1 %v15202_v31  ;;  %v8033_v31 = vrot.slane %v8031_v26, 4  ;;  %v8479_v16 = vrot.slane %v8477_v57, 1  ;;  %v8952_v45 = vshrl.u32 %v15209_v20, 16  ;;  %v8955_v40 = vshll.u32 %v15209_v20, 16 }
 0x587   : > { %14506 = vmatprep.mubr.bf16.mxu0 %v8432_v18  ;;  %14550 = vmatprep.subr.bf16.mxu1 %v15207_v38  ;;  %v8042_v18 = vrot.slane %v8040_v32, 4  ;;  %v8472_v24 = vsel %vm3013_vm2, %v8467_v43, %v8471_v53  ;;  %v8487_v33 = vrot.slane %v8485_v30, 1  ;;  %v8949_v12 = vrot.slane %v8947_v39, 4 }
 0x588   : > { %v8034_v50 = vor.u32 %v8033_v31, %v8030_v56  ;;  %v8489_v11 = vshrl.u32 %v15222_v7, 16  ;;  %v8954_v36 = vrot.slane %v8952_v45, 3  ;;  %v8964_v32 = vshll.u32 %v15214_v29, 16 }
 0x589   : > { %14471 = vmatmul.mubr.bf16.gmra.mxu1 %v7990_v22  ;;  %v8051_v22 = vrot.slane %v8049_v13, 4  ;;  %v8043_v51 = vor.u32 %v8042_v18, %v8039_v5  ;;  %v8497_v7 = vshrl.u32 %v18630_v61, 16  ;;  %v8517_v20 = vshll.u32 %v15232_v3, 16 }
 0x58a   : > { %14474 = vmatprep.mubr.bf16.mxu1 %v7999_v6  ;;  %14551 = vmatpush3.bf16.msra.mxu1 %v15207_v38  ;;  %v15206_v38 = vld [vmem:[#allocation2 + $0x80] ss:$0 sps:$4 sm:$0xff]   ;;  %v8475_v6 = vor.u32 %v8473_v52, %v8471_v53  ;;  %v8491_v31 = vor.u32 %v8489_v11, %v8487_v33  ;;  %v15219_v53 = vld [vmem:[#allocation2 + $0x28] sm:$0xff]   ;;  %v8966_v5 = vrot.slane %v8964_v32, 4 }
 0x58b   : > { %14552 = vmatprep.subr.bf16.mxu1 %v15210_v35  ;;  %v8055_v59 = vshrl.u32 %v15206_v38, 16  ;;  %v8058_v19 = vshll.u32 %v15206_v38, 16  ;;  %v8052_v0 = vor.u32 %v8051_v22, %v8048_v10  ;;  %v8044_v28 = vsel %vm2502_vm1, %v8034_v50, %v8043_v51  ;;  %v15229_v32 = vld [vmem:[#allocation2 + $0x48] sm:$0xff]  }
 0x58c   : > { %v8480_v47 = vsel %vm3013_vm2, %v8475_v6, %v8479_v16  ;;  %v8979_v43 = vshrl.u32 %v15219_v53, 16  ;;  %v8519_v45 = vrot.slane %v8517_v20, 1 }
 0x58d   : > { %v8057_v60 = vrot.slane %v8055_v59, 3  ;;  %v8060_v26 = vrot.slane %v8058_v19, 4  ;;  %v8982_v19 = vshll.u32 %v15219_v53, 16 }
 0x58e   : > { %14507 = vmatmul.mubr.bf16.vlgmr.msra.gmra.mxu0 %v8440_v48  ;;  %14553 = vmatpush3.bf16.msra.mxu1 %v15210_v35  ;;  %v8035_v35 = vsel %vm2502_vm1, %v8025_v49, %v8034_v50  ;;  %v15227_v48 = vld [vmem:[#allocation4 + $0x54] sm:$0xff]   ;;  %v15228_v49 = vld [vmem:[#allocation4 + $0x5c] sm:$0xff]  }
 0x58f   : > { %14587 = vmatpush3.bf16.msra.mxu0 %v18584_v63  ;;  %14510 = vmatprep.mubr.bf16.mxu0 %v8448_v27  ;;  %v8459_v63 = vor.u32 %v8457_v2, %v8455_v42  ;;  %v8946_v27 = vrot.slane %v8944_v15, 3  ;;  %v8481_v42 = vshrl.u32 %v18622_v1, 16  ;;  %v8053_v2 = vsel %vm2502_vm1, %v8043_v51, %v8052_v0  ;;  %v15233_v15 = vld [vmem:[#allocation4 + $0x6c] sm:$0xff]  }
 0x590   : > { %14588 = vmatprep.subr.bf16.mxu0 %v15211_v25  ;;  %14634 = vmatprep.subr.bf16.mxu1 %v18612_v4  ;;  %v8501_v55 = vshll.u32 %v15227_v48, 16  ;;  %v8061_v46 = vor.u32 %v8060_v26, %v8057_v60  ;;  %v8505_v18 = vshrl.u32 %v15227_v48, 16  ;;  %v8509_v10 = vshll.u32 %v15228_v49, 16  ;;  %v15237_v26 = vld [vmem:[#allocation11 + $0x170] sm:$0xff]  }
 0x591   : > { %14475 = vmatmul.mubr.bf16.gmra.mxu1 %v8008_v62  ;;  %v8464_v41 = vsel %vm3013_vm2, %v8459_v63, %v8463_v21  ;;  %v8493_v62 = vshll.u32 %v18630_v61, 16  ;;  %v8483_v56 = vor.u32 %v8481_v42, %v8479_v16  ;;  %v8961_v63 = vshrl.u32 %v15214_v29, 16  ;;  %v15245_v21 = vld [vmem:[#allocation11 + $0x100] sm:$0xff]  }
 0x592   : > { %14478 = vmatprep.mubr.bf16.mxu1 %v8017_v58  ;;  %v15215_v58 = vld [vmem:[#allocation2 + $0x20] sm:$0xff]   ;;  %v8950_v44 = vor.u32 %v8949_v12, %v8946_v27  ;;  %v8511_v30 = vrot.slane %v8509_v10, 1  ;;  %v8981_v29 = vrot.slane %v8979_v43, 3  ;;  %v8513_v60 = vshrl.u32 %v15228_v49, 16 }
 0x593   : > { %14589 = vmatpush3.bf16.msra.mxu0 %v15211_v25  ;;  %v15231_v25 = vld [vmem:[#allocation11 + $0x110] sm:$0xff]   ;;  %v8495_v23 = vrot.slane %v8493_v62, 1  ;;  %v8973_v50 = vshll.u32 %v15215_v58, 16  ;;  %v8488_v13 = vsel %vm3013_vm2, %v8483_v56, %v8487_v33  ;;  %v8521_v33 = vshrl.u32 %v15232_v3, 16  ;;  %v15225_v12 = vld [vmem:[#allocation2 + $0x40] sm:$0xff]  }
 0x594   : > { %14590 = vmatprep.subr.bf16.mxu0 %v15216_v37  ;;  %v8525_v48 = vshll.u32 %v15233_v15, 16  ;;  %v8515_v11 = vor.u32 %v8513_v60, %v8511_v30  ;;  %v15249_v10 = vld [vmem:[#allocation11 + $0x158] sm:$0xff]  }
 0x595   : > { %v8496_v38 = vsel %vm3013_vm2, %v8491_v31, %v8495_v23  ;;  %v8975_v57 = vrot.slane %v8973_v50, 4  ;;  %v8499_v22 = vor.u32 %v8497_v7, %v8495_v23  ;;  %v15240_v31 = vld [vmem:[#allocation4 + $0x7c] sm:$0xff]  }
 0x596   : > { %14511 = vmatmul.mubr.bf16.gmra.mxu0 %v8456_v34  ;;  %v8503_v34 = vrot.slane %v8501_v55, 1  ;;  %v8527_v56 = vrot.slane %v8525_v48, 1  ;;  %v15244_v50 = vld [vmem:[#allocation11 + $0x160] sm:$0xff]  }
 0x597   : > { %14514 = vmatprep.mubr.bf16.mxu0 %v8464_v41  ;;  %14591 = vmatpush3.bf16.msra.mxu0 %v15216_v37  ;;  %v8957_v37 = vrot.slane %v8955_v40, 4  ;;  %v8963_v41 = vrot.slane %v8961_v63, 3  ;;  %v15239_v40 = vld [vmem:[#allocation4 + $0x74] sm:$0xff]   ;;  %v9006_v63 = vshrl.u32 %v15225_v12, 16 }
 0x598   : > { %14592 = vmatprep.subr.bf16.mxu0 %v15221_v14  ;;  %v8507_v59 = vor.u32 %v8505_v18, %v8503_v34  ;;  %v8504_v61 = vsel %vm3013_vm2, %v8499_v22, %v8503_v34  ;;  %v8541_v34 = vshll.u32 %v15240_v31, 16  ;;  %v15246_v18 = vld [vmem:[#allocation4 + $0x84] ss:$0 sps:$4 sm:$0x11]  }
 0x599   : > { %14479 = vmatmul.mubr.bf16.gmra.mxu1 %v8026_v8  ;;  %v8958_v1 = vor.u32 %v8957_v37, %v8954_v36  ;;  %v8967_v6 = vor.u32 %v8966_v5, %v8963_v41  ;;  %v15242_v37 = vld [vmem:[#allocation11 + $0x168] sm:$0xff]   ;;  %v9008_v41 = vrot.slane %v9006_v63, 3 }
 0x59a   : > { %14482 = vmatprep.mubr.bf16.mxu1 %v8035_v35  ;;  %v15220_v35 = vld [vmem:[#allocation2 + $0x30] sm:$0xff]  }
 0x59b   : > { %14593 = vmatpush3.bf16.msra.mxu0 %v15221_v14  ;;  %v8970_v14 = vshrl.u32 %v15215_v58, 16  ;;  %v8959_v8 = vsel %vm2502_vm1, %v8950_v44, %v8958_v1  ;;  %v8988_v39 = vshrl.u32 %v15220_v35, 16  ;;  %v8991_v16 = vshll.u32 %v15220_v35, 16 }
 0x59c   : > { %14594 = vmatprep.subr.bf16.mxu0 %v15226_v17  ;;  %v8520_v44 = vsel %vm3013_vm2, %v8515_v11, %v8519_v45 }
 0x59d   : > { %v8972_v52 = vrot.slane %v8970_v14, 3  ;;  %v8990_v42 = vrot.slane %v8988_v39, 3  ;;  %v8529_v14 = vshrl.u32 %v15233_v15, 16 }
 0x59e   : > { %14515 = vmatmul.mubr.bf16.gmra.mxu0 %v8472_v24  ;;  %v8984_v24 = vrot.slane %v8982_v19, 4  ;;  %v15251_v19 = vld [vmem:[#allocation11 + $0x150] sm:$0xff]  }
 0x59f   : > { %14518 = vmatprep.mubr.bf16.mxu0 %v8480_v47  ;;  %14595 = vmatpush3.bf16.msra.mxu0 %v15226_v17  ;;  %v8062_v17 = vsel %vm2502_vm1, %v8052_v0, %v8061_v46  ;;  %v8976_v51 = vor.u32 %v8975_v57, %v8972_v52  ;;  %v8512_v0 = vsel %vm3013_vm2, %v8507_v59, %v8511_v30  ;;  %v9009_v46 = vshll.u32 %v15225_v12, 16  ;;  %v15259_v12 = vld [vmem:[#allocation11 + $0x140] sm:$0xff]  }
 0x5a0   : > { %14596 = vmatprep.subr.bf16.mxu0 %v15231_v25  ;;  %v8968_v47 = vsel %vm2502_vm1, %v8958_v1, %v8967_v6  ;;  %v8985_v58 = vor.u32 %v8984_v24, %v8981_v29  ;;  %v15230_v1 = vld [vmem:[#allocation2 + $0x50] sm:$0xff]   ;;  %v8531_v7 = vor.u32 %v8529_v14, %v8527_v56  ;;  %v9018_v52 = vshll.u32 %v15229_v32, 16 }
 0x5a1   : > { %14483 = vmatmul.mubr.bf16.gmra.mxu1 %v8044_v28  ;;  %v8977_v27 = vsel %vm2502_vm1, %v8967_v6, %v8976_v51  ;;  %v8993_v28 = vrot.slane %v8991_v16, 4  ;;  %v9011_v53 = vrot.slane %v9009_v46, 4  ;;  %v8543_v57 = vrot.slane %v8541_v34, 1  ;;  %v15234_v16 = vld [vmem:[#allocation2 + $0x58] sm:$0xff]   ;;  %v15256_v24 = vld [vmem:[#allocation11 + $0x148] sm:$0xff]  }
 0x5a2   : > { %14486 = vmatprep.mubr.bf16.mxu1 %v8053_v2  ;;  %v8533_v2 = vshll.u32 %v15239_v40, 16  ;;  %v9024_v22 = vshrl.u32 %v15230_v1, 16  ;;  %v9027_v59 = vshll.u32 %v15230_v1, 16  ;;  %v8545_v6 = vshrl.u32 %v15240_v31, 16  ;;  %v15253_v31 = vld [vmem:[#allocation3 + $0x14] sm:$0xff]   ;;  %v15248_v1 = vld [vmem:[#allocation2 + $0x78] sm:$0xff]  }
 0x5a3   : > { %14597 = vmatpush3.bf16.msra.mxu0 %v15231_v25  ;;  %v15224_v25 = vld [vmem:[#allocation2 + $0x38] sm:$0xff]   ;;  %v8994_v55 = vor.u32 %v8993_v28, %v8990_v42  ;;  %v9012_v35 = vor.u32 %v9011_v53, %v9008_v41  ;;  %v8549_v30 = vshll.u32 %v15246_v18, 16  ;;  %v9020_v39 = vrot.slane %v9018_v52, 4  ;;  %v15247_v28 = vld [vmem:[#allocation3 + $0xc] sm:$0xff]   ;;  %v15265_v34 = vld [vmem:[#allocation11 + $0x1a8] sm:$0xff]  }
 0x5a4   : > { %14598 = vmatprep.subr.bf16.mxu0 %v15238_v9  ;;  %v8997_v62 = vshrl.u32 %v15224_v25, 16  ;;  %v9000_v36 = vshll.u32 %v15224_v25, 16  ;;  %v8535_v49 = vrot.slane %v8533_v2, 1  ;;  %v15241_v2 = vld [vmem:[#allocation2 + $0x68] sm:$0xff]   ;;  %v15261_v18 = vld [vmem:[#allocation3 + $0x24] sm:$0xff]  }
 0x5a5   : > { %v8995_v3 = vsel %vm2502_vm1, %v8985_v58, %v8994_v55  ;;  %v8551_v29 = vrot.slane %v8549_v30, 1  ;;  %v9051_v63 = vshrl.u32 %v15241_v2, 16  ;;  %v9054_v46 = vshll.u32 %v15241_v2, 16 }
 0x5a6   : > { %14519 = vmatmul.mubr.bf16.gmra.mxu0 %v8488_v13  ;;  %v8986_v13 = vsel %vm2502_vm1, %v8976_v51, %v8985_v58  ;;  %v8536_v20 = vsel %vm3013_vm2, %v8531_v7, %v8535_v49  ;;  %v9069_v7 = vshrl.u32 %v15248_v1, 16 }
 0x5a7   : > { %14522 = vmatprep.mubr.bf16.mxu0 %v8496_v38  ;;  %14599 = vmatpush3.bf16.msra.mxu0 %v15238_v9  ;;  %v8523_v9 = vor.u32 %v8521_v33, %v8519_v45  ;;  %v8537_v38 = vshrl.u32 %v15239_v40, 16  ;;  %v9029_v45 = vrot.slane %v9027_v59, 4  ;;  %v8547_v40 = vor.u32 %v8545_v6, %v8543_v57  ;;  %v15257_v59 = vld [vmem:[#allocation4 + $0xc] sm:$0xff]  }
 0x5a8   : > { %14600 = vmatprep.subr.bf16.mxu0 %v15245_v21 }
 0x5a9   : > { %14487 = vmatmul.mubr.bf16.gmra.mxu1 %v8062_v17  ;;  %v8528_v23 = vsel %vm3013_vm2, %v8523_v9, %v8527_v56  ;;  %v9015_v17 = vshrl.u32 %v15229_v32, 16  ;;  %v8539_v5 = vor.u32 %v8537_v38, %v8535_v49  ;;  %v8552_v42 = vsel %vm3013_vm2, %v8547_v40, %v8551_v29  ;;  %v15260_v32 = vld [vmem:[#allocation11 + $0x1b0] sm:$0xff]   ;;  %v15250_v38 = vld [vmem:[#allocation2 + $0x80] sm:$0xff]  }
 0x5aa   : > { %14554 = vmatprep.mubr.bf16.mxu1 %v8959_v8  ;;  %v9081_v52 = vshll.u32 %v15250_v38, 16  ;;  %v15267_v40 = vld [vmem:[#allocation3 + $0x3c] sm:$0xff]  }
 0x5ab   : > { %14601 = vmatpush3.bf16.msra.mxu0 %v15245_v21  ;;  %v8999_v21 = vrot.slane %v8997_v62, 3  ;;  %v8544_v43 = vsel %vm3013_vm2, %v8539_v5, %v8543_v57  ;;  %v9017_v51 = vrot.slane %v9015_v17, 3  ;;  %v9078_v5 = vshrl.u32 %v15250_v38, 16  ;;  %v15262_v57 = vld [vmem:[#allocation3 + $0x2c] sm:$0xff]  }
 0x5ac   : > { %14682 = vmatprep.subr.bf16.mxu0 %v18642_v54 }
 0x5ad   : > { %v9021_v60 = vor.u32 %v9020_v39, %v9017_v51  ;;  %v9080_v30 = vrot.slane %v9078_v5, 3  ;;  %v15266_v39 = vld [vmem:[#allocation3 + $0x34] sm:$0xff]  }
 0x5ae   : > { %14523 = vmatmul.mubr.bf16.gmra.mxu0 %v8504_v61  ;;  %v15236_v61 = vld [vmem:[#allocation2 + $0x60] sm:$0xff]  }
 0x5af   : > { %14526 = vmatprep.mubr.bf16.mxu0 %v8512_v0  ;;  %v9026_v0 = vrot.slane %v9024_v22, 3  ;;  %v9042_v48 = vshrl.u32 %v15236_v61, 16  ;;  %v9022_v11 = vsel %vm2502_vm1, %v9012_v35, %v9021_v60  ;;  %v9071_v22 = vrot.slane %v9069_v7, 3 }
 0x5b1   : > { %14555 = vmatmul.mubr.bf16.vlgmr.msra.gmra.mxu1 %v8968_v47  ;;  %v9036_v47 = vshll.u32 %v15234_v16, 16  ;;  %v9030_v33 = vor.u32 %v9029_v45, %v9026_v0  ;;  %v9044_v58 = vrot.slane %v9042_v48, 3  ;;  %v9874_v45 = vshll.u32 %v15257_v59, 16 }
 0x5b2   : > { %14558 = vmatprep.mubr.bf16.mxu1 %v8977_v27  ;;  %14635 = vmatpush3.bf16.msra.mxu1 %v18612_v4  ;;  %v9002_v4 = vrot.slane %v9000_v36, 4  ;;  %v9045_v27 = vshll.u32 %v15236_v61, 16  ;;  %v15243_v36 = vld [vmem:[#allocation2 + $0x70] sm:$0xff]  }
 0x5b3   : > { %14636 = vmatprep.subr.bf16.mxu1 %v15237_v26  ;;  %v9038_v9 = vrot.slane %v9036_v47, 4  ;;  %v15287_v47 = vld [vmem:[#allocation11 + $0x188] sm:$0xff]   ;;  %v9876_v48 = vrot.slane %v9874_v45, 1 }
 0x5b4   : > { %v9003_v8 = vor.u32 %v9002_v4, %v8999_v21  ;;  %v9047_v56 = vrot.slane %v9045_v27, 4  ;;  %v9060_v21 = vshrl.u32 %v15243_v36, 16  ;;  %v9063_v4 = vshll.u32 %v15243_v36, 16  ;;  %v15263_v27 = vld [vmem:[#allocation4 + $0x1c] sm:$0xff]   ;;  %v15272_v36 = vld [vmem:[#allocation3 + $0x4c] sm:$0xff]  }
 0x5b5   : > { %v9887_v2 = vshll.u32 %v15263_v27, 16 }
 0x5b6   : > { %14527 = vmatmul.mubr.bf16.gmra.mxu0 %v8520_v44  ;;  %14637 = vmatpush3.bf16.msra.mxu1 %v15237_v26  ;;  %v9004_v15 = vsel %vm2502_vm1, %v8994_v55, %v9003_v8  ;;  %v9013_v25 = vsel %vm2502_vm1, %v9003_v8, %v9012_v35  ;;  %v9033_v26 = vshrl.u32 %v15234_v16, 16  ;;  %v15254_v44 = vld [vmem:[#allocation3 + $0x1c] sm:$0xff]   ;;  %v9048_v49 = vor.u32 %v9047_v56, %v9044_v58  ;;  %v15255_v35 = vld [vmem:[#allocation2 + $0x88] ss:$0 sps:$4 sm:$0xff]   ;;  %v15268_v56 = vld [vmem:[#allocation4 + $0x2c] sm:$0xff]  }
 0x5b7   : > { %14530 = vmatprep.mubr.bf16.mxu0 %v8528_v23  ;;  %14638 = vmatprep.subr.bf16.mxu1 %v15242_v37  ;;  %v18662_v23 = vld [vmem:[#allocation11 + $0x1f8] sm:$0xff]   ;;  %v9062_v41 = vrot.slane %v9060_v21, 3  ;;  %v9065_v53 = vrot.slane %v9063_v4, 4  ;;  %v9087_v51 = vshrl.u32 %v15255_v35, 16  ;;  %v9090_v61 = vshll.u32 %v15255_v35, 16  ;;  %v15264_v58 = vld [vmem:[#allocation4 + $0x24] sm:$0xff]  }
 0x5b8   : > { %v9035_v62 = vrot.slane %v9033_v26, 3  ;;  %v9903_v4 = vshll.u32 %v15268_v56, 16 }
 0x5b9   : > { %14559 = vmatmul.mubr.bf16.gmra.mxu1 %v8986_v13  ;;  %v9056_v13 = vrot.slane %v9054_v46, 4  ;;  %v9066_v8 = vor.u32 %v9065_v53, %v9062_v41  ;;  %v9089_v29 = vrot.slane %v9087_v51, 3  ;;  %v9092_v26 = vrot.slane %v9090_v61, 4  ;;  %v15273_v53 = vld [vmem:[#allocation4 + $0x3c] sm:$0xff]  }
 0x5ba   : > { %14562 = vmatprep.mubr.bf16.mxu1 %v8995_v3  ;;  %14639 = vmatpush3.bf16.msra.mxu1 %v15242_v37  ;;  %v9031_v37 = vsel %vm2502_vm1, %v9021_v60, %v9030_v33  ;;  %v9039_v55 = vor.u32 %v9038_v9, %v9035_v62  ;;  %v15294_v62 = vld [vmem:[#allocation11 + $0x180] sm:$0xff]   ;;  %v9889_v46 = vrot.slane %v9887_v2, 1  ;;  %v9905_v41 = vrot.slane %v9903_v4, 1  ;;  %v15301_v2 = vld [vmem:[#allocation11 + $0x1d0] sm:$0xff]  }
 0x5bb   : > { %14640 = vmatprep.subr.bf16.mxu1 %v15244_v50  ;;  %v9919_v35 = vshll.u32 %v15273_v53, 16 }
 0x5bc   : > { %v9040_v14 = vsel %vm2502_vm1, %v9030_v33, %v9039_v55  ;;  %v9049_v3 = vsel %vm2502_vm1, %v9039_v55, %v9048_v49  ;;  %v18673_v55 = vld [vmem:[#allocation11 + $0x238] sm:$0xff]  }
 0x5bd   : > { %v9921_v51 = vrot.slane %v9919_v35, 1 }
 0x5be   : > { %14531 = vmatmul.mubr.bf16.gmra.mxu0 %v8536_v20  ;;  %14641 = vmatpush3.bf16.msra.mxu1 %v15244_v50  ;;  %v9053_v50 = vrot.slane %v9051_v63, 3 }
 0x5bf   : > { %14534 = vmatprep.mubr.bf16.mxu0 %v8544_v43  ;;  %14642 = vmatprep.subr.bf16.mxu1 %v15249_v10 }
 0x5c0   : > { %v9057_v17 = vor.u32 %v9056_v13, %v9053_v50  ;;  %v15277_v50 = vld [vmem:[#allocation3 + $0x5c] sm:$0xff]   ;;  %v15269_v13 = vld [vmem:[#allocation4 + $0x34] sm:$0xff]  }
 0x5c1   : > { %14563 = vmatmul.mubr.bf16.gmra.mxu1 %v9004_v15  ;;  %v9083_v15 = vrot.slane %v9081_v52, 4  ;;  %v9911_v5 = vshll.u32 %v15269_v13, 16 }
 0x5c2   : > { %14566 = vmatprep.mubr.bf16.mxu1 %v9013_v25  ;;  %14643 = vmatpush3.bf16.msra.mxu1 %v15249_v10  ;;  %v15270_v10 = vld [vmem:[#allocation11 + $0x1a0] sm:$0xff]   ;;  %v9058_v20 = vsel %vm2502_vm1, %v9048_v49, %v9057_v17  ;;  %v9067_v6 = vsel %vm2502_vm1, %v9057_v17, %v9066_v8  ;;  %v15280_v25 = vld [vmem:[#allocation11 + $0x190] sm:$0xff]   ;;  %v9895_v49 = vshll.u32 %v15264_v58, 16  ;;  %v9899_v17 = vshrl.u32 %v15264_v58, 16 }
 0x5c3   : > { %14644 = vmatprep.subr.bf16.mxu1 %v15251_v19  ;;  %v9084_v0 = vor.u32 %v9083_v15, %v9080_v30  ;;  %v15278_v15 = vld [vmem:[#allocation4 + $0x4c] sm:$0xff]  }
 0x5c4   : > { %v9897_v38 = vrot.slane %v9895_v49, 1  ;;  %v9939_v58 = vshrl.u32 %v15278_v15, 16 }
 0x5c6   : > { %14535 = vmatmul.mubr.bf16.gmra.mxu0 %v8552_v42  ;;  %14645 = vmatpush3.bf16.msra.mxu1 %v15251_v19  ;;  %v15275_v19 = vld [vmem:[#allocation11 + $0x198] sm:$0xff]   ;;  %v9872_v42 = vshrl.u32 %v15257_v59, 16  ;;  %v9901_v52 = vor.u32 %v9899_v17, %v9897_v38  ;;  %v15296_v59 = vld [vmem:[#allocation2 + $0x10] sm:$0xf8]  }
 0x5c7   : > { %14602 = vmatprep.mubr.bf16.mxu0 %v15247_v28  ;;  %14646 = vmatprep.subr.bf16.mxu1 %v15256_v24 }
 0x5c8   : > { %v9877_v9 = vor.u32 %v9876_v48, %v9872_v42 }
 0x5c9   : > { %14567 = vmatmul.mubr.bf16.gmra.mxu1 %v9022_v11  ;;  %v15271_v11 = vld [vmem:[#allocation3 + $0x44] sm:$0xff]  }
 0x5ca   : > { %14570 = vmatprep.mubr.bf16.mxu1 %v9031_v37  ;;  %14647 = vmatpush3.bf16.msra.mxu1 %v15256_v24  ;;  %v15258_v24 = vld [vmem:[#allocation4 + $0x14] sm:$0xff]  }
 0x5cb   : > { %14648 = vmatprep.subr.bf16.mxu1 %v15259_v12  ;;  %v9879_v28 = vshll.u32 %v15258_v24, 16 }
 0x5cd   : > { %v9881_v37 = vrot.slane %v9879_v28, 1 }
 0x5ce   : > { %14603 = vmatmul.mubr.bf16.vlgmr.msra.gmra.mxu0 %v15253_v31  ;;  %14649 = vmatpush3.bf16.msra.mxu1 %v15259_v12  ;;  %v9093_v12 = vor.u32 %v9092_v26, %v9089_v29  ;;  %v18682_v29 = vld [vmem:[#allocation4 + $0x54] sm:$0xff]  }
 0x5cf   : > { %14683 = vmatpush3.bf16.msra.mxu0 %v18642_v54  ;;  %14606 = vmatprep.mubr.bf16.mxu0 %v15254_v44  ;;  %v9072_v54 = vshll.u32 %v15248_v1, 16  ;;  %v9882_v63 = vsel %vm3013_vm2, %v9877_v9, %v9881_v37  ;;  %v9883_v44 = vshrl.u32 %v15258_v24, 16  ;;  %v15276_v1 = vld [vmem:[#allocation3 + $0x54] sm:$0xff]  }
 0x5d0   : > { %14684 = vmatprep.subr.bf16.mxu0 %v15260_v32  ;;  %14730 = vmatprep.subr.bf16.mxu1 %v18662_v23  ;;  %v9094_v31 = vsel %vm2502_vm1, %v9084_v0, %v9093_v12  ;;  %v15288_v24 = vld [vmem:[#allocation3 + $0x74] sm:$0xff]  }
 0x5d1   : > { %14571 = vmatmul.mubr.bf16.gmra.mxu1 %v9040_v14  ;;  %v9074_v43 = vrot.slane %v9072_v54, 4  ;;  %v9885_v21 = vor.u32 %v9883_v44, %v9881_v37  ;;  %v9907_v54 = vshrl.u32 %v15268_v56, 16  ;;  %v15283_v56 = vld [vmem:[#allocation4 + $0x5c] sm:$0xff]  }
 0x5d2   : > { %14574 = vmatprep.mubr.bf16.mxu1 %v9049_v3 }
 0x5d3   : > { %14685 = vmatpush3.bf16.msra.mxu0 %v15260_v32  ;;  %v9075_v16 = vor.u32 %v9074_v43, %v9071_v22  ;;  %v9891_v32 = vshrl.u32 %v15263_v27, 16  ;;  %v9890_v3 = vsel %vm3013_vm2, %v9885_v21, %v9889_v46  ;;  %v15297_v22 = vld [vmem:[#allocation2 + $0x18] sm:$0xff]  }
 0x5d4   : > { %14686 = vmatprep.subr.bf16.mxu0 %v15265_v34  ;;  %v15274_v43 = vld [vmem:[#allocation4 + $0x44] sm:$0xff]   ;;  %v10405_v61 = vshll.u32 %v15297_v22, 16 }
 0x5d5   : > { %v9076_v60 = vsel %vm2502_vm1, %v9066_v8, %v9075_v16  ;;  %v9085_v33 = vsel %vm2502_vm1, %v9075_v16, %v9084_v0  ;;  %v9893_v14 = vor.u32 %v9891_v32, %v9889_v46  ;;  %v15291_v8 = vld [vmem:[#allocation11 + $0x1e8] sm:$0xff]   ;;  %v10402_v16 = vshrl.u32 %v15297_v22, 16 }
 0x5d6   : > { %14607 = vmatmul.mubr.bf16.gmra.mxu0 %v15261_v18  ;;  %v15281_v18 = vld [vmem:[#allocation3 + $0x64] sm:$0xff]   ;;  %v10397_v0 = vshll.u32 %v15296_v59, 16  ;;  %v9927_v45 = vshll.u32 %v15274_v43, 16  ;;  %v15289_v27 = vld [vmem:[#allocation3 + $0x7c] sm:$0xff]   ;;  %v10407_v12 = vrot.slane %v10405_v61, 4  ;;  %v9943_v46 = vshll.u32 %v18682_v29, 16 }
 0x5d7   : > { %14610 = vmatprep.mubr.bf16.mxu0 %v15262_v57  ;;  %14687 = vmatpush3.bf16.msra.mxu0 %v15265_v34  ;;  %v15286_v34 = vld [vmem:[#allocation11 + $0x1f0] sm:$0xff]   ;;  %v9898_v7 = vsel %vm3013_vm2, %v9893_v14, %v9897_v38  ;;  %v9909_v57 = vor.u32 %v9907_v54, %v9905_v41  ;;  %v10404_v28 = vrot.slane %v10402_v16, 3 }
 0x5d8   : > { %14688 = vmatprep.subr.bf16.mxu0 %v15270_v10  ;;  %v9929_v9 = vrot.slane %v9927_v45, 1  ;;  %v15295_v38 = vld [vmem:[#allocation3 + $0x84] sm:$0xff]  }
 0x5d9   : > { %14575 = vmatmul.mubr.bf16.gmra.mxu1 %v9058_v20  ;;  %v9913_v20 = vrot.slane %v9911_v5, 1  ;;  %v10408_v49 = vor.u32 %v10407_v12, %v10404_v28  ;;  %v15311_v5 = vld [vmem:[#allocation2 + $0x38] sm:$0xff]  }
 0x5da   : > { %14578 = vmatprep.mubr.bf16.mxu1 %v9067_v6  ;;  %v9906_v6 = vsel %vm3013_vm2, %v9901_v52, %v9905_v41  ;;  %v15310_v41 = vld [vmem:[#allocation2 + $0x30] sm:$0xff]   ;;  %v15309_v16 = vld [vmem:[#allocation11 + $0x230] sm:$0xff]  }
 0x5db   : > { %14689 = vmatpush3.bf16.msra.mxu0 %v15270_v10  ;;  %v15282_v10 = vld [vmem:[#allocation3 + $0x6c] sm:$0xff]   ;;  %v9914_v30 = vsel %vm3013_vm2, %v9909_v57, %v9913_v20  ;;  %v15290_v57 = vld [vmem:[#allocation4 + $0x6c] sm:$0xff]  }
 0x5dc   : > { %14690 = vmatprep.subr.bf16.mxu0 %v15275_v19  ;;  %v9971_v12 = vshrl.u32 %v15290_v57, 16 }
 0x5de   : > { %14611 = vmatmul.mubr.bf16.gmra.mxu0 %v15266_v39  ;;  %v10394_v39 = vshrl.u32 %v15296_v59, 16  ;;  %v10429_v59 = vshrl.u32 %v15310_v41, 16 }
 0x5df   : > { %14614 = vmatprep.mubr.bf16.mxu0 %v15267_v40  ;;  %14691 = vmatpush3.bf16.msra.mxu0 %v15275_v19  ;;  %v15293_v19 = vld [vmem:[#allocation11 + $0x1e0] sm:$0xff]   ;;  %v9931_v40 = vshrl.u32 %v15274_v43, 16  ;;  %v9947_v43 = vshrl.u32 %v18682_v29, 16 }
 0x5e0   : > { %14692 = vmatprep.subr.bf16.mxu0 %v15280_v25  ;;  %v10396_v42 = vrot.slane %v10394_v39, 3  ;;  %v9967_v39 = vshll.u32 %v15290_v57, 16 }
 0x5e1   : > { %14579 = vmatmul.mubr.bf16.gmra.mxu1 %v9076_v60  ;;  %v15299_v60 = vld [vmem:[#allocation11 + $0x1d8] sm:$0xff]   ;;  %v9933_v14 = vor.u32 %v9931_v40, %v9929_v9 }
 0x5e2   : > { %14582 = vmatprep.mubr.bf16.mxu1 %v9085_v33  ;;  %v15303_v33 = vld [vmem:[#allocation2 + $0x20] sm:$0xff]   ;;  %v9969_v28 = vrot.slane %v9967_v39, 1  ;;  %v15329_v39 = vld [vmem:[#allocation11 + $0x210] sm:$0xff]  }
 0x5e3   : > { %14693 = vmatpush3.bf16.msra.mxu0 %v15280_v25  ;;  %v9923_v25 = vshrl.u32 %v15273_v53, 16  ;;  %v10414_v44 = vshll.u32 %v15303_v33, 16  ;;  %v9945_v53 = vrot.slane %v9943_v46, 1  ;;  %v15315_v40 = vld [vmem:[#allocation2 + $0x40] sm:$0xff]  }
 0x5e4   : > { %14694 = vmatprep.subr.bf16.mxu0 %v15287_v47 }
 0x5e5   : > { %v9925_v48 = vor.u32 %v9923_v25, %v9921_v51 }
 0x5e6   : > { %14615 = vmatmul.mubr.bf16.gmra.mxu0 %v15271_v11  ;;  %v10399_v11 = vrot.slane %v10397_v0, 4  ;;  %v10431_v0 = vrot.slane %v10429_v59, 3 }
 0x5e7   : > { %14618 = vmatprep.mubr.bf16.mxu0 %v15272_v36  ;;  %14695 = vmatpush3.bf16.msra.mxu0 %v15287_v47  ;;  %v9935_v47 = vshll.u32 %v15278_v15, 16 }
 0x5e8   : > { %14696 = vmatprep.subr.bf16.mxu0 %v15294_v62  ;;  %v10400_v32 = vor.u32 %v10399_v11, %v10396_v42 }
 0x5e9   : > { %14583 = vmatmul.mubr.bf16.gmra.mxu1 %v9094_v31  ;;  %v9937_v37 = vrot.slane %v9935_v47, 1  ;;  %v10411_v31 = vshrl.u32 %v15303_v33, 16  ;;  %v15316_v33 = vld [vmem:[#allocation2 + $0x48] sm:$0xff]  }
 0x5ea   : > { %14650 = vmatprep.mubr.bf16.mxu1 %v9882_v63  ;;  %v9930_v63 = vsel %vm3013_vm2, %v9925_v48, %v9929_v9  ;;  %v10459_v46 = vshll.u32 %v15316_v33, 16 }
 0x5eb   : > { %14697 = vmatpush3.bf16.msra.mxu0 %v15294_v62  ;;  %v15304_v62 = vld [vmem:[#allocation2 + $0x28] sm:$0xff]  }
 0x5ec   : > { %14778 = vmatprep.subr.bf16.mxu0 %v18673_v55  ;;  %v10420_v21 = vshrl.u32 %v15304_v62, 16  ;;  %v10423_v4 = vshll.u32 %v15304_v62, 16  ;;  %v15314_v62 = vld [vmem:[#allocation11 + $0x228] sm:$0xff]  }
 0x5ee   : > { %14619 = vmatmul.mubr.bf16.gmra.mxu0 %v15276_v1  ;;  %v15306_v1 = vld [vmem:[#allocation11 + $0x1c8] sm:$0xff]   ;;  %v10422_v17 = vrot.slane %v10420_v21, 3  ;;  %v10425_v54 = vrot.slane %v10423_v4, 4  ;;  %v15319_v21 = vld [vmem:[#allocation11 + $0x220] sm:$0xff]  }
 0x5ef   : > { %14622 = vmatprep.mubr.bf16.mxu0 %v15277_v50  ;;  %v9941_v50 = vor.u32 %v9939_v58, %v9937_v37  ;;  %v10450_v58 = vshll.u32 %v15315_v40, 16 }
 0x5f1   : > { %14651 = vmatmul.mubr.bf16.vlgmr.msra.gmra.mxu1 %v9890_v3  ;;  %v10416_v3 = vrot.slane %v10414_v44, 4  ;;  %v9946_v52 = vsel %vm3013_vm2, %v9941_v50, %v9945_v53  ;;  %v10452_v50 = vrot.slane %v10450_v58, 4 }
 0x5f2   : > { %14654 = vmatprep.mubr.bf16.mxu1 %v9898_v7  ;;  %14731 = vmatpush3.bf16.msra.mxu1 %v18662_v23  ;;  %v9915_v23 = vshrl.u32 %v15269_v13, 16  ;;  %v9951_v13 = vshll.u32 %v15283_v56, 16  ;;  %v10409_v7 = vsel %vm2502_vm1, %v10400_v32, %v10408_v49  ;;  %v9973_v32 = vor.u32 %v9971_v12, %v9969_v28 }
 0x5f3   : > { %14732 = vmatprep.subr.bf16.mxu1 %v15286_v34 }
 0x5f4   : > { %v9917_v26 = vor.u32 %v9915_v23, %v9913_v20  ;;  %v9953_v35 = vrot.slane %v9951_v13, 1  ;;  %v10432_v20 = vshll.u32 %v15310_v41, 16  ;;  %v9955_v23 = vshrl.u32 %v15283_v56, 16  ;;  %v15320_v13 = vld [vmem:[#allocation2 + $0x50] sm:$0xff]  }
 0x5f5   : > { %v10465_v57 = vshrl.u32 %v15320_v13, 16 }
 0x5f6   : > { %14623 = vmatmul.mubr.bf16.gmra.mxu0 %v15281_v18  ;;  %14733 = vmatpush3.bf16.msra.mxu1 %v15286_v34  ;;  %v9922_v36 = vsel %vm3013_vm2, %v9917_v26, %v9921_v51  ;;  %v10413_v34 = vrot.slane %v10411_v31, 3  ;;  %v15285_v18 = vld [vmem:[#allocation4 + $0x64] sm:$0xff]   ;;  %v9949_v51 = vor.u32 %v9947_v43, %v9945_v53  ;;  %v9957_v61 = vor.u32 %v9955_v23, %v9953_v35 }
 0x5f7   : > { %14626 = vmatprep.mubr.bf16.mxu0 %v15282_v10  ;;  %14734 = vmatprep.subr.bf16.mxu1 %v15291_v8  ;;  %v15308_v10 = vld [vmem:[#allocation11 + $0x1c0] sm:$0xff]   ;;  %v9959_v15 = vshll.u32 %v15285_v18, 16  ;;  %v10434_v45 = vrot.slane %v10432_v20, 4  ;;  %v9963_v42 = vshrl.u32 %v15285_v18, 16  ;;  %v10461_v53 = vrot.slane %v10459_v46, 4 }
 0x5f8   : > { %v10417_v22 = vor.u32 %v10416_v3, %v10413_v34 }
 0x5f9   : > { %14655 = vmatmul.mubr.bf16.gmra.mxu1 %v9906_v6  ;;  %v10438_v6 = vshrl.u32 %v15311_v5, 16  ;;  %v9961_v48 = vrot.slane %v9959_v15, 1  ;;  %v15305_v15 = vld [vmem:[#allocation4 + $0x8c] ss:$0 sps:$4 sm:$0x11]  }
 0x5fa   : > { %14658 = vmatprep.mubr.bf16.mxu1 %v9914_v30  ;;  %14735 = vmatpush3.bf16.msra.mxu1 %v15291_v8  ;;  %v9938_v8 = vsel %vm3013_vm2, %v9933_v14, %v9937_v37  ;;  %v10441_v30 = vshll.u32 %v15311_v5, 16  ;;  %v10418_v25 = vsel %vm2502_vm1, %v10408_v49, %v10417_v22  ;;  %v10447_v37 = vshrl.u32 %v15315_v40, 16 }
 0x5fb   : > { %14736 = vmatprep.subr.bf16.mxu1 %v15293_v19  ;;  %v10440_v26 = vrot.slane %v10438_v6, 3  ;;  %v9962_v9 = vsel %vm3013_vm2, %v9957_v61, %v9961_v48  ;;  %v9965_v44 = vor.u32 %v9963_v42, %v9961_v48 }
 0x5fc   : > { %v10443_v47 = vrot.slane %v10441_v30, 4  ;;  %v10449_v14 = vrot.slane %v10447_v37, 3 }
 0x5fe   : > { %14627 = vmatmul.mubr.bf16.gmra.mxu0 %v15288_v24  ;;  %14737 = vmatpush3.bf16.msra.mxu1 %v15293_v19  ;;  %v10426_v19 = vor.u32 %v10425_v54, %v10422_v17  ;;  %v18692_v24 = vld [vmem:[#allocation4 + $0x74] sm:$0xff]   ;;  %v10444_v31 = vor.u32 %v10443_v47, %v10440_v26  ;;  %v15300_v17 = vld [vmem:[#allocation4 + $0x84] sm:$0xff]   ;;  %v9970_v54 = vsel %vm3013_vm2, %v9965_v44, %v9969_v28 }
 0x5ff   : > { %14630 = vmatprep.mubr.bf16.mxu0 %v15289_v27  ;;  %14738 = vmatprep.subr.bf16.mxu1 %v15299_v60  ;;  %v9954_v27 = vsel %vm3013_vm2, %v9949_v51, %v9953_v35  ;;  %v10468_v35 = vshll.u32 %v15320_v13, 16  ;;  %v9991_v30 = vshll.u32 %v15300_v17, 16  ;;  %v15326_v47 = vld [vmem:[#allocation2 + $0x68] sm:$0xff]   ;;  %v15334_v28 = vld [vmem:[#allocation11 + $0x208] sm:$0xff]  }
 0x600   : > { %v10427_v29 = vsel %vm2502_vm1, %v10417_v22, %v10426_v19  ;;  %v9979_v22 = vshrl.u32 %v18692_v24, 16 }
 0x601   : > { %14659 = vmatmul.mubr.bf16.gmra.mxu1 %v9922_v36  ;;  %v10435_v36 = vor.u32 %v10434_v45, %v10431_v0  ;;  %v10470_v0 = vrot.slane %v10468_v35, 4  ;;  %v15325_v45 = vld [vmem:[#allocation2 + $0x60] sm:$0xff]  }
 0x602   : > { %14662 = vmatprep.mubr.bf16.mxu1 %v9930_v63  ;;  %14739 = vmatpush3.bf16.msra.mxu1 %v15299_v60  ;;  %v10456_v63 = vshrl.u32 %v15316_v33, 16  ;;  %v9993_v33 = vrot.slane %v9991_v30, 1 }
 0x603   : > { %14740 = vmatprep.subr.bf16.mxu1 %v15301_v2  ;;  %v10445_v3 = vsel %vm2502_vm1, %v10435_v36, %v10444_v31 }
 0x604   : > { %v10458_v41 = vrot.slane %v10456_v63, 3 }
 0x606   : > { %14631 = vmatmul.mubr.bf16.gmra.mxu0 %v15295_v38  ;;  %14741 = vmatpush3.bf16.msra.mxu1 %v15301_v2  ;;  %v15298_v2 = vld [vmem:[#allocation4 + $0x7c] sm:$0xff]   ;;  %v10462_v20 = vor.u32 %v10461_v53, %v10458_v41  ;;  %v15331_v41 = vld [vmem:[#allocation2 + $0x78] sm:$0xff]  }
 0x607   : > { %14698 = vmatprep.mubr.bf16.mxu0 %v10409_v7  ;;  %14742 = vmatprep.subr.bf16.mxu1 %v15306_v1  ;;  %v9983_v4 = vshll.u32 %v15298_v2, 16  ;;  %v15321_v7 = vld [vmem:[#allocation2 + $0x58] sm:$0xff]   ;;  %v9987_v6 = vshrl.u32 %v15298_v2, 16  ;;  %v10486_v2 = vshll.u32 %v15325_v45, 16  ;;  %v10513_v35 = vshll.u32 %v15331_v41, 16 }
 0x608   : > { %v10474_v43 = vshrl.u32 %v15321_v7, 16 }
 0x609   : > { %14663 = vmatmul.mubr.bf16.gmra.mxu1 %v9938_v8  ;;  %v9985_v8 = vrot.slane %v9983_v4, 1 }
 0x60a   : > { %14666 = vmatprep.mubr.bf16.mxu1 %v9946_v52  ;;  %14743 = vmatpush3.bf16.msra.mxu1 %v15306_v1  ;;  %v18694_v60 = vpop.f32.mrf.mxu0  ;;  %v10436_v1 = vsel %vm2502_vm1, %v10426_v19, %v10435_v36  ;;  %v10453_v52 = vor.u32 %v10452_v50, %v10449_v14  ;;  %v10477_v19 = vshll.u32 %v15321_v7, 16  ;;  %v9995_v36 = vshrl.u32 %v15300_v17, 16  ;;  %v15330_v14 = vld [vmem:[#allocation2 + $0x70] sm:$0xff]  }
 0x60b   : > { %14744 = vmatprep.subr.bf16.mxu1 %v15308_v10  ;;  %v15307_v7 = vld [vmem:[#allocation3 + $0x14] sm:$0xff]  }
 0x60c   : > { %v18699_v11 = vpop.f32.mrf.mxu0  ;;  %v10454_v61 = vsel %vm2502_vm1, %v10444_v31, %v10453_v52  ;;  %v10479_v26 = vrot.slane %v10477_v19, 4  ;;  %v10495_v31 = vshll.u32 %v15326_v47, 16  ;;  %v9997_v63 = vor.u32 %v9995_v36, %v9993_v33 }
 0x60e   : > { %14699 = vmatmul.mubr.bf16.vlgmr.msra.gmra.mxu0 %v10418_v25  ;;  %14745 = vmatpush3.bf16.msra.mxu1 %v15308_v10  ;;  %v18703_v56 = vpop.f32.mrf.mxu0  ;;  %v15324_v10 = vld [vmem:[#allocation11 + $0x218] sm:$0xff]   ;;  %v10467_v25 = vrot.slane %v10465_v57, 3  ;;  %v10510_v57 = vshrl.u32 %v15331_v41, 16 }
 0x60f   : > { %14779 = vmatpush3.bf16.msra.mxu0 %v18673_v55  ;;  %14702 = vmatprep.mubr.bf16.mxu0 %v10427_v29  ;;  %v9975_v55 = vshll.u32 %v18692_v24, 16  ;;  %v10463_v24 = vsel %vm2502_vm1, %v10453_v52, %v10462_v20  ;;  %v10476_v29 = vrot.slane %v10474_v43, 3 }
 0x610   : > { %14780 = vmatprep.subr.bf16.mxu0 %v15309_v16  ;;  %v18705_v49 = vpop.f32.mrf.mxu0 }
 0x611   : > { %14667 = vmatmul.mubr.bf16.gmra.mxu1 %v9954_v27  ;;  %v9977_v38 = vrot.slane %v9975_v55, 1  ;;  %v9999_v27 = vshll.u32 %v15305_v15, 16  ;;  %v10480_v58 = vor.u32 %v10479_v26, %v10476_v29  ;;  %v10492_v55 = vshrl.u32 %v15326_v47, 16 }
 0x612   : > { %14670 = vmatprep.mubr.bf16.mxu1 %v9962_v9  ;;  %v10483_v9 = vshrl.u32 %v15325_v45, 16  ;;  %v10512_v15 = vrot.slane %v10510_v57, 3 }
 0x613   : > { %14781 = vmatpush3.bf16.msra.mxu0 %v15309_v16  ;;  %v18708_v34 = vpop.f32.mrf.mxu0  ;;  %v9978_v5 = vsel %vm3013_vm2, %v9973_v32, %v9977_v38  ;;  %v9981_v23 = vor.u32 %v9979_v22, %v9977_v38  ;;  %v9989_v16 = vor.u32 %v9987_v6, %v9985_v8  ;;  %v10001_v46 = vrot.slane %v9999_v27, 1  ;;  %v15339_v32 = vld [vmem:[#allocation11 + $0x200] sm:$0xff]   ;;  %v15335_v6 = vld [vmem:[#allocation2 + $0x80] sm:$0xff]  }
 0x614   : > { %14782 = vmatprep.subr.bf16.mxu0 %v15314_v62  ;;  %v10485_v4 = vrot.slane %v10483_v9, 3  ;;  %v10494_v38 = vrot.slane %v10492_v55, 3  ;;  %v10519_v29 = vshrl.u32 %v15335_v6, 16  ;;  %v10522_v26 = vshll.u32 %v15335_v6, 16 }
 0x615   : > { %v18713_v18 = vpop.f32.mrf.mxu0  ;;  %v9986_v48 = vsel %vm3013_vm2, %v9981_v23, %v9985_v8  ;;  %v9994_v12 = vsel %vm3013_vm2, %v9989_v16, %v9993_v33  ;;  %v10002_v53 = vsel %vm3013_vm2, %v9997_v63, %v10001_v46  ;;  %v15336_v16 = vld [vmem:[#allocation2 + $0x88] sm:$0xff]  }
 0x616   : > { %14703 = vmatmul.mubr.bf16.gmra.mxu0 %v10436_v1  ;;  %v10488_v1 = vrot.slane %v10486_v2, 4  ;;  %v10528_v27 = vshrl.u32 %v15336_v16, 16  ;;  %v10524_v55 = vrot.slane %v10522_v26, 4 }
 0x617   : > { %14706 = vmatprep.mubr.bf16.mxu0 %v10445_v3  ;;  %14783 = vmatpush3.bf16.msra.mxu0 %v15314_v62  ;;  %v18716_v59 = vpop.f32.mrf.mxu0  ;;  %v10471_v62 = vor.u32 %v10470_v0, %v10467_v25  ;;  %v10497_v3 = vrot.slane %v10495_v31, 4  ;;  %v15313_v25 = vld [vmem:[#allocation3 + $0x24] sm:$0xff]   ;;  %v15340_v31 = vld [vmem:[#allocation2 + $0x90] ss:$0 sps:$4 sm:$0xff]  }
 0x618   : > { %14784 = vmatprep.subr.bf16.mxu0 %v15319_v21  ;;  %v10537_v41 = vshrl.u32 %v15340_v31, 16 }
 0x619   : > { %14671 = vmatmul.mubr.bf16.gmra.mxu1 %v9970_v54  ;;  %v18718_v51 = vpop.f32.mrf.mxu0  ;;  %v10481_v13 = vsel %vm2502_vm1, %v10471_v62, %v10480_v58  ;;  %v10489_v54 = vor.u32 %v10488_v1, %v10485_v4  ;;  %v10498_v52 = vor.u32 %v10497_v3, %v10494_v38  ;;  %v15317_v1 = vld [vmem:[#allocation3 + $0x2c] sm:$0xff]  }
 0x61a   : > { %14674 = vmatprep.mubr.bf16.mxu1 %v9978_v5  ;;  %v10501_v5 = vshrl.u32 %v15330_v14, 16 }
 0x61b   : > { %14785 = vmatpush3.bf16.msra.mxu0 %v15319_v21  ;;  %v10472_v21 = vsel %vm2502_vm1, %v10462_v20, %v10471_v62  ;;  %v10490_v20 = vsel %vm2502_vm1, %v10480_v58, %v10489_v54  ;;  %v10499_v23 = vsel %vm2502_vm1, %v10489_v54, %v10498_v52  ;;  %v10521_v58 = vrot.slane %v10519_v29, 3 }
 0x61c   : > { %14786 = vmatprep.subr.bf16.mxu0 %v15324_v10  ;;  %v10503_v43 = vrot.slane %v10501_v5, 3 }
 0x61d   : > { %v18721_v40 = vpop.f32.mrf.mxu0 }
 0x61e   : > { %14707 = vmatmul.mubr.bf16.gmra.mxu0 %v10454_v61  ;;  %v15312_v61 = vld [vmem:[#allocation3 + $0x1c] sm:$0xff]  }
 0x61f   : > { %14710 = vmatprep.mubr.bf16.mxu0 %v10463_v24  ;;  %14787 = vmatpush3.bf16.msra.mxu0 %v15324_v10  ;;  %v18725_v42 = vpop.f32.mrf.mxu0  ;;  %v10504_v10 = vshll.u32 %v15330_v14, 16 }
 0x620   : > { %14788 = vmatprep.subr.bf16.mxu0 %v15329_v39 }
 0x621   : > { %14675 = vmatmul.mubr.bf16.gmra.mxu1 %v9986_v48  ;;  %v18728_v37 = vpop.f32.mrf.mxu0  ;;  %v10506_v19 = vrot.slane %v10504_v10, 4 }
 0x622   : > { %14678 = vmatprep.mubr.bf16.mxu1 %v9994_v12 }
 0x623   : > { %14789 = vmatpush3.bf16.msra.mxu0 %v15329_v39  ;;  %v18730_v44 = vpop.f32.mrf.mxu0  ;;  %v10515_v39 = vrot.slane %v10513_v35, 4  ;;  %v10507_v24 = vor.u32 %v10506_v19, %v10503_v43  ;;  %v15342_v35 = vld [vmem:[#allocation4 + $0x1c] sm:$0xff]   ;;  %v10539_v19 = vrot.slane %v10537_v41, 3 }
 0x624   : > { %14790 = vmatprep.subr.bf16.mxu0 %v15334_v28  ;;  %v11329_v26 = vshll.u32 %v15342_v35, 16  ;;  %v15328_v41 = vld [vmem:[#allocation3 + $0x54] sm:$0xff]  }
 0x625   : > { %v10516_v48 = vor.u32 %v10515_v39, %v10512_v15  ;;  %v10508_v36 = vsel %vm2502_vm1, %v10498_v52, %v10507_v24 }
 0x626   : > { %v18733_v50 = vpop.f32.mrf.mxu0  ;;  %14711 = vmatmul.mubr.bf16.gmra.mxu0 %v10472_v21 }
 0x627   : > { %14714 = vmatprep.mubr.bf16.mxu0 %v10481_v13  ;;  %14791 = vmatpush3.bf16.msra.mxu0 %v15334_v28  ;;  %v10531_v28 = vshll.u32 %v15336_v16, 16  ;;  %v10517_v46 = vsel %vm2502_vm1, %v10507_v24, %v10516_v48  ;;  %v15318_v13 = vld [vmem:[#allocation3 + $0x34] sm:$0xff]   ;;  %v15345_v16 = vld [vmem:[#allocation4 + $0x24] sm:$0xff]  }
 0x628   : > { %v18737_v17 = vpop.f32.mrf.mxu0  ;;  %14792 = vmatprep.subr.bf16.mxu0 %v15339_v32 }
 0x629   : > { %14679 = vmatmul.mubr.bf16.gmra.mxu1 %v10002_v53  ;;  %v10533_v21 = vrot.slane %v10531_v28, 4  ;;  %v10540_v53 = vshll.u32 %v15340_v31, 16  ;;  %v15346_v31 = vld [vmem:[#allocation4 + $0x2c] sm:$0xff]  }
 0x62a   : > { %14746 = vmatprep.mubr.bf16.mxu1 %v15307_v7  ;;  %v18739_v8 = vpop.f32.mrf.mxu0 }
 0x62b   : > { %14793 = vmatpush3.bf16.msra.mxu0 %v15339_v32  ;;  %v10530_v32 = vrot.slane %v10528_v27, 3  ;;  %v10542_v6 = vrot.slane %v10540_v53, 4 }
 0x62c   : > { %v18741_v22 = vpop.f32.mrf.mxu0 }
 0x62d   : > { %v10534_v5 = vor.u32 %v10533_v21, %v10530_v32 }
 0x62e   : > { %v18744_v30 = vpop.f32.mrf.mxu0  ;;  %14715 = vmatmul.mubr.bf16.gmra.mxu0 %v10490_v20 }
 0x62f   : > { %14718 = vmatprep.mubr.bf16.mxu0 %v10499_v23 }
 0x630   : > { %v18747_v0 = vpop.f32.mrf.mxu0 }
 0x631   : > { %v14460_v45 = vpop.f32.mrf.mxu1  ;;  %14747 = vmatmul.mubr.bf16.vlgmr.msra.gmra.mxu1 %v15312_v61  ;;  %v15322_v61 = vld [vmem:[#allocation3 + $0x3c] sm:$0xff]  }
 0x632   : > { %v18750_v47 = vadd.f32 %v14460_v45, %v18694_v60  ;;  %14750 = vmatprep.mubr.bf16.mxu1 %v15313_v25  ;;  %v18752_v33 = vpop.f32.mrf.mxu0  ;;  %v15323_v45 = vld [vmem:[#allocation3 + $0x44] sm:$0xff]  }
 0x633   : > { %v8161_v12 = vpop.f32.mrf.mxu1 }
 0x634   : > { %v18755_v62 = vadd.f32 %v8161_v12, %v18699_v11  ;;  %v18757_v9 = vpop.f32.mrf.mxu0  ;;  %v15341_v11 = vld [vmem:[#allocation4 + $0x14] sm:$0xff]  }
 0x635   : > { %v14461_v2 = vpop.f32.mrf.mxu1  ;;  %v11324_v10 = vshll.u32 %v15341_v11, 16  ;;  %v11322_v29 = vshrl.u32 %v15341_v11, 16 }
 0x636   : > { %v18761_v60 = vadd.f32 %v14461_v2, %v18703_v56  ;;  %v18763_v63 = vpop.f32.mrf.mxu0  ;;  %14719 = vmatmul.mubr.bf16.gmra.mxu0 %v10508_v36  ;;  %v10525_v56 = vor.u32 %v10524_v55, %v10521_v58  ;;  %v11337_v2 = vshll.u32 %v15345_v16, 16  ;;  %v11331_v55 = vrot.slane %v11329_v26, 1 }
 0x637   : > { %v8164_v4 = vpop.f32.mrf.mxu1  ;;  %14722 = vmatprep.mubr.bf16.mxu0 %v10517_v46  ;;  %v11326_v39 = vrot.slane %v11324_v10, 1 }
 0x638   : > { %v18767_v14 = vadd.f32 %v8164_v4, %v18705_v49  ;;  %v18769_v38 = vpop.f32.mrf.mxu0  ;;  %v10526_v43 = vsel %vm2502_vm1, %v10516_v48, %v10525_v56  ;;  %v10535_v15 = vsel %vm2502_vm1, %v10525_v56, %v10534_v5  ;;  %v10543_v48 = vor.u32 %v10542_v6, %v10539_v19 }
 0x639   : > { %v14464_v3 = vpop.f32.mrf.mxu1  ;;  %14751 = vmatmul.mubr.bf16.gmra.mxu1 %v15317_v1  ;;  %v11327_v12 = vor.u32 %v11326_v39, %v11322_v29  ;;  %v11339_v4 = vrot.slane %v11337_v2, 1  ;;  %v15348_v1 = vld [vmem:[#allocation4 + $0x34] sm:$0xff]   ;;  %v11349_v2 = vshrl.u32 %v15346_v31, 16 }
 0x63a   : > { %v18772_v7 = vadd.f32 %v14464_v3, %v18708_v34  ;;  %14754 = vmatprep.mubr.bf16.mxu1 %v15318_v13  ;;  %v18774_v54 = vpop.f32.mrf.mxu0  ;;  %v10544_v32 = vsel %vm2502_vm1, %v10534_v5, %v10543_v48  ;;  %v11333_v3 = vshrl.u32 %v15342_v35, 16  ;;  %v11341_v5 = vshrl.u32 %v15345_v16, 16  ;;  %v15349_v16 = vld [vmem:[#allocation4 + $0x3c] sm:$0xff]  }
 0x63b   : > { %v8177_v52 = vpop.f32.mrf.mxu1  ;;  %v11332_v11 = vsel %vm3013_vm2, %v11327_v12, %v11331_v55  ;;  %v11353_v35 = vshll.u32 %v15348_v1, 16  ;;  %v15332_v12 = vld [vmem:[#allocation3 + $0x5c] sm:$0xff]  }
 0x63c   : > { %v18777_v49 = vadd.f32 %v8177_v52, %v18713_v18  ;;  %v18779_v57 = vpop.f32.mrf.mxu0  ;;  %v11335_v52 = vor.u32 %v11333_v3, %v11331_v55  ;;  %v11343_v19 = vor.u32 %v11341_v5, %v11339_v4  ;;  %v15333_v55 = vld [vmem:[#allocation3 + $0x64] sm:$0xff]  }
 0x63d   : > { %v14465_v20 = vpop.f32.mrf.mxu1  ;;  %v11355_v26 = vrot.slane %v11353_v35, 1 }
 0x63e   : > { %v18783_v34 = vadd.f32 %v14465_v20, %v18716_v59  ;;  %v18785_v23 = vpop.f32.mrf.mxu0  ;;  %14723 = vmatmul.mubr.bf16.gmra.mxu0 %v10526_v43 }
 0x63f   : > { %v8180_v18 = vpop.f32.mrf.mxu1  ;;  %14726 = vmatprep.mubr.bf16.mxu0 %v10535_v15 }
 0x640   : > { %v18789_v25 = vadd.f32 %v8180_v18, %v18718_v51  ;;  %v18791_v24 = vpop.f32.mrf.mxu0 }
 0x641   : > { %v14468_v59 = vpop.f32.mrf.mxu1  ;;  %14755 = vmatmul.mubr.bf16.gmra.mxu1 %v15322_v61  ;;  %v11340_v61 = vsel %vm3013_vm2, %v11335_v52, %v11339_v4 }
 0x642   : > { %v18794_v27 = vadd.f32 %v14468_v59, %v18721_v40  ;;  %14758 = vmatprep.mubr.bf16.mxu1 %v15323_v45  ;;  %v18796_v28 = vpop.f32.mrf.mxu0  ;;  %v15350_v59 = vld [vmem:[#allocation4 + $0x44] sm:$0xff]  }
 0x643   : > { %v8193_v36 = vpop.f32.mrf.mxu1 }
 0x644   : > { %v18799_v51 = vadd.f32 %v8193_v36, %v18725_v42  ;;  %v18801_v58 = vpop.f32.mrf.mxu0  ;;  %v15327_v42 = vld [vmem:[#allocation3 + $0x4c] sm:$0xff]  }
 0x645   : > { %v14469_v46 = vpop.f32.mrf.mxu1 }
 0x646   : > { %v18805_v21 = vadd.f32 %v14469_v46, %v18728_v37  ;;  %v18807_v40 = vpop.f32.mrf.mxu0  ;;  %14727 = vmatmul.mubr.bf16.gmra.mxu0 %v10544_v32  ;;  %v11345_v37 = vshll.u32 %v15346_v31, 16  ;;  %v11361_v32 = vshll.u32 %v15349_v16, 16  ;;  %v11369_v31 = vshll.u32 %v15350_v59, 16 }
 0x647   : > { %v8196_v13 = vpop.f32.mrf.mxu1  ;;  %14794 = vmatprep.mubr.bf16.mxu0 %v11332_v11 }
 0x648   : > { %v18811_v56 = vadd.f32 %v8196_v13, %v18730_v44  ;;  %v18813_v53 = vpop.f32.mrf.mxu0  ;;  %v11347_v39 = vrot.slane %v11345_v37, 1  ;;  %v11363_v37 = vrot.slane %v11361_v32, 1 }
 0x649   : > { %v14472_v10 = vpop.f32.mrf.mxu1  ;;  %14759 = vmatmul.mubr.bf16.gmra.mxu1 %v15327_v42 }
 0x64a   : > { %v18816_v20 = vadd.f32 %v14472_v10, %v18733_v50  ;;  %14762 = vmatprep.mubr.bf16.mxu1 %v15328_v41  ;;  %v18818_v43 = vpop.f32.mrf.mxu0  ;;  %v11348_v29 = vsel %vm3013_vm2, %v11343_v19, %v11347_v39  ;;  %v11351_v13 = vor.u32 %v11349_v2, %v11347_v39  ;;  %v15351_v10 = vld [vmem:[#allocation4 + $0x4c] sm:$0xff]   ;;  %v15352_v39 = vld [vmem:[#allocation4 + $0x54] sm:$0xff]  }
 0x64b   : > { %v8209_v6 = vpop.f32.mrf.mxu1 }
 0x64c   : > { %v18821_v44 = vadd.f32 %v8209_v6, %v18737_v17  ;;  %v18823_v15 = vpop.f32.mrf.mxu0  ;;  %v11371_v6 = vrot.slane %v11369_v31, 1 }
 0x64d   : > { %v14473_v18 = vpop.f32.mrf.mxu1 }
 0x64e   : > { %v18827_v45 = vadd.f32 %v14473_v18, %v18739_v8  ;;  %v14508_v50 = vpop.f32.mrf.mxu0  ;;  %14795 = vmatmul.mubr.bf16.vlgmr.msra.gmra.mxu0 %v11340_v61  ;;  %v11357_v8 = vshrl.u32 %v15348_v1, 16  ;;  %v15337_v18 = vld [vmem:[#allocation3 + $0x6c] sm:$0xff]  }
 0x64f   : > { %v8212_v48 = vpop.f32.mrf.mxu1  ;;  %v18831_v17 = vadd.f32 %v14508_v50, %v18750_v47  ;;  %14798 = vmatprep.mubr.bf16.mxu0 %v11348_v29  ;;  %v11365_v50 = vshrl.u32 %v15349_v16, 16  ;;  %v15338_v29 = vld [vmem:[#allocation3 + $0x74] sm:$0xff]   ;;  %v11385_v16 = vshll.u32 %v15352_v39, 16 }
 0x650   : > { %v18834_v36 = vadd.f32 %v8212_v48, %v18741_v22  ;;  %v8651_v46 = vpop.f32.mrf.mxu0  ;;  %v11359_v3 = vor.u32 %v11357_v8, %v11355_v26  ;;  %v11377_v48 = vshll.u32 %v15351_v10, 16 }
 0x651   : > { %v14476_v11 = vpop.f32.mrf.mxu1  ;;  %14763 = vmatmul.mubr.bf16.gmra.mxu1 %v15332_v12  ;;  %v18837_v4 = vadd.f32 %v8651_v46, %v18755_v62 }
 0x652   : > { %v18840_v42 = vadd.f32 %v14476_v11, %v18744_v30  ;;  %14766 = vmatprep.mubr.bf16.mxu1 %v15333_v55  ;;  %v14509_v47 = vpop.f32.mrf.mxu0  ;;  %v11356_v30 = vsel %vm3013_vm2, %v11351_v13, %v11355_v26  ;;  %v11367_v55 = vor.u32 %v11365_v50, %v11363_v37  ;;  %v11379_v13 = vrot.slane %v11377_v48, 1 }
 0x653   : > { %v8225_v41 = vpop.f32.mrf.mxu1  ;;  %v18843_v22 = vadd.f32 %v14509_v47, %v18761_v60  ;;  %v11364_v60 = vsel %vm3013_vm2, %v11359_v3, %v11363_v37  ;;  %v15353_v47 = vld [vmem:[#allocation4 + $0x5c] sm:$0xff]   ;;  %v15354_v37 = vld [vmem:[#allocation4 + $0x64] sm:$0xff]  }
 0x654   : > { %v18846_v1 = vadd.f32 %v8225_v41, %v18747_v0  ;;  %v8654_v5 = vpop.f32.mrf.mxu0 }
 0x655   : > { %v14477_v62 = vpop.f32.mrf.mxu1  ;;  %v18849_v52 = vadd.f32 %v8654_v5, %v18767_v14  ;;  %v11387_v5 = vrot.slane %v11385_v16, 1 }
 0x656   : > { %v18853_v19 = vadd.f32 %v14477_v62, %v18752_v33  ;;  %v14512_v35 = vpop.f32.mrf.mxu0  ;;  %14799 = vmatmul.mubr.bf16.gmra.mxu0 %v11356_v30  ;;  %v11373_v33 = vshrl.u32 %v15350_v59, 16  ;;  %v15343_v62 = vld [vmem:[#allocation3 + $0x7c] sm:$0xff]  }
 0x657   : > { %v8228_v0 = vpop.f32.mrf.mxu1  ;;  %v18857_v61 = vadd.f32 %v14512_v35, %v18772_v7  ;;  %14802 = vmatprep.mubr.bf16.mxu0 %v11364_v60  ;;  %v11381_v35 = vshrl.u32 %v15351_v10, 16  ;;  %v15344_v60 = vld [vmem:[#allocation3 + $0x84] sm:$0xff]   ;;  %v11401_v10 = vshll.u32 %v15354_v37, 16 }
 0x658   : > { %v18860_v14 = vadd.f32 %v8228_v0, %v18757_v9  ;;  %v8667_v26 = vpop.f32.mrf.mxu0  ;;  %v11375_v8 = vor.u32 %v11373_v33, %v11371_v6  ;;  %v11393_v0 = vshll.u32 %v15353_v47, 16 }
 0x659   : > { %v14480_v12 = vpop.f32.mrf.mxu1  ;;  %14767 = vmatmul.mubr.bf16.gmra.mxu1 %v15337_v18  ;;  %v18863_v2 = vadd.f32 %v8667_v26, %v18777_v49 }
 0x65a   : > { %v18866_v46 = vadd.f32 %v14480_v12, %v18763_v63  ;;  %14770 = vmatprep.mubr.bf16.mxu1 %v15338_v29  ;;  %v14513_v7 = vpop.f32.mrf.mxu0  ;;  %v11372_v63 = vsel %vm3013_vm2, %v11367_v55, %v11371_v6  ;;  %v11383_v29 = vor.u32 %v11381_v35, %v11379_v13  ;;  %v11395_v55 = vrot.slane %v11393_v0, 1 }
 0x65b   : > { %v8241_v32 = vpop.f32.mrf.mxu1  ;;  %v18869_v9 = vadd.f32 %v14513_v7, %v18783_v34  ;;  %v11380_v34 = vsel %vm3013_vm2, %v11375_v8, %v11379_v13  ;;  %v15355_v7 = vld [vmem:[#allocation4 + $0x6c] sm:$0xff]   ;;  %v15347_v8 = vld [vmem:[#allocation3 + $0x8c] sm:$0xff]   ;;  %v11403_v13 = vrot.slane %v11401_v10, 1 }
 0x65c   : > { %v18872_v59 = vadd.f32 %v8241_v32, %v18769_v38  ;;  %v8670_v11 = vpop.f32.mrf.mxu0 }
 0x65d   : > { %v14481_v49 = vpop.f32.mrf.mxu1  ;;  %v18875_v3 = vadd.f32 %v8670_v11, %v18789_v25 }
 0x65e   : > { %v18879_v31 = vadd.f32 %v14481_v49, %v18774_v54  ;;  %v14516_v41 = vpop.f32.mrf.mxu0  ;;  %14803 = vmatmul.mubr.bf16.gmra.mxu0 %v11372_v63  ;;  %v11389_v54 = vshrl.u32 %v15352_v39, 16 }
 0x65f   : > { %v8244_v38 = vpop.f32.mrf.mxu1  ;;  %v18883_v30 = vadd.f32 %v14516_v41, %v18794_v27  ;;  %14806 = vmatprep.mubr.bf16.mxu0 %v11380_v34  ;;  %v11397_v41 = vshrl.u32 %v15353_v47, 16 }
 0x660   : > { %v18886_v25 = vadd.f32 %v8244_v38, %v18779_v57  ;;  %v8683_v6 = vpop.f32.mrf.mxu0  ;;  %v11391_v33 = vor.u32 %v11389_v54, %v11387_v5  ;;  %v11409_v38 = vshll.u32 %v15355_v7, 16 }
 0x661   : > { %v14484_v18 = vpop.f32.mrf.mxu1  ;;  %14771 = vmatmul.mubr.bf16.gmra.mxu1 %v15343_v62  ;;  %v18889_v50 = vadd.f32 %v8683_v6, %v18799_v51  ;;  %v11399_v35 = vor.u32 %v11397_v41, %v11395_v55 }
 0x662   : > { %v18892_v26 = vadd.f32 %v14484_v18, %v18785_v23  ;;  %14774 = vmatprep.mubr.bf16.mxu1 %v15344_v60  ;;  %v14517_v27 = vpop.f32.mrf.mxu0  ;;  %v11388_v23 = vsel %vm3013_vm2, %v11383_v29, %v11387_v5  ;;  %v11405_v5 = vshrl.u32 %v15354_v37, 16  ;;  %v11411_v18 = vrot.slane %v11409_v38, 1  ;;  %v15357_v29 = vld [vmem:[#allocation4 + $0x7c] sm:$0xff]  }
 0x663   : > { %v8257_v48 = vpop.f32.mrf.mxu1  ;;  %v18895_v57 = vadd.f32 %v14517_v27, %v18805_v21  ;;  %v11396_v21 = vsel %vm3013_vm2, %v11391_v33, %v11395_v55 }
 0x664   : > { %v18898_v39 = vadd.f32 %v8257_v48, %v18791_v24  ;;  %v8686_v12 = vpop.f32.mrf.mxu0  ;;  %v15356_v24 = vld [vmem:[#allocation4 + $0x74] sm:$0xff]  }
 0x665   : > { %v14485_v51 = vpop.f32.mrf.mxu1  ;;  %v18901_v16 = vadd.f32 %v8686_v12, %v18811_v56  ;;  %v11417_v54 = vshll.u32 %v15356_v24, 16  ;;  %v15358_v12 = vld [vmem:[#allocation4 + $0x84] sm:$0xff]  }
 0x666   : > { %v18905_v32 = vadd.f32 %v14485_v51, %v18796_v28  ;;  %v14520_v11 = vpop.f32.mrf.mxu0  ;;  %14807 = vmatmul.mubr.bf16.gmra.mxu0 %v11388_v23  ;;  %v11413_v51 = vshrl.u32 %v15355_v7, 16  ;;  %v11421_v23 = vshrl.u32 %v15356_v24, 16 }
 0x667   : > { %v8260_v49 = vpop.f32.mrf.mxu1  ;;  %v18909_v63 = vadd.f32 %v14520_v11, %v18816_v20  ;;  %14810 = vmatprep.mubr.bf16.mxu0 %v11396_v21  ;;  %v11407_v20 = vor.u32 %v11405_v5, %v11403_v13  ;;  %v11419_v48 = vrot.slane %v11417_v54, 1  ;;  %v11425_v11 = vshll.u32 %v15357_v29, 16  ;;  %v15359_v5 = vld [vmem:[#allocation4 + $0x8c] sm:$0xff]  }
 0x668   : > { %v18912_v56 = vadd.f32 %v8260_v49, %v18801_v58  ;;  %v8699_v34 = vpop.f32.mrf.mxu0 }
 0x669   : > { %v14488_v28 = vpop.f32.mrf.mxu1  ;;  %14775 = vmatmul.mubr.bf16.gmra.mxu1 %v15347_v8  ;;  %v18915_v62 = vadd.f32 %v8699_v34, %v18821_v44  ;;  %v11423_v34 = vor.u32 %v11421_v23, %v11419_v48 }
 0x66a   : > { %v18918_v60 = vadd.f32 %v14488_v28, %v18807_v40  ;;  %v14521_v6 = vpop.f32.mrf.mxu0  ;;  %v11404_v40 = vsel %vm3013_vm2, %v11399_v35, %v11403_v13  ;;  %v11415_v13 = vor.u32 %v11413_v51, %v11411_v18  ;;  %v11427_v28 = vrot.slane %v11425_v11, 1 }
 0x66b   : > { %v8273_v0 = vpop.f32.mrf.mxu1  ;;  %v18921_v47 = vadd.f32 %v14521_v6, %v18827_v45  ;;  %v11412_v45 = vsel %vm3013_vm2, %v11407_v20, %v11411_v18  ;;  %v11429_v18 = vshrl.u32 %v15357_v29, 16  ;;  %v11445_v11 = vshrl.u32 %v15359_v5, 16 }
 0x66c   : > { %v18924_v58 = vadd.f32 %v8273_v0, %v18813_v53  ;;  %v8702_v37 = vpop.f32.mrf.mxu0  ;;  %v11428_v54 = vsel %vm3013_vm2, %v11423_v34, %v11427_v28  ;;  %v11441_v0 = vshll.u32 %v15359_v5, 16 }
 0x66d   : > { %v14489_v27 = vpop.f32.mrf.mxu1  ;;  %v18927_v44 = vadd.f32 %v8702_v37, %v18834_v36 }
 0x66e   : > { %v18931_v33 = vadd.f32 %v14489_v27, %v18818_v43  ;;  %v14524_v10 = vpop.f32.mrf.mxu0  ;;  %14811 = vmatmul.mubr.bf16.gmra.mxu0 %v11404_v40  ;;  %v15360_v27 = vld [vmem:[#allocation4 + $0x94] ss:$0 sps:$4 sm:$0x11]  }
 0x66f   : > { %v8276_v53 = vpop.f32.mrf.mxu1  ;;  %v18935_v55 = vadd.f32 %v14524_v10, %v18840_v42  ;;  %14814 = vmatprep.mubr.bf16.mxu0 %v11412_v45  ;;  %v11433_v42 = vshll.u32 %v15358_v12, 16  ;;  %v11437_v10 = vshrl.u32 %v15358_v12, 16 }
 0x670   : > { %v18938_v36 = vadd.f32 %v8276_v53, %v18823_v15  ;;  %v8715_v8 = vpop.f32.mrf.mxu0 }
 0x671   : > { %v14556_v43 = vpop.f32.mrf.mxu1  ;;  %v18941_v21 = vadd.f32 %v8715_v8, %v18846_v1 }
 0x672   : > { %v18944_v49 = vadd.f32 %v14556_v43, %v18831_v17  ;;  %v14525_v41 = vpop.f32.mrf.mxu0  ;;  %v11420_v17 = vsel %vm3013_vm2, %v11415_v13, %v11419_v48  ;;  %v11431_v48 = vor.u32 %v11429_v18, %v11427_v28 }
 0x673   : > { %v9193_v38 = vpop.f32.mrf.mxu1  ;;  %v18947_v7 = vadd.f32 %v14525_v41, %v18853_v19  ;;  %v11435_v19 = vrot.slane %v11433_v42, 1 }
 0x674   : > { %v18950_v15 = vadd.f32 %v9193_v38, %v18837_v4  ;;  %v8718_v24 = vpop.f32.mrf.mxu0 }
 0x675   : > { %v14557_v35 = vpop.f32.mrf.mxu1  ;;  %v18953_v1 = vadd.f32 %v8718_v24, %v18860_v14  ;;  %v11439_v8 = vor.u32 %v11437_v10, %v11435_v19 }
 0x676   : > { %v18957_v6 = vadd.f32 %v14557_v35, %v18843_v22  ;;  %v14528_v20 = vpop.f32.mrf.mxu0  ;;  %14815 = vmatmul.mubr.bf16.gmra.mxu0 %v11420_v17 }
 0x677   : > { %v9196_v37 = vpop.f32.mrf.mxu1  ;;  %v18961_v4 = vadd.f32 %v14528_v20, %v18866_v46  ;;  %14818 = vmatprep.mubr.bf16.mxu0 %v11428_v54  ;;  %v11443_v46 = vrot.slane %v11441_v0, 1 }
 0x678   : > { %v18964_v14 = vadd.f32 %v9196_v37, %v18849_v52  ;;  %v8731_v40 = vpop.f32.mrf.mxu0  ;;  %v11449_v52 = vshll.u32 %v15360_v27, 16 }
 0x679   : > { %v14560_v22 = vpop.f32.mrf.mxu1  ;;  %v18967_v45 = vadd.f32 %v8731_v40, %v18872_v59 }
 0x67a   : > { %v18970_v53 = vadd.f32 %v14560_v22, %v18857_v61  ;;  %v14529_v51 = vpop.f32.mrf.mxu0  ;;  %v11436_v61 = vsel %vm3013_vm2, %v11431_v48, %v11435_v19  ;;  %v11451_v38 = vrot.slane %v11449_v52, 1 }
 0x67b   : > { %v9209_v23 = vpop.f32.mrf.mxu1  ;;  %v18973_v29 = vadd.f32 %v14529_v51, %v18879_v31  ;;  %v11444_v31 = vsel %vm3013_vm2, %v11439_v8, %v11443_v46 }
 0x67c   : > { %v18976_v43 = vadd.f32 %v9209_v23, %v18863_v2  ;;  %v8734_v12 = vpop.f32.mrf.mxu0  ;;  %v11447_v2 = vor.u32 %v11445_v11, %v11443_v46 }
 0x67d   : > { %v14561_v13 = vpop.f32.mrf.mxu1  ;;  %v18979_v59 = vadd.f32 %v8734_v12, %v18886_v25 }
 0x67e   : > { %v18983_v41 = vadd.f32 %v14561_v13, %v18869_v9  ;;  %v14532_v34 = vpop.f32.mrf.mxu0  ;;  %14819 = vmatmul.mubr.bf16.gmra.mxu0 %v11436_v61 }
 0x67f   : > { %v9212_v42 = vpop.f32.mrf.mxu1  ;;  %v18987_v5 = vadd.f32 %v14532_v34, %v18892_v26  ;;  %14822 = vmatprep.mubr.bf16.mxu0 %v11444_v31  ;;  %v11452_v26 = vsel %vm3013_vm2, %v11447_v2, %v11451_v38 }
 0x680   : > { %v9325_v24 = vadd.f32 %v9212_v42, %v18875_v3  ;;  %v8747_v25 = vpop.f32.mrf.mxu0 }
 0x681   : > { %v14564_v28 = vpop.f32.mrf.mxu1  ;;  %v18991_v35 = vadd.f32 %v8747_v25, %v18898_v39 }
 0x682   : > { %v9330_v9 = vadd.f32 %v14564_v28, %v18883_v30  ;;  %v14533_v17 = vpop.f32.mrf.mxu0 }
 0x683   : > { %v9225_v20 = vpop.f32.mrf.mxu1  ;;  %v18995_v54 = vadd.f32 %v14533_v17, %v18905_v32 }
 0x684   : > { %v9328_v19 = vadd.f32 %v9225_v20, %v18889_v50  ;;  %v8750_v0 = vpop.f32.mrf.mxu0 }
 0x685   : > { %v14565_v37 = vpop.f32.mrf.mxu1  ;;  %v19000_v3 = vadd.f32 %v8750_v0, %v18912_v56 }
 0x686   : > { %v9331_v18 = vadd.f32 %v14565_v37, %v18895_v57  ;;  %v14536_v39 = vpop.f32.mrf.mxu0  ;;  %14823 = vmatmul.mubr.bf16.gmra.mxu0 %v11452_v26 }
 0x687   : > { %v9228_v27 = vpop.f32.mrf.mxu1  ;;  %v19004_v30 = vadd.f32 %v14536_v39, %v18918_v60 }
 0x688   : > { %v9329_v32 = vadd.f32 %v9228_v27, %v18901_v16  ;;  %v8763_v40 = vpop.f32.mrf.mxu0 }
 0x689   : > { %v14568_v10 = vpop.f32.mrf.mxu1  ;;  %v19008_v22 = vadd.f32 %v8763_v40, %v18924_v58 }
 0x68a   : > { %v9334_v50 = vadd.f32 %v14568_v10, %v18909_v63  ;;  %v14537_v48 = vpop.f32.mrf.mxu0 }
 0x68b   : > { %v9241_v56 = vpop.f32.mrf.mxu1  ;;  %v19012_v51 = vadd.f32 %v14537_v48, %v18931_v33 }
 0x68c   : > { %v9332_v57 = vadd.f32 %v9241_v56, %v18915_v62  ;;  %v8766_v8 = vpop.f32.mrf.mxu0 }
 0x68d   : > { %v14569_v46 = vpop.f32.mrf.mxu1  ;;  %v19016_v60 = vadd.f32 %v8766_v8, %v18938_v36 }
 0x68e   : > { %v9335_v16 = vadd.f32 %v14569_v46, %v18921_v47  ;;  %v14604_v23 = vpop.f32.mrf.mxu0 }
 0x68f   : > { %v9244_v11 = vpop.f32.mrf.mxu1  ;;  %v19020_v58 = vadd.f32 %v14604_v23, %v18944_v49 }
 0x690   : > { %v9333_v63 = vadd.f32 %v9244_v11, %v18927_v44  ;;  %v9579_v52 = vpop.f32.mrf.mxu0 }
 0x691   : > { %v14572_v12 = vpop.f32.mrf.mxu1  ;;  %v19024_v33 = vadd.f32 %v9579_v52, %v18950_v15 }
 0x692   : > { %v9338_v62 = vadd.f32 %v14572_v12, %v18935_v55  ;;  %v14605_v13 = vpop.f32.mrf.mxu0 }
 0x693   : > { %v9257_v61 = vpop.f32.mrf.mxu1  ;;  %v19028_v36 = vadd.f32 %v14605_v13, %v18957_v6 }
 0x694   : > { %v9336_v47 = vadd.f32 %v9257_v61, %v18941_v21  ;;  %v9582_v34 = vpop.f32.mrf.mxu0 }
 0x695   : > { %v14573_v31 = vpop.f32.mrf.mxu1  ;;  %v19032_v49 = vadd.f32 %v9582_v34, %v18964_v14 }
 0x696   : > { %v9339_v44 = vadd.f32 %v14573_v31, %v18947_v7  ;;  %v14608_v42 = vpop.f32.mrf.mxu0 }
 0x697   : > { %v9260_v2 = vpop.f32.mrf.mxu1  ;;  %v19036_v15 = vadd.f32 %v14608_v42, %v18970_v53 }
 0x698   : > { %v9337_v55 = vadd.f32 %v9260_v2, %v18953_v1  ;;  %v9595_v38 = vpop.f32.mrf.mxu0 }
 0x699   : > { %v14576_v25 = vpop.f32.mrf.mxu1  ;;  %v19040_v6 = vadd.f32 %v9595_v38, %v18976_v43 }
 0x69a   : > { %v9342_v21 = vadd.f32 %v14576_v25, %v18961_v4  ;;  %v14609_v28 = vpop.f32.mrf.mxu0 }
 0x69b   : > { %v9273_v17 = vpop.f32.mrf.mxu1  ;;  %v19044_v14 = vadd.f32 %v14609_v28, %v18983_v41 }
 0x69c   : > { %v9340_v7 = vadd.f32 %v9273_v17, %v18967_v45  ;;  %v9598_v20 = vpop.f32.mrf.mxu0 }
 0x69d   : > { %v14577_v26 = vpop.f32.mrf.mxu1  ;;  %v19047_v53 = vadd.f32 %v9598_v20, %v9325_v24 }
 0x69e   : > { %v9343_v1 = vadd.f32 %v14577_v26, %v18973_v29  ;;  %v14612_v0 = vpop.f32.mrf.mxu0 }
 0x69f   : > { %v9276_v37 = vpop.f32.mrf.mxu1  ;;  %v19050_v39 = vadd.f32 %v14612_v0, %v9330_v9 }
 0x6a0   : > { %v9341_v43 = vadd.f32 %v9276_v37, %v18979_v59  ;;  %v9611_v4 = vpop.f32.mrf.mxu0 }
 0x6a1   : > { %v14580_v27 = vpop.f32.mrf.mxu1  ;;  %v19053_v40 = vadd.f32 %v9611_v4, %v9328_v19 }
 0x6a2   : > { %v9346_v41 = vadd.f32 %v14580_v27, %v18987_v5  ;;  %v14613_v10 = vpop.f32.mrf.mxu0 }
 0x6a3   : > { %v9289_v45 = vpop.f32.mrf.mxu1  ;;  %v19056_v48 = vadd.f32 %v14613_v10, %v9331_v18 }
 0x6a4   : > { %v9344_v24 = vadd.f32 %v9289_v45, %v18991_v35  ;;  %v9614_v56 = vpop.f32.mrf.mxu0 }
 0x6a5   : > { %v14581_v29 = vpop.f32.mrf.mxu1  ;;  %v19059_v8 = vadd.f32 %v9614_v56, %v9329_v32 }
 0x6a6   : > { %v9347_v9 = vadd.f32 %v14581_v29, %v18995_v54  ;;  %v14616_v46 = vpop.f32.mrf.mxu0 }
 0x6a7   : > { %v9292_v59 = vpop.f32.mrf.mxu1  ;;  %v19062_v23 = vadd.f32 %v14616_v46, %v9334_v50 }
 0x6a8   : > { %v9345_v19 = vadd.f32 %v9292_v59, %v19000_v3  ;;  %v9627_v11 = vpop.f32.mrf.mxu0 }
 0x6a9   : > { %v14584_v5 = vpop.f32.mrf.mxu1  ;;  %v19065_v52 = vadd.f32 %v9627_v11, %v9332_v57 }
 0x6aa   : > { %v9350_v18 = vadd.f32 %v14584_v5, %v19004_v30  ;;  %v14617_v12 = vpop.f32.mrf.mxu0 }
 0x6ab   : > { %v9305_v35 = vpop.f32.mrf.mxu1  ;;  %v19068_v13 = vadd.f32 %v14617_v12, %v9335_v16 }
 0x6ac   : > { %v9348_v32 = vadd.f32 %v9305_v35, %v19008_v22  ;;  %v9630_v61 = vpop.f32.mrf.mxu0 }
 0x6ad   : > { %v14585_v54 = vpop.f32.mrf.mxu1  ;;  %v19071_v34 = vadd.f32 %v9630_v61, %v9333_v63 }
 0x6ae   : > { %v9351_v50 = vadd.f32 %v14585_v54, %v19012_v51  ;;  %v14620_v31 = vpop.f32.mrf.mxu0 }
 0x6af   : > { %20041 = vst [vmem:[#allocation104_spill] sm:$0xff] %v19071_v34  ;;  %v9308_v3 = vpop.f32.mrf.mxu1  ;;  %v19074_v42 = vadd.f32 %v14620_v31, %v9338_v62 }
 0x6b0   : > { %v9349_v57 = vadd.f32 %v9308_v3, %v19016_v60  ;;  %v9643_v2 = vpop.f32.mrf.mxu0 }
 0x6b1   : > { %20042 = vst [vmem:[#allocation111_spill] sm:$0xff] %v19074_v42  ;;  %v19077_v30 = vpop.f32.mrf.mxu1  ;;  %v19079_v38 = vadd.f32 %v9643_v2, %v9336_v47 }
 0x6b2   : > { %v14621_v16 = vpop.f32.mrf.mxu0 }
 0x6b3   : > { %20043 = vst [vmem:[#allocation137_spill] sm:$0xff] %v19079_v38  ;;  %v19081_v25 = vpop.f32.mrf.mxu1  ;;  %v19083_v22 = vadd.f32 %v14621_v16, %v9339_v44 }
 0x6b4   : > { %v9646_v63 = vpop.f32.mrf.mxu0 }
 0x6b5   : > { %20044 = vst [vmem:[#allocation106_spill] sm:$0xff] %v19083_v22  ;;  %v19085_v28 = vpop.f32.mrf.mxu1  ;;  %v19087_v51 = vadd.f32 %v9646_v63, %v9337_v55 }
 0x6b6   : > { %v14624_v17 = vpop.f32.mrf.mxu0 }
 0x6b7   : > { %20045 = vst [vmem:[#allocation139_spill] sm:$0xff] %v19087_v51  ;;  %v19089_v62 = vpop.f32.mrf.mxu1  ;;  %v19091_v20 = vadd.f32 %v14624_v17, %v9342_v21 }
 0x6b8   : > { %v9659_v60 = vpop.f32.mrf.mxu0 }
 0x6b9   : > { %20046 = vst [vmem:[#allocation136_spill] sm:$0xff] %v19091_v20  ;;  %v19093_v26 = vpop.f32.mrf.mxu1  ;;  %v19095_v47 = vadd.f32 %v9659_v60, %v9340_v7 }
 0x6ba   : > { %v14625_v0 = vpop.f32.mrf.mxu0 }
 0x6bb   : > { %20047 = vst [vmem:[#allocation94_spill] sm:$0xff] %v19095_v47  ;;  %v19097_v37 = vpop.f32.mrf.mxu1  ;;  %v19099_v44 = vadd.f32 %v14625_v0, %v9343_v1 }
 0x6bc   : > { %v9662_v4 = vpop.f32.mrf.mxu0 }
 0x6bd   : > { %20048 = vst [vmem:[#allocation114_spill] sm:$0xff] %v19099_v44  ;;  %v19101_v27 = vpop.f32.mrf.mxu1  ;;  %v19103_v55 = vadd.f32 %v9662_v4, %v9341_v43 }
 0x6be   : > { %v14628_v10 = vpop.f32.mrf.mxu0 }
 0x6bf   : > { %20049 = vst [vmem:[#allocation97_spill] sm:$0xff] %v19103_v55  ;;  %v19105_v45 = vpop.f32.mrf.mxu1  ;;  %v19107_v21 = vadd.f32 %v14628_v10, %v9346_v41 }
 0x6c0   : > { %v9675_v56 = vpop.f32.mrf.mxu0 }
 0x6c1   : > { %20050 = vst [vmem:[#allocation141_spill] sm:$0xff] %v19107_v21  ;;  %v19109_v29 = vpop.f32.mrf.mxu1  ;;  %v19111_v7 = vadd.f32 %v9675_v56, %v9344_v24 }
 0x6c2   : > { %v14629_v46 = vpop.f32.mrf.mxu0 }
 0x6c3   : > { %20051 = vst [vmem:[#allocation138_spill] sm:$0xff] %v19111_v7  ;;  %v19113_v59 = vpop.f32.mrf.mxu1  ;;  %v19115_v1 = vadd.f32 %v14629_v46, %v9347_v9 }
 0x6c4   : > { %v9678_v11 = vpop.f32.mrf.mxu0 }
 0x6c5   : > { %20052 = vst [vmem:[#allocation109_spill] sm:$0xff] %v19115_v1  ;;  %v19117_v5 = vpop.f32.mrf.mxu1  ;;  %v19119_v43 = vadd.f32 %v9678_v11, %v9345_v19 }
 0x6c6   : > { %v14632_v12 = vpop.f32.mrf.mxu0 }
 0x6c7   : > { %20053 = vst [vmem:[#allocation117_spill] sm:$0xff] %v19119_v43  ;;  %v19121_v35 = vpop.f32.mrf.mxu1  ;;  %v19123_v41 = vadd.f32 %v14632_v12, %v9350_v18 }
 0x6c8   : > { %v9691_v61 = vpop.f32.mrf.mxu0 }
 0x6c9   : > { %20054 = vst [vmem:[#allocation140_spill] sm:$0xff] %v19123_v41  ;;  %v19125_v54 = vpop.f32.mrf.mxu1  ;;  %v19127_v24 = vadd.f32 %v9691_v61, %v9348_v32 }
 0x6ca   : > { %v14633_v31 = vpop.f32.mrf.mxu0 }
 0x6cb   : > { %20055 = vst [vmem:[#allocation72_spill] sm:$0xff] %v19127_v24  ;;  %v19129_v3 = vpop.f32.mrf.mxu1  ;;  %v19131_v9 = vadd.f32 %v14633_v31, %v9351_v50 }
 0x6cc   : > { %v9694_v2 = vpop.f32.mrf.mxu0 }
 0x6cd   : > { %20056 = vst [vmem:[#allocation79_spill] sm:$0xff] %v19131_v9  ;;  %v19133_v16 = vpop.f32.mrf.mxu1  ;;  %v19135_v19 = vadd.f32 %v9694_v2, %v9349_v57 }
 0x6ce   : > { %v19137_v63 = vpop.f32.mrf.mxu0 }
 0x6cf   : > { %20057 = vst [vmem:[#allocation112_spill] sm:$0xff] %v19135_v19  ;;  %v19139_v17 = vpop.f32.mrf.mxu1 }
 0x6d0   : > { %20058 = vst [vmem:[#allocation143_spill] sm:$0xff] %v19139_v17  ;;  %v19141_v18 = vpop.f32.mrf.mxu0 }
 0x6d1   : > { %v19143_v60 = vpop.f32.mrf.mxu1 }
 0x6d2   : > { %20059 = vst [vmem:[#allocation96_spill] sm:$0xff] %v19143_v60  ;;  %v19145_v32 = vpop.f32.mrf.mxu0 }
 0x6d3   : > { %v19147_v0 = vpop.f32.mrf.mxu1 }
 0x6d4   : > { %20060 = vst [vmem:[#allocation120_spill] sm:$0xff] %v19147_v0  ;;  %v19149_v4 = vpop.f32.mrf.mxu0 }
 0x6d5   : > { %v19151_v50 = vpop.f32.mrf.mxu1 }
 0x6d6   : > { %20061 = vst [vmem:[#allocation145_spill] sm:$0xff] %v19151_v50  ;;  %v19153_v10 = vpop.f32.mrf.mxu0 }
 0x6d7   : > { %v19155_v57 = vpop.f32.mrf.mxu1 }
 0x6d8   : > { %20062 = vst [vmem:[#allocation142_spill] sm:$0xff] %v19155_v57  ;;  %v19157_v56 = vpop.f32.mrf.mxu0 }
 0x6d9   : > { %v19159_v46 = vpop.f32.mrf.mxu1 }
 0x6da   : > { %20063 = vst [vmem:[#allocation99_spill] sm:$0xff] %v19159_v46  ;;  %v19161_v11 = vpop.f32.mrf.mxu0 }
 0x6db   : > { %v19163_v12 = vpop.f32.mrf.mxu1 }
 0x6dc   : > { %20064 = vst [vmem:[#allocation115_spill] sm:$0xff] %v19163_v12  ;;  %v19165_v61 = vpop.f32.mrf.mxu0 }
 0x6dd   : > { %v19167_v31 = vpop.f32.mrf.mxu1 }
 0x6de   : > { %20065 = vst [vmem:[#allocation123_spill] sm:$0xff] %v19167_v31  ;;  %v19169_v2 = vpop.f32.mrf.mxu0 }
 0x6df   : > { %v19171_v19 = vpop.f32.mrf.mxu1 }
 0x6e0   : > { %20066 = vst [vmem:[#allocation78_spill] sm:$0xff] %v19171_v19  ;;  %v19173_v9 = vpop.f32.mrf.mxu0 }
 0x6e1   : > { %v19175_v24 = vpop.f32.mrf.mxu1 }
 0x6e2   : > { %20067 = vst [vmem:[#allocation92_spill] sm:$0xff] %v19175_v24  ;;  %v19177_v41 = vpop.f32.mrf.mxu0 }
 0x6e3   : > { %v19179_v43 = vpop.f32.mrf.mxu1 }
 0x6e4   : > { %20068 = vst [vmem:[#allocation118_spill] sm:$0xff] %v19179_v43  ;;  %v19181_v1 = vpop.f32.mrf.mxu0 }
 0x6e5   : > { %v19183_v7 = vpop.f32.mrf.mxu1 }
 0x6e6   : > { %20069 = vst [vmem:[#allocation147_spill] sm:$0xff] %v19183_v7  ;;  %v19185_v21 = vpop.f32.mrf.mxu0 }
 0x6e7   : > { %v19187_v55 = vpop.f32.mrf.mxu1 }
 0x6e8   : > { %20070 = vst [vmem:[#allocation144_spill] sm:$0xff] %v19187_v55  ;;  %v19189_v31 = vpop.f32.mrf.mxu0 }
 0x6e9   : > { %v19191_v44 = vpop.f32.mrf.mxu1 }
 0x6ea   : > { %20071 = vst [vmem:[#allocation126_spill] sm:$0xff] %v19191_v44  ;;  %v19193_v19 = vpop.f32.mrf.mxu0 }
 0x6eb   : > { %20072 = vst [vmem:[#allocation98_spill] sm:$0xff] %v19193_v19  ;;  %v19195_v12 = vpop.f32.mrf.mxu1 }
 0x6ec   : > { %20073 = vst [vmem:[#allocation149_spill] sm:$0xff] %v19195_v12  ;;  %v19197_v24 = vpop.f32.mrf.mxu0 }
 0x6ed   : > { %20074 = vst [vmem:[#allocation100_spill] sm:$0xff] %v19197_v24  ;;  %v19199_v47 = vpop.f32.mrf.mxu1 }
 0x6ee   : > { %20075 = vst [vmem:[#allocation121_spill] sm:$0xff] %v19199_v47  ;;  %v19201_v43 = vpop.f32.mrf.mxu0 }
 0x6ef   : > { %20076 = vst [vmem:[#allocation128_spill] sm:$0xff] %v19201_v43  ;;  %v19203_v46 = vpop.f32.mrf.mxu1 }
 0x6f0   : > { %20077 = vst [vmem:[#allocation146_spill] sm:$0xff] %v19203_v46  ;;  %v19205_v7 = vpop.f32.mrf.mxu0 }
 0x6f1   : > { %20078 = vst [vmem:[#allocation124_spill] sm:$0xff] %v19205_v7  ;;  %v14748_v20 = vpop.f32.mrf.mxu1 }
 0x6f2   : > { %v19207_v55 = vpop.f32.mrf.mxu0 }
 0x6f3   : > { %20079 = vst [vmem:[#allocation151_spill] sm:$0xff] %v19207_v55  ;;  %v11029_v57 = vpop.f32.mrf.mxu1 }
 0x6f4   : > { %v19209_v51 = vpop.f32.mrf.mxu0 }
 0x6f5   : > { %20080 = vst [vmem:[#allocation148_spill] sm:$0xff] %v19209_v51  ;;  %v14749_v44 = vpop.f32.mrf.mxu1 }
 0x6f6   : > { %v19211_v50 = vpop.f32.mrf.mxu0 }
 0x6f7   : > { %20081 = vst [vmem:[#allocation129_spill] sm:$0xff] %v19211_v50  ;;  %v11032_v12 = vpop.f32.mrf.mxu1 }
 0x6f8   : > { %v19213_v22 = vpop.f32.mrf.mxu0 }
 0x6f9   : > { %20082 = vst [vmem:[#allocation150_spill] sm:$0xff] %v19213_v22  ;;  %v14752_v0 = vpop.f32.mrf.mxu1 }
 0x6fa   : > { %v19215_v47 = vpop.f32.mrf.mxu0 }
 0x6fb   : > { %20083 = vst [vmem:[#allocation101_spill] sm:$0xff] %v19215_v47  ;;  %v19217_v43 = vpop.f32.mrf.mxu1 }
 0x6fc   : > { %v19219_v46 = vpop.f32.mrf.mxu0 }
 0x6fd   : > { %20084 = vst [vmem:[#allocation103_spill] sm:$0xff] %v19219_v46  ;;  %v19221_v7 = vpop.f32.mrf.mxu1 }
 0x6fe   : > { %v19223_v38 = vpop.f32.mrf.mxu0 }
 0x6ff   : > { %20085 = vst [vmem:[#allocation105_spill] sm:$0xff] %v19223_v38  ;;  %v19225_v55 = vpop.f32.mrf.mxu1 }
 0x700   : > { %v19227_v51 = vpop.f32.mrf.mxu0 }
 0x701   : > { %20086 = vst [vmem:[#allocation107_spill] sm:$0xff] %v19227_v51  ;;  %v19229_v50 = vpop.f32.mrf.mxu1  ;;  %v10230_v51 = vadd.f32 %v19077_v30, %v19020_v58 }
 0x702   : > { %v19231_v24 = vpop.f32.mrf.mxu0 }
 0x703   : > { %20087 = vst [vmem:[#allocation110_spill] sm:$0xff] %v19231_v24  ;;  %v19233_v22 = vpop.f32.mrf.mxu1  ;;  %v10228_v24 = vadd.f32 %v19081_v25, %v19024_v33  ;;  %v19267_v33 = vld [vmem:[%s19563_s12] ss:$0 sm:$0xff]  ;;  %v10229_v25 = vadd.f32 %v19089_v62, %v19032_v49 }
 0x704   : > { %v19235_v47 = vpop.f32.mrf.mxu0 }
 0x705   : > { %20088 = vst [vmem:[#allocation113_spill] sm:$0xff] %v19235_v47  ;;  %v19237_v60 = vpop.f32.mrf.mxu1  ;;  %v10772_v47 = vadd.f32 %v19137_v63, %v10230_v51  ;;  %v10770_v58 = vadd.f32 %v19141_v18, %v10228_v24 }
 0x706   : > { %v19239_v46 = vpop.f32.mrf.mxu0 }
 0x707   : > { %20089 = vst [vmem:[#allocation116_spill] sm:$0xff] %v19239_v46  ;;  %v19241_v42 = vpop.f32.mrf.mxu1  ;;  %v11158_v30 = vadd.f32 %v14748_v20, %v10772_v47  ;;  %v11156_v63 = vadd.f32 %v11029_v57, %v10770_v58  ;;  %v10771_v47 = vadd.f32 %v19149_v4, %v10229_v25 }
 0x708   : > { %v19243_v38 = vpop.f32.mrf.mxu0 }
 0x709   : > { %20090 = vst [vmem:[#allocation119_spill] sm:$0xff] %v19243_v38  ;;  %v19247_v19 = vpop.f32.mrf.mxu1  ;;  %v10231_v38 = vadd.f32 %v19085_v28, %v19028_v36  ;;  %v10234_v28 = vadd.f32 %v19093_v26, %v19036_v15  ;;  %v15654_v15 = vld [vmem:[%s16081_s15 + $0x10] sm:$0xff] }
 0x70a   : > { %20091 = vst [vmem:[#allocation122_spill] sm:$0xff] %v19247_v19  ;;  %v19249_v17 = vpop.f32.mrf.mxu0 }
 0x70b   : > { %20092 = vst [vmem:[#allocation125_spill] sm:$0xff] %v19249_v17  ;;  %v19254_v34 = vpop.f32.mrf.mxu1  ;;  %v10773_v51 = vadd.f32 %v19145_v32, %v10231_v38  ;;  %v10232_v38 = vadd.f32 %v19097_v37, %v19040_v6  ;;  %v10776_v32 = vadd.f32 %v19153_v10, %v10234_v28  ;;  %v15655_v10 = vld [vmem:[%s16081_s15] sm:$0xff]  ;;  %v15656_v28 = vld [vmem:[%s16081_s15 + $0x18] sm:$0xff] }
 0x70c   : > { %v19256_v46 = vpop.f32.mrf.mxu0 }
 0x70d   : > { %20093 = vst [vmem:[#allocation127_spill] sm:$0xff] %v19256_v46  ;;  %v19262_v19 = vpop.f32.mrf.mxu1  ;;  %v11159_v24 = vadd.f32 %v14749_v44, %v10773_v51  ;;  %v10774_v25 = vadd.f32 %v19157_v56, %v10232_v38  ;;  %v11162_v6 = vadd.f32 %v14752_v0, %v10776_v32 }
 0x70e   : > { %v14796_v17 = vpop.f32.mrf.mxu0 }
 0x70f   : > { %v19272_v46 = vpop.f32.mrf.mxu1  ;;  %v11680_v36 = vadd.f32 %v14796_v17, %v11158_v30  ;;  %v11157_v17 = vadd.f32 %v11032_v12, %v10771_v47  ;;  %v10235_v30 = vadd.f32 %v19101_v27, %v19044_v14  ;;  %v10233_v14 = vadd.f32 %v19105_v45, %v19047_v53 }
 0x710   : > { %v11551_v20 = vpop.f32.mrf.mxu0  ;;  %v11160_v56 = vadd.f32 %v19217_v43, %v10774_v25  ;;  %v15657_v43 = vld [vmem:[%s16081_s15 + $0x8] sm:$0xff] }
 0x711   : > { %v19279_v18 = vpop.f32.mrf.mxu1  ;;  %v11719_v49 = vadd.f32 %v19267_v33, %v11680_v36  ;;  %v11678_v62 = vadd.f32 %v11551_v20, %v11156_v63  ;;  %v10777_v27 = vadd.f32 %v19161_v11, %v10235_v30 }
 0x712   : > { %v14797_v57 = vpop.f32.mrf.mxu0 }
 0x713   : > { %v19285_v58 = vpop.f32.mrf.mxu1  ;;  %v11751_v26 = vadd.f32 %v15654_v15, %v11719_v49  ;;  %v11717_v4 = vadd.f32 %v19267_v33, %v11678_v62  ;;  %v11681_v44 = vadd.f32 %v14797_v57, %v11159_v24  ;;  %v10238_v49 = vadd.f32 %v19109_v29, %v19050_v39  ;;  %v15658_v15 = vld [vmem:[%s16081_s15 + $0x30] sm:$0xff] }
 0x714   : > { %v11554_v51 = vpop.f32.mrf.mxu0  ;;  %v10775_v62 = vadd.f32 %v19165_v61, %v10233_v14  ;;  %v11163_v45 = vadd.f32 %v19221_v7, %v10777_v27  ;;  %v10242_v14 = vadd.f32 %v19125_v54, %v19062_v23 }
 0x715   : > { %v19292_v37 = vpop.f32.mrf.mxu1  ;;  %11783 = vst [vmem:[%s19294_s23 + $0x10] sm:$0xff] %v11751_v26  ;;  %v11749_v12 = vadd.f32 %v15655_v10, %v11717_v4  ;;  %v11720_v63 = vadd.f32 %v19267_v33, %v11681_v44  ;;  %v11679_v36 = vadd.f32 %v11554_v51, %v11157_v17  ;;  %v10236_v17 = vadd.f32 %v19113_v59, %v19053_v40 }
 0x716   : > { %v14800_v0 = vpop.f32.mrf.mxu0  ;;  %v10780_v39 = vadd.f32 %v19169_v2, %v10238_v49  ;;  %v11161_v61 = vadd.f32 %v19225_v55, %v10775_v62  ;;  %v10239_v44 = vadd.f32 %v19117_v5, %v19056_v48  ;;  %v15659_v55 = vld [vmem:[%s16081_s15 + $0x20] sm:$0xff]  ;;  %v10237_v10 = vadd.f32 %v19121_v35, %v19059_v8 }
 0x717   : > { %11781 = vst [vmem:[%s19294_s23] sm:$0xff] %v11749_v12  ;;  %v11752_v20 = vadd.f32 %v15656_v28, %v11720_v63  ;;  %v11718_v47 = vadd.f32 %v19267_v33, %v11679_v36  ;;  %v11684_v24 = vadd.f32 %v14800_v0, %v11162_v6  ;;  %v19309_v38 = vpop.f32.mrf.mxu1  ;;  %v10778_v30 = vadd.f32 %v19173_v9, %v10236_v17  ;;  %v15660_v12 = vld [vmem:[%s16081_s15 + $0x38] sm:$0xff]  ;;  %v20096_v17 = vld [vmem:[#allocation143_spill] sm:$0xff] }
 0x718   : > { %v11567_v53 = vpop.f32.mrf.mxu0  ;;  %v11166_v59 = vadd.f32 %v19229_v50, %v10780_v39  ;;  %v10781_v48 = vadd.f32 %v19177_v41, %v10239_v44  ;;  %v10779_v27 = vadd.f32 %v19181_v1, %v10237_v10  ;;  %v10784_v23 = vadd.f32 %v19185_v21, %v10242_v14  ;;  %v20094_v21 = vld [vmem:[#allocation122_spill] sm:$0xff]  ;;  %v20099_v44 = vld [vmem:[#allocation96_spill] sm:$0xff] }
 0x719   : > { %11784 = vst [vmem:[%s19294_s23 + $0x18] sm:$0xff] %v11752_v20  ;;  %v11750_v11 = vadd.f32 %v15657_v43, %v11718_v47  ;;  %v11723_v32 = vadd.f32 %v19267_v33, %v11684_v24  ;;  %v11682_v57 = vadd.f32 %v11567_v53, %v11160_v56  ;;  %v19325_v25 = vpop.f32.mrf.mxu1  ;;  %v11164_v9 = vadd.f32 %v19233_v22, %v10778_v30  ;;  %v15661_v22 = vld [vmem:[%s16081_s15 + $0x28] sm:$0xff]  ;;  %v15662_v47 = vld [vmem:[%s16081_s15 + $0x50] sm:$0xff] }
 0x71a   : > { %v14801_v29 = vpop.f32.mrf.mxu0  ;;  %v11167_v35 = vadd.f32 %v19237_v60, %v10781_v48  ;;  %v10240_v20 = vadd.f32 %v19129_v3, %v19065_v52  ;;  %v11165_v1 = vadd.f32 %v19241_v42, %v10779_v27  ;;  %v10243_v62 = vadd.f32 %v19133_v16, %v19068_v13  ;;  %v15663_v42 = vld [vmem:[%s16081_s15 + $0x40] sm:$0xff]  ;;  %v15666_v27 = vld [vmem:[%s16081_s15 + $0x70] sm:$0xff] }
 0x71b   : > { %11782 = vst [vmem:[%s19294_s23 + $0x8] sm:$0xff] %v11750_v11  ;;  %v11755_v26 = vadd.f32 %v15658_v15, %v11723_v32  ;;  %v11721_v7 = vadd.f32 %v19267_v33, %v11682_v57  ;;  %v11685_v4 = vadd.f32 %v14801_v29, %v11163_v45  ;;  %v19341_v0 = vpop.f32.mrf.mxu1  ;;  %v11170_v3 = vadd.f32 %v20094_v21, %v10784_v23  ;;  %v20095_v57 = vld [vmem:[#allocation104_spill] sm:$0xff]  ;;  %v20097_v29 = vld [vmem:[#allocation98_spill] sm:$0xff] }
 0x71c   : > { %v11570_v40 = vpop.f32.mrf.mxu0  ;;  %v10782_v53 = vadd.f32 %v19189_v31, %v10240_v20  ;;  %v10241_v39 = vadd.f32 %v20096_v17, %v20095_v57  ;;  %v10785_v13 = vadd.f32 %v20097_v29, %v10243_v62  ;;  %v20108_v62 = vld [vmem:[#allocation142_spill] sm:$0xff]  ;;  %v20110_v57 = vld [vmem:[#allocation136_spill] sm:$0xff]  ;;  %v20111_v17 = vld [vmem:[#allocation99_spill] sm:$0xff] }
 0x71d   : > { %11787 = vst [vmem:[%s19294_s23 + $0x30] sm:$0xff] %v11755_v26  ;;  %v11753_v2 = vadd.f32 %v15659_v55, %v11721_v7  ;;  %v11724_v51 = vadd.f32 %v19267_v33, %v11685_v4  ;;  %v11683_v6 = vadd.f32 %v11570_v40, %v11161_v61  ;;  %v19357_v45 = vpop.f32.mrf.mxu1  ;;  %v15664_v61 = vld [vmem:[%s16081_s15 + $0x58] sm:$0xff]  ;;  %v20098_v4 = vld [vmem:[#allocation111_spill] sm:$0xff]  ;;  %v20100_v40 = vld [vmem:[#allocation100_spill] sm:$0xff] }
 0x71e   : > { %v14804_v5 = vpop.f32.mrf.mxu0  ;;  %v11168_v31 = vadd.f32 %v19254_v34, %v10782_v53  ;;  %v10246_v30 = vadd.f32 %v20099_v44, %v20098_v4  ;;  %v15665_v34 = vld [vmem:[%s16081_s15 + $0x48] sm:$0xff]  ;;  %v20112_v29 = vld [vmem:[#allocation148_spill] sm:$0xff]  ;;  %v20113_v4 = vld [vmem:[#allocation94_spill] sm:$0xff] }
 0x71f   : > { %11785 = vst [vmem:[%s19294_s23 + $0x20] sm:$0xff] %v11753_v2  ;;  %v11756_v63 = vadd.f32 %v15660_v12, %v11724_v51  ;;  %v11722_v50 = vadd.f32 %v19267_v33, %v11683_v6  ;;  %v11688_v36 = vadd.f32 %v14804_v5, %v11166_v59  ;;  %v10783_v59 = vadd.f32 %v20100_v40, %v10241_v39  ;;  %v19373_v55 = vpop.f32.mrf.mxu1  ;;  %v20101_v5 = vld [vmem:[#allocation137_spill] sm:$0xff]  ;;  %v20114_v44 = vld [vmem:[#allocation115_spill] sm:$0xff] }
 0x720   : > { %v11583_v8 = vpop.f32.mrf.mxu0  ;;  %v11171_v51 = vadd.f32 %v19262_v19, %v10785_v13  ;;  %v10250_v39 = vadd.f32 %v20111_v17, %v20110_v57  ;;  %v20115_v40 = vld [vmem:[#allocation129_spill] sm:$0xff] }
 0x721   : > { %11788 = vst [vmem:[%s19294_s23 + $0x38] sm:$0xff] %v11756_v63  ;;  %v11754_v41 = vadd.f32 %v15661_v22, %v11722_v50  ;;  %v11727_v56 = vadd.f32 %v19267_v33, %v11688_v36  ;;  %v11686_v28 = vadd.f32 %v11583_v8, %v11164_v9  ;;  %v20102_v9 = vld [vmem:[#allocation120_spill] sm:$0xff]  ;;  %v11169_v14 = vadd.f32 %v19272_v46, %v10783_v59  ;;  %v20104_v22 = vld [vmem:[#allocation106_spill] sm:$0xff]  ;;  %v19389_v23 = vpop.f32.mrf.mxu1  ;;  %v20127_v17 = vld [vmem:[#allocation105_spill] sm:$0xff] }
 0x722   : > { %v14805_v54 = vpop.f32.mrf.mxu0  ;;  %v10244_v12 = vadd.f32 %v20102_v9, %v20101_v5  ;;  %v20103_v63 = vld [vmem:[#allocation128_spill] sm:$0xff]  ;;  %v15667_v46 = vld [vmem:[%s16081_s15 + $0x60] sm:$0xff]  ;;  %v10792_v59 = vadd.f32 %v20115_v40, %v10250_v39  ;;  %v20117_v5 = vld [vmem:[#allocation123_spill] sm:$0xff] }
 0x723   : > { %11786 = vst [vmem:[%s19294_s23 + $0x28] sm:$0xff] %v11754_v41  ;;  %v11759_v24 = vadd.f32 %v15662_v47, %v11727_v56  ;;  %v11725_v60 = vadd.f32 %v19267_v33, %v11686_v28  ;;  %v11689_v49 = vadd.f32 %v14805_v54, %v11167_v35  ;;  %v10788_v50 = vadd.f32 %v20103_v63, %v10246_v30  ;;  %v20105_v41 = vld [vmem:[#allocation145_spill] sm:$0xff]  ;;  %v20106_v28 = vld [vmem:[#allocation124_spill] sm:$0xff] }
 0x724   : > { %v11586_v52 = vpop.f32.mrf.mxu0  ;;  %v10247_v56 = vadd.f32 %v20105_v41, %v20104_v22  ;;  %v10786_v20 = vadd.f32 %v20106_v28, %v10244_v12  ;;  %v10248_v30 = vadd.f32 %v20114_v44, %v20113_v4  ;;  %v20118_v12 = vld [vmem:[#allocation150_spill] sm:$0xff]  ;;  %v20130_v4 = vld [vmem:[#allocation107_spill] sm:$0xff] }
 0x725   : > { %11791 = vst [vmem:[%s19294_s23 + $0x50] sm:$0xff] %v11759_v24  ;;  %v11757_v43 = vadd.f32 %v15663_v42, %v11725_v60  ;;  %v11728_v11 = vadd.f32 %v19267_v33, %v11689_v49  ;;  %v11687_v32 = vadd.f32 %v11586_v52, %v11165_v1  ;;  %v11174_v1 = vadd.f32 %v19279_v18, %v10788_v50  ;;  %v20107_v49 = vld [vmem:[#allocation139_spill] sm:$0xff]  ;;  %v20120_v22 = vld [vmem:[#allocation78_spill] sm:$0xff] }
 0x726   : > { %v14808_v16 = vpop.f32.mrf.mxu0  ;;  %v10245_v53 = vadd.f32 %v20108_v62, %v20107_v49  ;;  %v20109_v52 = vld [vmem:[#allocation151_spill] sm:$0xff]  ;;  %v11172_v42 = vadd.f32 %v19285_v58, %v10786_v20  ;;  %v10790_v63 = vadd.f32 %v20118_v12, %v10248_v30 }
 0x727   : > { %11789 = vst [vmem:[%s19294_s23 + $0x40] sm:$0xff] %v11757_v43  ;;  %v11760_v15 = vadd.f32 %v15664_v61, %v11728_v11  ;;  %v11726_v26 = vadd.f32 %v19267_v33, %v11687_v32  ;;  %v11692_v7 = vadd.f32 %v14808_v16, %v11170_v3  ;;  %v10789_v21 = vadd.f32 %v20109_v52, %v10247_v56  ;;  %v15668_v43 = vld [vmem:[%s16081_s15 + $0x78] sm:$0xff]  ;;  %v19405_v16 = vpop.f32.mrf.mxu1  ;;  %v15669_v58 = vld [vmem:[%s16081_s15 + $0x68] sm:$0xff] }
 0x728   : > { %v11599_v2 = vpop.f32.mrf.mxu0  ;;  %v10787_v13 = vadd.f32 %v20112_v29, %v10245_v53  ;;  %v20121_v56 = vld [vmem:[#allocation101_spill] sm:$0xff]  ;;  %v20124_v62 = vld [vmem:[#allocation103_spill] sm:$0xff] }
 0x729   : > { %11792 = vst [vmem:[%s19294_s23 + $0x58] sm:$0xff] %v11760_v15  ;;  %v11758_v6 = vadd.f32 %v15665_v34, %v11726_v26  ;;  %v11731_v10 = vadd.f32 %v19267_v33, %v11692_v7  ;;  %v11690_v48 = vadd.f32 %v11599_v2, %v11168_v31  ;;  %v11175_v61 = vadd.f32 %v19292_v37, %v10789_v21  ;;  %v15670_v34 = vld [vmem:[%s16081_s15 + $0x90] sm:$0xff]  ;;  %v14773_v50 = vpop.f32.mrf.mxu1 }
 0x72a   : > { %v14809_v36 = vpop.f32.mrf.mxu0 }
 0x72b   : > { %11790 = vst [vmem:[%s19294_s23 + $0x48] sm:$0xff] %v11758_v6  ;;  %v11763_v8 = vadd.f32 %v15666_v27, %v11731_v10  ;;  %v11729_v19 = vadd.f32 %v19267_v33, %v11690_v48  ;;  %v11693_v35 = vadd.f32 %v14809_v36, %v11171_v51  ;;  %v11173_v51 = vadd.f32 %v19309_v38, %v10787_v13  ;;  %v20116_v48 = vld [vmem:[#allocation114_spill] sm:$0xff]  ;;  %v11128_v52 = vpop.f32.mrf.mxu1 }
 0x72c   : > { %v11602_v54 = vpop.f32.mrf.mxu0  ;;  %v10251_v9 = vadd.f32 %v20117_v5, %v20116_v48  ;;  %v15671_v27 = vld [vmem:[%s16081_s15 + $0x80] sm:$0xff] }
 0x72d   : > { %11795 = vst [vmem:[%s19294_s23 + $0x70] sm:$0xff] %v11763_v8  ;;  %v11761_v47 = vadd.f32 %v15667_v46, %v11729_v19  ;;  %v11732_v24 = vadd.f32 %v19267_v33, %v11693_v35  ;;  %v11691_v60 = vadd.f32 %v11602_v54, %v11169_v14  ;;  %v11178_v14 = vadd.f32 %v19325_v25, %v10792_v59  ;;  %v20119_v35 = vld [vmem:[#allocation97_spill] sm:$0xff]  ;;  %v14776_v30 = vpop.f32.mrf.mxu1  ;;  %v20133_v48 = vld [vmem:[#allocation110_spill] sm:$0xff] }
 0x72e   : > { %v14812_v3 = vpop.f32.mrf.mxu0  ;;  %v10249_v41 = vadd.f32 %v20120_v22, %v20119_v35  ;;  %v10793_v28 = vadd.f32 %v20121_v56, %v10251_v9  ;;  %v11176_v54 = vadd.f32 %v19341_v0, %v10790_v63  ;;  %v15676_v63 = vld [vmem:[%s16081_s15 + $0xb8] sm:$0xff] }
 0x72f   : > { %11793 = vst [vmem:[%s19294_s23 + $0x60] sm:$0xff] %v11761_v47  ;;  %v11764_v11 = vadd.f32 %v15668_v43, %v11732_v24  ;;  %v11730_v18 = vadd.f32 %v19267_v33, %v11691_v60  ;;  %v11696_v32 = vadd.f32 %v14812_v3, %v11174_v1  ;;  %v15672_v1 = vld [vmem:[%s16081_s15 + $0x98] sm:$0xff]  ;;  %v20123_v60 = vld [vmem:[#allocation92_spill] sm:$0xff]  ;;  %v11141_v22 = vpop.f32.mrf.mxu1 }
 0x730   : > { %v11615_v31 = vpop.f32.mrf.mxu0  ;;  %v20122_v24 = vld [vmem:[#allocation141_spill] sm:$0xff]  ;;  %v10791_v53 = vadd.f32 %v20124_v62, %v10249_v41  ;;  %v11179_v3 = vadd.f32 %v19357_v45, %v10793_v28  ;;  %v15677_v28 = vld [vmem:[%s16081_s15 + $0xa8] sm:$0xff]  ;;  %v15678_v62 = vld [vmem:[%s16081_s15 + $0xd0] sm:$0xff] }
 0x731   : > { %11796 = vst [vmem:[%s19294_s23 + $0x78] sm:$0xff] %v11764_v11  ;;  %v11762_v15 = vadd.f32 %v15669_v58, %v11730_v18  ;;  %v11735_v26 = vadd.f32 %v19267_v33, %v11696_v32  ;;  %v11694_v7 = vadd.f32 %v11615_v31, %v11172_v42  ;;  %v10254_v49 = vadd.f32 %v20123_v60, %v20122_v24  ;;  %v15673_v42 = vld [vmem:[%s16081_s15 + $0x88] sm:$0xff]  ;;  %v20125_v18 = vld [vmem:[#allocation138_spill] sm:$0xff]  ;;  %v15674_v31 = vld [vmem:[%s16081_s15 + $0xb0] sm:$0xff] }
 0x732   : > { %v14813_v2 = vpop.f32.mrf.mxu0  ;;  %v20126_v32 = vld [vmem:[#allocation118_spill] sm:$0xff]  ;;  %v11177_v13 = vadd.f32 %v19373_v55, %v10791_v53 }
 0x733   : > { %11794 = vst [vmem:[%s19294_s23 + $0x68] sm:$0xff] %v11762_v15  ;;  %v11767_v6 = vadd.f32 %v15670_v34, %v11735_v26  ;;  %v11733_v37 = vadd.f32 %v19267_v33, %v11694_v7  ;;  %v11697_v10 = vadd.f32 %v14813_v2, %v11175_v61  ;;  %v10252_v57 = vadd.f32 %v20126_v32, %v20125_v18  ;;  %v20128_v15 = vld [vmem:[#allocation109_spill] sm:$0xff]  ;;  %v20129_v26 = vld [vmem:[#allocation147_spill] sm:$0xff]  ;;  %v15675_v2 = vld [vmem:[%s16081_s15 + $0xa0] sm:$0xff]  ;;  %v14777_v18 = vpop.f32.mrf.mxu1 }
 0x734   : > { %v11618_v36 = vpop.f32.mrf.mxu0  ;;  %v10796_v39 = vadd.f32 %v20127_v17, %v10254_v49  ;;  %v10255_v7 = vadd.f32 %v20129_v26, %v20128_v15  ;;  %v15679_v17 = vld [vmem:[%s16081_s15 + $0xc0] sm:$0xff] }
 0x735   : > { %11799 = vst [vmem:[%s19294_s23 + $0x90] sm:$0xff] %v11767_v6  ;;  %v11765_v38 = vadd.f32 %v15671_v27, %v11733_v37  ;;  %v11736_v8 = vadd.f32 %v19267_v33, %v11697_v10  ;;  %v11695_v19 = vadd.f32 %v11618_v36, %v11173_v51  ;;  %v10794_v44 = vadd.f32 %v20130_v4, %v10252_v57  ;;  %v20131_v6 = vld [vmem:[#allocation117_spill] sm:$0xff]  ;;  %v20132_v37 = vld [vmem:[#allocation144_spill] sm:$0xff] }
 0x736   : > { %v14816_v20 = vpop.f32.mrf.mxu0  ;;  %v11182_v59 = vadd.f32 %v19389_v23, %v10796_v39  ;;  %v10253_v10 = vadd.f32 %v20132_v37, %v20131_v6  ;;  %v10797_v5 = vadd.f32 %v20133_v48, %v10255_v7  ;;  %v20134_v27 = vld [vmem:[#allocation140_spill] sm:$0xff]  ;;  %v15680_v7 = vld [vmem:[%s16081_s15 + $0xd8] sm:$0xff] }
 0x737   : > { %11797 = vst [vmem:[%s19294_s23 + $0x80] sm:$0xff] %v11765_v38  ;;  %v11768_v46 = vadd.f32 %v15672_v1, %v11736_v8  ;;  %v11734_v25 = vadd.f32 %v19267_v33, %v11695_v19  ;;  %v11700_v47 = vadd.f32 %v14816_v20, %v11178_v14  ;;  %v11180_v12 = vadd.f32 %v19405_v16, %v10794_v44  ;;  %v20135_v38 = vld [vmem:[#allocation126_spill] sm:$0xff]  ;;  %v20136_v19 = vld [vmem:[#allocation113_spill] sm:$0xff]  ;;  %v20137_v1 = vld [vmem:[#allocation72_spill] sm:$0xff] }
 0x738   : > { %v11631_v21 = vpop.f32.mrf.mxu0  ;;  %v10258_v8 = vadd.f32 %v20135_v38, %v20134_v27  ;;  %v10795_v35 = vadd.f32 %v20136_v19, %v10253_v10  ;;  %v11183_v56 = vadd.f32 %v14773_v50, %v10797_v5  ;;  %v15684_v19 = vld [vmem:[%s16081_s15 + $0xf8] sm:$0xff] }
 0x739   : > { %11800 = vst [vmem:[%s19294_s23 + $0x98] sm:$0xff] %v11768_v46  ;;  %v11766_v0 = vadd.f32 %v15673_v42, %v11734_v25  ;;  %v11739_v43 = vadd.f32 %v19267_v33, %v11700_v47  ;;  %v11698_v11 = vadd.f32 %v11631_v21, %v11176_v54  ;;  %v20138_v46 = vld [vmem:[#allocation149_spill] sm:$0xff]  ;;  %v20139_v47 = vld [vmem:[#allocation116_spill] sm:$0xff] }
 0x73a   : > { %v14817_v29 = vpop.f32.mrf.mxu0  ;;  %v10256_v25 = vadd.f32 %v20138_v46, %v20137_v1  ;;  %v10800_v24 = vadd.f32 %v20139_v47, %v10258_v8  ;;  %v11181_v49 = vadd.f32 %v11128_v52, %v10795_v35  ;;  %v20141_v42 = vld [vmem:[#allocation121_spill] sm:$0xff] }
 0x73b   : > { %11798 = vst [vmem:[%s19294_s23 + $0x88] sm:$0xff] %v11766_v0  ;;  %v11771_v61 = vadd.f32 %v15674_v31, %v11739_v43  ;;  %v11737_v45 = vadd.f32 %v19267_v33, %v11698_v11  ;;  %v11701_v58 = vadd.f32 %v14817_v29, %v11179_v3  ;;  %v20140_v3 = vld [vmem:[#allocation79_spill] sm:$0xff]  ;;  %v20144_v31 = vld [vmem:[#allocation146_spill] sm:$0xff] }
 0x73c   : > { %v11634_v40 = vpop.f32.mrf.mxu0  ;;  %v10259_v0 = vadd.f32 %v20141_v42, %v20140_v3  ;;  %v20142_v43 = vld [vmem:[#allocation119_spill] sm:$0xff]  ;;  %v11186_v57 = vadd.f32 %v14776_v30, %v10800_v24 }
 0x73d   : > { %11803 = vst [vmem:[%s19294_s23 + $0xb0] sm:$0xff] %v11771_v61  ;;  %v11769_v55 = vadd.f32 %v15675_v2, %v11737_v45  ;;  %v11740_v51 = vadd.f32 %v19267_v33, %v11701_v58  ;;  %v11699_v34 = vadd.f32 %v11634_v40, %v11177_v13  ;;  %v10798_v11 = vadd.f32 %v20142_v43, %v10256_v25  ;;  %v20143_v13 = vld [vmem:[#allocation112_spill] sm:$0xff]  ;;  %v20145_v45 = vld [vmem:[#allocation125_spill] sm:$0xff]  ;;  %v20146_v40 = vld [vmem:[#allocation127_spill] sm:$0xff]  ;;  %v11144_v2 = vpop.f32.mrf.mxu1 }
 0x73e   : > { %v14820_v9 = vpop.f32.mrf.mxu0  ;;  %v10257_v61 = vadd.f32 %v20144_v31, %v20143_v13  ;;  %v10801_v58 = vadd.f32 %v20145_v45, %v10259_v0 }
 0x73f   : > { %11801 = vst [vmem:[%s19294_s23 + $0xa0] sm:$0xff] %v11769_v55  ;;  %v11772_v36 = vadd.f32 %v15676_v63, %v11740_v51  ;;  %v11738_v23 = vadd.f32 %v19267_v33, %v11699_v34  ;;  %v11704_v14 = vadd.f32 %v14820_v9, %v11182_v59  ;;  %v11184_v26 = vadd.f32 %v11141_v22, %v10798_v11  ;;  %v15681_v34 = vld [vmem:[%s16081_s15 + $0xc8] sm:$0xff]  ;;  %v15682_v9 = vld [vmem:[%s16081_s15 + $0xf0] sm:$0xff] }
 0x740   : > { %v11647_v41 = vpop.f32.mrf.mxu0  ;;  %v10799_v59 = vadd.f32 %v20146_v40, %v10257_v61  ;;  %v11187_v51 = vadd.f32 %v14777_v18, %v10801_v58 }
 0x741   : > { %11804 = vst [vmem:[%s19294_s23 + $0xb8] sm:$0xff] %v11772_v36  ;;  %v11770_v20 = vadd.f32 %v15677_v28, %v11738_v23  ;;  %v11743_v16 = vadd.f32 %v19267_v33, %v11704_v14  ;;  %v11702_v54 = vadd.f32 %v11647_v41, %v11180_v12  ;;  %v15683_v14 = vld [vmem:[%s16081_s15 + $0xe0] sm:$0xff]  ;;  %v15685_v41 = vld [vmem:[%s16081_s15 + $0xe8] sm:$0xff] }
 0x742   : > { %v14821_v60 = vpop.f32.mrf.mxu0  ;;  %v11185_v5 = vadd.f32 %v11144_v2, %v10799_v59 }
 0x743   : > { %11802 = vst [vmem:[%s19294_s23 + $0xa8] sm:$0xff] %v11770_v20  ;;  %v11775_v53 = vadd.f32 %v15678_v62, %v11743_v16  ;;  %v11741_v50 = vadd.f32 %v19267_v33, %v11702_v54  ;;  %v11705_v21 = vadd.f32 %v14821_v60, %v11183_v56 }
 0x744   : > { %v11650_v32 = vpop.f32.mrf.mxu0 }
 0x745   : > { %11807 = vst [vmem:[%s19294_s23 + $0xd0] sm:$0xff] %v11775_v53  ;;  %v11773_v39 = vadd.f32 %v15679_v17, %v11741_v50  ;;  %v11744_v52 = vadd.f32 %v19267_v33, %v11705_v21  ;;  %v11703_v29 = vadd.f32 %v11650_v32, %v11181_v49 }
 0x746   : > { %v14824_v15 = vpop.f32.mrf.mxu0 }
 0x747   : > { %11805 = vst [vmem:[%s19294_s23 + $0xc0] sm:$0xff] %v11773_v39  ;;  %v11776_v4 = vadd.f32 %v15680_v7, %v11744_v52  ;;  %v11742_v44 = vadd.f32 %v19267_v33, %v11703_v29  ;;  %v11708_v30 = vadd.f32 %v14824_v15, %v11186_v57 }
 0x748   : > { %v11663_v55 = vpop.f32.mrf.mxu0 }
 0x749   : > { %11808 = vst [vmem:[%s19294_s23 + $0xd8] sm:$0xff] %v11776_v4  ;;  %v11774_v6 = vadd.f32 %v15681_v34, %v11742_v44  ;;  %v11747_v37 = vadd.f32 %v19267_v33, %v11708_v30  ;;  %v11706_v10 = vadd.f32 %v11663_v55, %v11184_v26 }
 0x74a   : > { %v14825_v48 = vpop.f32.mrf.mxu0 }
 0x74b   : > { %11806 = vst [vmem:[%s19294_s23 + $0xc8] sm:$0xff] %v11774_v6  ;;  %v11779_v12 = vadd.f32 %v15682_v9, %v11747_v37  ;;  %v11745_v63 = vadd.f32 %v19267_v33, %v11706_v10  ;;  %v11709_v36 = vadd.f32 %v14825_v48, %v11187_v51 }
 0x74c   : > { %v11666_v23 = vpop.f32.mrf.mxu0 }
 0x74d   : > { %11811 = vst [vmem:[%s19294_s23 + $0xf0] sm:$0xff] %v11779_v12  ;;  %v11777_v27 = vadd.f32 %v15683_v14, %v11745_v63  ;;  %v11748_v38 = vadd.f32 %v19267_v33, %v11709_v36  ;;  %v11707_v8 = vadd.f32 %v11666_v23, %v11185_v5 }
 0x74f   : > { %11809 = vst [vmem:[%s19294_s23 + $0xe0] sm:$0xff] %v11777_v27  ;;  %v11780_v35 = vadd.f32 %v15684_v19, %v11748_v38  ;;  %v11746_v22 = vadd.f32 %v19267_v33, %v11707_v8 }
 0x751   : > { %11812 = vst [vmem:[%s19294_s23 + $0xf8] sm:$0xff] %v11780_v35  ;;  %v11778_v56 = vadd.f32 %v15685_v41, %v11746_v22 }
 0x753   : > { %11810 = vst [vmem:[%s19294_s23 + $0xe8] sm:$0xff] %v11778_v56 }
 0x754   : > { %15803 = shalt.err (!%p15800_p13)
}
 0x755   : > { %s15804_s15 = scalar_lea.hbm %s19502_s19, 4096  ;;  %s15808_s23 = scalar_lea.hbm %s19564_s13, 8192 }
 0x756   : > { %p15805_p9 = scmp.ne.s32.totalorder %s19502_s19, %s15804_s15  ;;  %p15809_p10 = scmp.lt.s32.totalorder %s19502_s19, %s19564_s13 }
 0x757   : > { %p15810_p12 = scmp.lt.s32.totalorder %s15808_s23, %s15804_s15 }
 0x758   : > { %p15806_p5 = pnand %p15805_p9, %p20147_p3 }
 0x759   : > { %p15811_p1 = por %p15810_p12, %p15809_p10 }
 0x75a   : > { %p15807_p6 = pneg %p15806_p5 }
 0x75c   : > { %p15812_p2 = pnand %p15811_p1, %p15807_p6 }
 0x75e   : > { %15815 = shalt.err (!%p15812_p2)
}
 0x75f   : > { %s15876_s27 = smov 128   ;;  %s15877_s30 = smov 8  }
 0x760   : > { %14842 = dma.vmem_to_hbm [thread:$0]  (%p20147_p3), %s19504_s22, 4096, %s19502_s19, %s19511_s29, %s15876_s27, %s15876_s27, %s15877_s30  }
 0x761 PF: > { %s20148_s21 = sld [smem:[#allocation18_spill]]  ;;  %p14869_p4 = scmp.ge.s32.totalorder %s15862_s28, 2 }
 0x762   : > { %s20149_s24 = sld [smem:[#allocation22_spill]] }
 0x767   : > { %s11842_s14 = sand.u32 1, %s20148_s21  }
 0x768   : > { %p20150_p7 = scmp.ne.s32.totalorder %s20149_s24, 0  ;;  %s11843_s15 = scalar_lea.sflag [#allocation7], %s11842_s14 }
 0x76a   : > { %p14858_p8 = pnand %p14869_p4, %p20150_p7 }
 0x76c   : > { %p14859_p11 = pneg %p14858_p8 }
 0x76e   : > { %15845 = dma.done.wait (%p14859_p11), %s11843_s15, 4096  }
 0x76f   : > { %15847 = vsyncadd (%p14859_p11), %s11843_s15, 4294963200  ;;  %s20151_s28 = sld [smem:[#allocation20_spill]]  ;;  %s20154_s25 = smov %s15854_s26 }
 0x770   : > { %s20152_s17 = sld [smem:[#allocation19_spill]] }
 0x771   : > { %s20153_s27 = sld [smem:[#allocation21_spill]] }
 0x775   : > { %p26_p0 = scmp.ge.s32.totalorder %s20151_s28, 4  }
 0x776   : > { %s20155_s26 = smov %s20152_s17 }
 0x777   :  { %28 = sbr.rel (!%p26_p0) target bundleno = 6 (0x6), region = 140 }
 0x77c   :  { %11848 = vsyncpa [#allocation6], 1 }
 0x77d   :  { %11850 = vsyncpa [#allocation6 + $0x1], 1 }
 0x77e   :  { %11851 = vsyncpa [#allocation9], 1 }
 0x77f   :  { %11852 = vsyncpa [#allocation12], 1 }
 0x780   :  { %11853 = vsyncpa [#allocation7], 1 }
 0x781   :  { %11855 = vsyncpa [#allocation7 + $0x1], 1 }

</bundles_post_ra>
